<compile_context>
chip_gen: v7x
topology: tpu7x:2x2x1
jax: 0.10.0
libtpu: 0.0.40
codegen_flags: <defaults>
</compile_context>

<pallas_src>
import math

import jax
import jax.numpy as jnp
from jax import lax
from jax.experimental import pallas as pl
from jax.experimental.pallas import tpu as pltpu


# ---------------------------------------------------------------------------
# Pallas kernels
# ---------------------------------------------------------------------------

def _apply_act(x, act):
    if act == "relu":
        return jnp.maximum(x, 0.0)
    if act == "lrelu":                       # LeakyReLU(negative_slope=0.1)
        return jnp.maximum(x, 0.1 * x)
    return x


def _make_conv_kernel(act, has_residual):
    """Conv as one lane-dense matmul: out[Cout, HWt] = W[Cout, K] @ X[K, HWt].

    Bias (+ folded BatchNorm), activation and the residual add are fused.
    """
    if has_residual:
        def kernel(x_ref, w_ref, b_ref, r_ref, o_ref):
            acc = jnp.dot(w_ref[...], x_ref[0],
                          preferred_element_type=jnp.float32)
            acc = acc + b_ref[...] + r_ref[0].astype(jnp.float32)
            o_ref[...] = _apply_act(acc, act)[None].astype(o_ref.dtype)
    else:
        def kernel(x_ref, w_ref, b_ref, o_ref):
            acc = jnp.dot(w_ref[...], x_ref[0],
                          preferred_element_type=jnp.float32)
            acc = acc + b_ref[...]
            o_ref[...] = _apply_act(acc, act)[None].astype(o_ref.dtype)
    return kernel


def _maxpool9_kernel(x_ref, o_ref):
    # x_ref: (1, 9, C, HW) = the nine 3x3/stride-2 shifted windows
    # o_ref: (1, C, HW)
    r = x_ref[0, 0]
    for t in range(1, 9):
        r = jnp.maximum(r, x_ref[0, t])
    o_ref[...] = r[None]


# ---------------------------------------------------------------------------
# Wrappers
# ---------------------------------------------------------------------------

def _pick_hw_tile(hw):
    # Lane-dense spatial tile (multiple of 128); prefer >=2 tiles so the second
    # "parallel" grid axis can feed both TensorCores on v7x even when N == 1.
    for t in (1024, 512, 256, 128):
        if hw % t == 0 and hw // t >= 2:
            return t
    return hw


def _im2col(x_pad, kh, kw, stride, hout, wout):
    """(N, Cin, Hp, Wp) -> (N, kh*kw*Cin, hout*wout); K ordered (ky, kx, cin)."""
    n, cin, _, _ = x_pad.shape
    cols = []
    for ky in range(kh):
        for kx in range(kw):
            patch = lax.slice(
                x_pad,
                (0, 0, ky, kx),
                (n, cin,
                 ky + stride * (hout - 1) + 1,
                 kx + stride * (wout - 1) + 1),
                (1, 1, stride, stride))                      # (N, Cin, hout, wout)
            cols.append(patch.reshape(n, cin, hout * wout))
    return jnp.concatenate(cols, axis=1)                     # (N, K, HW)


def conv2d_pallas(x, w, b, *, stride=1, padding=0, act="none", residual=None):
    """2-D conv (NCHW / OIHW) with bias + activation (+ residual) fused in-kernel."""
    n, cin, h, wd = x.shape
    cout, cin_w, kh, kw = w.shape
    assert cin == cin_w
    hout = (h + 2 * padding - kh) // stride + 1
    wout = (wd + 2 * padding - kw) // stride + 1
    hw = hout * wout
    k = kh * kw * cin

    if padding:
        x = jnp.pad(x, ((0, 0), (0, 0), (padding, padding), (padding, padding)))
    xcols = _im2col(x, kh, kw, stride, hout, wout)            # (N, K, HW)
    w_mat = jnp.transpose(w, (0, 2, 3, 1)).reshape(cout, k)   # (Cout, K)
    b_col = b.reshape(cout, 1)

    hw_t = _pick_hw_tile(hw)
    grid = (n, hw // hw_t)

    in_specs = [
        pl.BlockSpec((1, k, hw_t), lambda ni, hi: (ni, 0, hi)),
        pl.BlockSpec((cout, k), lambda ni, hi: (0, 0)),
        pl.BlockSpec((cout, 1), lambda ni, hi: (0, 0)),
    ]
    operands = [xcols, w_mat, b_col]
    if residual is not None:
        in_specs.append(pl.BlockSpec((1, cout, hw_t), lambda ni, hi: (ni, 0, hi)))
        operands.append(residual.reshape(n, cout, hw))

    out = pl.pallas_call(
        _make_conv_kernel(act, residual is not None),
        out_shape=jax.ShapeDtypeStruct((n, cout, hw), x.dtype),
        grid_spec=pltpu.PrefetchScalarGridSpec(
            num_scalar_prefetch=0,
            grid=grid,
            in_specs=in_specs,
            out_specs=pl.BlockSpec((1, cout, hw_t), lambda ni, hi: (ni, 0, hi)),
        ),
        compiler_params=pltpu.CompilerParams(
            dimension_semantics=("parallel", "parallel")),
    )(*operands)
    return out.reshape(n, cout, hout, wout)                   # free reshape


def maxpool3x3_s2_p1_pallas(x):
    """MaxPool2d(kernel=3, stride=2, padding=1) on NCHW."""
    n, c, h, w = x.shape
    ho = (h + 2 - 3) // 2 + 1
    wo = (w + 2 - 3) // 2 + 1
    xp = jnp.pad(x, ((0, 0), (0, 0), (1, 1), (1, 1)),
                 constant_values=-jnp.inf)
    taps = []
    for ky in range(3):
        for kx in range(3):
            t = lax.slice(xp, (0, 0, ky, kx),
                          (n, c, ky + 2 * (ho - 1) + 1, kx + 2 * (wo - 1) + 1),
                          (1, 1, 2, 2))
            taps.append(t.reshape(n, 1, c, ho * wo))
    stacked = jnp.concatenate(taps, axis=1)                   # (N, 9, C, HW)

    out = pl.pallas_call(
        _maxpool9_kernel,
        out_shape=jax.ShapeDtypeStruct((n, c, ho * wo), x.dtype),
        grid_spec=pltpu.PrefetchScalarGridSpec(
            num_scalar_prefetch=0,
            grid=(n,),
            in_specs=[pl.BlockSpec((1, 9, c, ho * wo), lambda ni: (ni, 0, 0, 0))],
            out_specs=pl.BlockSpec((1, c, ho * wo), lambda ni: (ni, 0, 0)),
        ),
        compiler_params=pltpu.CompilerParams(dimension_semantics=("parallel",)),
    )(stacked)
    return out.reshape(n, c, ho, wo)


# ---------------------------------------------------------------------------
# Parameters (deterministic random init; BN folded to inference scale/shift)
# ---------------------------------------------------------------------------

def _conv_init(key, cout, cin, k, bias=True):
    kw_, kb_ = jax.random.split(key)
    std = 1.0 / math.sqrt(cin * k * k)
    w = jax.random.normal(kw_, (cout, cin, k, k), jnp.float32) * std
    b = (0.01 * jax.random.normal(kb_, (cout,), jnp.float32)
         if bias else jnp.zeros((cout,), jnp.float32))
    return w, b


def _bn_init(key, c):
    k1, k2, k3, k4 = jax.random.split(key, 4)
    gamma = 1.0 + 0.1 * jax.random.normal(k1, (c,), jnp.float32)
    beta = 0.1 * jax.random.normal(k2, (c,), jnp.float32)
    mean = 0.1 * jax.random.normal(k3, (c,), jnp.float32)
    var = 1.0 + 0.1 * jnp.abs(jax.random.normal(k4, (c,), jnp.float32))
    return gamma, beta, mean, var


def _fold_bn(w, gamma, beta, mean, var, eps=1e-5):
    s = gamma / jnp.sqrt(var + eps)
    return w * s[:, None, None, None], beta - mean * s


def make_key_encoder_params(key):
    keys = iter(jax.random.split(key, 32))
    p = {}
    # forward_resblocks = ResidualBlocksWithInputConv(48, 48, 2)
    p["in_conv"] = _conv_init(next(keys), 48, 48, 3, bias=True)
    p["resblocks"] = [
        (_conv_init(next(keys), 48, 48, 3, bias=True),
         _conv_init(next(keys), 48, 48, 3, bias=True))
        for _ in range(2)
    ]
    # ResNet-50 stem: conv1 (in = 3 + extra_chan(45) = 48), bn1
    w, _ = _conv_init(next(keys), 64, 48, 7, bias=False)
    p["conv1"] = _fold_bn(w, *_bn_init(next(keys), 64))
    # layer1: 3 Bottleneck blocks (planes=64, expansion=4)
    blocks = []
    inplanes = 64
    for i in range(3):
        blk = {}
        w, _ = _conv_init(next(keys), 64, inplanes, 1, bias=False)
        blk["c1"] = _fold_bn(w, *_bn_init(next(keys), 64))
        w, _ = _conv_init(next(keys), 64, 64, 3, bias=False)
        blk["c2"] = _fold_bn(w, *_bn_init(next(keys), 64))
        w, _ = _conv_init(next(keys), 256, 64, 1, bias=False)
        blk["c3"] = _fold_bn(w, *_bn_init(next(keys), 256))
        if i == 0:
            w, _ = _conv_init(next(keys), 256, inplanes, 1, bias=False)
            blk["down"] = _fold_bn(w, *_bn_init(next(keys), 256))
        else:
            blk["down"] = None
        blocks.append(blk)
        inplanes = 256
    p["layer1"] = blocks
    return p


# ---------------------------------------------------------------------------
# KeyEncoder forward (Pallas) and pure-XLA reference
# ---------------------------------------------------------------------------

def key_encoder_forward_pallas(f, p):
    # forward_resblocks: input conv + LeakyReLU(0.1) + 2 x ResidualBlockNoBN
    w, b = p["in_conv"]
    x = conv2d_pallas(f, w, b, stride=1, padding=1, act="lrelu")
    for (w1, b1), (w2, b2) in p["resblocks"]:
        y = conv2d_pallas(x, w1, b1, stride=1, padding=1, act="relu")
        x = conv2d_pallas(y, w2, b2, stride=1, padding=1, act="none", residual=x)
    # conv1 + bn1 (folded) + relu
    w, b = p["conv1"]
    x = conv2d_pallas(x, w, b, stride=2, padding=3, act="relu")
    # maxpool 3x3 / s2 / p1
    x = maxpool3x3_s2_p1_pallas(x)
    # layer1: 3 Bottleneck blocks
    for blk in p["layer1"]:
        identity = x
        y = conv2d_pallas(x, blk["c1"][0], blk["c1"][1], stride=1, padding=0, act="relu")
        y = conv2d_pallas(y, blk["c2"][0], blk["c2"][1], stride=1, padding=1, act="relu")
        if blk["down"] is not None:
            identity = conv2d_pallas(x, blk["down"][0], blk["down"][1],
                                     stride=1, padding=0, act="none")
        x = conv2d_pallas(y, blk["c3"][0], blk["c3"][1], stride=1, padding=0,
                          act="relu", residual=identity)
    return x


def _conv_ref(x, w, b, stride, padding):
    y = lax.conv_general_dilated(
        x, w, (stride, stride), ((padding, padding), (padding, padding)),
        dimension_numbers=("NCHW", "OIHW", "NCHW"),
        precision=lax.Precision.HIGHEST)
    return y + b.reshape(1, -1, 1, 1)


def _maxpool_ref(x):
    return lax.reduce_window(x, -jnp.inf, lax.max, (1, 1, 3, 3), (1, 1, 2, 2),
                             ((0, 0), (0, 0), (1, 1), (1, 1)))


def key_encoder_forward_ref(f, p):
    w, b = p["in_conv"]
    x = _conv_ref(f, w, b, 1, 1)
    x = jnp.maximum(x, 0.1 * x)
    for (w1, b1), (w2, b2) in p["resblocks"]:
        y = jnp.maximum(_conv_ref(x, w1, b1, 1, 1), 0.0)
        x = x + _conv_ref(y, w2, b2, 1, 1)
    w, b = p["conv1"]
    x = jnp.maximum(_conv_ref(x, w, b, 2, 3), 0.0)
    x = _maxpool_ref(x)
    for blk in p["layer1"]:
        identity = x
        y = jnp.maximum(_conv_ref(x, blk["c1"][0], blk["c1"][1], 1, 0), 0.0)
        y = jnp.maximum(_conv_ref(y, blk["c2"][0], blk["c2"][1], 1, 1), 0.0)
        if blk["down"] is not None:
            identity = _conv_ref(x, blk["down"][0], blk["down"][1], 1, 0)
        x = jnp.maximum(_conv_ref(y, blk["c3"][0], blk["c3"][1], 1, 0) + identity, 0.0)
    return x


# ---------------------------------------------------------------------------
# Demo / self-test
# ---------------------------------------------------------------------------

if __name__ == "__main__":
    # KeyEncoder input: 48 channels (3 RGB + 45 extra), small spatial size.
    N, C, H, W = 2, 48, 16, 16
    root = jax.random.PRNGKey(0)
    k_x, k_p = jax.random.split(root)

    f = jax.random.normal(k_x, (N, C, H, W), jnp.float32)
    params = make_key_encoder_params(k_p)

    out = jax.jit(key_encoder_forward_pallas)(f, params)
    out = jax.block_until_ready(out)

    ref = jax.jit(key_encoder_forward_ref)(f, params)
    ref = jax.block_until_ready(ref)

    assert out.shape == (N, 256, H // 4, W // 4), out.shape
    max_err = float(jnp.max(jnp.abs(out - ref)))
    assert jnp.allclose(out, ref, atol=2e-3, rtol=2e-3), max_err
    print("KERNEL_OK")
</pallas_src>

<mosaic_0001>
module attributes {stable_mosaic.version = 11 : i64} {
  func.func @kernel(%arg0: i32, %arg1: i32, %arg2: memref<1x432x128xf32, #tpu.memory_space<vmem>>, %arg3: memref<48x432xf32, #tpu.memory_space<vmem>>, %arg4: memref<48x1xf32, #tpu.memory_space<vmem>>, %arg5: memref<1x48x128xf32, #tpu.memory_space<vmem>>) attributes {dimension_semantics = [#tpu.dimension_semantics<parallel>, #tpu.dimension_semantics<parallel>], iteration_bounds = array<i64: 2, 2>, scalar_prefetch = 0 : i64, scratch_operands = 0 : i64, tpu.core_type = #tpu.core_type<tc>, window_params = [{transform_indices = @transform_0, window_bounds = array<i64: 1, 432, 128>}, {pipeline_mode = #tpu.pipeline_mode<synchronous>, transform_indices = @transform_1, window_bounds = array<i64: 48, 432>}, {pipeline_mode = #tpu.pipeline_mode<synchronous>, transform_indices = @transform_2, window_bounds = array<i64: 48, 1>}, {transform_indices = @transform_3, window_bounds = array<i64: 1, 48, 128>}]} {
    %c0 = arith.constant 0 : index
    %c0_0 = arith.constant 0 : index
    %0 = vector.load %arg3[%c0, %c0_0] : memref<48x432xf32, #tpu.memory_space<vmem>>, vector<48x432xf32>
    %c0_1 = arith.constant 0 : index
    %c0_2 = arith.constant 0 : index
    %c0_3 = arith.constant 0 : index
    %1 = vector.load %arg2[%c0_1, %c0_2, %c0_3] : memref<1x432x128xf32, #tpu.memory_space<vmem>>, vector<1x432x128xf32>
    %2 = vector.shape_cast %1 : vector<1x432x128xf32> to vector<432x128xf32>
    %cst = arith.constant dense<0.000000e+00> : vector<48x128xf32>
    %3 = tpu.matmul %0, %2, %cst {dimension_numbers = #tpu.dot_dimension_numbers<[1], [0], [0], [1], [0, 0, 1, 1], [], []>} : vector<48x432xf32>, vector<432x128xf32>, vector<48x128xf32> -> vector<48x128xf32>
    %c0_4 = arith.constant 0 : index
    %c0_5 = arith.constant 0 : index
    %4 = vector.load %arg4[%c0_4, %c0_5] : memref<48x1xf32, #tpu.memory_space<vmem>>, vector<48x1xf32>
    %5 = vector.broadcast %4 : vector<48x1xf32> to vector<48x128xf32>
    %6 = arith.addf %3, %5 : vector<48x128xf32>
    %cst_6 = arith.constant 1.000000e-01 : f32
    %7 = vector.broadcast %cst_6 : f32 to vector<48x128xf32>
    %8 = arith.mulf %7, %6 : vector<48x128xf32>
    %9 = arith.maximumf %6, %8 : vector<48x128xf32>
    %10 = vector.shape_cast %9 : vector<48x128xf32> to vector<1x48x128xf32>
    %c0_7 = arith.constant 0 : index
    %c0_8 = arith.constant 0 : index
    %c0_9 = arith.constant 0 : index
    %11 = vector.load %arg5[%c0_7, %c0_8, %c0_9] : memref<1x48x128xf32, #tpu.memory_space<vmem>>, vector<1x48x128xf32>
    tpu.vector_store %arg5[%c0_7, %c0_8, %c0_9], %10 {strides = array<i32>} : memref<1x48x128xf32, #tpu.memory_space<vmem>>, vector<1x48x128xf32>,
    return
  }
  func.func @transform_0(%arg0: i32, %arg1: i32) -> (i32, i32, i32) {
    %c0_i32 = arith.constant 0 : i32
    %c0_i32_0 = arith.constant 0 : i32
    return %arg0, %c0_i32, %arg1 : i32, i32, i32
  }
  func.func @transform_1(%arg0: i32, %arg1: i32) -> (i32, i32) {
    %c0_i32 = arith.constant 0 : i32
    %c0_i32_0 = arith.constant 0 : i32
    %c0_i32_1 = arith.constant 0 : i32
    return %c0_i32, %c0_i32_0 : i32, i32
  }
  func.func @transform_2(%arg0: i32, %arg1: i32) -> (i32, i32) {
    %c0_i32 = arith.constant 0 : i32
    %c0_i32_0 = arith.constant 0 : i32
    %c0_i32_1 = arith.constant 0 : i32
    return %c0_i32, %c0_i32_0 : i32, i32
  }
  func.func @transform_3(%arg0: i32, %arg1: i32) -> (i32, i32, i32) {
    %c0_i32 = arith.constant 0 : i32
    %c0_i32_0 = arith.constant 0 : i32
    return %arg0, %c0_i32, %arg1 : i32, i32, i32
  }
}

module attributes {stable_mosaic.version = 11 : i64} {
  func.func @kernel(%arg0: i32, %arg1: i32, %arg2: memref<1x432x128xf32, #tpu.memory_space<vmem>>, %arg3: memref<48x432xf32, #tpu.memory_space<vmem>>, %arg4: memref<48x1xf32, #tpu.memory_space<vmem>>, %arg5: memref<1x48x128xf32, #tpu.memory_space<vmem>>) attributes {dimension_semantics = [#tpu.dimension_semantics<parallel>, #tpu.dimension_semantics<parallel>], iteration_bounds = array<i64: 2, 2>, scalar_prefetch = 0 : i64, scratch_operands = 0 : i64, tpu.core_type = #tpu.core_type<tc>, window_params = [{transform_indices = @transform_0, window_bounds = array<i64: 1, 432, 128>}, {pipeline_mode = #tpu.pipeline_mode<synchronous>, transform_indices = @transform_1, window_bounds = array<i64: 48, 432>}, {pipeline_mode = #tpu.pipeline_mode<synchronous>, transform_indices = @transform_2, window_bounds = array<i64: 48, 1>}, {transform_indices = @transform_3, window_bounds = array<i64: 1, 48, 128>}]} {
    %c0 = arith.constant 0 : index
    %c0_0 = arith.constant 0 : index
    %0 = vector.load %arg3[%c0, %c0_0] : memref<48x432xf32, #tpu.memory_space<vmem>>, vector<48x432xf32>
    %c0_1 = arith.constant 0 : index
    %c0_2 = arith.constant 0 : index
    %c0_3 = arith.constant 0 : index
    %1 = vector.load %arg2[%c0_1, %c0_2, %c0_3] : memref<1x432x128xf32, #tpu.memory_space<vmem>>, vector<1x432x128xf32>
    %2 = vector.shape_cast %1 : vector<1x432x128xf32> to vector<432x128xf32>
    %cst = arith.constant dense<0.000000e+00> : vector<48x128xf32>
    %3 = tpu.matmul %0, %2, %cst {dimension_numbers = #tpu.dot_dimension_numbers<[1], [0], [0], [1], [0, 0, 1, 1], [], []>} : vector<48x432xf32>, vector<432x128xf32>, vector<48x128xf32> -> vector<48x128xf32>
    %c0_4 = arith.constant 0 : index
    %c0_5 = arith.constant 0 : index
    %4 = vector.load %arg4[%c0_4, %c0_5] : memref<48x1xf32, #tpu.memory_space<vmem>>, vector<48x1xf32>
    %5 = vector.broadcast %4 : vector<48x1xf32> to vector<48x128xf32>
    %6 = arith.addf %3, %5 : vector<48x128xf32>
    %cst_6 = arith.constant 0.000000e+00 : f32
    %7 = vector.broadcast %cst_6 : f32 to vector<48x128xf32>
    %8 = arith.maximumf %6, %7 : vector<48x128xf32>
    %9 = vector.shape_cast %8 : vector<48x128xf32> to vector<1x48x128xf32>
    %c0_7 = arith.constant 0 : index
    %c0_8 = arith.constant 0 : index
    %c0_9 = arith.constant 0 : index
    %10 = vector.load %arg5[%c0_7, %c0_8, %c0_9] : memref<1x48x128xf32, #tpu.memory_space<vmem>>, vector<1x48x128xf32>
    tpu.vector_store %arg5[%c0_7, %c0_8, %c0_9], %9 {strides = array<i32>} : memref<1x48x128xf32, #tpu.memory_space<vmem>>, vector<1x48x128xf32>,
    return
  }
  func.func @transform_0(%arg0: i32, %arg1: i32) -> (i32, i32, i32) {
    %c0_i32 = arith.constant 0 : i32
    %c0_i32_0 = arith.constant 0 : i32
    return %arg0, %c0_i32, %arg1 : i32, i32, i32
  }
  func.func @transform_1(%arg0: i32, %arg1: i32) -> (i32, i32) {
    %c0_i32 = arith.constant 0 : i32
    %c0_i32_0 = arith.constant 0 : i32
    %c0_i32_1 = arith.constant 0 : i32
    return %c0_i32, %c0_i32_0 : i32, i32
  }
  func.func @transform_2(%arg0: i32, %arg1: i32) -> (i32, i32) {
    %c0_i32 = arith.constant 0 : i32
    %c0_i32_0 = arith.constant 0 : i32
    %c0_i32_1 = arith.constant 0 : i32
    return %c0_i32, %c0_i32_0 : i32, i32
  }
  func.func @transform_3(%arg0: i32, %arg1: i32) -> (i32, i32, i32) {
    %c0_i32 = arith.constant 0 : i32
    %c0_i32_0 = arith.constant 0 : i32
    return %arg0, %c0_i32, %arg1 : i32, i32, i32
  }
}

module attributes {stable_mosaic.version = 11 : i64} {
  func.func @kernel(%arg0: i32, %arg1: i32, %arg2: memref<1x432x128xf32, #tpu.memory_space<vmem>>, %arg3: memref<48x432xf32, #tpu.memory_space<vmem>>, %arg4: memref<48x1xf32, #tpu.memory_space<vmem>>, %arg5: memref<1x48x128xf32, #tpu.memory_space<vmem>>, %arg6: memref<1x48x128xf32, #tpu.memory_space<vmem>>) attributes {dimension_semantics = [#tpu.dimension_semantics<parallel>, #tpu.dimension_semantics<parallel>], iteration_bounds = array<i64: 2, 2>, scalar_prefetch = 0 : i64, scratch_operands = 0 : i64, tpu.core_type = #tpu.core_type<tc>, window_params = [{transform_indices = @transform_0, window_bounds = array<i64: 1, 432, 128>}, {pipeline_mode = #tpu.pipeline_mode<synchronous>, transform_indices = @transform_1, window_bounds = array<i64: 48, 432>}, {pipeline_mode = #tpu.pipeline_mode<synchronous>, transform_indices = @transform_2, window_bounds = array<i64: 48, 1>}, {transform_indices = @transform_3, window_bounds = array<i64: 1, 48, 128>}, {transform_indices = @transform_4, window_bounds = array<i64: 1, 48, 128>}]} {
    %c0 = arith.constant 0 : index
    %c0_0 = arith.constant 0 : index
    %0 = vector.load %arg3[%c0, %c0_0] : memref<48x432xf32, #tpu.memory_space<vmem>>, vector<48x432xf32>
    %c0_1 = arith.constant 0 : index
    %c0_2 = arith.constant 0 : index
    %c0_3 = arith.constant 0 : index
    %1 = vector.load %arg2[%c0_1, %c0_2, %c0_3] : memref<1x432x128xf32, #tpu.memory_space<vmem>>, vector<1x432x128xf32>
    %2 = vector.shape_cast %1 : vector<1x432x128xf32> to vector<432x128xf32>
    %cst = arith.constant dense<0.000000e+00> : vector<48x128xf32>
    %3 = tpu.matmul %0, %2, %cst {dimension_numbers = #tpu.dot_dimension_numbers<[1], [0], [0], [1], [0, 0, 1, 1], [], []>} : vector<48x432xf32>, vector<432x128xf32>, vector<48x128xf32> -> vector<48x128xf32>
    %c0_4 = arith.constant 0 : index
    %c0_5 = arith.constant 0 : index
    %4 = vector.load %arg4[%c0_4, %c0_5] : memref<48x1xf32, #tpu.memory_space<vmem>>, vector<48x1xf32>
    %5 = vector.broadcast %4 : vector<48x1xf32> to vector<48x128xf32>
    %6 = arith.addf %3, %5 : vector<48x128xf32>
    %c0_6 = arith.constant 0 : index
    %c0_7 = arith.constant 0 : index
    %c0_8 = arith.constant 0 : index
    %7 = vector.load %arg5[%c0_6, %c0_7, %c0_8] : memref<1x48x128xf32, #tpu.memory_space<vmem>>, vector<1x48x128xf32>
    %8 = vector.shape_cast %7 : vector<1x48x128xf32> to vector<48x128xf32>
    %9 = arith.addf %6, %8 : vector<48x128xf32>
    %10 = vector.shape_cast %9 : vector<48x128xf32> to vector<1x48x128xf32>
    %c0_9 = arith.constant 0 : index
    %c0_10 = arith.constant 0 : index
    %c0_11 = arith.constant 0 : index
    %11 = vector.load %arg6[%c0_9, %c0_10, %c0_11] : memref<1x48x128xf32, #tpu.memory_space<vmem>>, vector<1x48x128xf32>
    tpu.vector_store %arg6[%c0_9, %c0_10, %c0_11], %10 {strides = array<i32>} : memref<1x48x128xf32, #tpu.memory_space<vmem>>, vector<1x48x128xf32>,
    return
  }
  func.func @transform_0(%arg0: i32, %arg1: i32) -> (i32, i32, i32) {
    %c0_i32 = arith.constant 0 : i32
    %c0_i32_0 = arith.constant 0 : i32
    return %arg0, %c0_i32, %arg1 : i32, i32, i32
  }
  func.func @transform_1(%arg0: i32, %arg1: i32) -> (i32, i32) {
    %c0_i32 = arith.constant 0 : i32
    %c0_i32_0 = arith.constant 0 : i32
    %c0_i32_1 = arith.constant 0 : i32
    return %c0_i32, %c0_i32_0 : i32, i32
  }
  func.func @transform_2(%arg0: i32, %arg1: i32) -> (i32, i32) {
    %c0_i32 = arith.constant 0 : i32
    %c0_i32_0 = arith.constant 0 : i32
    %c0_i32_1 = arith.constant 0 : i32
    return %c0_i32, %c0_i32_0 : i32, i32
  }
  func.func @transform_3(%arg0: i32, %arg1: i32) -> (i32, i32, i32) {
    %c0_i32 = arith.constant 0 : i32
    %c0_i32_0 = arith.constant 0 : i32
    return %arg0, %c0_i32, %arg1 : i32, i32, i32
  }
  func.func @transform_4(%arg0: i32, %arg1: i32) -> (i32, i32, i32) {
    %c0_i32 = arith.constant 0 : i32
    %c0_i32_0 = arith.constant 0 : i32
    return %arg0, %c0_i32, %arg1 : i32, i32, i32
  }
}

module attributes {stable_mosaic.version = 11 : i64} {
  func.func @kernel(%arg0: i32, %arg1: i32, %arg2: memref<1x2352x64xf32, #tpu.memory_space<vmem>>, %arg3: memref<64x2352xf32, #tpu.memory_space<vmem>>, %arg4: memref<64x1xf32, #tpu.memory_space<vmem>>, %arg5: memref<1x64x64xf32, #tpu.memory_space<vmem>>) attributes {dimension_semantics = [#tpu.dimension_semantics<parallel>, #tpu.dimension_semantics<parallel>], iteration_bounds = array<i64: 2, 1>, scalar_prefetch = 0 : i64, scratch_operands = 0 : i64, tpu.core_type = #tpu.core_type<tc>, window_params = [{transform_indices = @transform_0, window_bounds = array<i64: 1, 2352, 64>}, {pipeline_mode = #tpu.pipeline_mode<synchronous>, transform_indices = @transform_1, window_bounds = array<i64: 64, 2352>}, {pipeline_mode = #tpu.pipeline_mode<synchronous>, transform_indices = @transform_2, window_bounds = array<i64: 64, 1>}, {transform_indices = @transform_3, window_bounds = array<i64: 1, 64, 64>}]} {
    %c0 = arith.constant 0 : index
    %c0_0 = arith.constant 0 : index
    %0 = vector.load %arg3[%c0, %c0_0] : memref<64x2352xf32, #tpu.memory_space<vmem>>, vector<64x2352xf32>
    %c0_1 = arith.constant 0 : index
    %c0_2 = arith.constant 0 : index
    %c0_3 = arith.constant 0 : index
    %1 = vector.load %arg2[%c0_1, %c0_2, %c0_3] : memref<1x2352x64xf32, #tpu.memory_space<vmem>>, vector<1x2352x64xf32>
    %2 = vector.shape_cast %1 : vector<1x2352x64xf32> to vector<2352x64xf32>
    %cst = arith.constant dense<0.000000e+00> : vector<64x64xf32>
    %3 = tpu.matmul %0, %2, %cst {dimension_numbers = #tpu.dot_dimension_numbers<[1], [0], [0], [1], [0, 0, 1, 1], [], []>} : vector<64x2352xf32>, vector<2352x64xf32>, vector<64x64xf32> -> vector<64x64xf32>
    %c0_4 = arith.constant 0 : index
    %c0_5 = arith.constant 0 : index
    %4 = vector.load %arg4[%c0_4, %c0_5] : memref<64x1xf32, #tpu.memory_space<vmem>>, vector<64x1xf32>
    %5 = vector.broadcast %4 : vector<64x1xf32> to vector<64x64xf32>
    %6 = arith.addf %3, %5 : vector<64x64xf32>
    %cst_6 = arith.constant 0.000000e+00 : f32
    %7 = vector.broadcast %cst_6 : f32 to vector<64x64xf32>
    %8 = arith.maximumf %6, %7 : vector<64x64xf32>
    %9 = vector.shape_cast %8 : vector<64x64xf32> to vector<1x64x64xf32>
    %c0_7 = arith.constant 0 : index
    %c0_8 = arith.constant 0 : index
    %c0_9 = arith.constant 0 : index
    %10 = vector.load %arg5[%c0_7, %c0_8, %c0_9] : memref<1x64x64xf32, #tpu.memory_space<vmem>>, vector<1x64x64xf32>
    tpu.vector_store %arg5[%c0_7, %c0_8, %c0_9], %9 {strides = array<i32>} : memref<1x64x64xf32, #tpu.memory_space<vmem>>, vector<1x64x64xf32>,
    return
  }
  func.func @transform_0(%arg0: i32, %arg1: i32) -> (i32, i32, i32) {
    %c0_i32 = arith.constant 0 : i32
    %c0_i32_0 = arith.constant 0 : i32
    return %arg0, %c0_i32, %arg1 : i32, i32, i32
  }
  func.func @transform_1(%arg0: i32, %arg1: i32) -> (i32, i32) {
    %c0_i32 = arith.constant 0 : i32
    %c0_i32_0 = arith.constant 0 : i32
    %c0_i32_1 = arith.constant 0 : i32
    return %c0_i32, %c0_i32_0 : i32, i32
  }
  func.func @transform_2(%arg0: i32, %arg1: i32) -> (i32, i32) {
    %c0_i32 = arith.constant 0 : i32
    %c0_i32_0 = arith.constant 0 : i32
    %c0_i32_1 = arith.constant 0 : i32
    return %c0_i32, %c0_i32_0 : i32, i32
  }
  func.func @transform_3(%arg0: i32, %arg1: i32) -> (i32, i32, i32) {
    %c0_i32 = arith.constant 0 : i32
    %c0_i32_0 = arith.constant 0 : i32
    return %arg0, %c0_i32, %arg1 : i32, i32, i32
  }
}

module attributes {stable_mosaic.version = 11 : i64} {
  func.func @_maxpool9_kernel(%arg0: i32, %arg1: memref<1x9x64x16xf32, #tpu.memory_space<vmem>>, %arg2: memref<1x64x16xf32, #tpu.memory_space<vmem>>) attributes {dimension_semantics = [#tpu.dimension_semantics<parallel>], iteration_bounds = array<i64: 2>, scalar_prefetch = 0 : i64, scratch_operands = 0 : i64, tpu.core_type = #tpu.core_type<tc>, window_params = [{transform_indices = @transform_0, window_bounds = array<i64: 1, 9, 64, 16>}, {transform_indices = @transform_1, window_bounds = array<i64: 1, 64, 16>}]} {
    %c0 = arith.constant 0 : index
    %c0_0 = arith.constant 0 : index
    %c0_1 = arith.constant 0 : index
    %c0_2 = arith.constant 0 : index
    %0 = vector.load %arg1[%c0, %c0_0, %c0_1, %c0_2] : memref<1x9x64x16xf32, #tpu.memory_space<vmem>>, vector<1x1x64x16xf32>
    %1 = vector.shape_cast %0 : vector<1x1x64x16xf32> to vector<64x16xf32>
    %c0_3 = arith.constant 0 : index
    %c1 = arith.constant 1 : index
    %c0_4 = arith.constant 0 : index
    %c0_5 = arith.constant 0 : index
    %2 = vector.load %arg1[%c0_3, %c1, %c0_4, %c0_5] : memref<1x9x64x16xf32, #tpu.memory_space<vmem>>, vector<1x1x64x16xf32>
    %3 = vector.shape_cast %2 : vector<1x1x64x16xf32> to vector<64x16xf32>
    %4 = arith.maximumf %1, %3 : vector<64x16xf32>
    %c0_6 = arith.constant 0 : index
    %c2 = arith.constant 2 : index
    %c0_7 = arith.constant 0 : index
    %c0_8 = arith.constant 0 : index
    %5 = vector.load %arg1[%c0_6, %c2, %c0_7, %c0_8] : memref<1x9x64x16xf32, #tpu.memory_space<vmem>>, vector<1x1x64x16xf32>
    %6 = vector.shape_cast %5 : vector<1x1x64x16xf32> to vector<64x16xf32>
    %7 = arith.maximumf %4, %6 : vector<64x16xf32>
    %c0_9 = arith.constant 0 : index
    %c3 = arith.constant 3 : index
    %c0_10 = arith.constant 0 : index
    %c0_11 = arith.constant 0 : index
    %8 = vector.load %arg1[%c0_9, %c3, %c0_10, %c0_11] : memref<1x9x64x16xf32, #tpu.memory_space<vmem>>, vector<1x1x64x16xf32>
    %9 = vector.shape_cast %8 : vector<1x1x64x16xf32> to vector<64x16xf32>
    %10 = arith.maximumf %7, %9 : vector<64x16xf32>
    %c0_12 = arith.constant 0 : index
    %c4 = arith.constant 4 : index
    %c0_13 = arith.constant 0 : index
    %c0_14 = arith.constant 0 : index
    %11 = vector.load %arg1[%c0_12, %c4, %c0_13, %c0_14] : memref<1x9x64x16xf32, #tpu.memory_space<vmem>>, vector<1x1x64x16xf32>
    %12 = vector.shape_cast %11 : vector<1x1x64x16xf32> to vector<64x16xf32>
    %13 = arith.maximumf %10, %12 : vector<64x16xf32>
    %c0_15 = arith.constant 0 : index
    %c5 = arith.constant 5 : index
    %c0_16 = arith.constant 0 : index
    %c0_17 = arith.constant 0 : index
    %14 = vector.load %arg1[%c0_15, %c5, %c0_16, %c0_17] : memref<1x9x64x16xf32, #tpu.memory_space<vmem>>, vector<1x1x64x16xf32>
    %15 = vector.shape_cast %14 : vector<1x1x64x16xf32> to vector<64x16xf32>
    %16 = arith.maximumf %13, %15 : vector<64x16xf32>
    %c0_18 = arith.constant 0 : index
    %c6 = arith.constant 6 : index
    %c0_19 = arith.constant 0 : index
    %c0_20 = arith.constant 0 : index
    %17 = vector.load %arg1[%c0_18, %c6, %c0_19, %c0_20] : memref<1x9x64x16xf32, #tpu.memory_space<vmem>>, vector<1x1x64x16xf32>
    %18 = vector.shape_cast %17 : vector<1x1x64x16xf32> to vector<64x16xf32>
    %19 = arith.maximumf %16, %18 : vector<64x16xf32>
    %c0_21 = arith.constant 0 : index
    %c7 = arith.constant 7 : index
    %c0_22 = arith.constant 0 : index
    %c0_23 = arith.constant 0 : index
    %20 = vector.load %arg1[%c0_21, %c7, %c0_22, %c0_23] : memref<1x9x64x16xf32, #tpu.memory_space<vmem>>, vector<1x1x64x16xf32>
    %21 = vector.shape_cast %20 : vector<1x1x64x16xf32> to vector<64x16xf32>
    %22 = arith.maximumf %19, %21 : vector<64x16xf32>
    %c0_24 = arith.constant 0 : index
    %c8 = arith.constant 8 : index
    %c0_25 = arith.constant 0 : index
    %c0_26 = arith.constant 0 : index
    %23 = vector.load %arg1[%c0_24, %c8, %c0_25, %c0_26] : memref<1x9x64x16xf32, #tpu.memory_space<vmem>>, vector<1x1x64x16xf32>
    %24 = vector.shape_cast %23 : vector<1x1x64x16xf32> to vector<64x16xf32>
    %25 = arith.maximumf %22, %24 : vector<64x16xf32>
    %26 = vector.shape_cast %25 : vector<64x16xf32> to vector<1x64x16xf32>
    %c0_27 = arith.constant 0 : index
    %c0_28 = arith.constant 0 : index
    %c0_29 = arith.constant 0 : index
    %27 = vector.load %arg2[%c0_27, %c0_28, %c0_29] : memref<1x64x16xf32, #tpu.memory_space<vmem>>, vector<1x64x16xf32>
    tpu.vector_store %arg2[%c0_27, %c0_28, %c0_29], %26 {strides = array<i32>} : memref<1x64x16xf32, #tpu.memory_space<vmem>>, vector<1x64x16xf32>,
    return
  }
  func.func @transform_0(%arg0: i32) -> (i32, i32, i32, i32) {
    %c0_i32 = arith.constant 0 : i32
    %c0_i32_0 = arith.constant 0 : i32
    %c0_i32_1 = arith.constant 0 : i32
    %c0_i32_2 = arith.constant 0 : i32
    return %arg0, %c0_i32, %c0_i32_0, %c0_i32_1 : i32, i32, i32, i32
  }
  func.func @transform_1(%arg0: i32) -> (i32, i32, i32) {
    %c0_i32 = arith.constant 0 : i32
    %c0_i32_0 = arith.constant 0 : i32
    %c0_i32_1 = arith.constant 0 : i32
    return %arg0, %c0_i32, %c0_i32_0 : i32, i32, i32
  }
}

module attributes {stable_mosaic.version = 11 : i64} {
  func.func @kernel(%arg0: i32, %arg1: i32, %arg2: memref<1x64x16xf32, #tpu.memory_space<vmem>>, %arg3: memref<64x64xf32, #tpu.memory_space<vmem>>, %arg4: memref<64x1xf32, #tpu.memory_space<vmem>>, %arg5: memref<1x64x16xf32, #tpu.memory_space<vmem>>) attributes {dimension_semantics = [#tpu.dimension_semantics<parallel>, #tpu.dimension_semantics<parallel>], iteration_bounds = array<i64: 2, 1>, scalar_prefetch = 0 : i64, scratch_operands = 0 : i64, tpu.core_type = #tpu.core_type<tc>, window_params = [{transform_indices = @transform_0, window_bounds = array<i64: 1, 64, 16>}, {pipeline_mode = #tpu.pipeline_mode<synchronous>, transform_indices = @transform_1, window_bounds = array<i64: 64, 64>}, {pipeline_mode = #tpu.pipeline_mode<synchronous>, transform_indices = @transform_2, window_bounds = array<i64: 64, 1>}, {transform_indices = @transform_3, window_bounds = array<i64: 1, 64, 16>}]} {
    %c0 = arith.constant 0 : index
    %c0_0 = arith.constant 0 : index
    %0 = vector.load %arg3[%c0, %c0_0] : memref<64x64xf32, #tpu.memory_space<vmem>>, vector<64x64xf32>
    %c0_1 = arith.constant 0 : index
    %c0_2 = arith.constant 0 : index
    %c0_3 = arith.constant 0 : index
    %1 = vector.load %arg2[%c0_1, %c0_2, %c0_3] : memref<1x64x16xf32, #tpu.memory_space<vmem>>, vector<1x64x16xf32>
    %2 = vector.shape_cast %1 : vector<1x64x16xf32> to vector<64x16xf32>
    %cst = arith.constant dense<0.000000e+00> : vector<64x16xf32>
    %3 = tpu.matmul %0, %2, %cst {dimension_numbers = #tpu.dot_dimension_numbers<[1], [0], [0], [1], [0, 0, 1, 1], [], []>} : vector<64x64xf32>, vector<64x16xf32>, vector<64x16xf32> -> vector<64x16xf32>
    %c0_4 = arith.constant 0 : index
    %c0_5 = arith.constant 0 : index
    %4 = vector.load %arg4[%c0_4, %c0_5] : memref<64x1xf32, #tpu.memory_space<vmem>>, vector<64x1xf32>
    %5 = vector.broadcast %4 : vector<64x1xf32> to vector<64x16xf32>
    %6 = arith.addf %3, %5 : vector<64x16xf32>
    %cst_6 = arith.constant 0.000000e+00 : f32
    %7 = vector.broadcast %cst_6 : f32 to vector<64x16xf32>
    %8 = arith.maximumf %6, %7 : vector<64x16xf32>
    %9 = vector.shape_cast %8 : vector<64x16xf32> to vector<1x64x16xf32>
    %c0_7 = arith.constant 0 : index
    %c0_8 = arith.constant 0 : index
    %c0_9 = arith.constant 0 : index
    %10 = vector.load %arg5[%c0_7, %c0_8, %c0_9] : memref<1x64x16xf32, #tpu.memory_space<vmem>>, vector<1x64x16xf32>
    tpu.vector_store %arg5[%c0_7, %c0_8, %c0_9], %9 {strides = array<i32>} : memref<1x64x16xf32, #tpu.memory_space<vmem>>, vector<1x64x16xf32>,
    return
  }
  func.func @transform_0(%arg0: i32, %arg1: i32) -> (i32, i32, i32) {
    %c0_i32 = arith.constant 0 : i32
    %c0_i32_0 = arith.constant 0 : i32
    return %arg0, %c0_i32, %arg1 : i32, i32, i32
  }
  func.func @transform_1(%arg0: i32, %arg1: i32) -> (i32, i32) {
    %c0_i32 = arith.constant 0 : i32
    %c0_i32_0 = arith.constant 0 : i32
    %c0_i32_1 = arith.constant 0 : i32
    return %c0_i32, %c0_i32_0 : i32, i32
  }
  func.func @transform_2(%arg0: i32, %arg1: i32) -> (i32, i32) {
    %c0_i32 = arith.constant 0 : i32
    %c0_i32_0 = arith.constant 0 : i32
    %c0_i32_1 = arith.constant 0 : i32
    return %c0_i32, %c0_i32_0 : i32, i32
  }
  func.func @transform_3(%arg0: i32, %arg1: i32) -> (i32, i32, i32) {
    %c0_i32 = arith.constant 0 : i32
    %c0_i32_0 = arith.constant 0 : i32
    return %arg0, %c0_i32, %arg1 : i32, i32, i32
  }
}

module attributes {stable_mosaic.version = 11 : i64} {
  func.func @kernel(%arg0: i32, %arg1: i32, %arg2: memref<1x576x16xf32, #tpu.memory_space<vmem>>, %arg3: memref<64x576xf32, #tpu.memory_space<vmem>>, %arg4: memref<64x1xf32, #tpu.memory_space<vmem>>, %arg5: memref<1x64x16xf32, #tpu.memory_space<vmem>>) attributes {dimension_semantics = [#tpu.dimension_semantics<parallel>, #tpu.dimension_semantics<parallel>], iteration_bounds = array<i64: 2, 1>, scalar_prefetch = 0 : i64, scratch_operands = 0 : i64, tpu.core_type = #tpu.core_type<tc>, window_params = [{transform_indices = @transform_0, window_bounds = array<i64: 1, 576, 16>}, {pipeline_mode = #tpu.pipeline_mode<synchronous>, transform_indices = @transform_1, window_bounds = array<i64: 64, 576>}, {pipeline_mode = #tpu.pipeline_mode<synchronous>, transform_indices = @transform_2, window_bounds = array<i64: 64, 1>}, {transform_indices = @transform_3, window_bounds = array<i64: 1, 64, 16>}]} {
    %c0 = arith.constant 0 : index
    %c0_0 = arith.constant 0 : index
    %0 = vector.load %arg3[%c0, %c0_0] : memref<64x576xf32, #tpu.memory_space<vmem>>, vector<64x576xf32>
    %c0_1 = arith.constant 0 : index
    %c0_2 = arith.constant 0 : index
    %c0_3 = arith.constant 0 : index
    %1 = vector.load %arg2[%c0_1, %c0_2, %c0_3] : memref<1x576x16xf32, #tpu.memory_space<vmem>>, vector<1x576x16xf32>
    %2 = vector.shape_cast %1 : vector<1x576x16xf32> to vector<576x16xf32>
    %cst = arith.constant dense<0.000000e+00> : vector<64x16xf32>
    %3 = tpu.matmul %0, %2, %cst {dimension_numbers = #tpu.dot_dimension_numbers<[1], [0], [0], [1], [0, 0, 1, 1], [], []>} : vector<64x576xf32>, vector<576x16xf32>, vector<64x16xf32> -> vector<64x16xf32>
    %c0_4 = arith.constant 0 : index
    %c0_5 = arith.constant 0 : index
    %4 = vector.load %arg4[%c0_4, %c0_5] : memref<64x1xf32, #tpu.memory_space<vmem>>, vector<64x1xf32>
    %5 = vector.broadcast %4 : vector<64x1xf32> to vector<64x16xf32>
    %6 = arith.addf %3, %5 : vector<64x16xf32>
    %cst_6 = arith.constant 0.000000e+00 : f32
    %7 = vector.broadcast %cst_6 : f32 to vector<64x16xf32>
    %8 = arith.maximumf %6, %7 : vector<64x16xf32>
    %9 = vector.shape_cast %8 : vector<64x16xf32> to vector<1x64x16xf32>
    %c0_7 = arith.constant 0 : index
    %c0_8 = arith.constant 0 : index
    %c0_9 = arith.constant 0 : index
    %10 = vector.load %arg5[%c0_7, %c0_8, %c0_9] : memref<1x64x16xf32, #tpu.memory_space<vmem>>, vector<1x64x16xf32>
    tpu.vector_store %arg5[%c0_7, %c0_8, %c0_9], %9 {strides = array<i32>} : memref<1x64x16xf32, #tpu.memory_space<vmem>>, vector<1x64x16xf32>,
    return
  }
  func.func @transform_0(%arg0: i32, %arg1: i32) -> (i32, i32, i32) {
    %c0_i32 = arith.constant 0 : i32
    %c0_i32_0 = arith.constant 0 : i32
    return %arg0, %c0_i32, %arg1 : i32, i32, i32
  }
  func.func @transform_1(%arg0: i32, %arg1: i32) -> (i32, i32) {
    %c0_i32 = arith.constant 0 : i32
    %c0_i32_0 = arith.constant 0 : i32
    %c0_i32_1 = arith.constant 0 : i32
    return %c0_i32, %c0_i32_0 : i32, i32
  }
  func.func @transform_2(%arg0: i32, %arg1: i32) -> (i32, i32) {
    %c0_i32 = arith.constant 0 : i32
    %c0_i32_0 = arith.constant 0 : i32
    %c0_i32_1 = arith.constant 0 : i32
    return %c0_i32, %c0_i32_0 : i32, i32
  }
  func.func @transform_3(%arg0: i32, %arg1: i32) -> (i32, i32, i32) {
    %c0_i32 = arith.constant 0 : i32
    %c0_i32_0 = arith.constant 0 : i32
    return %arg0, %c0_i32, %arg1 : i32, i32, i32
  }
}

module attributes {stable_mosaic.version = 11 : i64} {
  func.func @kernel(%arg0: i32, %arg1: i32, %arg2: memref<1x64x16xf32, #tpu.memory_space<vmem>>, %arg3: memref<256x64xf32, #tpu.memory_space<vmem>>, %arg4: memref<256x1xf32, #tpu.memory_space<vmem>>, %arg5: memref<1x256x16xf32, #tpu.memory_space<vmem>>) attributes {dimension_semantics = [#tpu.dimension_semantics<parallel>, #tpu.dimension_semantics<parallel>], iteration_bounds = array<i64: 2, 1>, scalar_prefetch = 0 : i64, scratch_operands = 0 : i64, tpu.core_type = #tpu.core_type<tc>, window_params = [{transform_indices = @transform_0, window_bounds = array<i64: 1, 64, 16>}, {pipeline_mode = #tpu.pipeline_mode<synchronous>, transform_indices = @transform_1, window_bounds = array<i64: 256, 64>}, {pipeline_mode = #tpu.pipeline_mode<synchronous>, transform_indices = @transform_2, window_bounds = array<i64: 256, 1>}, {transform_indices = @transform_3, window_bounds = array<i64: 1, 256, 16>}]} {
    %c0 = arith.constant 0 : index
    %c0_0 = arith.constant 0 : index
    %0 = vector.load %arg3[%c0, %c0_0] : memref<256x64xf32, #tpu.memory_space<vmem>>, vector<256x64xf32>
    %c0_1 = arith.constant 0 : index
    %c0_2 = arith.constant 0 : index
    %c0_3 = arith.constant 0 : index
    %1 = vector.load %arg2[%c0_1, %c0_2, %c0_3] : memref<1x64x16xf32, #tpu.memory_space<vmem>>, vector<1x64x16xf32>
    %2 = vector.shape_cast %1 : vector<1x64x16xf32> to vector<64x16xf32>
    %cst = arith.constant dense<0.000000e+00> : vector<256x16xf32>
    %3 = tpu.matmul %0, %2, %cst {dimension_numbers = #tpu.dot_dimension_numbers<[1], [0], [0], [1], [0, 0, 1, 1], [], []>} : vector<256x64xf32>, vector<64x16xf32>, vector<256x16xf32> -> vector<256x16xf32>
    %c0_4 = arith.constant 0 : index
    %c0_5 = arith.constant 0 : index
    %4 = vector.load %arg4[%c0_4, %c0_5] : memref<256x1xf32, #tpu.memory_space<vmem>>, vector<256x1xf32>
    %5 = vector.broadcast %4 : vector<256x1xf32> to vector<256x16xf32>
    %6 = arith.addf %3, %5 : vector<256x16xf32>
    %7 = vector.shape_cast %6 : vector<256x16xf32> to vector<1x256x16xf32>
    %c0_6 = arith.constant 0 : index
    %c0_7 = arith.constant 0 : index
    %c0_8 = arith.constant 0 : index
    %8 = vector.load %arg5[%c0_6, %c0_7, %c0_8] : memref<1x256x16xf32, #tpu.memory_space<vmem>>, vector<1x256x16xf32>
    tpu.vector_store %arg5[%c0_6, %c0_7, %c0_8], %7 {strides = array<i32>} : memref<1x256x16xf32, #tpu.memory_space<vmem>>, vector<1x256x16xf32>,
    return
  }
  func.func @transform_0(%arg0: i32, %arg1: i32) -> (i32, i32, i32) {
    %c0_i32 = arith.constant 0 : i32
    %c0_i32_0 = arith.constant 0 : i32
    return %arg0, %c0_i32, %arg1 : i32, i32, i32
  }
  func.func @transform_1(%arg0: i32, %arg1: i32) -> (i32, i32) {
    %c0_i32 = arith.constant 0 : i32
    %c0_i32_0 = arith.constant 0 : i32
    %c0_i32_1 = arith.constant 0 : i32
    return %c0_i32, %c0_i32_0 : i32, i32
  }
  func.func @transform_2(%arg0: i32, %arg1: i32) -> (i32, i32) {
    %c0_i32 = arith.constant 0 : i32
    %c0_i32_0 = arith.constant 0 : i32
    %c0_i32_1 = arith.constant 0 : i32
    return %c0_i32, %c0_i32_0 : i32, i32
  }
  func.func @transform_3(%arg0: i32, %arg1: i32) -> (i32, i32, i32) {
    %c0_i32 = arith.constant 0 : i32
    %c0_i32_0 = arith.constant 0 : i32
    return %arg0, %c0_i32, %arg1 : i32, i32, i32
  }
}

module attributes {stable_mosaic.version = 11 : i64} {
  func.func @kernel(%arg0: i32, %arg1: i32, %arg2: memref<1x64x16xf32, #tpu.memory_space<vmem>>, %arg3: memref<256x64xf32, #tpu.memory_space<vmem>>, %arg4: memref<256x1xf32, #tpu.memory_space<vmem>>, %arg5: memref<1x256x16xf32, #tpu.memory_space<vmem>>, %arg6: memref<1x256x16xf32, #tpu.memory_space<vmem>>) attributes {dimension_semantics = [#tpu.dimension_semantics<parallel>, #tpu.dimension_semantics<parallel>], iteration_bounds = array<i64: 2, 1>, scalar_prefetch = 0 : i64, scratch_operands = 0 : i64, tpu.core_type = #tpu.core_type<tc>, window_params = [{transform_indices = @transform_0, window_bounds = array<i64: 1, 64, 16>}, {pipeline_mode = #tpu.pipeline_mode<synchronous>, transform_indices = @transform_1, window_bounds = array<i64: 256, 64>}, {pipeline_mode = #tpu.pipeline_mode<synchronous>, transform_indices = @transform_2, window_bounds = array<i64: 256, 1>}, {transform_indices = @transform_3, window_bounds = array<i64: 1, 256, 16>}, {transform_indices = @transform_4, window_bounds = array<i64: 1, 256, 16>}]} {
    %c0 = arith.constant 0 : index
    %c0_0 = arith.constant 0 : index
    %0 = vector.load %arg3[%c0, %c0_0] : memref<256x64xf32, #tpu.memory_space<vmem>>, vector<256x64xf32>
    %c0_1 = arith.constant 0 : index
    %c0_2 = arith.constant 0 : index
    %c0_3 = arith.constant 0 : index
    %1 = vector.load %arg2[%c0_1, %c0_2, %c0_3] : memref<1x64x16xf32, #tpu.memory_space<vmem>>, vector<1x64x16xf32>
    %2 = vector.shape_cast %1 : vector<1x64x16xf32> to vector<64x16xf32>
    %cst = arith.constant dense<0.000000e+00> : vector<256x16xf32>
    %3 = tpu.matmul %0, %2, %cst {dimension_numbers = #tpu.dot_dimension_numbers<[1], [0], [0], [1], [0, 0, 1, 1], [], []>} : vector<256x64xf32>, vector<64x16xf32>, vector<256x16xf32> -> vector<256x16xf32>
    %c0_4 = arith.constant 0 : index
    %c0_5 = arith.constant 0 : index
    %4 = vector.load %arg4[%c0_4, %c0_5] : memref<256x1xf32, #tpu.memory_space<vmem>>, vector<256x1xf32>
    %5 = vector.broadcast %4 : vector<256x1xf32> to vector<256x16xf32>
    %6 = arith.addf %3, %5 : vector<256x16xf32>
    %c0_6 = arith.constant 0 : index
    %c0_7 = arith.constant 0 : index
    %c0_8 = arith.constant 0 : index
    %7 = vector.load %arg5[%c0_6, %c0_7, %c0_8] : memref<1x256x16xf32, #tpu.memory_space<vmem>>, vector<1x256x16xf32>
    %8 = vector.shape_cast %7 : vector<1x256x16xf32> to vector<256x16xf32>
    %9 = arith.addf %6, %8 : vector<256x16xf32>
    %cst_9 = arith.constant 0.000000e+00 : f32
    %10 = vector.broadcast %cst_9 : f32 to vector<256x16xf32>
    %11 = arith.maximumf %9, %10 : vector<256x16xf32>
    %12 = vector.shape_cast %11 : vector<256x16xf32> to vector<1x256x16xf32>
    %c0_10 = arith.constant 0 : index
    %c0_11 = arith.constant 0 : index
    %c0_12 = arith.constant 0 : index
    %13 = vector.load %arg6[%c0_10, %c0_11, %c0_12] : memref<1x256x16xf32, #tpu.memory_space<vmem>>, vector<1x256x16xf32>
    tpu.vector_store %arg6[%c0_10, %c0_11, %c0_12], %12 {strides = array<i32>} : memref<1x256x16xf32, #tpu.memory_space<vmem>>, vector<1x256x16xf32>,
    return
  }
  func.func @transform_0(%arg0: i32, %arg1: i32) -> (i32, i32, i32) {
    %c0_i32 = arith.constant 0 : i32
    %c0_i32_0 = arith.constant 0 : i32
    return %arg0, %c0_i32, %arg1 : i32, i32, i32
  }
  func.func @transform_1(%arg0: i32, %arg1: i32) -> (i32, i32) {
    %c0_i32 = arith.constant 0 : i32
    %c0_i32_0 = arith.constant 0 : i32
    %c0_i32_1 = arith.constant 0 : i32
    return %c0_i32, %c0_i32_0 : i32, i32
  }
  func.func @transform_2(%arg0: i32, %arg1: i32) -> (i32, i32) {
    %c0_i32 = arith.constant 0 : i32
    %c0_i32_0 = arith.constant 0 : i32
    %c0_i32_1 = arith.constant 0 : i32
    return %c0_i32, %c0_i32_0 : i32, i32
  }
  func.func @transform_3(%arg0: i32, %arg1: i32) -> (i32, i32, i32) {
    %c0_i32 = arith.constant 0 : i32
    %c0_i32_0 = arith.constant 0 : i32
    return %arg0, %c0_i32, %arg1 : i32, i32, i32
  }
  func.func @transform_4(%arg0: i32, %arg1: i32) -> (i32, i32, i32) {
    %c0_i32 = arith.constant 0 : i32
    %c0_i32_0 = arith.constant 0 : i32
    return %arg0, %c0_i32, %arg1 : i32, i32, i32
  }
}

module attributes {stable_mosaic.version = 11 : i64} {
  func.func @kernel(%arg0: i32, %arg1: i32, %arg2: memref<1x256x16xf32, #tpu.memory_space<vmem>>, %arg3: memref<64x256xf32, #tpu.memory_space<vmem>>, %arg4: memref<64x1xf32, #tpu.memory_space<vmem>>, %arg5: memref<1x64x16xf32, #tpu.memory_space<vmem>>) attributes {dimension_semantics = [#tpu.dimension_semantics<parallel>, #tpu.dimension_semantics<parallel>], iteration_bounds = array<i64: 2, 1>, scalar_prefetch = 0 : i64, scratch_operands = 0 : i64, tpu.core_type = #tpu.core_type<tc>, window_params = [{transform_indices = @transform_0, window_bounds = array<i64: 1, 256, 16>}, {pipeline_mode = #tpu.pipeline_mode<synchronous>, transform_indices = @transform_1, window_bounds = array<i64: 64, 256>}, {pipeline_mode = #tpu.pipeline_mode<synchronous>, transform_indices = @transform_2, window_bounds = array<i64: 64, 1>}, {transform_indices = @transform_3, window_bounds = array<i64: 1, 64, 16>}]} {
    %c0 = arith.constant 0 : index
    %c0_0 = arith.constant 0 : index
    %0 = vector.load %arg3[%c0, %c0_0] : memref<64x256xf32, #tpu.memory_space<vmem>>, vector<64x256xf32>
    %c0_1 = arith.constant 0 : index
    %c0_2 = arith.constant 0 : index
    %c0_3 = arith.constant 0 : index
    %1 = vector.load %arg2[%c0_1, %c0_2, %c0_3] : memref<1x256x16xf32, #tpu.memory_space<vmem>>, vector<1x256x16xf32>
    %2 = vector.shape_cast %1 : vector<1x256x16xf32> to vector<256x16xf32>
    %cst = arith.constant dense<0.000000e+00> : vector<64x16xf32>
    %3 = tpu.matmul %0, %2, %cst {dimension_numbers = #tpu.dot_dimension_numbers<[1], [0], [0], [1], [0, 0, 1, 1], [], []>} : vector<64x256xf32>, vector<256x16xf32>, vector<64x16xf32> -> vector<64x16xf32>
    %c0_4 = arith.constant 0 : index
    %c0_5 = arith.constant 0 : index
    %4 = vector.load %arg4[%c0_4, %c0_5] : memref<64x1xf32, #tpu.memory_space<vmem>>, vector<64x1xf32>
    %5 = vector.broadcast %4 : vector<64x1xf32> to vector<64x16xf32>
    %6 = arith.addf %3, %5 : vector<64x16xf32>
    %cst_6 = arith.constant 0.000000e+00 : f32
    %7 = vector.broadcast %cst_6 : f32 to vector<64x16xf32>
    %8 = arith.maximumf %6, %7 : vector<64x16xf32>
    %9 = vector.shape_cast %8 : vector<64x16xf32> to vector<1x64x16xf32>
    %c0_7 = arith.constant 0 : index
    %c0_8 = arith.constant 0 : index
    %c0_9 = arith.constant 0 : index
    %10 = vector.load %arg5[%c0_7, %c0_8, %c0_9] : memref<1x64x16xf32, #tpu.memory_space<vmem>>, vector<1x64x16xf32>
    tpu.vector_store %arg5[%c0_7, %c0_8, %c0_9], %9 {strides = array<i32>} : memref<1x64x16xf32, #tpu.memory_space<vmem>>, vector<1x64x16xf32>,
    return
  }
  func.func @transform_0(%arg0: i32, %arg1: i32) -> (i32, i32, i32) {
    %c0_i32 = arith.constant 0 : i32
    %c0_i32_0 = arith.constant 0 : i32
    return %arg0, %c0_i32, %arg1 : i32, i32, i32
  }
  func.func @transform_1(%arg0: i32, %arg1: i32) -> (i32, i32) {
    %c0_i32 = arith.constant 0 : i32
    %c0_i32_0 = arith.constant 0 : i32
    %c0_i32_1 = arith.constant 0 : i32
    return %c0_i32, %c0_i32_0 : i32, i32
  }
  func.func @transform_2(%arg0: i32, %arg1: i32) -> (i32, i32) {
    %c0_i32 = arith.constant 0 : i32
    %c0_i32_0 = arith.constant 0 : i32
    %c0_i32_1 = arith.constant 0 : i32
    return %c0_i32, %c0_i32_0 : i32, i32
  }
  func.func @transform_3(%arg0: i32, %arg1: i32) -> (i32, i32, i32) {
    %c0_i32 = arith.constant 0 : i32
    %c0_i32_0 = arith.constant 0 : i32
    return %arg0, %c0_i32, %arg1 : i32, i32, i32
  }
}

</mosaic_0001>

<bundles_post_ra>
// kernel: key_encoder_forward_pallas.18
= control target key start
LH: loop header
LB: loop body
LE: loop exit
PB: predicated region body
PF: predicated region fallthrough
CT: control target
= control target key end

     0   :  { %s1172_s12 = smov 0   ;;  %s1174_s13 = smov 0   ;;  %s1561_s0 = inlined_call_operand.vmem [shape: f32[2,432,256], index: 0, kind: input, shape index: {}]   ;;  %s1562_s1 = inlined_call_operand.vmem [shape: f32[48,432], index: 1, kind: input, shape index: {}]   ;;  %s1563_s2 = inlined_call_operand.vmem [shape: f32[48,1], index: 2, kind: input, shape index: {}]   ;;  %s1564_s3 = inlined_call_operand.vmem [shape: f32[2,48,256], index: 3, kind: output, shape index: {}]  }
   0x1   :  { %s1176_s14 = smov 0   ;;  %s1178_s15 = smov 0  }
   0x2   :  { %s1180_s16 = smov 0   ;;  %s1182_s17 = smov 0  }
   0x3   :  { %s1184_s18 = smov 0  }
   0x4 LB: > { %s22_s19 = sadd.s32 1, %s1140_s16  ;;  %s25_s20 = sadd.s32 1, %s1144_s17  ;;  %s1148_s18 = sphi %s1184_s18, %s13_s18   ;;  %s1144_s17 = sphi %s1182_s17, %s1571_s17   ;;  %s1140_s16 = sphi %s1180_s16, %s1570_s16   ;;  %s1136_s15 = sphi %s1178_s15, %s1569_s15   ;;  %s1132_s14 = sphi %s1176_s14, %s1568_s14   ;;  %s1128_s13 = sphi %s1174_s13, %s1567_s13   ;;  %s1124_s12 = sphi %s1172_s12, %s1566_s12  }
   0x5   : > { %p23_p0 = scmp.ge.s32.totalorder %s22_s19, 2  ;;  %s899_s21 = sadd.s32 4294967295, %s1148_s18  }
   0x6   : > { %p41_p1 = scmp.ne.s32.totalorder %s1128_s13, %s1124_s12  ;;  %p42_p2 = scmp.eq.s32.totalorder %s1148_s18, 0 }
   0x7   : > { %s1573_s19 = smov (%p23_p0, %s22_s19), 0  ;;  %s1575_s20 = smov (!%p23_p0, %s25_s20), %s1144_s17 }
   0x8   : > { %p27_p3 = scmp.ge.s32.totalorder %s1575_s20, 2  ;;  %p115_p4 = scmp.eq.s32.totalorder %s899_s21, 3 }
   0x9   : > { %s30_s22 = ssub.s32 %s1140_s16, %s1573_s19  ;;  %p43_p5 = por %p42_p2, %p41_p1 }
   0xa   : > { %s1577_s20 = smov (%p27_p3, %s1575_s20), 0  ;;  %p1220_p6 = por %p115_p4, %p41_p1 }
   0xb   : > { %s29_s24 = ssub.s32 %s1144_s17, %s1577_s20  ;;  %s34_s26 = sadd.s32 1, %s1128_s13 }
   0xc   : > { %s31_s25 = sor.u32 %s30_s22, %s29_s24  ;;  %p902_p8 = scmp.ge.s32.totalorder %s1148_s18, 4 }
   0xd   : > { %p32_p7 = scmp.eq.s32.totalorder %s31_s25, 0 }
   0xe   : > { %143 = sbr.rel (%p902_p8) target bundleno = 55 (0x37), region = 24 }
   0xf   : > { %s1228_s27 = scalar_select %p32_p7, %s1128_s13, %s34_s26  }
  0x15   : > { %146 = sbr.rel (!%p43_p5) target bundleno = 55 (0x37), region = 28  ;;  %s148_s28 = sand.u32 (%p43_p5), 1, %s1128_s13  }
  0x16   : > { %s1030_s29 = smul.u32 (%p43_p5), 108, %s1144_s17 }
  0x17   : > { %s1029_s30 = smul.u32 (%p43_p5), 432, %s148_s28 }
  0x18   : > { %s152_s4 = sadd.s32 (%p43_p5), %s1140_s16, %s1030_s29 }
  0x19   : > { %s903_s5 = sshll.u32 (%p43_p5), %s152_s4, 3  ;;  %s1242_s9 = scalar_lea.vmem (%p43_p5), [#allocation2], %s1029_s30 }
  0x1a   : > { %s1237_s8 = scalar_lea.vmem (%p43_p5), %s1561_s0, %s903_s5 }
  0x1b   : > { %v288_v0 = vld [vmem:[%s1237_s8] sm:$0xff] (%p43_p5)  ;;  %v290_v1 = vld [vmem:[%s1237_s8 + $0x10] sm:$0xff] (%p43_p5) }
  0x1c   : > { %v292_v2 = vld [vmem:[%s1237_s8 + $0x20] sm:$0xff]  ;;  %289 = vst [vmem:[%s1242_s9] sm:$0xff] %v288_v0  ;;  %291 = vst [vmem:[%s1242_s9 + $0x8] sm:$0xff] %v290_v1  ;;  %v294_v3 = vld [vmem:[%s1237_s8 + $0x30] sm:$0xff] }
  0x1d   : > { %293 = vst [vmem:[%s1242_s9 + $0x10] sm:$0xff] %v292_v2  ;;  %v296_v4 = vld [vmem:[%s1237_s8 + $0x40] sm:$0xff]  ;;  %v298_v5 = vld [vmem:[%s1237_s8 + $0x50] sm:$0xff]  ;;  %295 = vst [vmem:[%s1242_s9 + $0x18] sm:$0xff] %v294_v3 }
  0x1e   : > { %297 = vst [vmem:[%s1242_s9 + $0x20] sm:$0xff] %v296_v4  ;;  %299 = vst [vmem:[%s1242_s9 + $0x28] sm:$0xff] %v298_v5  ;;  %v300_v6 = vld [vmem:[%s1237_s8 + $0x60] sm:$0xff]  ;;  %v302_v7 = vld [vmem:[%s1237_s8 + $0x70] sm:$0xff] }
  0x1f   : > { %v304_v8 = vld [vmem:[%s1237_s8 + $0x80] sm:$0xff]  ;;  %301 = vst [vmem:[%s1242_s9 + $0x30] sm:$0xff] %v300_v6  ;;  %303 = vst [vmem:[%s1242_s9 + $0x38] sm:$0xff] %v302_v7  ;;  %v306_v9 = vld [vmem:[%s1237_s8 + $0x90] sm:$0xff] }
  0x20   : > { %305 = vst [vmem:[%s1242_s9 + $0x40] sm:$0xff] %v304_v8  ;;  %v308_v10 = vld [vmem:[%s1237_s8 + $0xa0] sm:$0xff]  ;;  %v310_v11 = vld [vmem:[%s1237_s8 + $0xb0] sm:$0xff]  ;;  %307 = vst [vmem:[%s1242_s9 + $0x48] sm:$0xff] %v306_v9 }
  0x21   : > { %309 = vst [vmem:[%s1242_s9 + $0x50] sm:$0xff] %v308_v10  ;;  %311 = vst [vmem:[%s1242_s9 + $0x58] sm:$0xff] %v310_v11  ;;  %v312_v12 = vld [vmem:[%s1237_s8 + $0xc0] sm:$0xff]  ;;  %v314_v13 = vld [vmem:[%s1237_s8 + $0xd0] sm:$0xff] }
  0x22   : > { %v316_v14 = vld [vmem:[%s1237_s8 + $0xe0] sm:$0xff]  ;;  %313 = vst [vmem:[%s1242_s9 + $0x60] sm:$0xff] %v312_v12  ;;  %315 = vst [vmem:[%s1242_s9 + $0x68] sm:$0xff] %v314_v13  ;;  %v318_v15 = vld [vmem:[%s1237_s8 + $0xf0] sm:$0xff] }
  0x23   : > { %317 = vst [vmem:[%s1242_s9 + $0x70] sm:$0xff] %v316_v14  ;;  %v320_v16 = vld [vmem:[%s1237_s8 + $0x100] sm:$0xff]  ;;  %v322_v17 = vld [vmem:[%s1237_s8 + $0x110] sm:$0xff]  ;;  %319 = vst [vmem:[%s1242_s9 + $0x78] sm:$0xff] %v318_v15 }
  0x24   : > { %321 = vst [vmem:[%s1242_s9 + $0x80] sm:$0xff] %v320_v16  ;;  %323 = vst [vmem:[%s1242_s9 + $0x88] sm:$0xff] %v322_v17  ;;  %v324_v18 = vld [vmem:[%s1237_s8 + $0x120] sm:$0xff]  ;;  %v326_v19 = vld [vmem:[%s1237_s8 + $0x130] sm:$0xff] }
  0x25   : > { %v328_v20 = vld [vmem:[%s1237_s8 + $0x140] sm:$0xff]  ;;  %325 = vst [vmem:[%s1242_s9 + $0x90] sm:$0xff] %v324_v18  ;;  %327 = vst [vmem:[%s1242_s9 + $0x98] sm:$0xff] %v326_v19  ;;  %v330_v21 = vld [vmem:[%s1237_s8 + $0x150] sm:$0xff] }
  0x26   : > { %329 = vst [vmem:[%s1242_s9 + $0xa0] sm:$0xff] %v328_v20  ;;  %v332_v22 = vld [vmem:[%s1237_s8 + $0x160] sm:$0xff]  ;;  %v334_v23 = vld [vmem:[%s1237_s8 + $0x170] sm:$0xff]  ;;  %331 = vst [vmem:[%s1242_s9 + $0xa8] sm:$0xff] %v330_v21 }
  0x27   : > { %333 = vst [vmem:[%s1242_s9 + $0xb0] sm:$0xff] %v332_v22  ;;  %335 = vst [vmem:[%s1242_s9 + $0xb8] sm:$0xff] %v334_v23  ;;  %v336_v24 = vld [vmem:[%s1237_s8 + $0x180] sm:$0xff]  ;;  %v338_v25 = vld [vmem:[%s1237_s8 + $0x190] sm:$0xff] }
  0x28   : > { %v340_v26 = vld [vmem:[%s1237_s8 + $0x1a0] sm:$0xff]  ;;  %337 = vst [vmem:[%s1242_s9 + $0xc0] sm:$0xff] %v336_v24  ;;  %339 = vst [vmem:[%s1242_s9 + $0xc8] sm:$0xff] %v338_v25  ;;  %v342_v27 = vld [vmem:[%s1237_s8 + $0x1b0] sm:$0xff] }
  0x29   : > { %341 = vst [vmem:[%s1242_s9 + $0xd0] sm:$0xff] %v340_v26  ;;  %v344_v28 = vld [vmem:[%s1237_s8 + $0x1c0] sm:$0xff]  ;;  %v346_v29 = vld [vmem:[%s1237_s8 + $0x1d0] sm:$0xff]  ;;  %343 = vst [vmem:[%s1242_s9 + $0xd8] sm:$0xff] %v342_v27 }
  0x2a   : > { %345 = vst [vmem:[%s1242_s9 + $0xe0] sm:$0xff] %v344_v28  ;;  %347 = vst [vmem:[%s1242_s9 + $0xe8] sm:$0xff] %v346_v29  ;;  %v348_v30 = vld [vmem:[%s1237_s8 + $0x1e0] sm:$0xff]  ;;  %v350_v31 = vld [vmem:[%s1237_s8 + $0x1f0] sm:$0xff] }
  0x2b   : > { %v352_v32 = vld [vmem:[%s1237_s8 + $0x200] sm:$0xff]  ;;  %349 = vst [vmem:[%s1242_s9 + $0xf0] sm:$0xff] %v348_v30  ;;  %351 = vst [vmem:[%s1242_s9 + $0xf8] sm:$0xff] %v350_v31  ;;  %v354_v33 = vld [vmem:[%s1237_s8 + $0x210] sm:$0xff] }
  0x2c   : > { %353 = vst [vmem:[%s1242_s9 + $0x100] sm:$0xff] %v352_v32  ;;  %v356_v34 = vld [vmem:[%s1237_s8 + $0x220] sm:$0xff]  ;;  %v358_v35 = vld [vmem:[%s1237_s8 + $0x230] sm:$0xff]  ;;  %355 = vst [vmem:[%s1242_s9 + $0x108] sm:$0xff] %v354_v33 }
  0x2d   : > { %357 = vst [vmem:[%s1242_s9 + $0x110] sm:$0xff] %v356_v34  ;;  %359 = vst [vmem:[%s1242_s9 + $0x118] sm:$0xff] %v358_v35  ;;  %v360_v36 = vld [vmem:[%s1237_s8 + $0x240] sm:$0xff]  ;;  %v362_v37 = vld [vmem:[%s1237_s8 + $0x250] sm:$0xff] }
  0x2e   : > { %v364_v38 = vld [vmem:[%s1237_s8 + $0x260] sm:$0xff]  ;;  %361 = vst [vmem:[%s1242_s9 + $0x120] sm:$0xff] %v360_v36  ;;  %363 = vst [vmem:[%s1242_s9 + $0x128] sm:$0xff] %v362_v37  ;;  %v366_v39 = vld [vmem:[%s1237_s8 + $0x270] sm:$0xff] }
  0x2f   : > { %365 = vst [vmem:[%s1242_s9 + $0x130] sm:$0xff] %v364_v38  ;;  %v368_v40 = vld [vmem:[%s1237_s8 + $0x280] sm:$0xff]  ;;  %v370_v41 = vld [vmem:[%s1237_s8 + $0x290] sm:$0xff]  ;;  %367 = vst [vmem:[%s1242_s9 + $0x138] sm:$0xff] %v366_v39 }
  0x30   : > { %369 = vst [vmem:[%s1242_s9 + $0x140] sm:$0xff] %v368_v40  ;;  %371 = vst [vmem:[%s1242_s9 + $0x148] sm:$0xff] %v370_v41  ;;  %v372_v42 = vld [vmem:[%s1237_s8 + $0x2a0] sm:$0xff]  ;;  %v374_v43 = vld [vmem:[%s1237_s8 + $0x2b0] sm:$0xff] }
  0x31   : > { %v376_v44 = vld [vmem:[%s1237_s8 + $0x2c0] sm:$0xff]  ;;  %373 = vst [vmem:[%s1242_s9 + $0x150] sm:$0xff] %v372_v42  ;;  %375 = vst [vmem:[%s1242_s9 + $0x158] sm:$0xff] %v374_v43  ;;  %v378_v45 = vld [vmem:[%s1237_s8 + $0x2d0] sm:$0xff] }
  0x32   : > { %377 = vst [vmem:[%s1242_s9 + $0x160] sm:$0xff] %v376_v44  ;;  %v380_v46 = vld [vmem:[%s1237_s8 + $0x2e0] sm:$0xff]  ;;  %v382_v47 = vld [vmem:[%s1237_s8 + $0x2f0] sm:$0xff]  ;;  %379 = vst [vmem:[%s1242_s9 + $0x168] sm:$0xff] %v378_v45 }
  0x33   : > { %381 = vst [vmem:[%s1242_s9 + $0x170] sm:$0xff] %v380_v46  ;;  %383 = vst [vmem:[%s1242_s9 + $0x178] sm:$0xff] %v382_v47  ;;  %v384_v48 = vld [vmem:[%s1237_s8 + $0x300] sm:$0xff]  ;;  %v386_v49 = vld [vmem:[%s1237_s8 + $0x310] sm:$0xff] }
  0x34   : > { %v388_v50 = vld [vmem:[%s1237_s8 + $0x320] sm:$0xff]  ;;  %385 = vst [vmem:[%s1242_s9 + $0x180] sm:$0xff] %v384_v48  ;;  %387 = vst [vmem:[%s1242_s9 + $0x188] sm:$0xff] %v386_v49  ;;  %v390_v51 = vld [vmem:[%s1237_s8 + $0x330] sm:$0xff] }
  0x35   : > { %389 = vst [vmem:[%s1242_s9 + $0x190] sm:$0xff] %v388_v50  ;;  %v392_v52 = vld [vmem:[%s1237_s8 + $0x340] sm:$0xff]  ;;  %v394_v53 = vld [vmem:[%s1237_s8 + $0x350] sm:$0xff]  ;;  %391 = vst [vmem:[%s1242_s9 + $0x198] sm:$0xff] %v390_v51 }
  0x36   : > { %393 = vst [vmem:[%s1242_s9 + $0x1a0] sm:$0xff] %v392_v52  ;;  %395 = vst [vmem:[%s1242_s9 + $0x1a8] sm:$0xff] %v394_v53 }
  0x37 PF: > { %p904_p9 = scmp.ge.s32.totalorder %s1148_s18, 1  ;;  %p400_p10 = scmp.lt.s32.totalorder %s1148_s18, 5 }
  0x39   : > { %p401_p11 = pnand %p904_p9, %p400_p10 }
  0x3a   : > { %s407_s10 = sand.u32 (!%p401_p11), 1, %s1124_s12   ;;  %v430_v54 = vld [vmem:[%s1562_s1 + $0x8] sm:$0xff] (!%p401_p11)  ;;  %vm543_vm0 = vcmask (!%p401_p11), 392192   ;;  %v1150_v55 = vmov (!%p401_p11), 0.0|0.0   ;;  %v432_v56 = vld [vmem:[%s1562_s1 + $0x18] sm:$0xff] (!%p401_p11)  ;;  %v1151_v57 = vmov (!%p401_p11), 0  }
  0x3b   : > { %404 = sbr.rel (%p401_p11) target bundleno = 355 (0x163), region = 66  ;;  %996 = vmatprep.subr.bf16.mxu1 (!%p401_p11), %v1150_v55  ;;  %626 = vmatprep.mubr.f32.mxu0 (!%p401_p11), %v430_v54 }
  0x3c   : > { %s1031_s22 = smul.u32 (!%p401_p11), 432, %s407_s10  ;;  %1092 = vset.pattern.permute.xlu0 (!%p401_p11), %v1151_v57  ;;  %1093 = vset.pattern.permute.xlu1 (!%p401_p11), %v1151_v57 }
  0x3d   : > { %905 = vmatprep.mubr.msk.f32.mxu1 (!%p401_p11), %vm543_vm0, %v432_v56 }
  0x3e   : > { %s1362_s26 = scalar_lea.vmem (!%p401_p11), [#allocation2], %s1031_s22 }
  0x3f   : > { %v469_v58 = vld [vmem:[%s1362_s26 + $0x80] sm:$0xff] (!%p401_p11)  ;;  %v470_v59 = vld [vmem:[%s1362_s26 + $0x88] sm:$0xff] (!%p401_p11)  ;;  %v471_v3 = vld [vmem:[%s1362_s26 + $0x90] sm:$0xff] (!%p401_p11) }
  0x40   : > { %v485_v60 = vld [vmem:[%s1362_s26 + $0x100] sm:$0xff] (!%p401_p11)  ;;  %v964_v61 = vpack.c.bf16 (!%p401_p11), %v470_v59, %v469_v58  ;;  %v486_v62 = vld [vmem:[%s1362_s26 + $0x108] sm:$0xff] (!%p401_p11)  ;;  %v472_v4 = vld [vmem:[%s1362_s26 + $0x98] sm:$0xff] (!%p401_p11) }
  0x41   : > { %v453_v63 = vld [vmem:[%s1362_s26] sm:$0xff] (!%p401_p11)  ;;  %v454_v0 = vld [vmem:[%s1362_s26 + $0x8] sm:$0xff] (!%p401_p11)  ;;  %v997_v1 = vpack.c.bf16 (!%p401_p11), %v486_v62, %v485_v60  ;;  %v487_v5 = vld [vmem:[%s1362_s26 + $0x110] sm:$0xff] (!%p401_p11)  ;;  %v968_v6 = vpack.c.bf16 (!%p401_p11), %v472_v4, %v471_v3 }
  0x42   : > { %v966_v2 = vpack.c.bf16 %v454_v0, %v453_v63  ;;  %965 = vmatprep.subr.bf16.mxu0 %v964_v61  ;;  %v488_v7 = vld [vmem:[%s1362_s26 + $0x118] sm:$0xff]  ;;  %v455_v8 = vld [vmem:[%s1362_s26 + $0x10] sm:$0xff]  ;;  %v473_v12 = vld [vmem:[%s1362_s26 + $0xa0] sm:$0xff]  ;;  %s1033_s12 = smul.u32 (%p1220_p6), 12, %s1136_s15 }
  0x43   : > { %v456_v9 = vld [vmem:[%s1362_s26 + $0x18] sm:$0xff]  ;;  %998 = vmatpush1.bf16.msra.mxu1 %v997_v1  ;;  %v1000_v10 = vpack.c.bf16 %v488_v7, %v487_v5  ;;  %v474_v13 = vld [vmem:[%s1362_s26 + $0xa8] sm:$0xff]  ;;  %v489_v14 = vld [vmem:[%s1362_s26 + $0x120] sm:$0xff] }
  0x44   : > { %967 = vmatpush3.bf16.msra.mxu0 %v966_v2  ;;  %v970_v11 = vpack.c.bf16 %v456_v9, %v455_v8  ;;  %999 = vmatprep.subr.bf16.mxu1 %v1150_v55  ;;  %v972_v15 = vpack.c.bf16 %v474_v13, %v473_v12  ;;  %v490_v16 = vld [vmem:[%s1362_s26 + $0x128] sm:$0xff]  ;;  %v457_v17 = vld [vmem:[%s1362_s26 + $0x20] sm:$0xff]  ;;  %v475_v19 = vld [vmem:[%s1362_s26 + $0xb0] sm:$0xff] }
  0x45   : > { %969 = vmatprep.subr.bf16.mxu0 %v968_v6  ;;  %v458_v18 = vld [vmem:[%s1362_s26 + $0x28] sm:$0xff]  ;;  %v476_v20 = vld [vmem:[%s1362_s26 + $0xb8] sm:$0xff]  ;;  %v1003_v21 = vpack.c.bf16 %v490_v16, %v489_v14  ;;  %v491_v23 = vld [vmem:[%s1362_s26 + $0x130] sm:$0xff] }
  0x46   : > { %v974_v22 = vpack.c.bf16 %v458_v18, %v457_v17  ;;  %v976_v24 = vpack.c.bf16 %v476_v20, %v475_v19  ;;  %v492_v25 = vld [vmem:[%s1362_s26 + $0x138] sm:$0xff]  ;;  %v459_v26 = vld [vmem:[%s1362_s26 + $0x30] sm:$0xff]  ;;  %v477_v28 = vld [vmem:[%s1362_s26 + $0xc0] sm:$0xff] }
  0x47   : > { %1001 = vmatpush1.bf16.msra.mxu1 %v1000_v10  ;;  %v460_v27 = vld [vmem:[%s1362_s26 + $0x38] sm:$0xff]  ;;  %v478_v29 = vld [vmem:[%s1362_s26 + $0xc8] sm:$0xff]  ;;  %v1006_v30 = vpack.c.bf16 %v492_v25, %v491_v23  ;;  %v493_v32 = vld [vmem:[%s1362_s26 + $0x140] sm:$0xff] }
  0x48   : > { %971 = vmatpush3.bf16.msra.mxu0 %v970_v11  ;;  %1002 = vmatprep.subr.bf16.mxu1 %v1150_v55  ;;  %v978_v31 = vpack.c.bf16 %v460_v27, %v459_v26  ;;  %v980_v33 = vpack.c.bf16 %v478_v29, %v477_v28  ;;  %v494_v34 = vld [vmem:[%s1362_s26 + $0x148] sm:$0xff]  ;;  %v461_v35 = vld [vmem:[%s1362_s26 + $0x40] sm:$0xff]  ;;  %v479_v37 = vld [vmem:[%s1362_s26 + $0xd0] sm:$0xff] }
  0x49   : > { %973 = vmatprep.subr.bf16.mxu0 %v972_v15  ;;  %v462_v36 = vld [vmem:[%s1362_s26 + $0x48] sm:$0xff]  ;;  %v480_v38 = vld [vmem:[%s1362_s26 + $0xd8] sm:$0xff]  ;;  %v1009_v39 = vpack.c.bf16 %v494_v34, %v493_v32  ;;  %v495_v41 = vld [vmem:[%s1362_s26 + $0x150] sm:$0xff] }
  0x4a   : > { %v982_v40 = vpack.c.bf16 %v462_v36, %v461_v35  ;;  %v984_v42 = vpack.c.bf16 %v480_v38, %v479_v37  ;;  %v496_v43 = vld [vmem:[%s1362_s26 + $0x158] sm:$0xff]  ;;  %v463_v44 = vld [vmem:[%s1362_s26 + $0x50] sm:$0xff]  ;;  %v481_v46 = vld [vmem:[%s1362_s26 + $0xe0] sm:$0xff] }
  0x4b   : > { %1004 = vmatpush1.bf16.msra.mxu1 %v1003_v21  ;;  %v464_v45 = vld [vmem:[%s1362_s26 + $0x58] sm:$0xff]  ;;  %v482_v47 = vld [vmem:[%s1362_s26 + $0xe8] sm:$0xff]  ;;  %v1012_v48 = vpack.c.bf16 %v496_v43, %v495_v41  ;;  %v497_v50 = vld [vmem:[%s1362_s26 + $0x160] sm:$0xff] }
  0x4c   : > { %975 = vmatpush3.bf16.msra.mxu0 %v974_v22  ;;  %1005 = vmatprep.subr.bf16.mxu1 %v1150_v55  ;;  %v986_v49 = vpack.c.bf16 %v464_v45, %v463_v44  ;;  %v498_v51 = vld [vmem:[%s1362_s26 + $0x168] sm:$0xff]  ;;  %v988_v52 = vpack.c.bf16 %v482_v47, %v481_v46  ;;  %v465_v53 = vld [vmem:[%s1362_s26 + $0x60] sm:$0xff]  ;;  %v483_v56 = vld [vmem:[%s1362_s26 + $0xf0] sm:$0xff] }
  0x4d   : > { %977 = vmatprep.subr.bf16.mxu0 %v976_v24  ;;  %v466_v54 = vld [vmem:[%s1362_s26 + $0x68] sm:$0xff]  ;;  %v484_v57 = vld [vmem:[%s1362_s26 + $0xf8] sm:$0xff]  ;;  %v507_v58 = vld [vmem:[%s1563_s2] sm:$0xff]  ;;  %v1015_v60 = vpack.c.bf16 %v498_v51, %v497_v50 }
  0x4e   : > { %v509_v59 = vld [vmem:[%s1563_s2 + $0x10] sm:$0xff]  ;;  %515 = vperm.xlu0 %1092, %v507_v58   ;;  %v990_v61 = vpack.c.bf16 %v466_v54, %v465_v53  ;;  %v508_v63 = vld [vmem:[%s1563_s2 + $0x8] sm:$0xff]  ;;  %v510_v0 = vld [vmem:[%s1563_s2 + $0x18] sm:$0xff]  ;;  %v992_v1 = vpack.c.bf16 %v484_v57, %v483_v56 }
  0x4f   : > { %1007 = vmatpush1.bf16.msra.mxu1 %v1006_v30  ;;  %525 = vperm.xlu1 %1093, %v509_v59   ;;  %v499_v62 = vld [vmem:[%s1362_s26 + $0x170] sm:$0xff]  ;;  %v500_v2 = vld [vmem:[%s1362_s26 + $0x178] sm:$0xff]  ;;  %v501_v9 = vld [vmem:[%s1362_s26 + $0x180] sm:$0xff] }
  0x50   : > { %979 = vmatpush3.bf16.msra.mxu0 %v978_v31  ;;  %1008 = vmatprep.subr.bf16.mxu1 %v1150_v55  ;;  %v467_v3 = vld [vmem:[%s1362_s26 + $0x70] sm:$0xff]  ;;  %v468_v4 = vld [vmem:[%s1362_s26 + $0x78] sm:$0xff]  ;;  %v1018_v5 = vpack.c.bf16 %v500_v2, %v499_v62  ;;  %v502_v10 = vld [vmem:[%s1362_s26 + $0x188] sm:$0xff] }
  0x51   : > { %981 = vmatprep.subr.bf16.mxu0 %v980_v33  ;;  %v994_v6 = vpack.c.bf16 %v468_v4, %v467_v3  ;;  %v512_v7 = vld [vmem:[%s1563_s2 + $0x28] sm:$0xff]  ;;  %v511_v8 = vld [vmem:[%s1563_s2 + $0x20] sm:$0xff]  ;;  %v1021_v12 = vpack.c.bf16 %v502_v10, %v501_v9  ;;  %v431_v24 = vld [vmem:[%s1562_s1 + $0x10] sm:$0xff] }
  0x52   : > { %520 = vperm.xlu0 %1092, %v508_v63   ;;  %v429_v11 = vld [vmem:[%s1562_s1] sm:$0xff]  ;;  %v434_v13 = vld [vmem:[%s1562_s1 + $0x28] sm:$0xff]  ;;  %v436_v26 = vld [vmem:[%s1562_s1 + $0x38] sm:$0xff] }
  0x53   : > { %1010 = vmatpush1.bf16.msra.mxu1 %v1009_v39  ;;  %530 = vperm.xlu1 %1093, %v510_v0   ;;  %v503_v14 = vld [vmem:[%s1362_s26 + $0x190] sm:$0xff]  ;;  %v504_v15 = vld [vmem:[%s1362_s26 + $0x198] sm:$0xff]  ;;  %v505_v19 = vld [vmem:[%s1362_s26 + $0x1a0] sm:$0xff] }
  0x54   : > { %983 = vmatpush3.bf16.msra.mxu0 %v982_v40  ;;  %1011 = vmatprep.subr.bf16.mxu1 %v1150_v55  ;;  %v433_v16 = vld [vmem:[%s1562_s1 + $0x20] sm:$0xff]  ;;  %v1024_v17 = vpack.c.bf16 %v504_v15, %v503_v14  ;;  %v438_v18 = vld [vmem:[%s1562_s1 + $0x48] sm:$0xff]  ;;  %v435_v27 = vld [vmem:[%s1562_s1 + $0x30] sm:$0xff] }
  0x55   : > { %985 = vmatprep.subr.bf16.mxu0 %v984_v42  ;;  %v506_v20 = vld [vmem:[%s1362_s26 + $0x1a8] sm:$0xff]  ;;  %v437_v21 = vld [vmem:[%s1562_s1 + $0x40] sm:$0xff]  ;;  %v439_v31 = vld [vmem:[%s1562_s1 + $0x50] sm:$0xff]  ;;  %s1032_s26 = smul.u32 48, %s407_s10  ;;  %s772_s10 = sadd.s32 (%p1220_p6), %s1132_s14, %s1033_s12 }
  0x56   : > { %535 = vperm.xlu0 %1092, %v511_v8   ;;  %v1027_v22 = vpack.c.bf16 %v506_v20, %v505_v19  ;;  %v442_v23 = vld [vmem:[%s1562_s1 + $0x68] sm:$0xff]  ;;  %v441_v25 = vld [vmem:[%s1562_s1 + $0x60] sm:$0xff]  ;;  %v440_v29 = vld [vmem:[%s1562_s1 + $0x58] sm:$0xff]  ;;  %s911_s25 = sshll.u32 (%p1220_p6), %s772_s10, 3 }
  0x57   : > { %1013 = vmatpush1.bf16.msra.mxu1 %v1012_v48  ;;  %540 = vperm.xlu1 %1093, %v512_v7   ;;  %v445_v28 = vld [vmem:[%s1562_s1 + $0x80] sm:$0xff]  ;;  %v450_v30 = vld [vmem:[%s1562_s1 + $0xa8] sm:$0xff]  ;;  %v444_v33 = vld [vmem:[%s1562_s1 + $0x78] sm:$0xff]  ;;  %s1519_s24 = scalar_lea.vmem [#allocation3], %s1032_s26  ;;  %s774_s29 = scalar_lea.vmem (%p1220_p6), %s1564_s3, %s911_s25 }
  0x58   : > { %987 = vmatpush3.bf16.msra.mxu0 %v986_v49  ;;  %1014 = vmatprep.subr.bf16.mxu1 %v1150_v55  ;;  %v449_v32 = vld [vmem:[%s1562_s1 + $0xa0] sm:$0xff]  ;;  %v443_v34 = vld [vmem:[%s1562_s1 + $0x70] sm:$0xff]  ;;  %v448_v35 = vld [vmem:[%s1562_s1 + $0x98] sm:$0xff] }
  0x59   : > { %989 = vmatprep.subr.bf16.mxu0 %v988_v52  ;;  %v447_v36 = vld [vmem:[%s1562_s1 + $0x90] sm:$0xff]  ;;  %v452_v37 = vld [vmem:[%s1562_s1 + $0xb8] sm:$0xff] }
  0x5a   : > { %v451_v38 = vld [vmem:[%s1562_s1 + $0xb0] sm:$0xff] }
  0x5b   : > { %1016 = vmatpush1.bf16.msra.mxu1 %v1015_v60 }
  0x5c   : > { %991 = vmatpush3.bf16.msra.mxu0 %v990_v61  ;;  %1017 = vmatprep.subr.bf16.mxu1 %v1150_v55 }
  0x5d   : > { %993 = vmatprep.subr.bf16.mxu0 %v992_v1 }
  0x5f   : > { %1019 = vmatpush1.bf16.msra.mxu1 %v1018_v5 }
  0x60   : > { %995 = vmatpush3.bf16.msra.mxu0 %v994_v6  ;;  %1020 = vmatprep.subr.bf16.mxu1 %v1150_v55 }
  0x63   : > { %627 = vmatmul.mubr.f32.vlgmr.msra.gmra.mrb[0].mxu0 %v429_v11  ;;  %1022 = vmatpush1.bf16.msra.mxu1 %v1021_v12 }
  0x64   : > { %631 = vmatprep.mubr.f32.mxu0 %v434_v13  ;;  %1023 = vmatprep.subr.bf16.mxu1 %v1150_v55 }
  0x67   : > { %632 = vmatmul.mubr.f32.gmra.mrb[2].mxu0 %v433_v16  ;;  %1025 = vmatpush1.bf16.msra.mxu1 %v1024_v17 }
  0x68   : > { %636 = vmatprep.mubr.f32.mxu0 %v438_v18  ;;  %1026 = vmatprep.subr.bf16.mxu1 %v1150_v55  ;;  %v446_v55 = vld [vmem:[%s1562_s1 + $0x88] sm:$0xff] }
  0x6b   : > { %637 = vmatmul.mubr.f32.gmra.mrb[4].mxu0 %v437_v21  ;;  %1028 = vmatpush1.bf16.msra.mxu1 %v1027_v22 }
  0x6c   : > { %641 = vmatprep.mubr.f32.mxu0 %v442_v23 }
  0x6e   : > { %722 = vmatmul.mubr.f32.vlgmr.msra.gmra.mrb[0].mxu1 %v431_v24 }
  0x6f   : > { %642 = vmatmul.mubr.f32.gmra.mrb[6].mxu0 %v441_v25  ;;  %906 = vmatprep.mubr.msk.f32.mxu1 %vm543_vm0, %v436_v26 }
  0x70   : > { %646 = vmatprep.mubr.f32.mxu0 %v446_v55 }
  0x72   : > { %727 = vmatmul.mubr.f32.gmra.mrb[2].mxu1 %v435_v27 }
  0x73   : > { %647 = vmatmul.mubr.f32.gmra.mrb[8].mxu0 %v445_v28  ;;  %907 = vmatprep.mubr.msk.f32.mxu1 %vm543_vm0, %v440_v29 }
  0x74   : > { %651 = vmatprep.mubr.f32.mxu0 %v450_v30 }
  0x76   : > { %732 = vmatmul.mubr.f32.gmra.mrb[4].mxu1 %v439_v31 }
  0x77   : > { %652 = vmatmul.mubr.f32.gmra.mrb[10].mxu0 %v449_v32  ;;  %908 = vmatprep.mubr.msk.f32.mxu1 %vm543_vm0, %v444_v33 }
  0x7a   : > { %737 = vmatmul.mubr.f32.gmra.mrb[6].mxu1 %v443_v34 }
  0x7b   : > { %909 = vmatprep.mubr.msk.f32.mxu1 %vm543_vm0, %v448_v35 }
  0x7e   : > { %742 = vmatmul.mubr.f32.gmra.mrb[8].mxu1 %v447_v36 }
  0x7f   : > { %910 = vmatprep.mubr.msk.f32.mxu1 %vm543_vm0, %v452_v37 }
  0x82   : > { %747 = vmatmul.mubr.f32.gmra.mrb[10].mxu1 %v451_v38 }
  0xcd   : > { %v516_v42 = vpop.permute.xlu0 %515 }
  0xce   : > { %v526_v51 = vpop.permute.xlu1 %525 }
  0xd1   : > { %v521_v49 = vpop.permute.xlu0 %520 }
  0xd2   : > { %v531_v5 = vpop.permute.xlu1 %530 }
  0xd5   : > { %v536_v14 = vpop.permute.xlu0 %535 }
  0xd6   : > { %v541_v23 = vpop.permute.xlu1 %540 }
 0x136   : > { %v946_v39 = vpop.f32.mrb[0].mxu0 }
 0x137   : > { %v947_v40 = vpop.f32.mrb[1].mxu0 }
 0x138   : > { %v948_v41 = vadd.f32 %v947_v40, %v946_v39 }
 0x13a   : > { %v949_v43 = vpop.f32.mrb[2].mxu0  ;;  %v629_v47 = vadd.f32 %v948_v41, %v516_v42 }
 0x13b   : > { %v950_v44 = vpop.f32.mrb[3].mxu0 }
 0x13c   : > { %v951_v45 = vadd.f32 %v950_v44, %v949_v43 }
 0x13e   : > { %v952_v46 = vpop.f32.mrb[4].mxu0  ;;  %v634_v56 = vadd.f32 %v951_v45, %v521_v49 }
 0x13f   : > { %v953_v48 = vpop.f32.mrb[5].mxu0 }
 0x140   : > { %v954_v50 = vadd.f32 %v953_v48, %v952_v46 }
 0x141   : > { %v723_v52 = vpop.f32.mrb[0].mxu1 }
 0x142   : > { %v955_v53 = vpop.f32.mrb[6].mxu0  ;;  %v724_v54 = vadd.f32 %v723_v52, %v629_v47  ;;  %v725_v57 = vpop.f32.mrb[1].mxu1  ;;  %v639_v2 = vadd.f32 %v954_v50, %v526_v51 }
 0x143   : > { %v956_v58 = vpop.f32.mrb[7].mxu0 }
 0x144   : > { %v957_v59 = vadd.f32 %v956_v58, %v955_v53  ;;  %v752_v60 = vmax.f32 %v724_v54, 0.0 }
 0x145   : > { %v728_v61 = vpop.f32.mrb[2].mxu1 }
 0x146   : > { %v958_v62 = vpop.f32.mrb[8].mxu0  ;;  %758 = vst [vmem:[%s1519_s24] sm:$0xff] %v752_v60  ;;  %v729_v63 = vadd.f32 %v728_v61, %v634_v56  ;;  %v730_v0 = vpop.f32.mrb[3].mxu1  ;;  %v644_v11 = vadd.f32 %v957_v59, %v531_v5 }
 0x147   : > { %v959_v1 = vpop.f32.mrb[9].mxu0 }
 0x148   : > { %v960_v3 = vadd.f32 %v959_v1, %v958_v62  ;;  %v753_v4 = vmax.f32 %v729_v63, 0.0 }
 0x149   : > { %v733_v6 = vpop.f32.mrb[4].mxu1 }
 0x14a   : > { %v961_v7 = vpop.f32.mrb[10].mxu0  ;;  %759 = vst [vmem:[%s1519_s24 + $0x8] sm:$0xff] %v753_v4  ;;  %v734_v8 = vadd.f32 %v733_v6, %v639_v2  ;;  %v735_v9 = vpop.f32.mrb[5].mxu1  ;;  %v649_v18 = vadd.f32 %v960_v3, %v536_v14 }
 0x14b   : > { %v962_v10 = vpop.f32.mrb[11].mxu0 }
 0x14c   : > { %v963_v12 = vadd.f32 %v962_v10, %v961_v7  ;;  %v754_v13 = vmax.f32 %v734_v8, 0.0 }
 0x14d   : > { %v738_v15 = vpop.f32.mrb[6].mxu1  ;;  %v812_v29 = vld [vmem:[%s1519_s24] sm:$0xff] (%p1220_p6) }
 0x14e   : > { %760 = vst [vmem:[%s1519_s24 + $0x10] sm:$0xff] %v754_v13  ;;  %v739_v16 = vadd.f32 %v738_v15, %v644_v11  ;;  %v740_v17 = vpop.f32.mrb[7].mxu1  ;;  %v654_v25 = vadd.f32 %v963_v12, %v541_v23  ;;  %813 = vst [vmem:[%s774_s29] sm:$0xff] (%p1220_p6), %v812_v29 }
 0x150   : > { %v755_v19 = vmax.f32 %v739_v16, 0.0 }
 0x151   : > { %v743_v20 = vpop.f32.mrb[8].mxu1  ;;  %v814_v30 = vld [vmem:[%s1519_s24 + $0x8] sm:$0xff] (%p1220_p6) }
 0x152   : > { %761 = vst [vmem:[%s1519_s24 + $0x18] sm:$0xff] %v755_v19  ;;  %v744_v21 = vadd.f32 %v743_v20, %v649_v18  ;;  %v745_v22 = vpop.f32.mrb[9].mxu1  ;;  %815 = vst [vmem:[%s774_s29 + $0x10] sm:$0xff] (%p1220_p6), %v814_v30 }
 0x154   : > { %v756_v24 = vmax.f32 %v744_v21, 0.0  ;;  %770 = sbr.rel (!%p1220_p6) target bundleno = 355 (0x163), region = 74 }
 0x155   : > { %v748_v26 = vpop.f32.mrb[10].mxu1  ;;  %v816_v31 = vld [vmem:[%s1519_s24 + $0x10] sm:$0xff] (%p1220_p6) }
 0x156   : > { %762 = vst [vmem:[%s1519_s24 + $0x20] sm:$0xff] %v756_v24  ;;  %v749_v55 = vadd.f32 %v748_v26, %v654_v25  ;;  %v750_v27 = vpop.f32.mrb[11].mxu1  ;;  %817 = vst [vmem:[%s774_s29 + $0x20] sm:$0xff] (%p1220_p6), %v816_v31 }
 0x158   : > { %v757_v28 = vmax.f32 %v749_v55, 0.0 }
 0x159   : > { %v818_v32 = vld [vmem:[%s1519_s24 + $0x18] sm:$0xff] (%p1220_p6) }
 0x15a   : > { %763 = vst [vmem:[%s1519_s24 + $0x28] sm:$0xff] %v757_v28  ;;  %819 = vst [vmem:[%s774_s29 + $0x30] sm:$0xff] (%p1220_p6), %v818_v32 }
 0x15d   : > { %v820_v33 = vld [vmem:[%s1519_s24 + $0x20] sm:$0xff] }
 0x15e   : > { %821 = vst [vmem:[%s774_s29 + $0x40] sm:$0xff] %v820_v33 }
 0x161   : > { %v822_v34 = vld [vmem:[%s1519_s24 + $0x28] sm:$0xff] }
 0x162   : > { %823 = vst [vmem:[%s774_s29 + $0x50] sm:$0xff] %v822_v34 }
 0x163 PF: > { %s13_s18 = sadd.s32 1, %s1148_s18   ;;  %s1566_s12 = smov %s1128_s13 }
 0x164   : > { %p10_p12 = scmp.ge.s32.totalorder %s13_s18, 6   ;;  %s1567_s13 = smov %s1228_s27 }
 0x165   : > { %s1568_s14 = smov %s1140_s16  ;;  %s1569_s15 = smov %s1144_s17 }
 0x166   : > { %s1570_s16 = smov %s1573_s19  ;;  %s1571_s17 = smov %s1577_s20 }
 0x167   :  { %12 = sbr.rel (!%p10_p12) target bundleno = 4 (0x4), region = 143 }

// kernel: key_encoder_forward_pallas.17
= control target key start
LH: loop header
LB: loop body
LE: loop exit
PB: predicated region body
PF: predicated region fallthrough
CT: control target
= control target key end

     0   :  { %s1178_s12 = smov 0   ;;  %s1180_s13 = smov 0   ;;  %s1567_s0 = inlined_call_operand.vmem [shape: f32[2,432,256], index: 0, kind: input, shape index: {}]   ;;  %s1568_s1 = inlined_call_operand.vmem [shape: f32[48,432], index: 1, kind: input, shape index: {}]   ;;  %s1569_s2 = inlined_call_operand.vmem [shape: f32[48,1], index: 2, kind: input, shape index: {}]   ;;  %s1570_s3 = inlined_call_operand.vmem [shape: f32[2,48,256], index: 3, kind: output, shape index: {}]  }
   0x1   :  { %s1182_s14 = smov 0   ;;  %s1184_s15 = smov 0  }
   0x2   :  { %s1186_s16 = smov 0   ;;  %s1188_s17 = smov 0  }
   0x3   :  { %s1190_s18 = smov 0  }
   0x4 LB: > { %s22_s19 = sadd.s32 1, %s1146_s16  ;;  %s25_s20 = sadd.s32 1, %s1150_s17  ;;  %s1154_s18 = sphi %s1190_s18, %s13_s18   ;;  %s1150_s17 = sphi %s1188_s17, %s1577_s17   ;;  %s1146_s16 = sphi %s1186_s16, %s1576_s16   ;;  %s1142_s15 = sphi %s1184_s15, %s1575_s15   ;;  %s1138_s14 = sphi %s1182_s14, %s1574_s14   ;;  %s1134_s13 = sphi %s1180_s13, %s1573_s13   ;;  %s1130_s12 = sphi %s1178_s12, %s1572_s12  }
   0x5   : > { %p23_p0 = scmp.ge.s32.totalorder %s22_s19, 2  ;;  %s905_s21 = sadd.s32 4294967295, %s1154_s18  }
   0x6   : > { %p41_p1 = scmp.ne.s32.totalorder %s1134_s13, %s1130_s12  ;;  %p42_p2 = scmp.eq.s32.totalorder %s1154_s18, 0 }
   0x7   : > { %s1579_s19 = smov (%p23_p0, %s22_s19), 0  ;;  %s1581_s20 = smov (!%p23_p0, %s25_s20), %s1150_s17 }
   0x8   : > { %p27_p3 = scmp.ge.s32.totalorder %s1581_s20, 2  ;;  %p115_p4 = scmp.eq.s32.totalorder %s905_s21, 3 }
   0x9   : > { %s30_s22 = ssub.s32 %s1146_s16, %s1579_s19  ;;  %p43_p5 = por %p42_p2, %p41_p1 }
   0xa   : > { %s1583_s20 = smov (%p27_p3, %s1581_s20), 0  ;;  %p1226_p6 = por %p115_p4, %p41_p1 }
   0xb   : > { %s29_s24 = ssub.s32 %s1150_s17, %s1583_s20  ;;  %s34_s26 = sadd.s32 1, %s1134_s13 }
   0xc   : > { %s31_s25 = sor.u32 %s30_s22, %s29_s24  ;;  %p908_p8 = scmp.ge.s32.totalorder %s1154_s18, 4 }
   0xd   : > { %p32_p7 = scmp.eq.s32.totalorder %s31_s25, 0 }
   0xe   : > { %143 = sbr.rel (%p908_p8) target bundleno = 55 (0x37), region = 24 }
   0xf   : > { %s1234_s27 = scalar_select %p32_p7, %s1134_s13, %s34_s26  }
  0x15   : > { %146 = sbr.rel (!%p43_p5) target bundleno = 55 (0x37), region = 28  ;;  %s148_s28 = sand.u32 (%p43_p5), 1, %s1134_s13  }
  0x16   : > { %s1036_s29 = smul.u32 (%p43_p5), 108, %s1150_s17 }
  0x17   : > { %s1035_s30 = smul.u32 (%p43_p5), 432, %s148_s28 }
  0x18   : > { %s152_s4 = sadd.s32 (%p43_p5), %s1146_s16, %s1036_s29 }
  0x19   : > { %s909_s5 = sshll.u32 (%p43_p5), %s152_s4, 3  ;;  %s1248_s9 = scalar_lea.vmem (%p43_p5), [#allocation2], %s1035_s30 }
  0x1a   : > { %s1243_s8 = scalar_lea.vmem (%p43_p5), %s1567_s0, %s909_s5 }
  0x1b   : > { %v288_v0 = vld [vmem:[%s1243_s8] sm:$0xff] (%p43_p5)  ;;  %v290_v1 = vld [vmem:[%s1243_s8 + $0x10] sm:$0xff] (%p43_p5) }
  0x1c   : > { %v292_v2 = vld [vmem:[%s1243_s8 + $0x20] sm:$0xff]  ;;  %289 = vst [vmem:[%s1248_s9] sm:$0xff] %v288_v0  ;;  %291 = vst [vmem:[%s1248_s9 + $0x8] sm:$0xff] %v290_v1  ;;  %v294_v3 = vld [vmem:[%s1243_s8 + $0x30] sm:$0xff] }
  0x1d   : > { %293 = vst [vmem:[%s1248_s9 + $0x10] sm:$0xff] %v292_v2  ;;  %v296_v4 = vld [vmem:[%s1243_s8 + $0x40] sm:$0xff]  ;;  %v298_v5 = vld [vmem:[%s1243_s8 + $0x50] sm:$0xff]  ;;  %295 = vst [vmem:[%s1248_s9 + $0x18] sm:$0xff] %v294_v3 }
  0x1e   : > { %297 = vst [vmem:[%s1248_s9 + $0x20] sm:$0xff] %v296_v4  ;;  %299 = vst [vmem:[%s1248_s9 + $0x28] sm:$0xff] %v298_v5  ;;  %v300_v6 = vld [vmem:[%s1243_s8 + $0x60] sm:$0xff]  ;;  %v302_v7 = vld [vmem:[%s1243_s8 + $0x70] sm:$0xff] }
  0x1f   : > { %v304_v8 = vld [vmem:[%s1243_s8 + $0x80] sm:$0xff]  ;;  %301 = vst [vmem:[%s1248_s9 + $0x30] sm:$0xff] %v300_v6  ;;  %303 = vst [vmem:[%s1248_s9 + $0x38] sm:$0xff] %v302_v7  ;;  %v306_v9 = vld [vmem:[%s1243_s8 + $0x90] sm:$0xff] }
  0x20   : > { %305 = vst [vmem:[%s1248_s9 + $0x40] sm:$0xff] %v304_v8  ;;  %v308_v10 = vld [vmem:[%s1243_s8 + $0xa0] sm:$0xff]  ;;  %v310_v11 = vld [vmem:[%s1243_s8 + $0xb0] sm:$0xff]  ;;  %307 = vst [vmem:[%s1248_s9 + $0x48] sm:$0xff] %v306_v9 }
  0x21   : > { %309 = vst [vmem:[%s1248_s9 + $0x50] sm:$0xff] %v308_v10  ;;  %311 = vst [vmem:[%s1248_s9 + $0x58] sm:$0xff] %v310_v11  ;;  %v312_v12 = vld [vmem:[%s1243_s8 + $0xc0] sm:$0xff]  ;;  %v314_v13 = vld [vmem:[%s1243_s8 + $0xd0] sm:$0xff] }
  0x22   : > { %v316_v14 = vld [vmem:[%s1243_s8 + $0xe0] sm:$0xff]  ;;  %313 = vst [vmem:[%s1248_s9 + $0x60] sm:$0xff] %v312_v12  ;;  %315 = vst [vmem:[%s1248_s9 + $0x68] sm:$0xff] %v314_v13  ;;  %v318_v15 = vld [vmem:[%s1243_s8 + $0xf0] sm:$0xff] }
  0x23   : > { %317 = vst [vmem:[%s1248_s9 + $0x70] sm:$0xff] %v316_v14  ;;  %v320_v16 = vld [vmem:[%s1243_s8 + $0x100] sm:$0xff]  ;;  %v322_v17 = vld [vmem:[%s1243_s8 + $0x110] sm:$0xff]  ;;  %319 = vst [vmem:[%s1248_s9 + $0x78] sm:$0xff] %v318_v15 }
  0x24   : > { %321 = vst [vmem:[%s1248_s9 + $0x80] sm:$0xff] %v320_v16  ;;  %323 = vst [vmem:[%s1248_s9 + $0x88] sm:$0xff] %v322_v17  ;;  %v324_v18 = vld [vmem:[%s1243_s8 + $0x120] sm:$0xff]  ;;  %v326_v19 = vld [vmem:[%s1243_s8 + $0x130] sm:$0xff] }
  0x25   : > { %v328_v20 = vld [vmem:[%s1243_s8 + $0x140] sm:$0xff]  ;;  %325 = vst [vmem:[%s1248_s9 + $0x90] sm:$0xff] %v324_v18  ;;  %327 = vst [vmem:[%s1248_s9 + $0x98] sm:$0xff] %v326_v19  ;;  %v330_v21 = vld [vmem:[%s1243_s8 + $0x150] sm:$0xff] }
  0x26   : > { %329 = vst [vmem:[%s1248_s9 + $0xa0] sm:$0xff] %v328_v20  ;;  %v332_v22 = vld [vmem:[%s1243_s8 + $0x160] sm:$0xff]  ;;  %v334_v23 = vld [vmem:[%s1243_s8 + $0x170] sm:$0xff]  ;;  %331 = vst [vmem:[%s1248_s9 + $0xa8] sm:$0xff] %v330_v21 }
  0x27   : > { %333 = vst [vmem:[%s1248_s9 + $0xb0] sm:$0xff] %v332_v22  ;;  %335 = vst [vmem:[%s1248_s9 + $0xb8] sm:$0xff] %v334_v23  ;;  %v336_v24 = vld [vmem:[%s1243_s8 + $0x180] sm:$0xff]  ;;  %v338_v25 = vld [vmem:[%s1243_s8 + $0x190] sm:$0xff] }
  0x28   : > { %v340_v26 = vld [vmem:[%s1243_s8 + $0x1a0] sm:$0xff]  ;;  %337 = vst [vmem:[%s1248_s9 + $0xc0] sm:$0xff] %v336_v24  ;;  %339 = vst [vmem:[%s1248_s9 + $0xc8] sm:$0xff] %v338_v25  ;;  %v342_v27 = vld [vmem:[%s1243_s8 + $0x1b0] sm:$0xff] }
  0x29   : > { %341 = vst [vmem:[%s1248_s9 + $0xd0] sm:$0xff] %v340_v26  ;;  %v344_v28 = vld [vmem:[%s1243_s8 + $0x1c0] sm:$0xff]  ;;  %v346_v29 = vld [vmem:[%s1243_s8 + $0x1d0] sm:$0xff]  ;;  %343 = vst [vmem:[%s1248_s9 + $0xd8] sm:$0xff] %v342_v27 }
  0x2a   : > { %345 = vst [vmem:[%s1248_s9 + $0xe0] sm:$0xff] %v344_v28  ;;  %347 = vst [vmem:[%s1248_s9 + $0xe8] sm:$0xff] %v346_v29  ;;  %v348_v30 = vld [vmem:[%s1243_s8 + $0x1e0] sm:$0xff]  ;;  %v350_v31 = vld [vmem:[%s1243_s8 + $0x1f0] sm:$0xff] }
  0x2b   : > { %v352_v32 = vld [vmem:[%s1243_s8 + $0x200] sm:$0xff]  ;;  %349 = vst [vmem:[%s1248_s9 + $0xf0] sm:$0xff] %v348_v30  ;;  %351 = vst [vmem:[%s1248_s9 + $0xf8] sm:$0xff] %v350_v31  ;;  %v354_v33 = vld [vmem:[%s1243_s8 + $0x210] sm:$0xff] }
  0x2c   : > { %353 = vst [vmem:[%s1248_s9 + $0x100] sm:$0xff] %v352_v32  ;;  %v356_v34 = vld [vmem:[%s1243_s8 + $0x220] sm:$0xff]  ;;  %v358_v35 = vld [vmem:[%s1243_s8 + $0x230] sm:$0xff]  ;;  %355 = vst [vmem:[%s1248_s9 + $0x108] sm:$0xff] %v354_v33 }
  0x2d   : > { %357 = vst [vmem:[%s1248_s9 + $0x110] sm:$0xff] %v356_v34  ;;  %359 = vst [vmem:[%s1248_s9 + $0x118] sm:$0xff] %v358_v35  ;;  %v360_v36 = vld [vmem:[%s1243_s8 + $0x240] sm:$0xff]  ;;  %v362_v37 = vld [vmem:[%s1243_s8 + $0x250] sm:$0xff] }
  0x2e   : > { %v364_v38 = vld [vmem:[%s1243_s8 + $0x260] sm:$0xff]  ;;  %361 = vst [vmem:[%s1248_s9 + $0x120] sm:$0xff] %v360_v36  ;;  %363 = vst [vmem:[%s1248_s9 + $0x128] sm:$0xff] %v362_v37  ;;  %v366_v39 = vld [vmem:[%s1243_s8 + $0x270] sm:$0xff] }
  0x2f   : > { %365 = vst [vmem:[%s1248_s9 + $0x130] sm:$0xff] %v364_v38  ;;  %v368_v40 = vld [vmem:[%s1243_s8 + $0x280] sm:$0xff]  ;;  %v370_v41 = vld [vmem:[%s1243_s8 + $0x290] sm:$0xff]  ;;  %367 = vst [vmem:[%s1248_s9 + $0x138] sm:$0xff] %v366_v39 }
  0x30   : > { %369 = vst [vmem:[%s1248_s9 + $0x140] sm:$0xff] %v368_v40  ;;  %371 = vst [vmem:[%s1248_s9 + $0x148] sm:$0xff] %v370_v41  ;;  %v372_v42 = vld [vmem:[%s1243_s8 + $0x2a0] sm:$0xff]  ;;  %v374_v43 = vld [vmem:[%s1243_s8 + $0x2b0] sm:$0xff] }
  0x31   : > { %v376_v44 = vld [vmem:[%s1243_s8 + $0x2c0] sm:$0xff]  ;;  %373 = vst [vmem:[%s1248_s9 + $0x150] sm:$0xff] %v372_v42  ;;  %375 = vst [vmem:[%s1248_s9 + $0x158] sm:$0xff] %v374_v43  ;;  %v378_v45 = vld [vmem:[%s1243_s8 + $0x2d0] sm:$0xff] }
  0x32   : > { %377 = vst [vmem:[%s1248_s9 + $0x160] sm:$0xff] %v376_v44  ;;  %v380_v46 = vld [vmem:[%s1243_s8 + $0x2e0] sm:$0xff]  ;;  %v382_v47 = vld [vmem:[%s1243_s8 + $0x2f0] sm:$0xff]  ;;  %379 = vst [vmem:[%s1248_s9 + $0x168] sm:$0xff] %v378_v45 }
  0x33   : > { %381 = vst [vmem:[%s1248_s9 + $0x170] sm:$0xff] %v380_v46  ;;  %383 = vst [vmem:[%s1248_s9 + $0x178] sm:$0xff] %v382_v47  ;;  %v384_v48 = vld [vmem:[%s1243_s8 + $0x300] sm:$0xff]  ;;  %v386_v49 = vld [vmem:[%s1243_s8 + $0x310] sm:$0xff] }
  0x34   : > { %v388_v50 = vld [vmem:[%s1243_s8 + $0x320] sm:$0xff]  ;;  %385 = vst [vmem:[%s1248_s9 + $0x180] sm:$0xff] %v384_v48  ;;  %387 = vst [vmem:[%s1248_s9 + $0x188] sm:$0xff] %v386_v49  ;;  %v390_v51 = vld [vmem:[%s1243_s8 + $0x330] sm:$0xff] }
  0x35   : > { %389 = vst [vmem:[%s1248_s9 + $0x190] sm:$0xff] %v388_v50  ;;  %v392_v52 = vld [vmem:[%s1243_s8 + $0x340] sm:$0xff]  ;;  %v394_v53 = vld [vmem:[%s1243_s8 + $0x350] sm:$0xff]  ;;  %391 = vst [vmem:[%s1248_s9 + $0x198] sm:$0xff] %v390_v51 }
  0x36   : > { %393 = vst [vmem:[%s1248_s9 + $0x1a0] sm:$0xff] %v392_v52  ;;  %395 = vst [vmem:[%s1248_s9 + $0x1a8] sm:$0xff] %v394_v53 }
  0x37 PF: > { %p910_p9 = scmp.ge.s32.totalorder %s1154_s18, 1  ;;  %p400_p10 = scmp.lt.s32.totalorder %s1154_s18, 5 }
  0x39   : > { %p401_p11 = pnand %p910_p9, %p400_p10 }
  0x3a   : > { %s407_s10 = sand.u32 (!%p401_p11), 1, %s1130_s12   ;;  %v430_v54 = vld [vmem:[%s1568_s1 + $0x8] sm:$0xff] (!%p401_p11)  ;;  %vm543_vm0 = vcmask (!%p401_p11), 392192   ;;  %v1156_v55 = vmov (!%p401_p11), 0.0|0.0   ;;  %v432_v56 = vld [vmem:[%s1568_s1 + $0x18] sm:$0xff] (!%p401_p11)  ;;  %v1157_v57 = vmov (!%p401_p11), 0  }
  0x3b   : > { %404 = sbr.rel (%p401_p11) target bundleno = 357 (0x165), region = 66  ;;  %1002 = vmatprep.subr.bf16.mxu1 (!%p401_p11), %v1156_v55  ;;  %626 = vmatprep.mubr.f32.mxu0 (!%p401_p11), %v430_v54 }
  0x3c   : > { %s1037_s22 = smul.u32 (!%p401_p11), 432, %s407_s10  ;;  %1098 = vset.pattern.permute.xlu0 (!%p401_p11), %v1157_v57  ;;  %1099 = vset.pattern.permute.xlu1 (!%p401_p11), %v1157_v57 }
  0x3d   : > { %911 = vmatprep.mubr.msk.f32.mxu1 (!%p401_p11), %vm543_vm0, %v432_v56 }
  0x3e   : > { %s1368_s26 = scalar_lea.vmem (!%p401_p11), [#allocation2], %s1037_s22 }
  0x3f   : > { %v469_v58 = vld [vmem:[%s1368_s26 + $0x80] sm:$0xff] (!%p401_p11)  ;;  %v470_v59 = vld [vmem:[%s1368_s26 + $0x88] sm:$0xff] (!%p401_p11)  ;;  %v471_v3 = vld [vmem:[%s1368_s26 + $0x90] sm:$0xff] (!%p401_p11) }
  0x40   : > { %v485_v60 = vld [vmem:[%s1368_s26 + $0x100] sm:$0xff] (!%p401_p11)  ;;  %v970_v61 = vpack.c.bf16 (!%p401_p11), %v470_v59, %v469_v58  ;;  %v486_v62 = vld [vmem:[%s1368_s26 + $0x108] sm:$0xff] (!%p401_p11)  ;;  %v472_v4 = vld [vmem:[%s1368_s26 + $0x98] sm:$0xff] (!%p401_p11) }
  0x41   : > { %v453_v63 = vld [vmem:[%s1368_s26] sm:$0xff] (!%p401_p11)  ;;  %v454_v0 = vld [vmem:[%s1368_s26 + $0x8] sm:$0xff] (!%p401_p11)  ;;  %v1003_v1 = vpack.c.bf16 (!%p401_p11), %v486_v62, %v485_v60  ;;  %v487_v5 = vld [vmem:[%s1368_s26 + $0x110] sm:$0xff] (!%p401_p11)  ;;  %v974_v6 = vpack.c.bf16 (!%p401_p11), %v472_v4, %v471_v3 }
  0x42   : > { %v972_v2 = vpack.c.bf16 %v454_v0, %v453_v63  ;;  %971 = vmatprep.subr.bf16.mxu0 %v970_v61  ;;  %v488_v7 = vld [vmem:[%s1368_s26 + $0x118] sm:$0xff]  ;;  %v455_v8 = vld [vmem:[%s1368_s26 + $0x10] sm:$0xff]  ;;  %v473_v12 = vld [vmem:[%s1368_s26 + $0xa0] sm:$0xff]  ;;  %s1039_s12 = smul.u32 (%p1226_p6), 12, %s1142_s15 }
  0x43   : > { %v456_v9 = vld [vmem:[%s1368_s26 + $0x18] sm:$0xff]  ;;  %1004 = vmatpush1.bf16.msra.mxu1 %v1003_v1  ;;  %v1006_v10 = vpack.c.bf16 %v488_v7, %v487_v5  ;;  %v474_v13 = vld [vmem:[%s1368_s26 + $0xa8] sm:$0xff]  ;;  %v489_v14 = vld [vmem:[%s1368_s26 + $0x120] sm:$0xff] }
  0x44   : > { %973 = vmatpush3.bf16.msra.mxu0 %v972_v2  ;;  %v976_v11 = vpack.c.bf16 %v456_v9, %v455_v8  ;;  %1005 = vmatprep.subr.bf16.mxu1 %v1156_v55  ;;  %v978_v15 = vpack.c.bf16 %v474_v13, %v473_v12  ;;  %v490_v16 = vld [vmem:[%s1368_s26 + $0x128] sm:$0xff]  ;;  %v457_v17 = vld [vmem:[%s1368_s26 + $0x20] sm:$0xff]  ;;  %v475_v19 = vld [vmem:[%s1368_s26 + $0xb0] sm:$0xff] }
  0x45   : > { %975 = vmatprep.subr.bf16.mxu0 %v974_v6  ;;  %v458_v18 = vld [vmem:[%s1368_s26 + $0x28] sm:$0xff]  ;;  %v476_v20 = vld [vmem:[%s1368_s26 + $0xb8] sm:$0xff]  ;;  %v1009_v21 = vpack.c.bf16 %v490_v16, %v489_v14  ;;  %v491_v23 = vld [vmem:[%s1368_s26 + $0x130] sm:$0xff] }
  0x46   : > { %v980_v22 = vpack.c.bf16 %v458_v18, %v457_v17  ;;  %v982_v24 = vpack.c.bf16 %v476_v20, %v475_v19  ;;  %v492_v25 = vld [vmem:[%s1368_s26 + $0x138] sm:$0xff]  ;;  %v459_v26 = vld [vmem:[%s1368_s26 + $0x30] sm:$0xff]  ;;  %v477_v28 = vld [vmem:[%s1368_s26 + $0xc0] sm:$0xff] }
  0x47   : > { %1007 = vmatpush1.bf16.msra.mxu1 %v1006_v10  ;;  %v460_v27 = vld [vmem:[%s1368_s26 + $0x38] sm:$0xff]  ;;  %v478_v29 = vld [vmem:[%s1368_s26 + $0xc8] sm:$0xff]  ;;  %v1012_v30 = vpack.c.bf16 %v492_v25, %v491_v23  ;;  %v493_v32 = vld [vmem:[%s1368_s26 + $0x140] sm:$0xff] }
  0x48   : > { %977 = vmatpush3.bf16.msra.mxu0 %v976_v11  ;;  %1008 = vmatprep.subr.bf16.mxu1 %v1156_v55  ;;  %v984_v31 = vpack.c.bf16 %v460_v27, %v459_v26  ;;  %v986_v33 = vpack.c.bf16 %v478_v29, %v477_v28  ;;  %v494_v34 = vld [vmem:[%s1368_s26 + $0x148] sm:$0xff]  ;;  %v461_v35 = vld [vmem:[%s1368_s26 + $0x40] sm:$0xff]  ;;  %v479_v37 = vld [vmem:[%s1368_s26 + $0xd0] sm:$0xff] }
  0x49   : > { %979 = vmatprep.subr.bf16.mxu0 %v978_v15  ;;  %v462_v36 = vld [vmem:[%s1368_s26 + $0x48] sm:$0xff]  ;;  %v480_v38 = vld [vmem:[%s1368_s26 + $0xd8] sm:$0xff]  ;;  %v1015_v39 = vpack.c.bf16 %v494_v34, %v493_v32  ;;  %v495_v41 = vld [vmem:[%s1368_s26 + $0x150] sm:$0xff] }
  0x4a   : > { %v988_v40 = vpack.c.bf16 %v462_v36, %v461_v35  ;;  %v990_v42 = vpack.c.bf16 %v480_v38, %v479_v37  ;;  %v496_v43 = vld [vmem:[%s1368_s26 + $0x158] sm:$0xff]  ;;  %v463_v44 = vld [vmem:[%s1368_s26 + $0x50] sm:$0xff]  ;;  %v481_v46 = vld [vmem:[%s1368_s26 + $0xe0] sm:$0xff] }
  0x4b   : > { %1010 = vmatpush1.bf16.msra.mxu1 %v1009_v21  ;;  %v464_v45 = vld [vmem:[%s1368_s26 + $0x58] sm:$0xff]  ;;  %v482_v47 = vld [vmem:[%s1368_s26 + $0xe8] sm:$0xff]  ;;  %v1018_v48 = vpack.c.bf16 %v496_v43, %v495_v41  ;;  %v497_v50 = vld [vmem:[%s1368_s26 + $0x160] sm:$0xff] }
  0x4c   : > { %981 = vmatpush3.bf16.msra.mxu0 %v980_v22  ;;  %1011 = vmatprep.subr.bf16.mxu1 %v1156_v55  ;;  %v992_v49 = vpack.c.bf16 %v464_v45, %v463_v44  ;;  %v498_v51 = vld [vmem:[%s1368_s26 + $0x168] sm:$0xff]  ;;  %v994_v52 = vpack.c.bf16 %v482_v47, %v481_v46  ;;  %v465_v53 = vld [vmem:[%s1368_s26 + $0x60] sm:$0xff]  ;;  %v483_v56 = vld [vmem:[%s1368_s26 + $0xf0] sm:$0xff] }
  0x4d   : > { %983 = vmatprep.subr.bf16.mxu0 %v982_v24  ;;  %v466_v54 = vld [vmem:[%s1368_s26 + $0x68] sm:$0xff]  ;;  %v484_v57 = vld [vmem:[%s1368_s26 + $0xf8] sm:$0xff]  ;;  %v507_v58 = vld [vmem:[%s1569_s2] sm:$0xff]  ;;  %v1021_v60 = vpack.c.bf16 %v498_v51, %v497_v50 }
  0x4e   : > { %v509_v59 = vld [vmem:[%s1569_s2 + $0x10] sm:$0xff]  ;;  %515 = vperm.xlu0 %1098, %v507_v58   ;;  %v996_v61 = vpack.c.bf16 %v466_v54, %v465_v53  ;;  %v508_v63 = vld [vmem:[%s1569_s2 + $0x8] sm:$0xff]  ;;  %v510_v0 = vld [vmem:[%s1569_s2 + $0x18] sm:$0xff]  ;;  %v998_v1 = vpack.c.bf16 %v484_v57, %v483_v56 }
  0x4f   : > { %1013 = vmatpush1.bf16.msra.mxu1 %v1012_v30  ;;  %525 = vperm.xlu1 %1099, %v509_v59   ;;  %v499_v62 = vld [vmem:[%s1368_s26 + $0x170] sm:$0xff]  ;;  %v500_v2 = vld [vmem:[%s1368_s26 + $0x178] sm:$0xff]  ;;  %v501_v9 = vld [vmem:[%s1368_s26 + $0x180] sm:$0xff] }
  0x50   : > { %985 = vmatpush3.bf16.msra.mxu0 %v984_v31  ;;  %1014 = vmatprep.subr.bf16.mxu1 %v1156_v55  ;;  %v467_v3 = vld [vmem:[%s1368_s26 + $0x70] sm:$0xff]  ;;  %v468_v4 = vld [vmem:[%s1368_s26 + $0x78] sm:$0xff]  ;;  %v1024_v5 = vpack.c.bf16 %v500_v2, %v499_v62  ;;  %v502_v10 = vld [vmem:[%s1368_s26 + $0x188] sm:$0xff] }
  0x51   : > { %987 = vmatprep.subr.bf16.mxu0 %v986_v33  ;;  %v1000_v6 = vpack.c.bf16 %v468_v4, %v467_v3  ;;  %v512_v7 = vld [vmem:[%s1569_s2 + $0x28] sm:$0xff]  ;;  %v511_v8 = vld [vmem:[%s1569_s2 + $0x20] sm:$0xff]  ;;  %v1027_v12 = vpack.c.bf16 %v502_v10, %v501_v9  ;;  %v431_v24 = vld [vmem:[%s1568_s1 + $0x10] sm:$0xff] }
  0x52   : > { %520 = vperm.xlu0 %1098, %v508_v63   ;;  %v429_v11 = vld [vmem:[%s1568_s1] sm:$0xff]  ;;  %v434_v13 = vld [vmem:[%s1568_s1 + $0x28] sm:$0xff]  ;;  %v436_v26 = vld [vmem:[%s1568_s1 + $0x38] sm:$0xff] }
  0x53   : > { %1016 = vmatpush1.bf16.msra.mxu1 %v1015_v39  ;;  %530 = vperm.xlu1 %1099, %v510_v0   ;;  %v503_v14 = vld [vmem:[%s1368_s26 + $0x190] sm:$0xff]  ;;  %v504_v15 = vld [vmem:[%s1368_s26 + $0x198] sm:$0xff]  ;;  %v505_v19 = vld [vmem:[%s1368_s26 + $0x1a0] sm:$0xff] }
  0x54   : > { %989 = vmatpush3.bf16.msra.mxu0 %v988_v40  ;;  %1017 = vmatprep.subr.bf16.mxu1 %v1156_v55  ;;  %v433_v16 = vld [vmem:[%s1568_s1 + $0x20] sm:$0xff]  ;;  %v1030_v17 = vpack.c.bf16 %v504_v15, %v503_v14  ;;  %v438_v18 = vld [vmem:[%s1568_s1 + $0x48] sm:$0xff]  ;;  %v435_v27 = vld [vmem:[%s1568_s1 + $0x30] sm:$0xff] }
  0x55   : > { %991 = vmatprep.subr.bf16.mxu0 %v990_v42  ;;  %v506_v20 = vld [vmem:[%s1368_s26 + $0x1a8] sm:$0xff]  ;;  %v437_v21 = vld [vmem:[%s1568_s1 + $0x40] sm:$0xff]  ;;  %v439_v31 = vld [vmem:[%s1568_s1 + $0x50] sm:$0xff]  ;;  %s1038_s26 = smul.u32 48, %s407_s10  ;;  %s778_s10 = sadd.s32 (%p1226_p6), %s1138_s14, %s1039_s12 }
  0x56   : > { %535 = vperm.xlu0 %1098, %v511_v8   ;;  %v1033_v22 = vpack.c.bf16 %v506_v20, %v505_v19  ;;  %v442_v23 = vld [vmem:[%s1568_s1 + $0x68] sm:$0xff]  ;;  %v441_v25 = vld [vmem:[%s1568_s1 + $0x60] sm:$0xff]  ;;  %v440_v29 = vld [vmem:[%s1568_s1 + $0x58] sm:$0xff]  ;;  %s917_s25 = sshll.u32 (%p1226_p6), %s778_s10, 3 }
  0x57   : > { %1019 = vmatpush1.bf16.msra.mxu1 %v1018_v48  ;;  %540 = vperm.xlu1 %1099, %v512_v7   ;;  %v445_v28 = vld [vmem:[%s1568_s1 + $0x80] sm:$0xff]  ;;  %v450_v30 = vld [vmem:[%s1568_s1 + $0xa8] sm:$0xff]  ;;  %v444_v33 = vld [vmem:[%s1568_s1 + $0x78] sm:$0xff]  ;;  %s1525_s24 = scalar_lea.vmem [#allocation3], %s1038_s26  ;;  %s780_s29 = scalar_lea.vmem (%p1226_p6), %s1570_s3, %s917_s25 }
  0x58   : > { %993 = vmatpush3.bf16.msra.mxu0 %v992_v49  ;;  %1020 = vmatprep.subr.bf16.mxu1 %v1156_v55  ;;  %v449_v32 = vld [vmem:[%s1568_s1 + $0xa0] sm:$0xff]  ;;  %v443_v34 = vld [vmem:[%s1568_s1 + $0x70] sm:$0xff]  ;;  %v448_v35 = vld [vmem:[%s1568_s1 + $0x98] sm:$0xff] }
  0x59   : > { %995 = vmatprep.subr.bf16.mxu0 %v994_v52  ;;  %v447_v36 = vld [vmem:[%s1568_s1 + $0x90] sm:$0xff]  ;;  %v452_v37 = vld [vmem:[%s1568_s1 + $0xb8] sm:$0xff] }
  0x5a   : > { %v451_v38 = vld [vmem:[%s1568_s1 + $0xb0] sm:$0xff] }
  0x5b   : > { %1022 = vmatpush1.bf16.msra.mxu1 %v1021_v60 }
  0x5c   : > { %997 = vmatpush3.bf16.msra.mxu0 %v996_v61  ;;  %1023 = vmatprep.subr.bf16.mxu1 %v1156_v55 }
  0x5d   : > { %999 = vmatprep.subr.bf16.mxu0 %v998_v1 }
  0x5f   : > { %1025 = vmatpush1.bf16.msra.mxu1 %v1024_v5 }
  0x60   : > { %1001 = vmatpush3.bf16.msra.mxu0 %v1000_v6  ;;  %1026 = vmatprep.subr.bf16.mxu1 %v1156_v55 }
  0x63   : > { %627 = vmatmul.mubr.f32.vlgmr.msra.gmra.mrb[0].mxu0 %v429_v11  ;;  %1028 = vmatpush1.bf16.msra.mxu1 %v1027_v12 }
  0x64   : > { %631 = vmatprep.mubr.f32.mxu0 %v434_v13  ;;  %1029 = vmatprep.subr.bf16.mxu1 %v1156_v55 }
  0x67   : > { %632 = vmatmul.mubr.f32.gmra.mrb[2].mxu0 %v433_v16  ;;  %1031 = vmatpush1.bf16.msra.mxu1 %v1030_v17 }
  0x68   : > { %636 = vmatprep.mubr.f32.mxu0 %v438_v18  ;;  %1032 = vmatprep.subr.bf16.mxu1 %v1156_v55  ;;  %v446_v55 = vld [vmem:[%s1568_s1 + $0x88] sm:$0xff] }
  0x6b   : > { %637 = vmatmul.mubr.f32.gmra.mrb[4].mxu0 %v437_v21  ;;  %1034 = vmatpush1.bf16.msra.mxu1 %v1033_v22 }
  0x6c   : > { %641 = vmatprep.mubr.f32.mxu0 %v442_v23 }
  0x6e   : > { %722 = vmatmul.mubr.f32.vlgmr.msra.gmra.mrb[0].mxu1 %v431_v24 }
  0x6f   : > { %642 = vmatmul.mubr.f32.gmra.mrb[6].mxu0 %v441_v25  ;;  %912 = vmatprep.mubr.msk.f32.mxu1 %vm543_vm0, %v436_v26 }
  0x70   : > { %646 = vmatprep.mubr.f32.mxu0 %v446_v55 }
  0x72   : > { %727 = vmatmul.mubr.f32.gmra.mrb[2].mxu1 %v435_v27 }
  0x73   : > { %647 = vmatmul.mubr.f32.gmra.mrb[8].mxu0 %v445_v28  ;;  %913 = vmatprep.mubr.msk.f32.mxu1 %vm543_vm0, %v440_v29 }
  0x74   : > { %651 = vmatprep.mubr.f32.mxu0 %v450_v30 }
  0x76   : > { %732 = vmatmul.mubr.f32.gmra.mrb[4].mxu1 %v439_v31 }
  0x77   : > { %652 = vmatmul.mubr.f32.gmra.mrb[10].mxu0 %v449_v32  ;;  %914 = vmatprep.mubr.msk.f32.mxu1 %vm543_vm0, %v444_v33 }
  0x7a   : > { %737 = vmatmul.mubr.f32.gmra.mrb[6].mxu1 %v443_v34 }
  0x7b   : > { %915 = vmatprep.mubr.msk.f32.mxu1 %vm543_vm0, %v448_v35 }
  0x7e   : > { %742 = vmatmul.mubr.f32.gmra.mrb[8].mxu1 %v447_v36 }
  0x7f   : > { %916 = vmatprep.mubr.msk.f32.mxu1 %vm543_vm0, %v452_v37 }
  0x82   : > { %747 = vmatmul.mubr.f32.gmra.mrb[10].mxu1 %v451_v38 }
  0xcd   : > { %v516_v42 = vpop.permute.xlu0 %515 }
  0xce   : > { %v526_v51 = vpop.permute.xlu1 %525 }
  0xd1   : > { %v521_v49 = vpop.permute.xlu0 %520 }
  0xd2   : > { %v531_v6 = vpop.permute.xlu1 %530 }
  0xd5   : > { %v536_v16 = vpop.permute.xlu0 %535 }
  0xd6   : > { %v541_v55 = vpop.permute.xlu1 %540 }
 0x136   : > { %v952_v39 = vpop.f32.mrb[0].mxu0 }
 0x137   : > { %v953_v40 = vpop.f32.mrb[1].mxu0 }
 0x138   : > { %v954_v41 = vadd.f32 %v953_v40, %v952_v39 }
 0x13a   : > { %v955_v43 = vpop.f32.mrb[2].mxu0  ;;  %v629_v47 = vadd.f32 %v954_v41, %v516_v42 }
 0x13b   : > { %v956_v44 = vpop.f32.mrb[3].mxu0 }
 0x13c   : > { %v957_v45 = vadd.f32 %v956_v44, %v955_v43 }
 0x13e   : > { %v958_v46 = vpop.f32.mrb[4].mxu0  ;;  %v634_v56 = vadd.f32 %v957_v45, %v521_v49 }
 0x13f   : > { %v959_v48 = vpop.f32.mrb[5].mxu0 }
 0x140   : > { %v960_v50 = vadd.f32 %v959_v48, %v958_v46 }
 0x141   : > { %v723_v52 = vpop.f32.mrb[0].mxu1 }
 0x142   : > { %v961_v53 = vpop.f32.mrb[6].mxu0  ;;  %v724_v54 = vadd.f32 %v723_v52, %v629_v47  ;;  %v725_v57 = vpop.f32.mrb[1].mxu1  ;;  %v639_v3 = vadd.f32 %v960_v50, %v526_v51 }
 0x143   : > { %v962_v58 = vpop.f32.mrb[7].mxu0 }
 0x144   : > { %v963_v59 = vadd.f32 %v962_v58, %v961_v53  ;;  %v752_v60 = vmul.f32 0.1, %v724_v54 }
 0x145   : > { %v728_v61 = vpop.f32.mrb[2].mxu1 }
 0x146   : > { %v964_v62 = vpop.f32.mrb[8].mxu0  ;;  %v758_v63 = vmax.f32 %v724_v54, %v752_v60  ;;  %v729_v0 = vadd.f32 %v728_v61, %v634_v56  ;;  %v730_v1 = vpop.f32.mrb[3].mxu1  ;;  %v644_v13 = vadd.f32 %v963_v59, %v531_v6 }
 0x147   : > { %v965_v2 = vpop.f32.mrb[9].mxu0 }
 0x148   : > { %v966_v4 = vadd.f32 %v965_v2, %v964_v62  ;;  %764 = vst [vmem:[%s1525_s24] sm:$0xff] %v758_v63  ;;  %v753_v5 = vmul.f32 0.1, %v729_v0 }
 0x149   : > { %v733_v7 = vpop.f32.mrb[4].mxu1 }
 0x14a   : > { %v967_v8 = vpop.f32.mrb[10].mxu0  ;;  %v759_v9 = vmax.f32 %v729_v0, %v753_v5  ;;  %v734_v10 = vadd.f32 %v733_v7, %v639_v3  ;;  %v735_v11 = vpop.f32.mrb[5].mxu1  ;;  %v649_v21 = vadd.f32 %v966_v4, %v536_v16 }
 0x14b   : > { %v968_v12 = vpop.f32.mrb[11].mxu0 }
 0x14c   : > { %v969_v14 = vadd.f32 %v968_v12, %v967_v8  ;;  %765 = vst [vmem:[%s1525_s24 + $0x8] sm:$0xff] %v759_v9  ;;  %v754_v15 = vmul.f32 0.1, %v734_v10 }
 0x14d   : > { %v738_v17 = vpop.f32.mrb[6].mxu1 }
 0x14e   : > { %v760_v18 = vmax.f32 %v734_v10, %v754_v15  ;;  %v739_v19 = vadd.f32 %v738_v17, %v644_v13  ;;  %v740_v20 = vpop.f32.mrb[7].mxu1  ;;  %v654_v28 = vadd.f32 %v969_v14, %v541_v55 }
 0x14f   : > { %v818_v35 = vld [vmem:[%s1525_s24] sm:$0xff] (%p1226_p6) }
 0x150   : > { %766 = vst [vmem:[%s1525_s24 + $0x10] sm:$0xff] %v760_v18  ;;  %v755_v22 = vmul.f32 0.1, %v739_v19  ;;  %819 = vst [vmem:[%s780_s29] sm:$0xff] (%p1226_p6), %v818_v35 }
 0x151   : > { %v743_v23 = vpop.f32.mrb[8].mxu1 }
 0x152   : > { %v761_v24 = vmax.f32 %v739_v19, %v755_v22  ;;  %v744_v25 = vadd.f32 %v743_v23, %v649_v21  ;;  %v745_v26 = vpop.f32.mrb[9].mxu1 }
 0x153   : > { %v820_v36 = vld [vmem:[%s1525_s24 + $0x8] sm:$0xff] (%p1226_p6) }
 0x154   : > { %767 = vst [vmem:[%s1525_s24 + $0x18] sm:$0xff] %v761_v24  ;;  %v756_v27 = vmul.f32 0.1, %v744_v25  ;;  %821 = vst [vmem:[%s780_s29 + $0x10] sm:$0xff] (%p1226_p6), %v820_v36 }
 0x155   : > { %v748_v29 = vpop.f32.mrb[10].mxu1 }
 0x156   : > { %v762_v30 = vmax.f32 %v744_v25, %v756_v27  ;;  %v749_v31 = vadd.f32 %v748_v29, %v654_v28  ;;  %v750_v32 = vpop.f32.mrb[11].mxu1  ;;  %776 = sbr.rel (!%p1226_p6) target bundleno = 357 (0x165), region = 74 }
 0x157   : > { %v822_v37 = vld [vmem:[%s1525_s24 + $0x10] sm:$0xff] (%p1226_p6) }
 0x158   : > { %768 = vst [vmem:[%s1525_s24 + $0x20] sm:$0xff] %v762_v30  ;;  %v757_v33 = vmul.f32 0.1, %v749_v31  ;;  %823 = vst [vmem:[%s780_s29 + $0x20] sm:$0xff] (%p1226_p6), %v822_v37 }
 0x15a   : > { %v763_v34 = vmax.f32 %v749_v31, %v757_v33 }
 0x15b   : > { %v824_v38 = vld [vmem:[%s1525_s24 + $0x18] sm:$0xff] (%p1226_p6) }
 0x15c   : > { %769 = vst [vmem:[%s1525_s24 + $0x28] sm:$0xff] %v763_v34  ;;  %825 = vst [vmem:[%s780_s29 + $0x30] sm:$0xff] (%p1226_p6), %v824_v38 }
 0x15f   : > { %v826_v39 = vld [vmem:[%s1525_s24 + $0x20] sm:$0xff] }
 0x160   : > { %827 = vst [vmem:[%s780_s29 + $0x40] sm:$0xff] %v826_v39 }
 0x163   : > { %v828_v40 = vld [vmem:[%s1525_s24 + $0x28] sm:$0xff] }
 0x164   : > { %829 = vst [vmem:[%s780_s29 + $0x50] sm:$0xff] %v828_v40 }
 0x165 PF: > { %s13_s18 = sadd.s32 1, %s1154_s18   ;;  %s1572_s12 = smov %s1134_s13 }
 0x166   : > { %p10_p12 = scmp.ge.s32.totalorder %s13_s18, 6   ;;  %s1573_s13 = smov %s1234_s27 }
 0x167   : > { %s1574_s14 = smov %s1146_s16  ;;  %s1575_s15 = smov %s1150_s17 }
 0x168   : > { %s1576_s16 = smov %s1579_s19  ;;  %s1577_s17 = smov %s1583_s20 }
 0x169   :  { %12 = sbr.rel (!%p10_p12) target bundleno = 4 (0x4), region = 143 }

// kernel: key_encoder_forward_pallas.19
= control target key start
LH: loop header
LB: loop body
LE: loop exit
PB: predicated region body
PF: predicated region fallthrough
CT: control target
= control target key end

     0   :  { %s1311_s15 = smov 0   ;;  %s1313_s16 = smov 0   ;;  %s1722_s0 = inlined_call_operand.vmem [shape: f32[2,432,256], index: 0, kind: input, shape index: {}]   ;;  %s1723_s1 = inlined_call_operand.vmem [shape: f32[48,432], index: 1, kind: input, shape index: {}]   ;;  %s1724_s2 = inlined_call_operand.vmem [shape: f32[48,1], index: 2, kind: input, shape index: {}]   ;;  %s1725_s3 = inlined_call_operand.vmem [shape: f32[2,48,256], index: 3, kind: input, shape index: {}]   ;;  %s1726_s4 = inlined_call_operand.vmem [shape: f32[2,48,256], index: 4, kind: output, shape index: {}]  }
   0x1   :  { %s1315_s17 = smov 0   ;;  %s1317_s18 = smov 0  }
   0x2   :  { %s1319_s19 = smov 0   ;;  %s1321_s20 = smov 0  }
   0x3   :  { %s1323_s21 = smov 0  }
   0x4 LB: > { %s23_s22 = sadd.s32 1, %s1274_s19  ;;  %s26_s23 = sadd.s32 1, %s1278_s20  ;;  %s1282_s21 = sphi %s1323_s21, %s14_s21   ;;  %s1278_s20 = sphi %s1321_s20, %s1734_s20   ;;  %s1274_s19 = sphi %s1319_s19, %s1733_s19   ;;  %s1270_s18 = sphi %s1317_s18, %s1732_s18   ;;  %s1266_s17 = sphi %s1315_s17, %s1731_s17   ;;  %s1262_s16 = sphi %s1313_s16, %s1730_s16   ;;  %s1258_s15 = sphi %s1311_s15, %s1729_s15  }
   0x5   : > { %p24_p0 = scmp.ge.s32.totalorder %s23_s22, 2  ;;  %s1030_s24 = sadd.s32 4294967295, %s1282_s21  }
   0x6   : > { %p42_p1 = scmp.ne.s32.totalorder %s1262_s16, %s1258_s15  ;;  %p43_p2 = scmp.eq.s32.totalorder %s1282_s21, 0 }
   0x7   : > { %s1736_s22 = smov (%p24_p0, %s23_s22), 0  ;;  %s1738_s23 = smov (!%p24_p0, %s26_s23), %s1278_s20 }
   0x8   : > { %p28_p3 = scmp.ge.s32.totalorder %s1738_s23, 2  ;;  %p144_p4 = scmp.eq.s32.totalorder %s1030_s24, 3 }
   0x9   : > { %s31_s25 = ssub.s32 %s1274_s19, %s1736_s22  ;;  %p1357_p5 = por %p43_p2, %p42_p1 }
   0xa   : > { %s1740_s23 = smov (%p28_p3, %s1738_s23), 0  ;;  %p1363_p6 = por %p144_p4, %p42_p1 }
   0xb   : > { %s30_s28 = ssub.s32 %s1278_s20, %s1740_s23  ;;  %s35_s30 = sadd.s32 1, %s1262_s16 }
   0xc   : > { %s32_s29 = sor.u32 %s31_s25, %s30_s28  ;;  %p1033_p8 = scmp.ge.s32.totalorder %s1282_s21, 4 }
   0xd   : > { %p33_p7 = scmp.eq.s32.totalorder %s32_s29, 0 }
   0xe   : > { %172 = sbr.rel (%p1033_p8) target bundleno = 65 (0x41), region = 24 }
   0xf   : > { %s1371_s5 = scalar_select %p33_p7, %s1262_s16, %s35_s30  }
  0x15   : > { %175 = sbr.rel (!%p1357_p5) target bundleno = 55 (0x37), region = 28  ;;  %s177_s6 = sand.u32 (%p1357_p5), 1, %s1262_s16  }
  0x16   : > { %s1162_s7 = smul.u32 (%p1357_p5), 108, %s1278_s20 }
  0x17   : > { %s1161_s8 = smul.u32 (%p1357_p5), 432, %s177_s6 }
  0x18   : > { %s181_s9 = sadd.s32 (%p1357_p5), %s1274_s19, %s1162_s7 }
  0x19   : > { %s1034_s10 = sshll.u32 (%p1357_p5), %s181_s9, 3  ;;  %s1387_s14 = scalar_lea.vmem (%p1357_p5), [#allocation2], %s1161_s8 }
  0x1a   : > { %s1382_s13 = scalar_lea.vmem (%p1357_p5), %s1722_s0, %s1034_s10 }
  0x1b   : > { %v317_v0 = vld [vmem:[%s1382_s13] sm:$0xff] (%p1357_p5)  ;;  %v319_v1 = vld [vmem:[%s1382_s13 + $0x10] sm:$0xff] (%p1357_p5) }
  0x1c   : > { %v321_v2 = vld [vmem:[%s1382_s13 + $0x20] sm:$0xff]  ;;  %318 = vst [vmem:[%s1387_s14] sm:$0xff] %v317_v0  ;;  %320 = vst [vmem:[%s1387_s14 + $0x8] sm:$0xff] %v319_v1  ;;  %v323_v3 = vld [vmem:[%s1382_s13 + $0x30] sm:$0xff] }
  0x1d   : > { %322 = vst [vmem:[%s1387_s14 + $0x10] sm:$0xff] %v321_v2  ;;  %v325_v4 = vld [vmem:[%s1382_s13 + $0x40] sm:$0xff]  ;;  %v327_v5 = vld [vmem:[%s1382_s13 + $0x50] sm:$0xff]  ;;  %324 = vst [vmem:[%s1387_s14 + $0x18] sm:$0xff] %v323_v3 }
  0x1e   : > { %326 = vst [vmem:[%s1387_s14 + $0x20] sm:$0xff] %v325_v4  ;;  %328 = vst [vmem:[%s1387_s14 + $0x28] sm:$0xff] %v327_v5  ;;  %v329_v6 = vld [vmem:[%s1382_s13 + $0x60] sm:$0xff]  ;;  %v331_v7 = vld [vmem:[%s1382_s13 + $0x70] sm:$0xff] }
  0x1f   : > { %v333_v8 = vld [vmem:[%s1382_s13 + $0x80] sm:$0xff]  ;;  %330 = vst [vmem:[%s1387_s14 + $0x30] sm:$0xff] %v329_v6  ;;  %332 = vst [vmem:[%s1387_s14 + $0x38] sm:$0xff] %v331_v7  ;;  %v335_v9 = vld [vmem:[%s1382_s13 + $0x90] sm:$0xff] }
  0x20   : > { %334 = vst [vmem:[%s1387_s14 + $0x40] sm:$0xff] %v333_v8  ;;  %v337_v10 = vld [vmem:[%s1382_s13 + $0xa0] sm:$0xff]  ;;  %v339_v11 = vld [vmem:[%s1382_s13 + $0xb0] sm:$0xff]  ;;  %336 = vst [vmem:[%s1387_s14 + $0x48] sm:$0xff] %v335_v9 }
  0x21   : > { %338 = vst [vmem:[%s1387_s14 + $0x50] sm:$0xff] %v337_v10  ;;  %340 = vst [vmem:[%s1387_s14 + $0x58] sm:$0xff] %v339_v11  ;;  %v341_v12 = vld [vmem:[%s1382_s13 + $0xc0] sm:$0xff]  ;;  %v343_v13 = vld [vmem:[%s1382_s13 + $0xd0] sm:$0xff] }
  0x22   : > { %v345_v14 = vld [vmem:[%s1382_s13 + $0xe0] sm:$0xff]  ;;  %342 = vst [vmem:[%s1387_s14 + $0x60] sm:$0xff] %v341_v12  ;;  %344 = vst [vmem:[%s1387_s14 + $0x68] sm:$0xff] %v343_v13  ;;  %v347_v15 = vld [vmem:[%s1382_s13 + $0xf0] sm:$0xff] }
  0x23   : > { %346 = vst [vmem:[%s1387_s14 + $0x70] sm:$0xff] %v345_v14  ;;  %v349_v16 = vld [vmem:[%s1382_s13 + $0x100] sm:$0xff]  ;;  %v351_v17 = vld [vmem:[%s1382_s13 + $0x110] sm:$0xff]  ;;  %348 = vst [vmem:[%s1387_s14 + $0x78] sm:$0xff] %v347_v15 }
  0x24   : > { %350 = vst [vmem:[%s1387_s14 + $0x80] sm:$0xff] %v349_v16  ;;  %352 = vst [vmem:[%s1387_s14 + $0x88] sm:$0xff] %v351_v17  ;;  %v353_v18 = vld [vmem:[%s1382_s13 + $0x120] sm:$0xff]  ;;  %v355_v19 = vld [vmem:[%s1382_s13 + $0x130] sm:$0xff] }
  0x25   : > { %v357_v20 = vld [vmem:[%s1382_s13 + $0x140] sm:$0xff]  ;;  %354 = vst [vmem:[%s1387_s14 + $0x90] sm:$0xff] %v353_v18  ;;  %356 = vst [vmem:[%s1387_s14 + $0x98] sm:$0xff] %v355_v19  ;;  %v359_v21 = vld [vmem:[%s1382_s13 + $0x150] sm:$0xff] }
  0x26   : > { %358 = vst [vmem:[%s1387_s14 + $0xa0] sm:$0xff] %v357_v20  ;;  %v361_v22 = vld [vmem:[%s1382_s13 + $0x160] sm:$0xff]  ;;  %v363_v23 = vld [vmem:[%s1382_s13 + $0x170] sm:$0xff]  ;;  %360 = vst [vmem:[%s1387_s14 + $0xa8] sm:$0xff] %v359_v21 }
  0x27   : > { %362 = vst [vmem:[%s1387_s14 + $0xb0] sm:$0xff] %v361_v22  ;;  %364 = vst [vmem:[%s1387_s14 + $0xb8] sm:$0xff] %v363_v23  ;;  %v365_v24 = vld [vmem:[%s1382_s13 + $0x180] sm:$0xff]  ;;  %v367_v25 = vld [vmem:[%s1382_s13 + $0x190] sm:$0xff] }
  0x28   : > { %v369_v26 = vld [vmem:[%s1382_s13 + $0x1a0] sm:$0xff]  ;;  %366 = vst [vmem:[%s1387_s14 + $0xc0] sm:$0xff] %v365_v24  ;;  %368 = vst [vmem:[%s1387_s14 + $0xc8] sm:$0xff] %v367_v25  ;;  %v371_v27 = vld [vmem:[%s1382_s13 + $0x1b0] sm:$0xff] }
  0x29   : > { %370 = vst [vmem:[%s1387_s14 + $0xd0] sm:$0xff] %v369_v26  ;;  %v373_v28 = vld [vmem:[%s1382_s13 + $0x1c0] sm:$0xff]  ;;  %v375_v29 = vld [vmem:[%s1382_s13 + $0x1d0] sm:$0xff]  ;;  %372 = vst [vmem:[%s1387_s14 + $0xd8] sm:$0xff] %v371_v27 }
  0x2a   : > { %374 = vst [vmem:[%s1387_s14 + $0xe0] sm:$0xff] %v373_v28  ;;  %376 = vst [vmem:[%s1387_s14 + $0xe8] sm:$0xff] %v375_v29  ;;  %v377_v30 = vld [vmem:[%s1382_s13 + $0x1e0] sm:$0xff]  ;;  %v379_v31 = vld [vmem:[%s1382_s13 + $0x1f0] sm:$0xff] }
  0x2b   : > { %v381_v32 = vld [vmem:[%s1382_s13 + $0x200] sm:$0xff]  ;;  %378 = vst [vmem:[%s1387_s14 + $0xf0] sm:$0xff] %v377_v30  ;;  %380 = vst [vmem:[%s1387_s14 + $0xf8] sm:$0xff] %v379_v31  ;;  %v383_v33 = vld [vmem:[%s1382_s13 + $0x210] sm:$0xff] }
  0x2c   : > { %382 = vst [vmem:[%s1387_s14 + $0x100] sm:$0xff] %v381_v32  ;;  %v385_v34 = vld [vmem:[%s1382_s13 + $0x220] sm:$0xff]  ;;  %v387_v35 = vld [vmem:[%s1382_s13 + $0x230] sm:$0xff]  ;;  %384 = vst [vmem:[%s1387_s14 + $0x108] sm:$0xff] %v383_v33 }
  0x2d   : > { %386 = vst [vmem:[%s1387_s14 + $0x110] sm:$0xff] %v385_v34  ;;  %388 = vst [vmem:[%s1387_s14 + $0x118] sm:$0xff] %v387_v35  ;;  %v389_v36 = vld [vmem:[%s1382_s13 + $0x240] sm:$0xff]  ;;  %v391_v37 = vld [vmem:[%s1382_s13 + $0x250] sm:$0xff] }
  0x2e   : > { %v393_v38 = vld [vmem:[%s1382_s13 + $0x260] sm:$0xff]  ;;  %390 = vst [vmem:[%s1387_s14 + $0x120] sm:$0xff] %v389_v36  ;;  %392 = vst [vmem:[%s1387_s14 + $0x128] sm:$0xff] %v391_v37  ;;  %v395_v39 = vld [vmem:[%s1382_s13 + $0x270] sm:$0xff] }
  0x2f   : > { %394 = vst [vmem:[%s1387_s14 + $0x130] sm:$0xff] %v393_v38  ;;  %v397_v40 = vld [vmem:[%s1382_s13 + $0x280] sm:$0xff]  ;;  %v399_v41 = vld [vmem:[%s1382_s13 + $0x290] sm:$0xff]  ;;  %396 = vst [vmem:[%s1387_s14 + $0x138] sm:$0xff] %v395_v39 }
  0x30   : > { %398 = vst [vmem:[%s1387_s14 + $0x140] sm:$0xff] %v397_v40  ;;  %400 = vst [vmem:[%s1387_s14 + $0x148] sm:$0xff] %v399_v41  ;;  %v401_v42 = vld [vmem:[%s1382_s13 + $0x2a0] sm:$0xff]  ;;  %v403_v43 = vld [vmem:[%s1382_s13 + $0x2b0] sm:$0xff] }
  0x31   : > { %v405_v44 = vld [vmem:[%s1382_s13 + $0x2c0] sm:$0xff]  ;;  %402 = vst [vmem:[%s1387_s14 + $0x150] sm:$0xff] %v401_v42  ;;  %404 = vst [vmem:[%s1387_s14 + $0x158] sm:$0xff] %v403_v43  ;;  %v407_v45 = vld [vmem:[%s1382_s13 + $0x2d0] sm:$0xff] }
  0x32   : > { %406 = vst [vmem:[%s1387_s14 + $0x160] sm:$0xff] %v405_v44  ;;  %v409_v46 = vld [vmem:[%s1382_s13 + $0x2e0] sm:$0xff]  ;;  %v411_v47 = vld [vmem:[%s1382_s13 + $0x2f0] sm:$0xff]  ;;  %408 = vst [vmem:[%s1387_s14 + $0x168] sm:$0xff] %v407_v45 }
  0x33   : > { %410 = vst [vmem:[%s1387_s14 + $0x170] sm:$0xff] %v409_v46  ;;  %412 = vst [vmem:[%s1387_s14 + $0x178] sm:$0xff] %v411_v47  ;;  %v413_v48 = vld [vmem:[%s1382_s13 + $0x300] sm:$0xff]  ;;  %v415_v49 = vld [vmem:[%s1382_s13 + $0x310] sm:$0xff] }
  0x34   : > { %v417_v50 = vld [vmem:[%s1382_s13 + $0x320] sm:$0xff]  ;;  %414 = vst [vmem:[%s1387_s14 + $0x180] sm:$0xff] %v413_v48  ;;  %416 = vst [vmem:[%s1387_s14 + $0x188] sm:$0xff] %v415_v49  ;;  %v419_v51 = vld [vmem:[%s1382_s13 + $0x330] sm:$0xff] }
  0x35   : > { %418 = vst [vmem:[%s1387_s14 + $0x190] sm:$0xff] %v417_v50  ;;  %v421_v52 = vld [vmem:[%s1382_s13 + $0x340] sm:$0xff]  ;;  %v423_v53 = vld [vmem:[%s1382_s13 + $0x350] sm:$0xff]  ;;  %420 = vst [vmem:[%s1387_s14 + $0x198] sm:$0xff] %v419_v51 }
  0x36   : > { %422 = vst [vmem:[%s1387_s14 + $0x1a0] sm:$0xff] %v421_v52  ;;  %424 = vst [vmem:[%s1387_s14 + $0x1a8] sm:$0xff] %v423_v53 }
  0x37 PF: > { %430 = sbr.rel (!%p1357_p5) target bundleno = 65 (0x41), region = 66  ;;  %s432_s24 = sand.u32 (%p1357_p5), 1, %s1262_s16  }
  0x38   : > { %s1164_s25 = smul.u32 (%p1357_p5), 12, %s1278_s20 }
  0x39   : > { %s1163_s28 = smul.u32 (%p1357_p5), 48, %s432_s24 }
  0x3a   : > { %s436_s29 = sadd.s32 (%p1357_p5), %s1274_s19, %s1164_s25 }
  0x3b   : > { %s1035_s30 = sshll.u32 (%p1357_p5), %s436_s29, 3  ;;  %s434_s9 = scalar_lea.vmem (%p1357_p5), [#allocation3], %s1163_s28 }
  0x3c   : > { %s438_s8 = scalar_lea.vmem (%p1357_p5), %s1725_s3, %s1035_s30 }
  0x3d   : > { %v476_v54 = vld [vmem:[%s438_s8] sm:$0xff] (%p1357_p5)  ;;  %v478_v55 = vld [vmem:[%s438_s8 + $0x10] sm:$0xff] (%p1357_p5) }
  0x3e   : > { %v480_v56 = vld [vmem:[%s438_s8 + $0x20] sm:$0xff]  ;;  %477 = vst [vmem:[%s434_s9] sm:$0xff] %v476_v54  ;;  %479 = vst [vmem:[%s434_s9 + $0x8] sm:$0xff] %v478_v55  ;;  %v482_v57 = vld [vmem:[%s438_s8 + $0x30] sm:$0xff] }
  0x3f   : > { %481 = vst [vmem:[%s434_s9 + $0x10] sm:$0xff] %v480_v56  ;;  %v484_v58 = vld [vmem:[%s438_s8 + $0x40] sm:$0xff]  ;;  %v486_v59 = vld [vmem:[%s438_s8 + $0x50] sm:$0xff]  ;;  %483 = vst [vmem:[%s434_s9 + $0x18] sm:$0xff] %v482_v57 }
  0x40   : > { %485 = vst [vmem:[%s434_s9 + $0x20] sm:$0xff] %v484_v58  ;;  %487 = vst [vmem:[%s434_s9 + $0x28] sm:$0xff] %v486_v59 }
  0x41 PF: > { %p1036_p9 = scmp.ge.s32.totalorder %s1282_s21, 1  ;;  %p492_p10 = scmp.lt.s32.totalorder %s1282_s21, 5 }
  0x43   : > { %p493_p11 = pnand %p1036_p9, %p492_p10 }
  0x44   : > { %s499_s26 = sand.u32 (!%p493_p11), 1, %s1258_s15   ;;  %v535_v60 = vld [vmem:[%s1723_s1 + $0x8] sm:$0xff] (!%p493_p11)  ;;  %vm648_vm0 = vcmask (!%p493_p11), 392192   ;;  %v1284_v61 = vmov (!%p493_p11), 0.0|0.0   ;;  %v537_v62 = vld [vmem:[%s1723_s1 + $0x18] sm:$0xff] (!%p493_p11)  ;;  %v1285_v63 = vmov (!%p493_p11), 0  }
  0x45   : > { %496 = sbr.rel (%p493_p11) target bundleno = 365 (0x16d), region = 104  ;;  %1128 = vmatprep.subr.bf16.mxu1 (!%p493_p11), %v1284_v61  ;;  %731 = vmatprep.mubr.f32.mxu0 (!%p493_p11), %v535_v60 }
  0x46   : > { %s1165_s12 = smul.u32 (!%p493_p11), 432, %s499_s26  ;;  %1226 = vset.pattern.permute.xlu0 (!%p493_p11), %v1285_v63  ;;  %1227 = vset.pattern.permute.xlu1 (!%p493_p11), %v1285_v63 }
  0x47   : > { %1037 = vmatprep.mubr.msk.f32.mxu1 (!%p493_p11), %vm648_vm0, %v537_v62  ;;  %s1166_s28 = smul.u32 (!%p493_p11), 48, %s499_s26 }
  0x48   : > { %s1515_s24 = scalar_lea.vmem (!%p493_p11), [#allocation2], %s1165_s12 }
  0x49   : > { %v574_v0 = vld [vmem:[%s1515_s24 + $0x80] sm:$0xff] (!%p493_p11)  ;;  %v575_v1 = vld [vmem:[%s1515_s24 + $0x88] sm:$0xff] (!%p493_p11)  ;;  %v576_v9 = vld [vmem:[%s1515_s24 + $0x90] sm:$0xff] (!%p493_p11)  ;;  %s1672_s29 = scalar_lea.vmem (!%p493_p11), [#allocation3], %s1166_s28  ;;  %s1676_s15 = scalar_lea.vmem (!%p493_p11), [#allocation4], %s1166_s28 }
  0x4a   : > { %v590_v2 = vld [vmem:[%s1515_s24 + $0x100] sm:$0xff] (!%p493_p11)  ;;  %v1096_v3 = vpack.c.bf16 (!%p493_p11), %v575_v1, %v574_v0  ;;  %v591_v4 = vld [vmem:[%s1515_s24 + $0x108] sm:$0xff] (!%p493_p11)  ;;  %v577_v10 = vld [vmem:[%s1515_s24 + $0x98] sm:$0xff] (!%p493_p11) }
  0x4b   : > { %v558_v5 = vld [vmem:[%s1515_s24] sm:$0xff] (!%p493_p11)  ;;  %v559_v6 = vld [vmem:[%s1515_s24 + $0x8] sm:$0xff] (!%p493_p11)  ;;  %v1129_v7 = vpack.c.bf16 (!%p493_p11), %v591_v4, %v590_v2  ;;  %v592_v11 = vld [vmem:[%s1515_s24 + $0x110] sm:$0xff] (!%p493_p11)  ;;  %v1100_v12 = vpack.c.bf16 (!%p493_p11), %v577_v10, %v576_v9 }
  0x4c   : > { %v1098_v8 = vpack.c.bf16 %v559_v6, %v558_v5  ;;  %1097 = vmatprep.subr.bf16.mxu0 %v1096_v3  ;;  %v593_v13 = vld [vmem:[%s1515_s24 + $0x118] sm:$0xff]  ;;  %v560_v14 = vld [vmem:[%s1515_s24 + $0x10] sm:$0xff]  ;;  %v578_v18 = vld [vmem:[%s1515_s24 + $0xa0] sm:$0xff]  ;;  %s1167_s26 = smul.u32 (%p1363_p6), 12, %s1270_s18 }
  0x4d   : > { %v561_v15 = vld [vmem:[%s1515_s24 + $0x18] sm:$0xff]  ;;  %1130 = vmatpush1.bf16.msra.mxu1 %v1129_v7  ;;  %v1132_v16 = vpack.c.bf16 %v593_v13, %v592_v11  ;;  %v579_v19 = vld [vmem:[%s1515_s24 + $0xa8] sm:$0xff]  ;;  %v594_v20 = vld [vmem:[%s1515_s24 + $0x120] sm:$0xff] }
  0x4e   : > { %1099 = vmatpush3.bf16.msra.mxu0 %v1098_v8  ;;  %v1102_v17 = vpack.c.bf16 %v561_v15, %v560_v14  ;;  %1131 = vmatprep.subr.bf16.mxu1 %v1284_v61  ;;  %v1104_v21 = vpack.c.bf16 %v579_v19, %v578_v18  ;;  %v595_v22 = vld [vmem:[%s1515_s24 + $0x128] sm:$0xff]  ;;  %v562_v23 = vld [vmem:[%s1515_s24 + $0x20] sm:$0xff]  ;;  %v580_v25 = vld [vmem:[%s1515_s24 + $0xb0] sm:$0xff]  ;;  %s883_s30 = sadd.s32 (%p1363_p6), %s1266_s17, %s1167_s26 }
  0x4f   : > { %1101 = vmatprep.subr.bf16.mxu0 %v1100_v12  ;;  %v563_v24 = vld [vmem:[%s1515_s24 + $0x28] sm:$0xff]  ;;  %v581_v26 = vld [vmem:[%s1515_s24 + $0xb8] sm:$0xff]  ;;  %v1135_v27 = vpack.c.bf16 %v595_v22, %v594_v20  ;;  %v596_v29 = vld [vmem:[%s1515_s24 + $0x130] sm:$0xff]  ;;  %s1043_s6 = sshll.u32 (%p1363_p6), %s883_s30, 3 }
  0x50   : > { %v1106_v28 = vpack.c.bf16 %v563_v24, %v562_v23  ;;  %v1108_v30 = vpack.c.bf16 %v581_v26, %v580_v25  ;;  %v597_v31 = vld [vmem:[%s1515_s24 + $0x138] sm:$0xff]  ;;  %v564_v32 = vld [vmem:[%s1515_s24 + $0x30] sm:$0xff]  ;;  %v582_v34 = vld [vmem:[%s1515_s24 + $0xc0] sm:$0xff]  ;;  %s885_s8 = scalar_lea.vmem (%p1363_p6), %s1726_s4, %s1043_s6 }
  0x51   : > { %1133 = vmatpush1.bf16.msra.mxu1 %v1132_v16  ;;  %v565_v33 = vld [vmem:[%s1515_s24 + $0x38] sm:$0xff]  ;;  %v583_v35 = vld [vmem:[%s1515_s24 + $0xc8] sm:$0xff]  ;;  %v1138_v36 = vpack.c.bf16 %v597_v31, %v596_v29  ;;  %v598_v38 = vld [vmem:[%s1515_s24 + $0x140] sm:$0xff] }
  0x52   : > { %1103 = vmatpush3.bf16.msra.mxu0 %v1102_v17  ;;  %1134 = vmatprep.subr.bf16.mxu1 %v1284_v61  ;;  %v1110_v37 = vpack.c.bf16 %v565_v33, %v564_v32  ;;  %v1112_v39 = vpack.c.bf16 %v583_v35, %v582_v34  ;;  %v599_v40 = vld [vmem:[%s1515_s24 + $0x148] sm:$0xff]  ;;  %v566_v41 = vld [vmem:[%s1515_s24 + $0x40] sm:$0xff]  ;;  %v584_v43 = vld [vmem:[%s1515_s24 + $0xd0] sm:$0xff] }
  0x53   : > { %1105 = vmatprep.subr.bf16.mxu0 %v1104_v21  ;;  %v567_v42 = vld [vmem:[%s1515_s24 + $0x48] sm:$0xff]  ;;  %v585_v44 = vld [vmem:[%s1515_s24 + $0xd8] sm:$0xff]  ;;  %v1141_v45 = vpack.c.bf16 %v599_v40, %v598_v38  ;;  %v600_v47 = vld [vmem:[%s1515_s24 + $0x150] sm:$0xff] }
  0x54   : > { %v1114_v46 = vpack.c.bf16 %v567_v42, %v566_v41  ;;  %v1116_v48 = vpack.c.bf16 %v585_v44, %v584_v43  ;;  %v601_v49 = vld [vmem:[%s1515_s24 + $0x158] sm:$0xff]  ;;  %v568_v50 = vld [vmem:[%s1515_s24 + $0x50] sm:$0xff]  ;;  %v586_v52 = vld [vmem:[%s1515_s24 + $0xe0] sm:$0xff] }
  0x55   : > { %1136 = vmatpush1.bf16.msra.mxu1 %v1135_v27  ;;  %v569_v51 = vld [vmem:[%s1515_s24 + $0x58] sm:$0xff]  ;;  %v587_v53 = vld [vmem:[%s1515_s24 + $0xe8] sm:$0xff]  ;;  %v1144_v54 = vpack.c.bf16 %v601_v49, %v600_v47  ;;  %v602_v56 = vld [vmem:[%s1515_s24 + $0x160] sm:$0xff] }
  0x56   : > { %1107 = vmatpush3.bf16.msra.mxu0 %v1106_v28  ;;  %1137 = vmatprep.subr.bf16.mxu1 %v1284_v61  ;;  %v1118_v55 = vpack.c.bf16 %v569_v51, %v568_v50  ;;  %v603_v57 = vld [vmem:[%s1515_s24 + $0x168] sm:$0xff]  ;;  %v1120_v58 = vpack.c.bf16 %v587_v53, %v586_v52  ;;  %v570_v59 = vld [vmem:[%s1515_s24 + $0x60] sm:$0xff]  ;;  %v588_v62 = vld [vmem:[%s1515_s24 + $0xf0] sm:$0xff] }
  0x57   : > { %1109 = vmatprep.subr.bf16.mxu0 %v1108_v30  ;;  %v571_v60 = vld [vmem:[%s1515_s24 + $0x68] sm:$0xff]  ;;  %v589_v63 = vld [vmem:[%s1515_s24 + $0xf8] sm:$0xff]  ;;  %v612_v0 = vld [vmem:[%s1724_s2] sm:$0xff]  ;;  %v1147_v2 = vpack.c.bf16 %v603_v57, %v602_v56 }
  0x58   : > { %v614_v1 = vld [vmem:[%s1724_s2 + $0x10] sm:$0xff]  ;;  %620 = vperm.xlu0 %1226, %v612_v0   ;;  %v1122_v3 = vpack.c.bf16 %v571_v60, %v570_v59  ;;  %v613_v5 = vld [vmem:[%s1724_s2 + $0x8] sm:$0xff]  ;;  %v615_v6 = vld [vmem:[%s1724_s2 + $0x18] sm:$0xff]  ;;  %v1124_v7 = vpack.c.bf16 %v589_v63, %v588_v62 }
  0x59   : > { %1139 = vmatpush1.bf16.msra.mxu1 %v1138_v36  ;;  %630 = vperm.xlu1 %1227, %v614_v1   ;;  %v604_v4 = vld [vmem:[%s1515_s24 + $0x170] sm:$0xff]  ;;  %v605_v8 = vld [vmem:[%s1515_s24 + $0x178] sm:$0xff]  ;;  %v606_v15 = vld [vmem:[%s1515_s24 + $0x180] sm:$0xff] }
  0x5a   : > { %1111 = vmatpush3.bf16.msra.mxu0 %v1110_v37  ;;  %1140 = vmatprep.subr.bf16.mxu1 %v1284_v61  ;;  %v572_v9 = vld [vmem:[%s1515_s24 + $0x70] sm:$0xff]  ;;  %v573_v10 = vld [vmem:[%s1515_s24 + $0x78] sm:$0xff]  ;;  %v1150_v11 = vpack.c.bf16 %v605_v8, %v604_v4  ;;  %v607_v16 = vld [vmem:[%s1515_s24 + $0x188] sm:$0xff] }
  0x5b   : > { %1113 = vmatprep.subr.bf16.mxu0 %v1112_v39  ;;  %v1126_v12 = vpack.c.bf16 %v573_v10, %v572_v9  ;;  %v617_v13 = vld [vmem:[%s1724_s2 + $0x28] sm:$0xff]  ;;  %v616_v14 = vld [vmem:[%s1724_s2 + $0x20] sm:$0xff]  ;;  %v1153_v18 = vpack.c.bf16 %v607_v16, %v606_v15  ;;  %v536_v30 = vld [vmem:[%s1723_s1 + $0x10] sm:$0xff] }
  0x5c   : > { %625 = vperm.xlu0 %1226, %v613_v5   ;;  %v534_v17 = vld [vmem:[%s1723_s1] sm:$0xff]  ;;  %v539_v19 = vld [vmem:[%s1723_s1 + $0x28] sm:$0xff]  ;;  %v541_v32 = vld [vmem:[%s1723_s1 + $0x38] sm:$0xff] }
  0x5d   : > { %1142 = vmatpush1.bf16.msra.mxu1 %v1141_v45  ;;  %635 = vperm.xlu1 %1227, %v615_v6   ;;  %v608_v20 = vld [vmem:[%s1515_s24 + $0x190] sm:$0xff]  ;;  %v609_v21 = vld [vmem:[%s1515_s24 + $0x198] sm:$0xff]  ;;  %v610_v25 = vld [vmem:[%s1515_s24 + $0x1a0] sm:$0xff] }
  0x5e   : > { %1115 = vmatpush3.bf16.msra.mxu0 %v1114_v46  ;;  %1143 = vmatprep.subr.bf16.mxu1 %v1284_v61  ;;  %v538_v22 = vld [vmem:[%s1723_s1 + $0x20] sm:$0xff]  ;;  %v1156_v23 = vpack.c.bf16 %v609_v21, %v608_v20  ;;  %v543_v24 = vld [vmem:[%s1723_s1 + $0x48] sm:$0xff]  ;;  %v540_v33 = vld [vmem:[%s1723_s1 + $0x30] sm:$0xff] }
  0x5f   : > { %1117 = vmatprep.subr.bf16.mxu0 %v1116_v48  ;;  %v611_v26 = vld [vmem:[%s1515_s24 + $0x1a8] sm:$0xff]  ;;  %v542_v27 = vld [vmem:[%s1723_s1 + $0x40] sm:$0xff]  ;;  %v544_v37 = vld [vmem:[%s1723_s1 + $0x50] sm:$0xff] }
  0x60   : > { %640 = vperm.xlu0 %1226, %v616_v14   ;;  %v1159_v28 = vpack.c.bf16 %v611_v26, %v610_v25  ;;  %v547_v29 = vld [vmem:[%s1723_s1 + $0x68] sm:$0xff]  ;;  %v546_v31 = vld [vmem:[%s1723_s1 + $0x60] sm:$0xff]  ;;  %v545_v35 = vld [vmem:[%s1723_s1 + $0x58] sm:$0xff] }
  0x61   : > { %1145 = vmatpush1.bf16.msra.mxu1 %v1144_v54  ;;  %645 = vperm.xlu1 %1227, %v617_v13   ;;  %v550_v34 = vld [vmem:[%s1723_s1 + $0x80] sm:$0xff]  ;;  %v555_v36 = vld [vmem:[%s1723_s1 + $0xa8] sm:$0xff]  ;;  %v549_v39 = vld [vmem:[%s1723_s1 + $0x78] sm:$0xff] }
  0x62   : > { %1119 = vmatpush3.bf16.msra.mxu0 %v1118_v55  ;;  %1146 = vmatprep.subr.bf16.mxu1 %v1284_v61  ;;  %v554_v38 = vld [vmem:[%s1723_s1 + $0xa0] sm:$0xff]  ;;  %v548_v40 = vld [vmem:[%s1723_s1 + $0x70] sm:$0xff]  ;;  %v553_v41 = vld [vmem:[%s1723_s1 + $0x98] sm:$0xff] }
  0x63   : > { %1121 = vmatprep.subr.bf16.mxu0 %v1120_v58  ;;  %v552_v42 = vld [vmem:[%s1723_s1 + $0x90] sm:$0xff]  ;;  %v557_v43 = vld [vmem:[%s1723_s1 + $0xb8] sm:$0xff] }
  0x64   : > { %v556_v44 = vld [vmem:[%s1723_s1 + $0xb0] sm:$0xff]  ;;  %v858_v5 = vld [vmem:[%s1672_s29 + $0x8] sm:$0xff]  ;;  %v860_v25 = vld [vmem:[%s1672_s29 + $0x18] sm:$0xff] }
  0x65   : > { %1148 = vmatpush1.bf16.msra.mxu1 %v1147_v2  ;;  %v857_v59 = vld [vmem:[%s1672_s29] sm:$0xff]  ;;  %v859_v15 = vld [vmem:[%s1672_s29 + $0x10] sm:$0xff] }
  0x66   : > { %1123 = vmatpush3.bf16.msra.mxu0 %v1122_v3  ;;  %1149 = vmatprep.subr.bf16.mxu1 %v1284_v61 }
  0x67   : > { %1125 = vmatprep.subr.bf16.mxu0 %v1124_v7 }
  0x69   : > { %1151 = vmatpush1.bf16.msra.mxu1 %v1150_v11 }
  0x6a   : > { %1127 = vmatpush3.bf16.msra.mxu0 %v1126_v12  ;;  %1152 = vmatprep.subr.bf16.mxu1 %v1284_v61 }
  0x6d   : > { %732 = vmatmul.mubr.f32.vlgmr.msra.gmra.mrb[0].mxu0 %v534_v17  ;;  %1154 = vmatpush1.bf16.msra.mxu1 %v1153_v18 }
  0x6e   : > { %736 = vmatprep.mubr.f32.mxu0 %v539_v19  ;;  %1155 = vmatprep.subr.bf16.mxu1 %v1284_v61 }
  0x71   : > { %737 = vmatmul.mubr.f32.gmra.mrb[2].mxu0 %v538_v22  ;;  %1157 = vmatpush1.bf16.msra.mxu1 %v1156_v23 }
  0x72   : > { %741 = vmatprep.mubr.f32.mxu0 %v543_v24  ;;  %1158 = vmatprep.subr.bf16.mxu1 %v1284_v61  ;;  %v551_v61 = vld [vmem:[%s1723_s1 + $0x88] sm:$0xff] }
  0x75   : > { %742 = vmatmul.mubr.f32.gmra.mrb[4].mxu0 %v542_v27  ;;  %1160 = vmatpush1.bf16.msra.mxu1 %v1159_v28 }
  0x76   : > { %746 = vmatprep.mubr.f32.mxu0 %v547_v29 }
  0x78   : > { %827 = vmatmul.mubr.f32.vlgmr.msra.gmra.mrb[0].mxu1 %v536_v30 }
  0x79   : > { %747 = vmatmul.mubr.f32.gmra.mrb[6].mxu0 %v546_v31  ;;  %1038 = vmatprep.mubr.msk.f32.mxu1 %vm648_vm0, %v541_v32  ;;  %v861_v31 = vld [vmem:[%s1672_s29 + $0x20] sm:$0xff] }
  0x7a   : > { %751 = vmatprep.mubr.f32.mxu0 %v551_v61 }
  0x7c   : > { %832 = vmatmul.mubr.f32.gmra.mrb[2].mxu1 %v540_v33 }
  0x7d   : > { %752 = vmatmul.mubr.f32.gmra.mrb[8].mxu0 %v550_v34  ;;  %1039 = vmatprep.mubr.msk.f32.mxu1 %vm648_vm0, %v545_v35 }
  0x7e   : > { %756 = vmatprep.mubr.f32.mxu0 %v555_v36 }
  0x80   : > { %837 = vmatmul.mubr.f32.gmra.mrb[4].mxu1 %v544_v37  ;;  %v862_v37 = vld [vmem:[%s1672_s29 + $0x28] sm:$0xff] }
  0x81   : > { %757 = vmatmul.mubr.f32.gmra.mrb[10].mxu0 %v554_v38  ;;  %1040 = vmatprep.mubr.msk.f32.mxu1 %vm648_vm0, %v549_v39 }
  0x84   : > { %842 = vmatmul.mubr.f32.gmra.mrb[6].mxu1 %v548_v40 }
  0x85   : > { %1041 = vmatprep.mubr.msk.f32.mxu1 %vm648_vm0, %v553_v41 }
  0x88   : > { %847 = vmatmul.mubr.f32.gmra.mrb[8].mxu1 %v552_v42 }
  0x89   : > { %1042 = vmatprep.mubr.msk.f32.mxu1 %vm648_vm0, %v557_v43 }
  0x8c   : > { %852 = vmatmul.mubr.f32.gmra.mrb[10].mxu1 %v556_v44 }
  0xd7   : > { %v621_v48 = vpop.permute.xlu0 %620 }
  0xd8   : > { %v631_v57 = vpop.permute.xlu1 %630 }
  0xdb   : > { %v626_v55 = vpop.permute.xlu0 %625 }
  0xdc   : > { %v636_v13 = vpop.permute.xlu1 %635 }
  0xdf   : > { %v641_v23 = vpop.permute.xlu0 %640 }
  0xe0   : > { %v646_v33 = vpop.permute.xlu1 %645 }
 0x140   : > { %v1078_v45 = vpop.f32.mrb[0].mxu0 }
 0x141   : > { %v1079_v46 = vpop.f32.mrb[1].mxu0 }
 0x142   : > { %v1080_v47 = vadd.f32 %v1079_v46, %v1078_v45 }
 0x144   : > { %v1081_v49 = vpop.f32.mrb[2].mxu0  ;;  %v734_v53 = vadd.f32 %v1080_v47, %v621_v48 }
 0x145   : > { %v1082_v50 = vpop.f32.mrb[3].mxu0 }
 0x146   : > { %v1083_v51 = vadd.f32 %v1082_v50, %v1081_v49 }
 0x148   : > { %v1084_v52 = vpop.f32.mrb[4].mxu0  ;;  %v739_v63 = vadd.f32 %v1083_v51, %v626_v55 }
 0x149   : > { %v1085_v54 = vpop.f32.mrb[5].mxu0 }
 0x14a   : > { %v1086_v56 = vadd.f32 %v1085_v54, %v1084_v52 }
 0x14b   : > { %v828_v58 = vpop.f32.mrb[0].mxu1 }
 0x14c   : > { %v1087_v60 = vpop.f32.mrb[6].mxu0  ;;  %v829_v62 = vadd.f32 %v828_v58, %v734_v53  ;;  %v830_v0 = vpop.f32.mrb[1].mxu1  ;;  %v744_v10 = vadd.f32 %v1086_v56, %v631_v57 }
 0x14d   : > { %v1088_v1 = vpop.f32.mrb[7].mxu0 }
 0x14e   : > { %v1089_v2 = vadd.f32 %v1088_v1, %v1087_v60  ;;  %v863_v3 = vadd.f32 %v857_v59, %v829_v62 }
 0x14f   : > { %v833_v4 = vpop.f32.mrb[2].mxu1 }
 0x150   : > { %v1090_v6 = vpop.f32.mrb[8].mxu0  ;;  %869 = vst [vmem:[%s1676_s15] sm:$0xff] %v863_v3  ;;  %v834_v7 = vadd.f32 %v833_v4, %v739_v63  ;;  %v835_v8 = vpop.f32.mrb[3].mxu1  ;;  %v749_v20 = vadd.f32 %v1089_v2, %v636_v13 }
 0x151   : > { %v1091_v9 = vpop.f32.mrb[9].mxu0 }
 0x152   : > { %v1092_v11 = vadd.f32 %v1091_v9, %v1090_v6  ;;  %v864_v12 = vadd.f32 %v858_v5, %v834_v7 }
 0x153   : > { %v838_v14 = vpop.f32.mrb[4].mxu1 }
 0x154   : > { %v1093_v16 = vpop.f32.mrb[10].mxu0  ;;  %870 = vst [vmem:[%s1676_s15 + $0x8] sm:$0xff] %v864_v12  ;;  %v839_v17 = vadd.f32 %v838_v14, %v744_v10  ;;  %v840_v18 = vpop.f32.mrb[5].mxu1  ;;  %v754_v28 = vadd.f32 %v1092_v11, %v641_v23 }
 0x155   : > { %v1094_v19 = vpop.f32.mrb[11].mxu0 }
 0x156   : > { %v1095_v21 = vadd.f32 %v1094_v19, %v1093_v16  ;;  %v865_v22 = vadd.f32 %v859_v15, %v839_v17 }
 0x157   : > { %v843_v24 = vpop.f32.mrb[6].mxu1  ;;  %v923_v41 = vld [vmem:[%s1676_s15] sm:$0xff] (%p1363_p6) }
 0x158   : > { %871 = vst [vmem:[%s1676_s15 + $0x10] sm:$0xff] %v865_v22  ;;  %v844_v26 = vadd.f32 %v843_v24, %v749_v20  ;;  %v845_v27 = vpop.f32.mrb[7].mxu1  ;;  %v759_v35 = vadd.f32 %v1095_v21, %v646_v33  ;;  %924 = vst [vmem:[%s885_s8] sm:$0xff] (%p1363_p6), %v923_v41 }
 0x15a   : > { %v866_v29 = vadd.f32 %v860_v25, %v844_v26 }
 0x15b   : > { %v848_v30 = vpop.f32.mrb[8].mxu1  ;;  %v925_v42 = vld [vmem:[%s1676_s15 + $0x8] sm:$0xff] (%p1363_p6) }
 0x15c   : > { %872 = vst [vmem:[%s1676_s15 + $0x18] sm:$0xff] %v866_v29  ;;  %v849_v32 = vadd.f32 %v848_v30, %v754_v28  ;;  %v850_v61 = vpop.f32.mrb[9].mxu1  ;;  %926 = vst [vmem:[%s885_s8 + $0x10] sm:$0xff] (%p1363_p6), %v925_v42 }
 0x15e   : > { %v867_v34 = vadd.f32 %v861_v31, %v849_v32  ;;  %881 = sbr.rel (!%p1363_p6) target bundleno = 365 (0x16d), region = 116 }
 0x15f   : > { %v853_v36 = vpop.f32.mrb[10].mxu1  ;;  %v927_v43 = vld [vmem:[%s1676_s15 + $0x10] sm:$0xff] (%p1363_p6) }
 0x160   : > { %873 = vst [vmem:[%s1676_s15 + $0x20] sm:$0xff] %v867_v34  ;;  %v854_v38 = vadd.f32 %v853_v36, %v759_v35  ;;  %v855_v39 = vpop.f32.mrb[11].mxu1  ;;  %928 = vst [vmem:[%s885_s8 + $0x20] sm:$0xff] (%p1363_p6), %v927_v43 }
 0x162   : > { %v868_v40 = vadd.f32 %v862_v37, %v854_v38 }
 0x163   : > { %v929_v44 = vld [vmem:[%s1676_s15 + $0x18] sm:$0xff] (%p1363_p6) }
 0x164   : > { %874 = vst [vmem:[%s1676_s15 + $0x28] sm:$0xff] %v868_v40  ;;  %930 = vst [vmem:[%s885_s8 + $0x30] sm:$0xff] (%p1363_p6), %v929_v44 }
 0x167   : > { %v931_v45 = vld [vmem:[%s1676_s15 + $0x20] sm:$0xff] }
 0x168   : > { %932 = vst [vmem:[%s885_s8 + $0x40] sm:$0xff] %v931_v45 }
 0x16b   : > { %v933_v46 = vld [vmem:[%s1676_s15 + $0x28] sm:$0xff] }
 0x16c   : > { %934 = vst [vmem:[%s885_s8 + $0x50] sm:$0xff] %v933_v46 }
 0x16d PF: > { %s14_s21 = sadd.s32 1, %s1282_s21   ;;  %s1729_s15 = smov %s1262_s16 }
 0x16e   : > { %p11_p12 = scmp.ge.s32.totalorder %s14_s21, 6   ;;  %s1730_s16 = smov %s1371_s5 }
 0x16f   : > { %s1731_s17 = smov %s1274_s19  ;;  %s1732_s18 = smov %s1278_s20 }
 0x170   : > { %s1733_s19 = smov %s1736_s22  ;;  %s1734_s20 = smov %s1740_s23 }
 0x171   :  { %13 = sbr.rel (!%p11_p12) target bundleno = 4 (0x4), region = 193 }

// kernel: key_encoder_forward_pallas.24
= control target key start
LH: loop header
LB: loop body
LE: loop exit
PB: predicated region body
PF: predicated region fallthrough
CT: control target
= control target key end

     0   :  { %s657_s12 = smov 0   ;;  %s659_s13 = smov 0   ;;  %s761_s0 = inlined_call_operand.vmem [shape: f32[2,64,16], index: 0, kind: input, shape index: {}]   ;;  %s762_s1 = inlined_call_operand.vmem [shape: f32[64,64], index: 1, kind: input, shape index: {}]   ;;  %s763_s2 = inlined_call_operand.vmem [shape: f32[64,1], index: 2, kind: input, shape index: {}]   ;;  %s764_s3 = inlined_call_operand.vmem [shape: f32[2,64,16], index: 3, kind: output, shape index: {}]  }
   0x1   :  { %s661_s14 = smov 0  }
   0x2 LB: > { %s25_s15 = sadd.s32 1, %s630_s13  ;;  %p500_p0 = scmp.ge.s32.totalorder %s634_s14, 1  ;;  %s634_s14 = sphi %s661_s14, %s13_s14   ;;  %s630_s13 = sphi %s659_s13, %s766_s13   ;;  %s626_s12 = sphi %s657_s12, %s765_s12  }
   0x3   : > { %p27_p1 = scmp.ge.s32.totalorder %s25_s15, 2  ;;  %p156_p2 = scmp.lt.s32.totalorder %s634_s14, 3 }
   0x5   : > { %s768_s15 = smov (%p27_p1, %s25_s15), 0  ;;  %p157_p3 = pnand %p500_p0, %p156_p2 }
   0x6   : > { %p186_p4 = scmp.lt.s32.totalorder (!%p157_p3), %s626_s12, 1  ;;  %v202_v0 = vld [vmem:[%s762_s1] sm:$0xff] (!%p157_p3)  ;;  %vm266_vm0 = vcmask (!%p157_p3), 523264   ;;  %v636_v2 = vmov (!%p157_p3), 0   ;;  %v220_v3 = vld [vmem:[%s763_s2 + $0x10] sm:$0xff] (!%p157_p3)  ;;  %v221_v5 = vld [vmem:[%s763_s2 + $0x18] sm:$0xff] (!%p157_p3) }
   0x7   : > { %160 = sbr.rel (%p157_p3) target bundleno = 258 (0x102), region = 32  ;;  %v206_v1 = vld [vmem:[%s762_s1 + $0x20] sm:$0xff] (!%p157_p3)  ;;  %549 = vmatprep.mubr.msk.f32.mxu0 (!%p157_p3), %vm266_vm0, %v202_v0  ;;  %611 = vset.pattern.permute.xlu1 (!%p157_p3), %v636_v2  ;;  %v219_v6 = vld [vmem:[%s763_s2 + $0x8] sm:$0xff] (!%p157_p3)  ;;  %v225_v20 = vld [vmem:[%s763_s2 + $0x38] sm:$0xff] (!%p157_p3)  ;;  %vm404_vm1 = vcmask (!%p157_p3), 130048  }
   0x8   : > { %555 = vmatprep.mubr.msk.f32.mxu1 (!%p157_p3), %vm266_vm0, %v206_v1  ;;  %610 = vset.pattern.permute.xlu0 (!%p157_p3), %v636_v2  ;;  %v218_v4 = vld [vmem:[%s763_s2] sm:$0xff] (!%p157_p3)  ;;  %v223_v15 = vld [vmem:[%s763_s2 + $0x28] sm:$0xff] (!%p157_p3)  ;;  %v224_v21 = vld [vmem:[%s763_s2 + $0x30] sm:$0xff] (!%p157_p3) }
   0x9   : > { %238 = vperm.xlu1 (!%p157_p3), %611, %v220_v3   ;;  %228 = vperm.xlu0 (!%p157_p3), %610, %v218_v4   ;;  %v222_v16 = vld [vmem:[%s763_s2 + $0x20] sm:$0xff] (!%p157_p3)  ;;  %v203_v23 = vld [vmem:[%s762_s1 + $0x8] sm:$0xff] (!%p157_p3)  ;;  %v204_v25 = vld [vmem:[%s762_s1 + $0x10] sm:$0xff] (!%p157_p3) }
   0xa   : > { %v207_v24 = vld [vmem:[%s762_s1 + $0x28] sm:$0xff] (!%p157_p3)  ;;  %v208_v26 = vld [vmem:[%s762_s1 + $0x30] sm:$0xff] (!%p157_p3)  ;;  %v205_v27 = vld [vmem:[%s762_s1 + $0x18] sm:$0xff] (!%p157_p3) }
   0xb   : > { %v209_v28 = vld [vmem:[%s762_s1 + $0x38] sm:$0xff] (!%p157_p3) }
   0xd   : > { %243 = vperm.xlu1 (!%p157_p3), %611, %v221_v5   ;;  %233 = vperm.xlu0 (!%p157_p3), %610, %v219_v6  }
   0xe   : > { %s770_s12 = smov (!%p186_p4, %s626_s12), 1 }
   0xf   : > { %s515_s24 = sshll.u32 %s770_s12, 6 }
  0x10   : > { %s193_s29 = scalar_lea.vmem %s761_s0, %s515_s24  ;;  %s201_s5 = scalar_lea.vmem %s764_s3, %s515_s24 }
  0x11   : > { %v210_v7 = vld [vmem:[%s193_s29] sm:$0xff]  ;;  %v211_v8 = vld [vmem:[%s193_s29 + $0x8] sm:$0xff]  ;;  %v212_v9 = vld [vmem:[%s193_s29 + $0x10] sm:$0xff]  ;;  %253 = vperm.xlu1 %611, %v223_v15   ;;  %248 = vperm.xlu0 %610, %v222_v16  }
  0x12   : > { %v561_v10 = vpack.c.bf16 %v211_v8, %v210_v7  ;;  %v213_v11 = vld [vmem:[%s193_s29 + $0x18] sm:$0xff]  ;;  %v214_v13 = vld [vmem:[%s193_s29 + $0x20] sm:$0xff]  ;;  %v215_v14 = vld [vmem:[%s193_s29 + $0x28] sm:$0xff] }
  0x13   : > { %v565_v12 = vpack.c.bf16 %v213_v11, %v212_v9  ;;  %v569_v17 = vpack.c.bf16 %v215_v14, %v214_v13  ;;  %v216_v18 = vld [vmem:[%s193_s29 + $0x30] sm:$0xff]  ;;  %v217_v19 = vld [vmem:[%s193_s29 + $0x38] sm:$0xff] }
  0x14   : > { %562 = vmatprep.subr.bf16.mxu0 %v561_v10  ;;  %577 = vmatprep.subr.bf16.mxu1 %v561_v10  ;;  %v573_v22 = vpack.c.bf16 %v217_v19, %v216_v18 }
  0x15   : > { %564 = vmatpush3.bf16.msra.mxu0 %v561_v10  ;;  %581 = vmatpush3.bf16.msra.mxu1 %v561_v10 }
  0x16   : > { %566 = vmatprep.subr.bf16.mxu0 %v565_v12  ;;  %578 = vmatprep.subr.bf16.mxu1 %v565_v12 }
  0x17   : > { %263 = vperm.xlu1 %611, %v225_v20   ;;  %258 = vperm.xlu0 %610, %v224_v21  }
  0x19   : > { %568 = vmatpush3.bf16.msra.mxu0 %v565_v12  ;;  %582 = vmatpush3.bf16.msra.mxu1 %v565_v12 }
  0x1a   : > { %570 = vmatprep.subr.bf16.mxu0 %v569_v17  ;;  %579 = vmatprep.subr.bf16.mxu1 %v569_v17 }
  0x1d   : > { %572 = vmatpush3.bf16.msra.mxu0 %v569_v17  ;;  %583 = vmatpush3.bf16.msra.mxu1 %v569_v17 }
  0x1e   : > { %574 = vmatprep.subr.bf16.mxu0 %v573_v22  ;;  %580 = vmatprep.subr.bf16.mxu1 %v573_v22 }
  0x21   : > { %576 = vmatpush3.bf16.msra.mxu0 %v573_v22  ;;  %584 = vmatpush3.bf16.msra.mxu1 %v573_v22 }
  0x24   : > { %550 = vmatmul.mubr.msk.f32.vlgmr.msra.gmra.mrb[0].mxu0 %vm266_vm0, %v203_v23  ;;  %556 = vmatmul.mubr.msk.f32.vlgmr.msra.gmra.mrb[0].mxu1 %vm266_vm0, %v207_v24 }
  0x25   : > { %552 = vmatprep.mubr.msk.f32.mxu0 %vm266_vm0, %v204_v25  ;;  %558 = vmatprep.mubr.msk.f32.mxu1 %vm266_vm0, %v208_v26 }
  0x28   : > { %553 = vmatmul.mubr.msk.f32.gmra.mrb[2].mxu0 %vm266_vm0, %v205_v27  ;;  %559 = vmatmul.mubr.msk.f32.gmra.mrb[2].mxu1 %vm266_vm0, %v209_v28 }
  0x88   : > { %v239_v29 = vpop.permute.xlu1 %238  ;;  %v229_v30 = vpop.permute.xlu0 %228 }
  0x8c   : > { %v244_v31 = vpop.permute.xlu1 %243  ;;  %v234_v32 = vpop.permute.xlu0 %233 }
  0x90   : > { %v254_v33 = vpop.permute.xlu1 %253  ;;  %v249_v34 = vpop.permute.xlu0 %248 }
  0x96   : > { %v264_v43 = vpop.permute.xlu1 %263  ;;  %v259_v44 = vpop.permute.xlu0 %258 }
  0xf7   : > { %v551_v35 = vpop.f32.mrb[0].mxu0  ;;  %v557_v36 = vpop.f32.mrb[0].mxu1 }
  0xf8   : > { %v363_v37 = vadd.f32 %v551_v35, %v234_v32  ;;  %v383_v38 = vadd.f32 %v557_v36, %v254_v33  ;;  %v357_v39 = vpop.f32.mrb[1].mxu0  ;;  %v377_v40 = vpop.f32.mrb[1].mxu1 }
  0xf9   : > { %v358_v41 = vadd.f32 %v357_v39, %v229_v30  ;;  %v378_v42 = vadd.f32 %v377_v40, %v249_v34 }
  0xfa   : > { %v397_v45 = vmax.f32 %v363_v37, 0.0  ;;  %v401_v46 = vmax.f32 %v383_v38, 0.0 }
  0xfb   : > { %v396_v47 = vmax.f32 %v358_v41, 0.0  ;;  %v400_v48 = vmax.f32 %v378_v42, 0.0  ;;  %v554_v49 = vpop.f32.mrb[2].mxu0  ;;  %v560_v50 = vpop.f32.mrb[2].mxu1 }
  0xfc   : > { %406 = vst.msk [vmem:[%s201_s5 + $0x8] sm:$0xff] %vm404_vm1, %v397_v45  ;;  %410 = vst.msk [vmem:[%s201_s5 + $0x28] sm:$0xff] %vm404_vm1, %v401_v46  ;;  %v373_v51 = vadd.f32 %v554_v49, %v244_v31  ;;  %v393_v52 = vadd.f32 %v560_v50, %v264_v43  ;;  %v367_v53 = vpop.f32.mrb[3].mxu0  ;;  %v387_v54 = vpop.f32.mrb[3].mxu1 }
  0xfd   : > { %405 = vst.msk [vmem:[%s201_s5] sm:$0xff] %vm404_vm1, %v396_v47  ;;  %409 = vst.msk [vmem:[%s201_s5 + $0x20] sm:$0xff] %vm404_vm1, %v400_v48  ;;  %v368_v55 = vadd.f32 %v367_v53, %v239_v29  ;;  %v388_v56 = vadd.f32 %v387_v54, %v259_v44 }
  0xfe   : > { %v399_v57 = vmax.f32 %v373_v51, 0.0  ;;  %v403_v58 = vmax.f32 %v393_v52, 0.0 }
  0xff   : > { %v398_v59 = vmax.f32 %v368_v55, 0.0  ;;  %v402_v60 = vmax.f32 %v388_v56, 0.0 }
 0x100   : > { %408 = vst.msk [vmem:[%s201_s5 + $0x18] sm:$0xff] %vm404_vm1, %v399_v57  ;;  %412 = vst.msk [vmem:[%s201_s5 + $0x38] sm:$0xff] %vm404_vm1, %v403_v58 }
 0x101   : > { %407 = vst.msk [vmem:[%s201_s5 + $0x10] sm:$0xff] %vm404_vm1, %v398_v59  ;;  %411 = vst.msk [vmem:[%s201_s5 + $0x30] sm:$0xff] %vm404_vm1, %v402_v60 }
 0x102 PF: > { %s13_s14 = sadd.s32 1, %s634_s14   ;;  %s765_s12 = smov %s630_s13 }
 0x103   : > { %p10_p5 = scmp.ge.s32.totalorder %s13_s14, 4   ;;  %s766_s13 = smov %s768_s15 }
 0x105   :  { %12 = sbr.rel (!%p10_p5) target bundleno = 2 (0x2), region = 62 }

// kernel: key_encoder_forward_pallas.23
= control target key start
LH: loop header
LB: loop body
LE: loop exit
PB: predicated region body
PF: predicated region fallthrough
CT: control target
= control target key end

     0   :  { %s427_s6 = smov 0   ;;  %s540_s0 = inlined_call_operand.vmem [shape: f32[2,9,64,16], index: 0, kind: input, shape index: {}]   ;;  %s541_s1 = inlined_call_operand.vmem [shape: f32[2,64,16], index: 1, kind: output, shape index: {}]  }
   0x1 LB: > { %s325_s7 = sadd.s32 4294967295, %s415_s6   ;;  %p329_p0 = scmp.ge.s32.totalorder %s415_s6, 1  ;;  %s415_s6 = sphi %s427_s6, %s11_s6  }
   0x2   : > { %p87_p1 = scmp.lt.s32.totalorder %s415_s6, 3 }
   0x4   : > { %p88_p2 = pnand %p329_p0, %p87_p1 }
   0x5   : > { %p107_p3 = scmp.lt.s32.totalorder (!%p88_p2), %s325_s7, 1  ;;  %vm261_vm0 = vcmask (!%p88_p2), 130048  }
   0x6   : > { %91 = sbr.rel (%p88_p2) target bundleno = 53 (0x35), region = 24 }
   0xd   : > { %s543_s7 = smov (!%p107_p3, %s325_s7), 1 }
   0xe   : > { %s400_s8 = smul.u32 576, %s543_s7  ;;  %s399_s12 = sshll.u32 %s543_s7, 6 }
   0xf   : > { %s479_s15 = scalar_lea.vmem %s541_s1, %s399_s12 }
  0x10   : > { %s441_s11 = scalar_lea.vmem %s540_s0, %s400_s8 }
  0x11   : > { %v117_v0 = vld [vmem:[%s441_s11] sm:$0xff]  ;;  %v118_v6 = vld [vmem:[%s441_s11 + $0x8] sm:$0xff]  ;;  %v119_v15 = vld [vmem:[%s441_s11 + $0x10] sm:$0xff] }
  0x12   : > { %v333_v1 = vld [vmem:[%s441_s11 + $0x40] sm:$0xff]  ;;  %v334_v7 = vld [vmem:[%s441_s11 + $0x48] sm:$0xff]  ;;  %v335_v16 = vld [vmem:[%s441_s11 + $0x50] sm:$0xff] }
  0x13   : > { %v341_v2 = vld [vmem:[%s441_s11 + $0x80] sm:$0xff]  ;;  %v134_v3 = vmax.f32 %v117_v0, %v333_v1  ;;  %v342_v8 = vld [vmem:[%s441_s11 + $0x88] sm:$0xff]  ;;  %v135_v10 = vmax.f32 %v118_v6, %v334_v7  ;;  %v343_v17 = vld [vmem:[%s441_s11 + $0x90] sm:$0xff]  ;;  %v136_v20 = vmax.f32 %v119_v15, %v335_v16 }
  0x14   : > { %v349_v4 = vld [vmem:[%s441_s11 + $0xc0] sm:$0xff]  ;;  %v350_v13 = vld [vmem:[%s441_s11 + $0xc8] sm:$0xff]  ;;  %v351_v24 = vld [vmem:[%s441_s11 + $0xd0] sm:$0xff] }
  0x15   : > { %v151_v5 = vmax.f32 %v134_v3, %v341_v2  ;;  %v357_v9 = vld [vmem:[%s441_s11 + $0x100] sm:$0xff]  ;;  %v152_v14 = vmax.f32 %v135_v10, %v342_v8  ;;  %v358_v19 = vld [vmem:[%s441_s11 + $0x108] sm:$0xff]  ;;  %v153_v26 = vmax.f32 %v136_v20, %v343_v17  ;;  %v120_v27 = vld [vmem:[%s441_s11 + $0x18] sm:$0xff] }
  0x16   : > { %v365_v12 = vld [vmem:[%s441_s11 + $0x140] sm:$0xff]  ;;  %v366_v23 = vld [vmem:[%s441_s11 + $0x148] sm:$0xff]  ;;  %v336_v28 = vld [vmem:[%s441_s11 + $0x58] sm:$0xff] }
  0x17   : > { %v168_v11 = vmax.f32 %v151_v5, %v349_v4  ;;  %v373_v21 = vld [vmem:[%s441_s11 + $0x180] sm:$0xff]  ;;  %v169_v22 = vmax.f32 %v152_v14, %v350_v13  ;;  %v344_v29 = vld [vmem:[%s441_s11 + $0x98] sm:$0xff]  ;;  %v359_v33 = vld [vmem:[%s441_s11 + $0x110] sm:$0xff]  ;;  %v137_v34 = vmax.f32 %v120_v27, %v336_v28  ;;  %v170_v37 = vmax.f32 %v153_v26, %v351_v24 }
  0x18   : > { %v381_v30 = vld [vmem:[%s441_s11 + $0x1c0] sm:$0xff]  ;;  %v374_v36 = vld [vmem:[%s441_s11 + $0x188] sm:$0xff]  ;;  %v367_v38 = vld [vmem:[%s441_s11 + $0x150] sm:$0xff] }
  0x19   : > { %v185_v18 = vmax.f32 %v168_v11, %v357_v9  ;;  %v389_v31 = vld [vmem:[%s441_s11 + $0x200] sm:$0xff]  ;;  %v186_v32 = vmax.f32 %v169_v22, %v358_v19  ;;  %v352_v39 = vld [vmem:[%s441_s11 + $0xd8] sm:$0xff]  ;;  %v154_v41 = vmax.f32 %v137_v34, %v344_v29  ;;  %v382_v46 = vld [vmem:[%s441_s11 + $0x1c8] sm:$0xff]  ;;  %v187_v48 = vmax.f32 %v170_v37, %v359_v33 }
  0x1a   : > { %v121_v42 = vld [vmem:[%s441_s11 + $0x20] sm:$0xff]  ;;  %v390_v47 = vld [vmem:[%s441_s11 + $0x208] sm:$0xff]  ;;  %v360_v49 = vld [vmem:[%s441_s11 + $0x118] sm:$0xff] }
  0x1b   : > { %v202_v25 = vmax.f32 %v185_v18, %v365_v12  ;;  %v203_v40 = vmax.f32 %v186_v32, %v366_v23  ;;  %v337_v43 = vld [vmem:[%s441_s11 + $0x60] sm:$0xff]  ;;  %v375_v52 = vld [vmem:[%s441_s11 + $0x190] sm:$0xff]  ;;  %v171_v53 = vmax.f32 %v154_v41, %v352_v39  ;;  %v368_v54 = vld [vmem:[%s441_s11 + $0x158] sm:$0xff]  ;;  %v204_v57 = vmax.f32 %v187_v48, %v367_v38 }
  0x1c   : > { %v345_v44 = vld [vmem:[%s441_s11 + $0xa0] sm:$0xff]  ;;  %v138_v50 = vmax.f32 %v121_v42, %v337_v43  ;;  %v122_v59 = vld [vmem:[%s441_s11 + $0x28] sm:$0xff]  ;;  %v383_v63 = vld [vmem:[%s441_s11 + $0x1d0] sm:$0xff] }
  0x1d   : > { %v219_v35 = vmax.f32 %v202_v25, %v373_v21  ;;  %v220_v51 = vmax.f32 %v203_v40, %v374_v36  ;;  %v353_v55 = vld [vmem:[%s441_s11 + $0xe0] sm:$0xff]  ;;  %v338_v60 = vld [vmem:[%s441_s11 + $0x68] sm:$0xff]  ;;  %v391_v0 = vld [vmem:[%s441_s11 + $0x210] sm:$0xff]  ;;  %v188_v1 = vmax.f32 %v171_v53, %v360_v49  ;;  %v221_v4 = vmax.f32 %v204_v57, %v375_v52 }
  0x1e   : > { %v155_v58 = vmax.f32 %v138_v50, %v345_v44  ;;  %v346_v61 = vld [vmem:[%s441_s11 + $0xa8] sm:$0xff]  ;;  %v361_v2 = vld [vmem:[%s441_s11 + $0x120] sm:$0xff]  ;;  %v139_v3 = vmax.f32 %v122_v59, %v338_v60  ;;  %v376_v5 = vld [vmem:[%s441_s11 + $0x198] sm:$0xff] }
  0x1f   : > { %v236_v45 = vmax.f32 %v219_v35, %v381_v30  ;;  %v237_v62 = vmax.f32 %v220_v51, %v382_v46  ;;  %v369_v7 = vld [vmem:[%s441_s11 + $0x160] sm:$0xff]  ;;  %v354_v8 = vld [vmem:[%s441_s11 + $0xe8] sm:$0xff]  ;;  %v205_v10 = vmax.f32 %v188_v1, %v368_v54  ;;  %v123_v12 = vld [vmem:[%s441_s11 + $0x30] sm:$0xff]  ;;  %v238_v15 = vmax.f32 %v221_v4, %v383_v63 }
  0x20   : > { %v172_v6 = vmax.f32 %v155_v58, %v353_v55  ;;  %v156_v11 = vmax.f32 %v139_v3, %v346_v61  ;;  %v339_v13 = vld [vmem:[%s441_s11 + $0x70] sm:$0xff]  ;;  %v384_v16 = vld [vmem:[%s441_s11 + $0x1d8] sm:$0xff]  ;;  %v362_v19 = vld [vmem:[%s441_s11 + $0x128] sm:$0xff] }
  0x21   : > { %v253_v56 = vmax.f32 %v236_v45, %v389_v31  ;;  %v254_v9 = vmax.f32 %v237_v62, %v390_v47  ;;  %v347_v14 = vld [vmem:[%s441_s11 + $0xb0] sm:$0xff]  ;;  %v392_v17 = vld [vmem:[%s441_s11 + $0x218] sm:$0xff]  ;;  %v140_v20 = vmax.f32 %v123_v12, %v339_v13  ;;  %v222_v21 = vmax.f32 %v205_v10, %v376_v5  ;;  %v377_v22 = vld [vmem:[%s441_s11 + $0x1a0] sm:$0xff] }
  0x22   : > { %v189_v18 = vmax.f32 %v172_v6, %v361_v2  ;;  %v173_v23 = vmax.f32 %v156_v11, %v354_v8  ;;  %v370_v24 = vld [vmem:[%s441_s11 + $0x168] sm:$0xff]  ;;  %v355_v25 = vld [vmem:[%s441_s11 + $0xf0] sm:$0xff]  ;;  %v255_v26 = vmax.f32 %v238_v15, %v391_v0  ;;  %v124_v29 = vld [vmem:[%s441_s11 + $0x38] sm:$0xff] }
  0x23   : > { %262 = vst.msk [vmem:[%s479_s15] sm:$0xff] %vm261_vm0, %v253_v56  ;;  %263 = vst.msk [vmem:[%s479_s15 + $0x8] sm:$0xff] %vm261_vm0, %v254_v9  ;;  %v157_v28 = vmax.f32 %v140_v20, %v347_v14  ;;  %v340_v30 = vld [vmem:[%s441_s11 + $0x78] sm:$0xff]  ;;  %v239_v32 = vmax.f32 %v222_v21, %v384_v16  ;;  %v385_v33 = vld [vmem:[%s441_s11 + $0x1e0] sm:$0xff] }
  0x24   : > { %v206_v27 = vmax.f32 %v189_v18, %v369_v7  ;;  %v348_v31 = vld [vmem:[%s441_s11 + $0xb8] sm:$0xff]  ;;  %v190_v34 = vmax.f32 %v173_v23, %v362_v19  ;;  %v363_v35 = vld [vmem:[%s441_s11 + $0x130] sm:$0xff]  ;;  %v141_v36 = vmax.f32 %v124_v29, %v340_v30  ;;  %264 = vst.msk [vmem:[%s479_s15 + $0x10] sm:$0xff] %vm261_vm0, %v255_v26  ;;  %v378_v38 = vld [vmem:[%s441_s11 + $0x1a8] sm:$0xff] }
  0x25   : > { %v174_v39 = vmax.f32 %v157_v28, %v355_v25  ;;  %v356_v40 = vld [vmem:[%s441_s11 + $0xf8] sm:$0xff]  ;;  %v256_v41 = vmax.f32 %v239_v32, %v392_v17  ;;  %v393_v42 = vld [vmem:[%s441_s11 + $0x220] sm:$0xff]  ;;  %v371_v44 = vld [vmem:[%s441_s11 + $0x170] sm:$0xff] }
  0x26   : > { %v223_v37 = vmax.f32 %v206_v27, %v377_v22  ;;  %v207_v43 = vmax.f32 %v190_v34, %v370_v24  ;;  %v158_v45 = vmax.f32 %v141_v36, %v348_v31  ;;  %v386_v47 = vld [vmem:[%s441_s11 + $0x1e8] sm:$0xff]  ;;  %v364_v49 = vld [vmem:[%s441_s11 + $0x138] sm:$0xff]  ;;  %v379_v51 = vld [vmem:[%s441_s11 + $0x1b0] sm:$0xff] }
  0x27   : > { %v191_v48 = vmax.f32 %v174_v39, %v363_v35  ;;  %265 = vst.msk [vmem:[%s479_s15 + $0x18] sm:$0xff] %vm261_vm0, %v256_v41  ;;  %v394_v54 = vld [vmem:[%s441_s11 + $0x228] sm:$0xff]  ;;  %v372_v56 = vld [vmem:[%s441_s11 + $0x178] sm:$0xff]  ;;  %v387_v58 = vld [vmem:[%s441_s11 + $0x1f0] sm:$0xff] }
  0x28   : > { %v240_v46 = vmax.f32 %v223_v37, %v385_v33  ;;  %v224_v50 = vmax.f32 %v207_v43, %v378_v38  ;;  %v175_v52 = vmax.f32 %v158_v45, %v356_v40  ;;  %v380_v61 = vld [vmem:[%s441_s11 + $0x1b8] sm:$0xff]  ;;  %v395_v63 = vld [vmem:[%s441_s11 + $0x230] sm:$0xff] }
  0x29   : > { %v208_v55 = vmax.f32 %v191_v48, %v371_v44  ;;  %v388_v2 = vld [vmem:[%s441_s11 + $0x1f8] sm:$0xff] }
  0x2a   : > { %v257_v53 = vmax.f32 %v240_v46, %v393_v42  ;;  %v241_v57 = vmax.f32 %v224_v50, %v386_v47  ;;  %v192_v59 = vmax.f32 %v175_v52, %v364_v49  ;;  %v396_v5 = vld [vmem:[%s441_s11 + $0x238] sm:$0xff] }
  0x2b   : > { %v225_v60 = vmax.f32 %v208_v55, %v379_v51 }
  0x2c   : > { %266 = vst.msk [vmem:[%s479_s15 + $0x20] sm:$0xff] %vm261_vm0, %v257_v53  ;;  %v258_v62 = vmax.f32 %v241_v57, %v394_v54  ;;  %v209_v0 = vmax.f32 %v192_v59, %v372_v56 }
  0x2d   : > { %v242_v1 = vmax.f32 %v225_v60, %v387_v58 }
  0x2e   : > { %267 = vst.msk [vmem:[%s479_s15 + $0x28] sm:$0xff] %vm261_vm0, %v258_v62  ;;  %v226_v3 = vmax.f32 %v209_v0, %v380_v61 }
  0x2f   : > { %v259_v4 = vmax.f32 %v242_v1, %v395_v63 }
  0x30   : > { %v243_v6 = vmax.f32 %v226_v3, %v388_v2 }
  0x31   : > { %268 = vst.msk [vmem:[%s479_s15 + $0x30] sm:$0xff] %vm261_vm0, %v259_v4 }
  0x32   : > { %v260_v7 = vmax.f32 %v243_v6, %v396_v5 }
  0x34   : > { %269 = vst.msk [vmem:[%s479_s15 + $0x38] sm:$0xff] %vm261_vm0, %v260_v7 }
  0x35 PF: > { %s11_s6 = sadd.s32 1, %s415_s6  }
  0x36   : > { %p8_p4 = scmp.ge.s32.totalorder %s11_s6, 4  }
  0x38   :  { %10 = sbr.rel (!%p8_p4) target bundleno = 1 (0x1), region = 62 }

// kernel: key_encoder_forward_pallas.22
= control target key start
LH: loop header
LB: loop body
LE: loop exit
PB: predicated region body
PF: predicated region fallthrough
CT: control target
= control target key end

     0   :  { %s2805_s12 = smov 0   ;;  %s2807_s13 = smov 0   ;;  %s3668_s0 = inlined_call_operand.vmem [shape: f32[2,2352,64], index: 0, kind: input, shape index: {}]   ;;  %s3669_s1 = inlined_call_operand.vmem [shape: f32[64,2352], index: 1, kind: input, shape index: {}]   ;;  %s3670_s2 = inlined_call_operand.vmem [shape: f32[64,1], index: 2, kind: input, shape index: {}]   ;;  %s3671_s3 = inlined_call_operand.vmem [shape: f32[2,64,64], index: 3, kind: output, shape index: {}]  }
   0x1   :  { %s2809_s14 = smov 0  }
   0x2 LB: > { %s25_s15 = sadd.s32 1, %s2778_s13  ;;  %p1875_p0 = scmp.ge.s32.totalorder %s2782_s14, 1  ;;  %s2782_s14 = sphi %s2809_s14, %s13_s14   ;;  %s2778_s13 = sphi %s2807_s13, %s3673_s13   ;;  %s2774_s12 = sphi %s2805_s12, %s3672_s12  }
   0x3   : > { %p27_p1 = scmp.ge.s32.totalorder %s25_s15, 2  ;;  %p156_p2 = scmp.lt.s32.totalorder %s2782_s14, 3 }
   0x5   : > { %s3675_s15 = smov (%p27_p1, %s25_s15), 0  ;;  %p157_p3 = pnand %p1875_p0, %p156_p2 }
   0x6   : > { %p186_p4 = scmp.lt.s32.totalorder (!%p157_p3), %s2774_s12, 1  ;;  %v203_v0 = vld [vmem:[%s3669_s1 + $0x8] sm:$0xff] (!%p157_p3)  ;;  %v205_v1 = vld [vmem:[%s3669_s1 + $0x18] sm:$0xff] (!%p157_p3)  ;;  %v2784_v2 = vmov (!%p157_p3), 0   ;;  %vm696_vm0 = vcmask (!%p157_p3), 392192   ;;  %vm1779_vm1 = vcmask (!%p157_p3), 523264  }
   0x7   : > { %160 = sbr.rel (%p157_p3) target bundleno = 432 (0x1b0), region = 32  ;;  %785 = vmatprep.mubr.f32.mxu0 (!%p157_p3), %v203_v0  ;;  %890 = vmatprep.mubr.f32.mxu1 (!%p157_p3), %v205_v1 }
   0x8   : > { %2758 = vset.pattern.permute.xlu0 (!%p157_p3), %v2784_v2  ;;  %2759 = vset.pattern.permute.xlu1 (!%p157_p3), %v2784_v2 }
   0xe   : > { %s3677_s12 = smov (!%p186_p4, %s2774_s12), 1 }
   0xf   : > { %s2732_s20 = smul.u32 2352, %s3677_s12  ;;  %s1889_s29 = sshll.u32 %s3677_s12, 6 }
  0x10   : > { %s3638_s5 = scalar_lea.vmem %s3671_s3, %s1889_s29 }
  0x11   : > { %s2835_s23 = scalar_lea.vmem %s3668_s0, %s2732_s20 }
  0x12   : > { %v370_v3 = vld [vmem:[%s2835_s23 + $0x80] sm:$0xff]  ;;  %v371_v4 = vld [vmem:[%s2835_s23 + $0x88] sm:$0xff]  ;;  %v372_v14 = vld [vmem:[%s2835_s23 + $0x90] sm:$0xff] }
  0x13   : > { %v354_v5 = vld [vmem:[%s2835_s23] sm:$0xff]  ;;  %v2432_v6 = vpack.c.bf16 %v371_v4, %v370_v3  ;;  %v355_v7 = vld [vmem:[%s2835_s23 + $0x8] sm:$0xff]  ;;  %v373_v16 = vld [vmem:[%s2835_s23 + $0x98] sm:$0xff] }
  0x14   : > { %v402_v8 = vld [vmem:[%s2835_s23 + $0x180] sm:$0xff]  ;;  %v403_v9 = vld [vmem:[%s2835_s23 + $0x188] sm:$0xff]  ;;  %v2434_v10 = vpack.c.bf16 %v355_v7, %v354_v5  ;;  %v356_v17 = vld [vmem:[%s2835_s23 + $0x10] sm:$0xff]  ;;  %v2436_v19 = vpack.c.bf16 %v373_v16, %v372_v14 }
  0x15   : > { %v2464_v11 = vpack.c.bf16 %v403_v9, %v402_v8  ;;  %v386_v12 = vld [vmem:[%s2835_s23 + $0x100] sm:$0xff]  ;;  %v387_v13 = vld [vmem:[%s2835_s23 + $0x108] sm:$0xff]  ;;  %2433 = vmatprep.subr.bf16.mxu0 %v2432_v6  ;;  %v357_v18 = vld [vmem:[%s2835_s23 + $0x18] sm:$0xff] }
  0x16   : > { %v2466_v15 = vpack.c.bf16 %v387_v13, %v386_v12  ;;  %2435 = vmatpush3.bf16.msra.mxu0 %v2434_v10  ;;  %v2438_v20 = vpack.c.bf16 %v357_v18, %v356_v17  ;;  %v404_v21 = vld [vmem:[%s2835_s23 + $0x190] sm:$0xff]  ;;  %v405_v22 = vld [vmem:[%s2835_s23 + $0x198] sm:$0xff]  ;;  %v374_v26 = vld [vmem:[%s2835_s23 + $0xa0] sm:$0xff] }
  0x17   : > { %2465 = vmatprep.subr.bf16.mxu1 %v2464_v11  ;;  %v388_v23 = vld [vmem:[%s2835_s23 + $0x110] sm:$0xff]  ;;  %v2468_v24 = vpack.c.bf16 %v405_v22, %v404_v21  ;;  %v389_v25 = vld [vmem:[%s2835_s23 + $0x118] sm:$0xff]  ;;  %v375_v27 = vld [vmem:[%s2835_s23 + $0xa8] sm:$0xff]  ;;  %2437 = vmatprep.subr.bf16.mxu0 %v2436_v19 }
  0x18   : > { %2467 = vmatpush3.bf16.msra.mxu1 %v2466_v15  ;;  %v2470_v28 = vpack.c.bf16 %v389_v25, %v388_v23  ;;  %v2440_v29 = vpack.c.bf16 %v375_v27, %v374_v26  ;;  %v358_v30 = vld [vmem:[%s2835_s23 + $0x20] sm:$0xff]  ;;  %v359_v31 = vld [vmem:[%s2835_s23 + $0x28] sm:$0xff]  ;;  %v376_v38 = vld [vmem:[%s2835_s23 + $0xb0] sm:$0xff] }
  0x19   : > { %v406_v32 = vld [vmem:[%s2835_s23 + $0x1a0] sm:$0xff]  ;;  %2469 = vmatprep.subr.bf16.mxu1 %v2468_v24  ;;  %v407_v33 = vld [vmem:[%s2835_s23 + $0x1a8] sm:$0xff]  ;;  %v2442_v36 = vpack.c.bf16 %v359_v31, %v358_v30  ;;  %v377_v39 = vld [vmem:[%s2835_s23 + $0xb8] sm:$0xff] }
  0x1a   : > { %v390_v34 = vld [vmem:[%s2835_s23 + $0x120] sm:$0xff]  ;;  %v391_v35 = vld [vmem:[%s2835_s23 + $0x128] sm:$0xff]  ;;  %2439 = vmatpush3.bf16.msra.mxu0 %v2438_v20  ;;  %v2472_v37 = vpack.c.bf16 %v407_v33, %v406_v32  ;;  %v360_v40 = vld [vmem:[%s2835_s23 + $0x30] sm:$0xff]  ;;  %v2444_v42 = vpack.c.bf16 %v377_v39, %v376_v38 }
  0x1b   : > { %2441 = vmatprep.subr.bf16.mxu0 %v2440_v29  ;;  %v2474_v41 = vpack.c.bf16 %v391_v35, %v390_v34  ;;  %v361_v43 = vld [vmem:[%s2835_s23 + $0x38] sm:$0xff]  ;;  %v408_v44 = vld [vmem:[%s2835_s23 + $0x1b0] sm:$0xff]  ;;  %v378_v49 = vld [vmem:[%s2835_s23 + $0xc0] sm:$0xff] }
  0x1c   : > { %2471 = vmatpush3.bf16.msra.mxu1 %v2470_v28  ;;  %v409_v45 = vld [vmem:[%s2835_s23 + $0x1b8] sm:$0xff]  ;;  %v392_v47 = vld [vmem:[%s2835_s23 + $0x130] sm:$0xff]  ;;  %v379_v50 = vld [vmem:[%s2835_s23 + $0xc8] sm:$0xff]  ;;  %v2446_v51 = vpack.c.bf16 %v361_v43, %v360_v40 }
  0x1d   : > { %2473 = vmatprep.subr.bf16.mxu1 %v2472_v37  ;;  %v2476_v46 = vpack.c.bf16 %v409_v45, %v408_v44  ;;  %v393_v48 = vld [vmem:[%s2835_s23 + $0x138] sm:$0xff]  ;;  %v410_v52 = vld [vmem:[%s2835_s23 + $0x1c0] sm:$0xff]  ;;  %v411_v53 = vld [vmem:[%s2835_s23 + $0x1c8] sm:$0xff]  ;;  %v2448_v55 = vpack.c.bf16 %v379_v50, %v378_v49 }
  0x1e   : > { %2443 = vmatpush3.bf16.msra.mxu0 %v2442_v36  ;;  %v2478_v54 = vpack.c.bf16 %v393_v48, %v392_v47  ;;  %v362_v56 = vld [vmem:[%s2835_s23 + $0x40] sm:$0xff]  ;;  %v363_v57 = vld [vmem:[%s2835_s23 + $0x48] sm:$0xff]  ;;  %v2480_v59 = vpack.c.bf16 %v411_v53, %v410_v52  ;;  %v380_v61 = vld [vmem:[%s2835_s23 + $0xd0] sm:$0xff] }
  0x1f   : > { %2445 = vmatprep.subr.bf16.mxu0 %v2444_v42  ;;  %v394_v58 = vld [vmem:[%s2835_s23 + $0x140] sm:$0xff]  ;;  %v395_v60 = vld [vmem:[%s2835_s23 + $0x148] sm:$0xff]  ;;  %v381_v62 = vld [vmem:[%s2835_s23 + $0xd8] sm:$0xff]  ;;  %v2450_v1 = vpack.c.bf16 %v363_v57, %v362_v56 }
  0x20   : > { %2475 = vmatpush3.bf16.msra.mxu1 %v2474_v41  ;;  %v412_v63 = vld [vmem:[%s2835_s23 + $0x1d0] sm:$0xff]  ;;  %v413_v0 = vld [vmem:[%s2835_s23 + $0x1d8] sm:$0xff]  ;;  %v2482_v2 = vpack.c.bf16 %v395_v60, %v394_v58  ;;  %v2452_v3 = vpack.c.bf16 %v381_v62, %v380_v61  ;;  %v382_v9 = vld [vmem:[%s2835_s23 + $0xe0] sm:$0xff] }
  0x21   : > { %2477 = vmatprep.subr.bf16.mxu1 %v2476_v46  ;;  %v364_v4 = vld [vmem:[%s2835_s23 + $0x50] sm:$0xff]  ;;  %v365_v5 = vld [vmem:[%s2835_s23 + $0x58] sm:$0xff]  ;;  %v2484_v7 = vpack.c.bf16 %v413_v0, %v412_v63  ;;  %v383_v10 = vld [vmem:[%s2835_s23 + $0xe8] sm:$0xff] }
  0x22   : > { %2447 = vmatpush3.bf16.msra.mxu0 %v2446_v51  ;;  %v396_v6 = vld [vmem:[%s2835_s23 + $0x150] sm:$0xff]  ;;  %v397_v8 = vld [vmem:[%s2835_s23 + $0x158] sm:$0xff]  ;;  %v414_v11 = vld [vmem:[%s2835_s23 + $0x1e0] sm:$0xff]  ;;  %v2454_v13 = vpack.c.bf16 %v365_v5, %v364_v4  ;;  %v2456_v15 = vpack.c.bf16 %v383_v10, %v382_v9 }
  0x23   : > { %2449 = vmatprep.subr.bf16.mxu0 %v2448_v55  ;;  %v415_v12 = vld [vmem:[%s2835_s23 + $0x1e8] sm:$0xff]  ;;  %v2486_v14 = vpack.c.bf16 %v397_v8, %v396_v6  ;;  %v366_v16 = vld [vmem:[%s2835_s23 + $0x60] sm:$0xff]  ;;  %v384_v21 = vld [vmem:[%s2835_s23 + $0xf0] sm:$0xff] }
  0x24   : > { %2479 = vmatpush3.bf16.msra.mxu1 %v2478_v54  ;;  %v367_v17 = vld [vmem:[%s2835_s23 + $0x68] sm:$0xff]  ;;  %v398_v18 = vld [vmem:[%s2835_s23 + $0x160] sm:$0xff]  ;;  %v2488_v19 = vpack.c.bf16 %v415_v12, %v414_v11  ;;  %v385_v22 = vld [vmem:[%s2835_s23 + $0xf8] sm:$0xff] }
  0x25   : > { %2481 = vmatprep.subr.bf16.mxu1 %v2480_v59  ;;  %v399_v20 = vld [vmem:[%s2835_s23 + $0x168] sm:$0xff]  ;;  %v416_v23 = vld [vmem:[%s2835_s23 + $0x1f0] sm:$0xff]  ;;  %v417_v24 = vld [vmem:[%s2835_s23 + $0x1f8] sm:$0xff]  ;;  %v2458_v25 = vpack.c.bf16 %v367_v17, %v366_v16  ;;  %v2460_v27 = vpack.c.bf16 %v385_v22, %v384_v21 }
  0x26   : > { %2451 = vmatpush3.bf16.msra.mxu0 %v2450_v1  ;;  %v2490_v26 = vpack.c.bf16 %v399_v20, %v398_v18  ;;  %v368_v28 = vld [vmem:[%s2835_s23 + $0x70] sm:$0xff]  ;;  %v369_v29 = vld [vmem:[%s2835_s23 + $0x78] sm:$0xff]  ;;  %v2492_v31 = vpack.c.bf16 %v417_v24, %v416_v23  ;;  %v434_v33 = vld [vmem:[%s2835_s23 + $0x280] sm:$0xff] }
  0x27   : > { %2453 = vmatprep.subr.bf16.mxu0 %v2452_v3  ;;  %v400_v30 = vld [vmem:[%s2835_s23 + $0x170] sm:$0xff]  ;;  %v401_v32 = vld [vmem:[%s2835_s23 + $0x178] sm:$0xff]  ;;  %v435_v34 = vld [vmem:[%s2835_s23 + $0x288] sm:$0xff]  ;;  %v2462_v37 = vpack.c.bf16 %v369_v29, %v368_v28 }
  0x28   : > { %2483 = vmatpush3.bf16.msra.mxu1 %v2482_v2  ;;  %v466_v35 = vld [vmem:[%s2835_s23 + $0x380] sm:$0xff]  ;;  %v467_v36 = vld [vmem:[%s2835_s23 + $0x388] sm:$0xff]  ;;  %v2494_v38 = vpack.c.bf16 %v401_v32, %v400_v30  ;;  %v2496_v39 = vpack.c.bf16 %v435_v34, %v434_v33  ;;  %v436_v45 = vld [vmem:[%s2835_s23 + $0x290] sm:$0xff] }
  0x29   : > { %2485 = vmatprep.subr.bf16.mxu1 %v2484_v7  ;;  %v418_v40 = vld [vmem:[%s2835_s23 + $0x200] sm:$0xff]  ;;  %v419_v41 = vld [vmem:[%s2835_s23 + $0x208] sm:$0xff]  ;;  %v2528_v42 = vpack.c.bf16 %v467_v36, %v466_v35  ;;  %v437_v46 = vld [vmem:[%s2835_s23 + $0x298] sm:$0xff] }
  0x2a   : > { %2455 = vmatpush3.bf16.msra.mxu0 %v2454_v13  ;;  %v450_v43 = vld [vmem:[%s2835_s23 + $0x300] sm:$0xff]  ;;  %v451_v44 = vld [vmem:[%s2835_s23 + $0x308] sm:$0xff]  ;;  %v2498_v48 = vpack.c.bf16 %v419_v41, %v418_v40  ;;  %v468_v49 = vld [vmem:[%s2835_s23 + $0x390] sm:$0xff]  ;;  %v2500_v56 = vpack.c.bf16 %v437_v46, %v436_v45 }
  0x2b   : > { %2457 = vmatprep.subr.bf16.mxu0 %v2456_v15  ;;  %v202_v47 = vld [vmem:[%s3669_s1] sm:$0xff]  ;;  %v469_v50 = vld [vmem:[%s2835_s23 + $0x398] sm:$0xff]  ;;  %v204_v51 = vld [vmem:[%s3669_s1 + $0x10] sm:$0xff]  ;;  %v2530_v52 = vpack.c.bf16 %v451_v44, %v450_v43 }
  0x2c   : > { %2487 = vmatpush3.bf16.msra.mxu1 %v2486_v14  ;;  %v420_v53 = vld [vmem:[%s2835_s23 + $0x210] sm:$0xff]  ;;  %v421_v54 = vld [vmem:[%s2835_s23 + $0x218] sm:$0xff]  ;;  %v222_v55 = vld [vmem:[%s3669_s1 + $0xa0] sm:$0xff]  ;;  %v2532_v60 = vpack.c.bf16 %v469_v50, %v468_v49 }
  0x2d   : > { %2489 = vmatprep.subr.bf16.mxu1 %v2488_v19  ;;  %v452_v57 = vld [vmem:[%s2835_s23 + $0x310] sm:$0xff]  ;;  %v453_v58 = vld [vmem:[%s2835_s23 + $0x318] sm:$0xff]  ;;  %v438_v61 = vld [vmem:[%s2835_s23 + $0x2a0] sm:$0xff]  ;;  %v2502_v0 = vpack.c.bf16 %v421_v54, %v420_v53 }
  0x2e   : > { %2459 = vmatpush3.bf16.msra.mxu0 %v2458_v25  ;;  %v224_v59 = vld [vmem:[%s3669_s1 + $0xb0] sm:$0xff]  ;;  %v439_v62 = vld [vmem:[%s2835_s23 + $0x2a8] sm:$0xff]  ;;  %v221_v63 = vld [vmem:[%s3669_s1 + $0x98] sm:$0xff]  ;;  %v2534_v4 = vpack.c.bf16 %v453_v58, %v452_v57 }
  0x2f   : > { %2461 = vmatprep.subr.bf16.mxu0 %v2460_v27  ;;  %v470_v1 = vld [vmem:[%s2835_s23 + $0x3a0] sm:$0xff]  ;;  %v471_v2 = vld [vmem:[%s2835_s23 + $0x3a8] sm:$0xff]  ;;  %v241_v7 = vld [vmem:[%s3669_s1 + $0x138] sm:$0xff]  ;;  %v2504_v8 = vpack.c.bf16 %v439_v62, %v438_v61 }
  0x30   : > { %2491 = vmatpush3.bf16.msra.mxu1 %v2490_v26  ;;  %v223_v3 = vld [vmem:[%s3669_s1 + $0xa8] sm:$0xff]  ;;  %v422_v5 = vld [vmem:[%s2835_s23 + $0x220] sm:$0xff]  ;;  %v2536_v12 = vpack.c.bf16 %v471_v2, %v470_v1  ;;  %v440_v13 = vld [vmem:[%s2835_s23 + $0x2b0] sm:$0xff] }
  0x31   : > { %2493 = vmatprep.subr.bf16.mxu1 %v2492_v31  ;;  %v423_v6 = vld [vmem:[%s2835_s23 + $0x228] sm:$0xff]  ;;  %v454_v9 = vld [vmem:[%s2835_s23 + $0x320] sm:$0xff]  ;;  %v441_v14 = vld [vmem:[%s2835_s23 + $0x2b8] sm:$0xff] }
  0x32   : > { %2463 = vmatpush3.bf16.msra.mxu0 %v2462_v37  ;;  %v455_v10 = vld [vmem:[%s2835_s23 + $0x328] sm:$0xff]  ;;  %v240_v15 = vld [vmem:[%s3669_s1 + $0x130] sm:$0xff]  ;;  %v2506_v16 = vpack.c.bf16 %v423_v6, %v422_v5  ;;  %v473_v18 = vld [vmem:[%s2835_s23 + $0x3b8] sm:$0xff]  ;;  %v2508_v24 = vpack.c.bf16 %v441_v14, %v440_v13 }
  0x33   : > { %2497 = vmatprep.subr.bf16.mxu0 %v2496_v39  ;;  %v243_v11 = vld [vmem:[%s3669_s1 + $0x148] sm:$0xff]  ;;  %v472_v17 = vld [vmem:[%s2835_s23 + $0x3b0] sm:$0xff]  ;;  %v242_v19 = vld [vmem:[%s3669_s1 + $0x140] sm:$0xff]  ;;  %v2538_v20 = vpack.c.bf16 %v455_v10, %v454_v9 }
  0x34   : > { %2495 = vmatpush3.bf16.msra.mxu1 %v2494_v38  ;;  %v424_v21 = vld [vmem:[%s2835_s23 + $0x230] sm:$0xff]  ;;  %v425_v22 = vld [vmem:[%s2835_s23 + $0x238] sm:$0xff]  ;;  %v262_v27 = vld [vmem:[%s3669_s1 + $0x1e0] sm:$0xff]  ;;  %v2540_v28 = vpack.c.bf16 %v473_v18, %v472_v17 }
  0x35   : > { %2529 = vmatprep.subr.bf16.mxu1 %v2528_v42  ;;  %786 = vmatmul.mubr.f32.vlgmr.msra.gmra.mrb[0].mxu0 %v202_v47  ;;  %v260_v23 = vld [vmem:[%s3669_s1 + $0x1d0] sm:$0xff]  ;;  %v457_v26 = vld [vmem:[%s2835_s23 + $0x338] sm:$0xff]  ;;  %v442_v29 = vld [vmem:[%s2835_s23 + $0x2c0] sm:$0xff]  ;;  %v2510_v32 = vpack.c.bf16 %v425_v22, %v424_v21 }
  0x36   : > { %2499 = vmatpush3.bf16.msra.mxu0 %v2498_v48  ;;  %790 = vmatprep.mubr.f32.mxu0 %v222_v55  ;;  %v456_v25 = vld [vmem:[%s2835_s23 + $0x330] sm:$0xff]  ;;  %v443_v30 = vld [vmem:[%s2835_s23 + $0x2c8] sm:$0xff]  ;;  %v474_v33 = vld [vmem:[%s2835_s23 + $0x3c0] sm:$0xff] }
  0x37   : > { %891 = vmatmul.mubr.f32.vlgmr.msra.gmra.mrb[0].mxu1 %v204_v51  ;;  %2501 = vmatprep.subr.bf16.mxu0 %v2500_v56  ;;  %v259_v31 = vld [vmem:[%s3669_s1 + $0x1c8] sm:$0xff]  ;;  %v261_v35 = vld [vmem:[%s3669_s1 + $0x1d8] sm:$0xff]  ;;  %v2542_v36 = vpack.c.bf16 %v457_v26, %v456_v25  ;;  %v426_v37 = vld [vmem:[%s2835_s23 + $0x240] sm:$0xff]  ;;  %v2512_v40 = vpack.c.bf16 %v443_v30, %v442_v29 }
  0x38   : > { %2531 = vmatpush3.bf16.msra.mxu1 %v2530_v52  ;;  %895 = vmatprep.mubr.f32.mxu1 %v224_v59  ;;  %v475_v34 = vld [vmem:[%s2835_s23 + $0x3c8] sm:$0xff]  ;;  %v458_v41 = vld [vmem:[%s2835_s23 + $0x340] sm:$0xff]  ;;  %v281_v43 = vld [vmem:[%s3669_s1 + $0x278] sm:$0xff] }
  0x39   : > { %791 = vmatmul.mubr.f32.gmra.mrb[2].mxu0 %v221_v63  ;;  %2533 = vmatprep.subr.bf16.mxu1 %v2532_v60  ;;  %v427_v38 = vld [vmem:[%s2835_s23 + $0x248] sm:$0xff]  ;;  %v2544_v44 = vpack.c.bf16 %v475_v34, %v474_v33  ;;  %v444_v45 = vld [vmem:[%s2835_s23 + $0x2d0] sm:$0xff]  ;;  %v445_v46 = vld [vmem:[%s2835_s23 + $0x2d8] sm:$0xff] }
  0x3a   : > { %2503 = vmatpush3.bf16.msra.mxu0 %v2502_v0  ;;  %795 = vmatprep.mubr.f32.mxu0 %v241_v7  ;;  %v279_v39 = vld [vmem:[%s3669_s1 + $0x268] sm:$0xff]  ;;  %v278_v47 = vld [vmem:[%s3669_s1 + $0x260] sm:$0xff]  ;;  %v2514_v48 = vpack.c.bf16 %v427_v38, %v426_v37  ;;  %v476_v49 = vld [vmem:[%s2835_s23 + $0x3d0] sm:$0xff]  ;;  %v2516_v56 = vpack.c.bf16 %v445_v46, %v444_v45 }
  0x3b   : > { %896 = vmatmul.mubr.f32.gmra.mrb[2].mxu1 %v223_v3  ;;  %2505 = vmatprep.subr.bf16.mxu0 %v2504_v8  ;;  %v459_v42 = vld [vmem:[%s2835_s23 + $0x348] sm:$0xff]  ;;  %v477_v50 = vld [vmem:[%s2835_s23 + $0x3d8] sm:$0xff]  ;;  %v280_v51 = vld [vmem:[%s3669_s1 + $0x270] sm:$0xff] }
  0x3c   : > { %2535 = vmatpush3.bf16.msra.mxu1 %v2534_v4  ;;  %900 = vmatprep.mubr.f32.mxu1 %v243_v11  ;;  %v2546_v52 = vpack.c.bf16 %v459_v42, %v458_v41  ;;  %v428_v53 = vld [vmem:[%s2835_s23 + $0x250] sm:$0xff]  ;;  %v429_v54 = vld [vmem:[%s2835_s23 + $0x258] sm:$0xff]  ;;  %v298_v55 = vld [vmem:[%s3669_s1 + $0x300] sm:$0xff]  ;;  %v2548_v60 = vpack.c.bf16 %v477_v50, %v476_v49 }
  0x3d   : > { %796 = vmatmul.mubr.f32.gmra.mrb[4].mxu0 %v240_v15  ;;  %2537 = vmatprep.subr.bf16.mxu1 %v2536_v12  ;;  %v460_v57 = vld [vmem:[%s2835_s23 + $0x350] sm:$0xff]  ;;  %v461_v58 = vld [vmem:[%s2835_s23 + $0x358] sm:$0xff]  ;;  %v446_v61 = vld [vmem:[%s2835_s23 + $0x2e0] sm:$0xff]  ;;  %v2518_v0 = vpack.c.bf16 %v429_v54, %v428_v53 }
  0x3e   : > { %2507 = vmatpush3.bf16.msra.mxu0 %v2506_v16  ;;  %800 = vmatprep.mubr.f32.mxu0 %v260_v23  ;;  %v300_v59 = vld [vmem:[%s3669_s1 + $0x310] sm:$0xff]  ;;  %v447_v62 = vld [vmem:[%s2835_s23 + $0x2e8] sm:$0xff]  ;;  %v297_v63 = vld [vmem:[%s3669_s1 + $0x2f8] sm:$0xff]  ;;  %v2550_v4 = vpack.c.bf16 %v461_v58, %v460_v57 }
  0x3f   : > { %901 = vmatmul.mubr.f32.gmra.mrb[4].mxu1 %v242_v19  ;;  %2509 = vmatprep.subr.bf16.mxu0 %v2508_v24  ;;  %v478_v1 = vld [vmem:[%s2835_s23 + $0x3e0] sm:$0xff]  ;;  %v479_v2 = vld [vmem:[%s2835_s23 + $0x3e8] sm:$0xff]  ;;  %v317_v7 = vld [vmem:[%s3669_s1 + $0x398] sm:$0xff]  ;;  %v2520_v8 = vpack.c.bf16 %v447_v62, %v446_v61 }
  0x40   : > { %2539 = vmatpush3.bf16.msra.mxu1 %v2538_v20  ;;  %905 = vmatprep.mubr.f32.mxu1 %v262_v27  ;;  %v299_v3 = vld [vmem:[%s3669_s1 + $0x308] sm:$0xff]  ;;  %v430_v5 = vld [vmem:[%s2835_s23 + $0x260] sm:$0xff]  ;;  %v2552_v12 = vpack.c.bf16 %v479_v2, %v478_v1  ;;  %v448_v13 = vld [vmem:[%s2835_s23 + $0x2f0] sm:$0xff] }
  0x41   : > { %801 = vmatmul.mubr.f32.gmra.mrb[6].mxu0 %v259_v31  ;;  %2541 = vmatprep.subr.bf16.mxu1 %v2540_v28  ;;  %v431_v6 = vld [vmem:[%s2835_s23 + $0x268] sm:$0xff]  ;;  %v462_v9 = vld [vmem:[%s2835_s23 + $0x360] sm:$0xff]  ;;  %v449_v14 = vld [vmem:[%s2835_s23 + $0x2f8] sm:$0xff] }
  0x42   : > { %2511 = vmatpush3.bf16.msra.mxu0 %v2510_v32  ;;  %805 = vmatprep.mubr.f32.mxu0 %v279_v39  ;;  %v463_v10 = vld [vmem:[%s2835_s23 + $0x368] sm:$0xff]  ;;  %v316_v15 = vld [vmem:[%s3669_s1 + $0x390] sm:$0xff]  ;;  %v2522_v16 = vpack.c.bf16 %v431_v6, %v430_v5  ;;  %v481_v18 = vld [vmem:[%s2835_s23 + $0x3f8] sm:$0xff]  ;;  %v2524_v24 = vpack.c.bf16 %v449_v14, %v448_v13 }
  0x43   : > { %906 = vmatmul.mubr.f32.gmra.mrb[6].mxu1 %v261_v35  ;;  %2513 = vmatprep.subr.bf16.mxu0 %v2512_v40  ;;  %v319_v11 = vld [vmem:[%s3669_s1 + $0x3a8] sm:$0xff]  ;;  %v480_v17 = vld [vmem:[%s2835_s23 + $0x3f0] sm:$0xff]  ;;  %v318_v19 = vld [vmem:[%s3669_s1 + $0x3a0] sm:$0xff]  ;;  %v2554_v20 = vpack.c.bf16 %v463_v10, %v462_v9 }
  0x44   : > { %2543 = vmatpush3.bf16.msra.mxu1 %v2542_v36  ;;  %910 = vmatprep.mubr.f32.mxu1 %v281_v43  ;;  %v432_v21 = vld [vmem:[%s2835_s23 + $0x270] sm:$0xff]  ;;  %v433_v22 = vld [vmem:[%s2835_s23 + $0x278] sm:$0xff]  ;;  %v338_v27 = vld [vmem:[%s3669_s1 + $0x440] sm:$0xff]  ;;  %v2556_v28 = vpack.c.bf16 %v481_v18, %v480_v17 }
  0x45   : > { %806 = vmatmul.mubr.f32.gmra.mrb[8].mxu0 %v278_v47  ;;  %2545 = vmatprep.subr.bf16.mxu1 %v2544_v44  ;;  %v336_v23 = vld [vmem:[%s3669_s1 + $0x430] sm:$0xff]  ;;  %v465_v26 = vld [vmem:[%s2835_s23 + $0x378] sm:$0xff]  ;;  %v498_v29 = vld [vmem:[%s2835_s23 + $0x480] sm:$0xff]  ;;  %v2526_v32 = vpack.c.bf16 %v433_v22, %v432_v21 }
  0x46   : > { %2515 = vmatpush3.bf16.msra.mxu0 %v2514_v48  ;;  %810 = vmatprep.mubr.f32.mxu0 %v298_v55  ;;  %v464_v25 = vld [vmem:[%s2835_s23 + $0x370] sm:$0xff]  ;;  %v499_v30 = vld [vmem:[%s2835_s23 + $0x488] sm:$0xff]  ;;  %v530_v33 = vld [vmem:[%s2835_s23 + $0x580] sm:$0xff] }
  0x47   : > { %911 = vmatmul.mubr.f32.gmra.mrb[8].mxu1 %v280_v51  ;;  %2517 = vmatprep.subr.bf16.mxu0 %v2516_v56  ;;  %v335_v31 = vld [vmem:[%s3669_s1 + $0x428] sm:$0xff]  ;;  %v337_v35 = vld [vmem:[%s3669_s1 + $0x438] sm:$0xff]  ;;  %v2558_v36 = vpack.c.bf16 %v465_v26, %v464_v25  ;;  %v482_v37 = vld [vmem:[%s2835_s23 + $0x400] sm:$0xff]  ;;  %v2560_v40 = vpack.c.bf16 %v499_v30, %v498_v29 }
  0x48   : > { %2547 = vmatpush3.bf16.msra.mxu1 %v2546_v52  ;;  %915 = vmatprep.mubr.f32.mxu1 %v300_v59  ;;  %v531_v34 = vld [vmem:[%s2835_s23 + $0x588] sm:$0xff]  ;;  %v514_v41 = vld [vmem:[%s2835_s23 + $0x500] sm:$0xff]  ;;  %v209_v43 = vld [vmem:[%s3669_s1 + $0x38] sm:$0xff] }
  0x49   : > { %811 = vmatmul.mubr.f32.gmra.mrb[10].mxu0 %v297_v63  ;;  %2549 = vmatprep.subr.bf16.mxu1 %v2548_v60  ;;  %v483_v38 = vld [vmem:[%s2835_s23 + $0x408] sm:$0xff]  ;;  %v2592_v44 = vpack.c.bf16 %v531_v34, %v530_v33  ;;  %v500_v45 = vld [vmem:[%s2835_s23 + $0x490] sm:$0xff]  ;;  %v501_v46 = vld [vmem:[%s2835_s23 + $0x498] sm:$0xff] }
  0x4a   : > { %2519 = vmatpush3.bf16.msra.mxu0 %v2518_v0  ;;  %815 = vmatprep.mubr.f32.mxu0 %v317_v7  ;;  %v207_v39 = vld [vmem:[%s3669_s1 + $0x28] sm:$0xff]  ;;  %v206_v47 = vld [vmem:[%s3669_s1 + $0x20] sm:$0xff]  ;;  %v2562_v48 = vpack.c.bf16 %v483_v38, %v482_v37  ;;  %v532_v49 = vld [vmem:[%s2835_s23 + $0x590] sm:$0xff]  ;;  %v2564_v56 = vpack.c.bf16 %v501_v46, %v500_v45 }
  0x4b   : > { %916 = vmatmul.mubr.f32.gmra.mrb[10].mxu1 %v299_v3  ;;  %2521 = vmatprep.subr.bf16.mxu0 %v2520_v8  ;;  %v515_v42 = vld [vmem:[%s2835_s23 + $0x508] sm:$0xff]  ;;  %v533_v50 = vld [vmem:[%s2835_s23 + $0x598] sm:$0xff]  ;;  %v208_v51 = vld [vmem:[%s3669_s1 + $0x30] sm:$0xff] }
  0x4c   : > { %2551 = vmatpush3.bf16.msra.mxu1 %v2550_v4  ;;  %920 = vmatprep.mubr.f32.mxu1 %v319_v11  ;;  %v2594_v52 = vpack.c.bf16 %v515_v42, %v514_v41  ;;  %v484_v53 = vld [vmem:[%s2835_s23 + $0x410] sm:$0xff]  ;;  %v485_v54 = vld [vmem:[%s2835_s23 + $0x418] sm:$0xff]  ;;  %v226_v55 = vld [vmem:[%s3669_s1 + $0xc0] sm:$0xff]  ;;  %v2596_v60 = vpack.c.bf16 %v533_v50, %v532_v49 }
  0x4d   : > { %816 = vmatmul.mubr.f32.gmra.mrb[12].mxu0 %v316_v15  ;;  %2553 = vmatprep.subr.bf16.mxu1 %v2552_v12  ;;  %v516_v57 = vld [vmem:[%s2835_s23 + $0x510] sm:$0xff]  ;;  %v517_v58 = vld [vmem:[%s2835_s23 + $0x518] sm:$0xff]  ;;  %v502_v61 = vld [vmem:[%s2835_s23 + $0x4a0] sm:$0xff]  ;;  %v2566_v0 = vpack.c.bf16 %v485_v54, %v484_v53 }
  0x4e   : > { %2523 = vmatpush3.bf16.msra.mxu0 %v2522_v16  ;;  %820 = vmatprep.mubr.f32.mxu0 %v336_v23  ;;  %v228_v59 = vld [vmem:[%s3669_s1 + $0xd0] sm:$0xff]  ;;  %v503_v62 = vld [vmem:[%s2835_s23 + $0x4a8] sm:$0xff]  ;;  %v225_v63 = vld [vmem:[%s3669_s1 + $0xb8] sm:$0xff]  ;;  %v2598_v4 = vpack.c.bf16 %v517_v58, %v516_v57 }
  0x4f   : > { %921 = vmatmul.mubr.f32.gmra.mrb[12].mxu1 %v318_v19  ;;  %2525 = vmatprep.subr.bf16.mxu0 %v2524_v24  ;;  %v534_v1 = vld [vmem:[%s2835_s23 + $0x5a0] sm:$0xff]  ;;  %v535_v2 = vld [vmem:[%s2835_s23 + $0x5a8] sm:$0xff]  ;;  %v245_v7 = vld [vmem:[%s3669_s1 + $0x158] sm:$0xff]  ;;  %v2568_v8 = vpack.c.bf16 %v503_v62, %v502_v61 }
  0x50   : > { %2555 = vmatpush3.bf16.msra.mxu1 %v2554_v20  ;;  %925 = vmatprep.mubr.f32.mxu1 %v338_v27  ;;  %v227_v3 = vld [vmem:[%s3669_s1 + $0xc8] sm:$0xff]  ;;  %v486_v5 = vld [vmem:[%s2835_s23 + $0x420] sm:$0xff]  ;;  %v2600_v12 = vpack.c.bf16 %v535_v2, %v534_v1  ;;  %v504_v13 = vld [vmem:[%s2835_s23 + $0x4b0] sm:$0xff] }
  0x51   : > { %821 = vmatmul.mubr.f32.gmra.mrb[14].mxu0 %v335_v31  ;;  %2557 = vmatprep.subr.bf16.mxu1 %v2556_v28  ;;  %v487_v6 = vld [vmem:[%s2835_s23 + $0x428] sm:$0xff]  ;;  %v518_v9 = vld [vmem:[%s2835_s23 + $0x520] sm:$0xff]  ;;  %v505_v14 = vld [vmem:[%s2835_s23 + $0x4b8] sm:$0xff] }
  0x52   : > { %2527 = vmatpush3.bf16.msra.mxu0 %v2526_v32  ;;  %995 = vmatprep.mubr.f32.mxu0 %v207_v39  ;;  %v519_v10 = vld [vmem:[%s2835_s23 + $0x528] sm:$0xff]  ;;  %v244_v15 = vld [vmem:[%s3669_s1 + $0x150] sm:$0xff]  ;;  %v2570_v16 = vpack.c.bf16 %v487_v6, %v486_v5  ;;  %v537_v18 = vld [vmem:[%s2835_s23 + $0x5b8] sm:$0xff]  ;;  %v2572_v24 = vpack.c.bf16 %v505_v14, %v504_v13 }
  0x53   : > { %926 = vmatmul.mubr.f32.gmra.mrb[14].mxu1 %v337_v35  ;;  %2561 = vmatprep.subr.bf16.mxu0 %v2560_v40  ;;  %v247_v11 = vld [vmem:[%s3669_s1 + $0x168] sm:$0xff]  ;;  %v536_v17 = vld [vmem:[%s2835_s23 + $0x5b0] sm:$0xff]  ;;  %v246_v19 = vld [vmem:[%s3669_s1 + $0x160] sm:$0xff]  ;;  %v2602_v20 = vpack.c.bf16 %v519_v10, %v518_v9 }
  0x54   : > { %2559 = vmatpush3.bf16.msra.mxu1 %v2558_v36  ;;  %1100 = vmatprep.mubr.f32.mxu1 %v209_v43  ;;  %v488_v21 = vld [vmem:[%s2835_s23 + $0x430] sm:$0xff]  ;;  %v489_v22 = vld [vmem:[%s2835_s23 + $0x438] sm:$0xff]  ;;  %v266_v27 = vld [vmem:[%s3669_s1 + $0x200] sm:$0xff]  ;;  %v2604_v28 = vpack.c.bf16 %v537_v18, %v536_v17 }
  0x55   : > { %996 = vmatmul.mubr.f32.vlgmr.msra.gmra.mrb[16].mxu0 %v206_v47  ;;  %2593 = vmatprep.subr.bf16.mxu1 %v2592_v44  ;;  %v264_v23 = vld [vmem:[%s3669_s1 + $0x1f0] sm:$0xff]  ;;  %v521_v26 = vld [vmem:[%s2835_s23 + $0x538] sm:$0xff]  ;;  %v506_v29 = vld [vmem:[%s2835_s23 + $0x4c0] sm:$0xff]  ;;  %v2574_v32 = vpack.c.bf16 %v489_v22, %v488_v21 }
  0x56   : > { %2563 = vmatpush3.bf16.msra.mxu0 %v2562_v48  ;;  %1000 = vmatprep.mubr.f32.mxu0 %v226_v55  ;;  %v520_v25 = vld [vmem:[%s2835_s23 + $0x530] sm:$0xff]  ;;  %v507_v30 = vld [vmem:[%s2835_s23 + $0x4c8] sm:$0xff]  ;;  %v538_v33 = vld [vmem:[%s2835_s23 + $0x5c0] sm:$0xff] }
  0x57   : > { %1101 = vmatmul.mubr.f32.vlgmr.msra.gmra.mrb[16].mxu1 %v208_v51  ;;  %2565 = vmatprep.subr.bf16.mxu0 %v2564_v56  ;;  %v263_v31 = vld [vmem:[%s3669_s1 + $0x1e8] sm:$0xff]  ;;  %v265_v35 = vld [vmem:[%s3669_s1 + $0x1f8] sm:$0xff]  ;;  %v2606_v36 = vpack.c.bf16 %v521_v26, %v520_v25  ;;  %v490_v37 = vld [vmem:[%s2835_s23 + $0x440] sm:$0xff]  ;;  %v2576_v40 = vpack.c.bf16 %v507_v30, %v506_v29 }
  0x58   : > { %2595 = vmatpush3.bf16.msra.mxu1 %v2594_v52  ;;  %1105 = vmatprep.mubr.f32.mxu1 %v228_v59  ;;  %v539_v34 = vld [vmem:[%s2835_s23 + $0x5c8] sm:$0xff]  ;;  %v522_v41 = vld [vmem:[%s2835_s23 + $0x540] sm:$0xff]  ;;  %v285_v43 = vld [vmem:[%s3669_s1 + $0x298] sm:$0xff] }
  0x59   : > { %1001 = vmatmul.mubr.f32.gmra.mrb[18].mxu0 %v225_v63  ;;  %2597 = vmatprep.subr.bf16.mxu1 %v2596_v60  ;;  %v491_v38 = vld [vmem:[%s2835_s23 + $0x448] sm:$0xff]  ;;  %v2608_v44 = vpack.c.bf16 %v539_v34, %v538_v33  ;;  %v508_v45 = vld [vmem:[%s2835_s23 + $0x4d0] sm:$0xff]  ;;  %v509_v46 = vld [vmem:[%s2835_s23 + $0x4d8] sm:$0xff] }
  0x5a   : > { %2567 = vmatpush3.bf16.msra.mxu0 %v2566_v0  ;;  %1005 = vmatprep.mubr.f32.mxu0 %v245_v7  ;;  %v283_v39 = vld [vmem:[%s3669_s1 + $0x288] sm:$0xff]  ;;  %v282_v47 = vld [vmem:[%s3669_s1 + $0x280] sm:$0xff]  ;;  %v2578_v48 = vpack.c.bf16 %v491_v38, %v490_v37  ;;  %v540_v49 = vld [vmem:[%s2835_s23 + $0x5d0] sm:$0xff]  ;;  %v2580_v56 = vpack.c.bf16 %v509_v46, %v508_v45 }
  0x5b   : > { %1106 = vmatmul.mubr.f32.gmra.mrb[18].mxu1 %v227_v3  ;;  %2569 = vmatprep.subr.bf16.mxu0 %v2568_v8  ;;  %v523_v42 = vld [vmem:[%s2835_s23 + $0x548] sm:$0xff]  ;;  %v541_v50 = vld [vmem:[%s2835_s23 + $0x5d8] sm:$0xff]  ;;  %v284_v51 = vld [vmem:[%s3669_s1 + $0x290] sm:$0xff] }
  0x5c   : > { %2599 = vmatpush3.bf16.msra.mxu1 %v2598_v4  ;;  %1110 = vmatprep.mubr.f32.mxu1 %v247_v11  ;;  %v2610_v52 = vpack.c.bf16 %v523_v42, %v522_v41  ;;  %v492_v53 = vld [vmem:[%s2835_s23 + $0x450] sm:$0xff]  ;;  %v493_v54 = vld [vmem:[%s2835_s23 + $0x458] sm:$0xff]  ;;  %v302_v55 = vld [vmem:[%s3669_s1 + $0x320] sm:$0xff]  ;;  %v2612_v60 = vpack.c.bf16 %v541_v50, %v540_v49 }
  0x5d   : > { %1006 = vmatmul.mubr.f32.gmra.mrb[20].mxu0 %v244_v15  ;;  %2601 = vmatprep.subr.bf16.mxu1 %v2600_v12  ;;  %v524_v57 = vld [vmem:[%s2835_s23 + $0x550] sm:$0xff]  ;;  %v525_v58 = vld [vmem:[%s2835_s23 + $0x558] sm:$0xff]  ;;  %v510_v61 = vld [vmem:[%s2835_s23 + $0x4e0] sm:$0xff]  ;;  %v2582_v0 = vpack.c.bf16 %v493_v54, %v492_v53 }
  0x5e   : > { %2571 = vmatpush3.bf16.msra.mxu0 %v2570_v16  ;;  %1010 = vmatprep.mubr.f32.mxu0 %v264_v23  ;;  %v304_v59 = vld [vmem:[%s3669_s1 + $0x330] sm:$0xff]  ;;  %v511_v62 = vld [vmem:[%s2835_s23 + $0x4e8] sm:$0xff]  ;;  %v301_v63 = vld [vmem:[%s3669_s1 + $0x318] sm:$0xff]  ;;  %v2614_v4 = vpack.c.bf16 %v525_v58, %v524_v57 }
  0x5f   : > { %1111 = vmatmul.mubr.f32.gmra.mrb[20].mxu1 %v246_v19  ;;  %2573 = vmatprep.subr.bf16.mxu0 %v2572_v24  ;;  %v542_v1 = vld [vmem:[%s2835_s23 + $0x5e0] sm:$0xff]  ;;  %v543_v2 = vld [vmem:[%s2835_s23 + $0x5e8] sm:$0xff]  ;;  %v321_v7 = vld [vmem:[%s3669_s1 + $0x3b8] sm:$0xff]  ;;  %v2584_v8 = vpack.c.bf16 %v511_v62, %v510_v61 }
  0x60   : > { %2603 = vmatpush3.bf16.msra.mxu1 %v2602_v20  ;;  %1115 = vmatprep.mubr.f32.mxu1 %v266_v27  ;;  %v303_v3 = vld [vmem:[%s3669_s1 + $0x328] sm:$0xff]  ;;  %v494_v5 = vld [vmem:[%s2835_s23 + $0x460] sm:$0xff]  ;;  %v2616_v12 = vpack.c.bf16 %v543_v2, %v542_v1  ;;  %v512_v13 = vld [vmem:[%s2835_s23 + $0x4f0] sm:$0xff] }
  0x61   : > { %1011 = vmatmul.mubr.f32.gmra.mrb[22].mxu0 %v263_v31  ;;  %2605 = vmatprep.subr.bf16.mxu1 %v2604_v28  ;;  %v495_v6 = vld [vmem:[%s2835_s23 + $0x468] sm:$0xff]  ;;  %v526_v9 = vld [vmem:[%s2835_s23 + $0x560] sm:$0xff]  ;;  %v513_v14 = vld [vmem:[%s2835_s23 + $0x4f8] sm:$0xff] }
  0x62   : > { %2575 = vmatpush3.bf16.msra.mxu0 %v2574_v32  ;;  %1015 = vmatprep.mubr.f32.mxu0 %v283_v39  ;;  %v527_v10 = vld [vmem:[%s2835_s23 + $0x568] sm:$0xff]  ;;  %v320_v15 = vld [vmem:[%s3669_s1 + $0x3b0] sm:$0xff]  ;;  %v2586_v16 = vpack.c.bf16 %v495_v6, %v494_v5  ;;  %v545_v18 = vld [vmem:[%s2835_s23 + $0x5f8] sm:$0xff]  ;;  %v2588_v24 = vpack.c.bf16 %v513_v14, %v512_v13 }
  0x63   : > { %1116 = vmatmul.mubr.f32.gmra.mrb[22].mxu1 %v265_v35  ;;  %2577 = vmatprep.subr.bf16.mxu0 %v2576_v40  ;;  %v323_v11 = vld [vmem:[%s3669_s1 + $0x3c8] sm:$0xff]  ;;  %v544_v17 = vld [vmem:[%s2835_s23 + $0x5f0] sm:$0xff]  ;;  %v322_v19 = vld [vmem:[%s3669_s1 + $0x3c0] sm:$0xff]  ;;  %v2618_v20 = vpack.c.bf16 %v527_v10, %v526_v9 }
  0x64   : > { %2607 = vmatpush3.bf16.msra.mxu1 %v2606_v36  ;;  %1120 = vmatprep.mubr.f32.mxu1 %v285_v43  ;;  %v496_v21 = vld [vmem:[%s2835_s23 + $0x470] sm:$0xff]  ;;  %v497_v22 = vld [vmem:[%s2835_s23 + $0x478] sm:$0xff]  ;;  %v342_v27 = vld [vmem:[%s3669_s1 + $0x460] sm:$0xff]  ;;  %v2620_v28 = vpack.c.bf16 %v545_v18, %v544_v17 }
  0x65   : > { %1016 = vmatmul.mubr.f32.gmra.mrb[24].mxu0 %v282_v47  ;;  %2609 = vmatprep.subr.bf16.mxu1 %v2608_v44  ;;  %v340_v23 = vld [vmem:[%s3669_s1 + $0x450] sm:$0xff]  ;;  %v529_v26 = vld [vmem:[%s2835_s23 + $0x578] sm:$0xff]  ;;  %v562_v29 = vld [vmem:[%s2835_s23 + $0x680] sm:$0xff]  ;;  %v2590_v32 = vpack.c.bf16 %v497_v22, %v496_v21 }
  0x66   : > { %2579 = vmatpush3.bf16.msra.mxu0 %v2578_v48  ;;  %1020 = vmatprep.mubr.f32.mxu0 %v302_v55  ;;  %v528_v25 = vld [vmem:[%s2835_s23 + $0x570] sm:$0xff]  ;;  %v563_v30 = vld [vmem:[%s2835_s23 + $0x688] sm:$0xff]  ;;  %v594_v33 = vld [vmem:[%s2835_s23 + $0x780] sm:$0xff] }
  0x67   : > { %1121 = vmatmul.mubr.f32.gmra.mrb[24].mxu1 %v284_v51  ;;  %2581 = vmatprep.subr.bf16.mxu0 %v2580_v56  ;;  %v339_v31 = vld [vmem:[%s3669_s1 + $0x448] sm:$0xff]  ;;  %v341_v35 = vld [vmem:[%s3669_s1 + $0x458] sm:$0xff]  ;;  %v2622_v36 = vpack.c.bf16 %v529_v26, %v528_v25  ;;  %v546_v37 = vld [vmem:[%s2835_s23 + $0x600] sm:$0xff]  ;;  %v2624_v40 = vpack.c.bf16 %v563_v30, %v562_v29 }
  0x68   : > { %2611 = vmatpush3.bf16.msra.mxu1 %v2610_v52  ;;  %1125 = vmatprep.mubr.f32.mxu1 %v304_v59  ;;  %v595_v34 = vld [vmem:[%s2835_s23 + $0x788] sm:$0xff]  ;;  %v578_v41 = vld [vmem:[%s2835_s23 + $0x700] sm:$0xff]  ;;  %v213_v43 = vld [vmem:[%s3669_s1 + $0x58] sm:$0xff] }
  0x69   : > { %1021 = vmatmul.mubr.f32.gmra.mrb[26].mxu0 %v301_v63  ;;  %2613 = vmatprep.subr.bf16.mxu1 %v2612_v60  ;;  %v547_v38 = vld [vmem:[%s2835_s23 + $0x608] sm:$0xff]  ;;  %v2656_v44 = vpack.c.bf16 %v595_v34, %v594_v33  ;;  %v564_v45 = vld [vmem:[%s2835_s23 + $0x690] sm:$0xff]  ;;  %v565_v46 = vld [vmem:[%s2835_s23 + $0x698] sm:$0xff] }
  0x6a   : > { %2583 = vmatpush3.bf16.msra.mxu0 %v2582_v0  ;;  %1025 = vmatprep.mubr.f32.mxu0 %v321_v7  ;;  %v211_v39 = vld [vmem:[%s3669_s1 + $0x48] sm:$0xff]  ;;  %v210_v47 = vld [vmem:[%s3669_s1 + $0x40] sm:$0xff]  ;;  %v2626_v48 = vpack.c.bf16 %v547_v38, %v546_v37  ;;  %v596_v49 = vld [vmem:[%s2835_s23 + $0x790] sm:$0xff]  ;;  %v2628_v56 = vpack.c.bf16 %v565_v46, %v564_v45 }
  0x6b   : > { %1126 = vmatmul.mubr.f32.gmra.mrb[26].mxu1 %v303_v3  ;;  %2585 = vmatprep.subr.bf16.mxu0 %v2584_v8  ;;  %v579_v42 = vld [vmem:[%s2835_s23 + $0x708] sm:$0xff]  ;;  %v597_v50 = vld [vmem:[%s2835_s23 + $0x798] sm:$0xff]  ;;  %v212_v51 = vld [vmem:[%s3669_s1 + $0x50] sm:$0xff] }
  0x6c   : > { %2615 = vmatpush3.bf16.msra.mxu1 %v2614_v4  ;;  %1130 = vmatprep.mubr.f32.mxu1 %v323_v11  ;;  %v2658_v52 = vpack.c.bf16 %v579_v42, %v578_v41  ;;  %v548_v53 = vld [vmem:[%s2835_s23 + $0x610] sm:$0xff]  ;;  %v549_v54 = vld [vmem:[%s2835_s23 + $0x618] sm:$0xff]  ;;  %v230_v55 = vld [vmem:[%s3669_s1 + $0xe0] sm:$0xff]  ;;  %v2660_v60 = vpack.c.bf16 %v597_v50, %v596_v49 }
  0x6d   : > { %1026 = vmatmul.mubr.f32.gmra.mrb[28].mxu0 %v320_v15  ;;  %2617 = vmatprep.subr.bf16.mxu1 %v2616_v12  ;;  %v580_v57 = vld [vmem:[%s2835_s23 + $0x710] sm:$0xff]  ;;  %v581_v58 = vld [vmem:[%s2835_s23 + $0x718] sm:$0xff]  ;;  %v566_v61 = vld [vmem:[%s2835_s23 + $0x6a0] sm:$0xff]  ;;  %v2630_v0 = vpack.c.bf16 %v549_v54, %v548_v53 }
  0x6e   : > { %2587 = vmatpush3.bf16.msra.mxu0 %v2586_v16  ;;  %1030 = vmatprep.mubr.f32.mxu0 %v340_v23  ;;  %v232_v59 = vld [vmem:[%s3669_s1 + $0xf0] sm:$0xff]  ;;  %v567_v62 = vld [vmem:[%s2835_s23 + $0x6a8] sm:$0xff]  ;;  %v229_v63 = vld [vmem:[%s3669_s1 + $0xd8] sm:$0xff]  ;;  %v2662_v4 = vpack.c.bf16 %v581_v58, %v580_v57 }
  0x6f   : > { %1131 = vmatmul.mubr.f32.gmra.mrb[28].mxu1 %v322_v19  ;;  %2589 = vmatprep.subr.bf16.mxu0 %v2588_v24  ;;  %v598_v1 = vld [vmem:[%s2835_s23 + $0x7a0] sm:$0xff]  ;;  %v599_v2 = vld [vmem:[%s2835_s23 + $0x7a8] sm:$0xff]  ;;  %v249_v7 = vld [vmem:[%s3669_s1 + $0x178] sm:$0xff]  ;;  %v2632_v8 = vpack.c.bf16 %v567_v62, %v566_v61 }
  0x70   : > { %2619 = vmatpush3.bf16.msra.mxu1 %v2618_v20  ;;  %1135 = vmatprep.mubr.f32.mxu1 %v342_v27  ;;  %v231_v3 = vld [vmem:[%s3669_s1 + $0xe8] sm:$0xff]  ;;  %v550_v5 = vld [vmem:[%s2835_s23 + $0x620] sm:$0xff]  ;;  %v2664_v12 = vpack.c.bf16 %v599_v2, %v598_v1  ;;  %v568_v13 = vld [vmem:[%s2835_s23 + $0x6b0] sm:$0xff] }
  0x71   : > { %1031 = vmatmul.mubr.f32.gmra.mrb[30].mxu0 %v339_v31  ;;  %2621 = vmatprep.subr.bf16.mxu1 %v2620_v28  ;;  %v551_v6 = vld [vmem:[%s2835_s23 + $0x628] sm:$0xff]  ;;  %v582_v9 = vld [vmem:[%s2835_s23 + $0x720] sm:$0xff]  ;;  %v569_v14 = vld [vmem:[%s2835_s23 + $0x6b8] sm:$0xff] }
  0x72   : > { %2591 = vmatpush3.bf16.msra.mxu0 %v2590_v32  ;;  %1205 = vmatprep.mubr.f32.mxu0 %v211_v39  ;;  %v583_v10 = vld [vmem:[%s2835_s23 + $0x728] sm:$0xff]  ;;  %v248_v15 = vld [vmem:[%s3669_s1 + $0x170] sm:$0xff]  ;;  %v2634_v16 = vpack.c.bf16 %v551_v6, %v550_v5  ;;  %v601_v18 = vld [vmem:[%s2835_s23 + $0x7b8] sm:$0xff]  ;;  %v2636_v24 = vpack.c.bf16 %v569_v14, %v568_v13 }
  0x73   : > { %1136 = vmatmul.mubr.f32.gmra.mrb[30].mxu1 %v341_v35  ;;  %2625 = vmatprep.subr.bf16.mxu0 %v2624_v40  ;;  %v251_v11 = vld [vmem:[%s3669_s1 + $0x188] sm:$0xff]  ;;  %v600_v17 = vld [vmem:[%s2835_s23 + $0x7b0] sm:$0xff]  ;;  %v250_v19 = vld [vmem:[%s3669_s1 + $0x180] sm:$0xff]  ;;  %v2666_v20 = vpack.c.bf16 %v583_v10, %v582_v9 }
  0x74   : > { %2623 = vmatpush3.bf16.msra.mxu1 %v2622_v36  ;;  %1310 = vmatprep.mubr.f32.mxu1 %v213_v43  ;;  %v552_v21 = vld [vmem:[%s2835_s23 + $0x630] sm:$0xff]  ;;  %v553_v22 = vld [vmem:[%s2835_s23 + $0x638] sm:$0xff]  ;;  %v270_v27 = vld [vmem:[%s3669_s1 + $0x220] sm:$0xff]  ;;  %v2668_v28 = vpack.c.bf16 %v601_v18, %v600_v17 }
  0x75   : > { %1206 = vmatmul.mubr.f32.vlgmr.msra.gmra.mrb[32].mxu0 %v210_v47  ;;  %2657 = vmatprep.subr.bf16.mxu1 %v2656_v44  ;;  %v268_v23 = vld [vmem:[%s3669_s1 + $0x210] sm:$0xff]  ;;  %v585_v26 = vld [vmem:[%s2835_s23 + $0x738] sm:$0xff]  ;;  %v570_v29 = vld [vmem:[%s2835_s23 + $0x6c0] sm:$0xff]  ;;  %v2638_v32 = vpack.c.bf16 %v553_v22, %v552_v21 }
  0x76   : > { %2627 = vmatpush3.bf16.msra.mxu0 %v2626_v48  ;;  %1210 = vmatprep.mubr.f32.mxu0 %v230_v55  ;;  %v584_v25 = vld [vmem:[%s2835_s23 + $0x730] sm:$0xff]  ;;  %v571_v30 = vld [vmem:[%s2835_s23 + $0x6c8] sm:$0xff]  ;;  %v602_v33 = vld [vmem:[%s2835_s23 + $0x7c0] sm:$0xff] }
  0x77   : > { %1311 = vmatmul.mubr.f32.vlgmr.msra.gmra.mrb[32].mxu1 %v212_v51  ;;  %2629 = vmatprep.subr.bf16.mxu0 %v2628_v56  ;;  %v267_v31 = vld [vmem:[%s3669_s1 + $0x208] sm:$0xff]  ;;  %v269_v35 = vld [vmem:[%s3669_s1 + $0x218] sm:$0xff]  ;;  %v2670_v36 = vpack.c.bf16 %v585_v26, %v584_v25  ;;  %v554_v37 = vld [vmem:[%s2835_s23 + $0x640] sm:$0xff]  ;;  %v2640_v40 = vpack.c.bf16 %v571_v30, %v570_v29 }
  0x78   : > { %2659 = vmatpush3.bf16.msra.mxu1 %v2658_v52  ;;  %1315 = vmatprep.mubr.f32.mxu1 %v232_v59  ;;  %v603_v34 = vld [vmem:[%s2835_s23 + $0x7c8] sm:$0xff]  ;;  %v586_v41 = vld [vmem:[%s2835_s23 + $0x740] sm:$0xff]  ;;  %v289_v43 = vld [vmem:[%s3669_s1 + $0x2b8] sm:$0xff] }
  0x79   : > { %1211 = vmatmul.mubr.f32.gmra.mrb[34].mxu0 %v229_v63  ;;  %2661 = vmatprep.subr.bf16.mxu1 %v2660_v60  ;;  %v555_v38 = vld [vmem:[%s2835_s23 + $0x648] sm:$0xff]  ;;  %v2672_v44 = vpack.c.bf16 %v603_v34, %v602_v33  ;;  %v572_v45 = vld [vmem:[%s2835_s23 + $0x6d0] sm:$0xff]  ;;  %v573_v46 = vld [vmem:[%s2835_s23 + $0x6d8] sm:$0xff] }
  0x7a   : > { %2631 = vmatpush3.bf16.msra.mxu0 %v2630_v0  ;;  %1215 = vmatprep.mubr.f32.mxu0 %v249_v7  ;;  %v287_v39 = vld [vmem:[%s3669_s1 + $0x2a8] sm:$0xff]  ;;  %v286_v47 = vld [vmem:[%s3669_s1 + $0x2a0] sm:$0xff]  ;;  %v2642_v48 = vpack.c.bf16 %v555_v38, %v554_v37  ;;  %v604_v49 = vld [vmem:[%s2835_s23 + $0x7d0] sm:$0xff]  ;;  %v2644_v56 = vpack.c.bf16 %v573_v46, %v572_v45 }
  0x7b   : > { %1316 = vmatmul.mubr.f32.gmra.mrb[34].mxu1 %v231_v3  ;;  %2633 = vmatprep.subr.bf16.mxu0 %v2632_v8  ;;  %v587_v42 = vld [vmem:[%s2835_s23 + $0x748] sm:$0xff]  ;;  %v605_v50 = vld [vmem:[%s2835_s23 + $0x7d8] sm:$0xff]  ;;  %v288_v51 = vld [vmem:[%s3669_s1 + $0x2b0] sm:$0xff] }
  0x7c   : > { %2663 = vmatpush3.bf16.msra.mxu1 %v2662_v4  ;;  %1320 = vmatprep.mubr.f32.mxu1 %v251_v11  ;;  %v2674_v52 = vpack.c.bf16 %v587_v42, %v586_v41  ;;  %v556_v53 = vld [vmem:[%s2835_s23 + $0x650] sm:$0xff]  ;;  %v557_v54 = vld [vmem:[%s2835_s23 + $0x658] sm:$0xff]  ;;  %v306_v55 = vld [vmem:[%s3669_s1 + $0x340] sm:$0xff]  ;;  %v2676_v59 = vpack.c.bf16 %v605_v50, %v604_v49 }
  0x7d   : > { %1216 = vmatmul.mubr.f32.gmra.mrb[36].mxu0 %v248_v15  ;;  %2665 = vmatprep.subr.bf16.mxu1 %v2664_v12  ;;  %v308_v57 = vld [vmem:[%s3669_s1 + $0x350] sm:$0xff]  ;;  %v589_v60 = vld [vmem:[%s2835_s23 + $0x758] sm:$0xff]  ;;  %v574_v61 = vld [vmem:[%s2835_s23 + $0x6e0] sm:$0xff]  ;;  %v2646_v0 = vpack.c.bf16 %v557_v54, %v556_v53 }
  0x7e   : > { %2635 = vmatpush3.bf16.msra.mxu0 %v2634_v16  ;;  %1220 = vmatprep.mubr.f32.mxu0 %v268_v23  ;;  %v588_v58 = vld [vmem:[%s2835_s23 + $0x750] sm:$0xff]  ;;  %v575_v62 = vld [vmem:[%s2835_s23 + $0x6e8] sm:$0xff]  ;;  %v305_v63 = vld [vmem:[%s3669_s1 + $0x338] sm:$0xff] }
  0x7f   : > { %1321 = vmatmul.mubr.f32.gmra.mrb[36].mxu1 %v250_v19  ;;  %2637 = vmatprep.subr.bf16.mxu0 %v2636_v24  ;;  %v307_v1 = vld [vmem:[%s3669_s1 + $0x348] sm:$0xff]  ;;  %v648_v2 = vld [vmem:[%s3670_s2] sm:$0xff]  ;;  %v325_v5 = vld [vmem:[%s3669_s1 + $0x3d8] sm:$0xff]  ;;  %v2678_v6 = vpack.c.bf16 %v589_v60, %v588_v58  ;;  %v2648_v7 = vpack.c.bf16 %v575_v62, %v574_v61 }
  0x80   : > { %2667 = vmatpush3.bf16.msra.mxu1 %v2666_v20  ;;  %1325 = vmatprep.mubr.f32.mxu1 %v270_v27  ;;  %v558_v3 = vld [vmem:[%s2835_s23 + $0x660] sm:$0xff]  ;;  %v559_v4 = vld [vmem:[%s2835_s23 + $0x668] sm:$0xff]  ;;  %v324_v10 = vld [vmem:[%s3669_s1 + $0x3d0] sm:$0xff] }
  0x81   : > { %1221 = vmatmul.mubr.f32.gmra.mrb[38].mxu0 %v267_v31  ;;  %2669 = vmatprep.subr.bf16.mxu1 %v2668_v28  ;;  %v606_v8 = vld [vmem:[%s2835_s23 + $0x7e0] sm:$0xff]  ;;  %v607_v9 = vld [vmem:[%s2835_s23 + $0x7e8] sm:$0xff]  ;;  %v2650_v14 = vpack.c.bf16 %v559_v4, %v558_v3  ;;  %v576_v15 = vld [vmem:[%s2835_s23 + $0x6f0] sm:$0xff] }
  0x82   : > { %2639 = vmatpush3.bf16.msra.mxu0 %v2638_v32  ;;  %1225 = vmatprep.mubr.f32.mxu0 %v287_v39  ;;  %v590_v11 = vld [vmem:[%s2835_s23 + $0x760] sm:$0xff]  ;;  %v591_v12 = vld [vmem:[%s2835_s23 + $0x768] sm:$0xff]  ;;  %v577_v16 = vld [vmem:[%s2835_s23 + $0x6f8] sm:$0xff]  ;;  %v2680_v18 = vpack.c.bf16 %v607_v9, %v606_v8 }
  0x83   : > { %1326 = vmatmul.mubr.f32.gmra.mrb[38].mxu1 %v269_v35  ;;  %2641 = vmatprep.subr.bf16.mxu0 %v2640_v40  ;;  %v327_v13 = vld [vmem:[%s3669_s1 + $0x3e8] sm:$0xff]  ;;  %v326_v17 = vld [vmem:[%s3669_s1 + $0x3e0] sm:$0xff]  ;;  %v560_v19 = vld [vmem:[%s2835_s23 + $0x670] sm:$0xff]  ;;  %v2682_v22 = vpack.c.bf16 %v591_v12, %v590_v11  ;;  %v2652_v26 = vpack.c.bf16 %v577_v16, %v576_v15 }
  0x84   : > { %2671 = vmatpush3.bf16.msra.mxu1 %v2670_v36  ;;  %1330 = vmatprep.mubr.f32.mxu1 %v289_v43  ;;  %v561_v20 = vld [vmem:[%s2835_s23 + $0x678] sm:$0xff]  ;;  %v649_v21 = vld [vmem:[%s3670_s2 + $0x8] sm:$0xff]  ;;  %v608_v23 = vld [vmem:[%s2835_s23 + $0x7f0] sm:$0xff] }
  0x85   : > { %1226 = vmatmul.mubr.f32.gmra.mrb[40].mxu0 %v286_v47  ;;  %2673 = vmatprep.subr.bf16.mxu1 %v2672_v44  ;;  %v609_v24 = vld [vmem:[%s2835_s23 + $0x7f8] sm:$0xff]  ;;  %v344_v25 = vld [vmem:[%s3669_s1 + $0x470] sm:$0xff]  ;;  %v343_v27 = vld [vmem:[%s3669_s1 + $0x468] sm:$0xff]  ;;  %v2654_v28 = vpack.c.bf16 %v561_v20, %v560_v19 }
  0x86   : > { %2643 = vmatpush3.bf16.msra.mxu0 %v2642_v48  ;;  %1230 = vmatprep.mubr.f32.mxu0 %v306_v55  ;;  %v592_v29 = vld [vmem:[%s2835_s23 + $0x770] sm:$0xff]  ;;  %v593_v30 = vld [vmem:[%s2835_s23 + $0x778] sm:$0xff]  ;;  %v346_v31 = vld [vmem:[%s3669_s1 + $0x480] sm:$0xff]  ;;  %v2684_v32 = vpack.c.bf16 %v609_v24, %v608_v23 }
  0x87   : > { %1331 = vmatmul.mubr.f32.gmra.mrb[40].mxu1 %v288_v51  ;;  %2645 = vmatprep.subr.bf16.mxu0 %v2644_v56  ;;  %v626_v33 = vld [vmem:[%s2835_s23 + $0x880] sm:$0xff]  ;;  %v627_v34 = vld [vmem:[%s2835_s23 + $0x888] sm:$0xff]  ;;  %v345_v35 = vld [vmem:[%s3669_s1 + $0x478] sm:$0xff]  ;;  %v2686_v40 = vpack.c.bf16 %v593_v30, %v592_v29 }
  0x88   : > { %2675 = vmatpush3.bf16.msra.mxu1 %v2674_v52  ;;  %1335 = vmatprep.mubr.f32.mxu1 %v308_v57  ;;  %v610_v36 = vld [vmem:[%s2835_s23 + $0x800] sm:$0xff]  ;;  %v611_v37 = vld [vmem:[%s2835_s23 + $0x808] sm:$0xff]  ;;  %v650_v38 = vld [vmem:[%s3670_s2 + $0x10] sm:$0xff]  ;;  %v2688_v42 = vpack.c.bf16 %v627_v34, %v626_v33 }
  0x89   : > { %1231 = vmatmul.mubr.f32.gmra.mrb[42].mxu0 %v305_v63  ;;  %2677 = vmatprep.subr.bf16.mxu1 %v2676_v59  ;;  %v215_v39 = vld [vmem:[%s3669_s1 + $0x68] sm:$0xff]  ;;  %v214_v41 = vld [vmem:[%s3669_s1 + $0x60] sm:$0xff]  ;;  %v628_v43 = vld [vmem:[%s2835_s23 + $0x890] sm:$0xff]  ;;  %v2690_v46 = vpack.c.bf16 %v611_v37, %v610_v36 }
  0x8a   : > { %2647 = vmatpush3.bf16.msra.mxu0 %v2646_v0  ;;  %658 = vperm.xlu0 %2758, %v648_v2   ;;  %v629_v44 = vld [vmem:[%s2835_s23 + $0x898] sm:$0xff]  ;;  %v216_v47 = vld [vmem:[%s3669_s1 + $0x70] sm:$0xff]  ;;  %v234_v48 = vld [vmem:[%s3669_s1 + $0x100] sm:$0xff] }
  0x8b   : > { %1336 = vmatmul.mubr.f32.gmra.mrb[42].mxu1 %v307_v1  ;;  %1235 = vmatprep.mubr.f32.mxu0 %v325_v5  ;;  %v217_v45 = vld [vmem:[%s3669_s1 + $0x78] sm:$0xff]  ;;  %v612_v49 = vld [vmem:[%s2835_s23 + $0x810] sm:$0xff]  ;;  %v2692_v52 = vpack.c.bf16 %v629_v44, %v628_v43  ;;  %v630_v53 = vld [vmem:[%s2835_s23 + $0x8a0] sm:$0xff] }
  0x8c   : > { %2679 = vmatpush3.bf16.msra.mxu1 %v2678_v6  ;;  %2649 = vmatprep.subr.bf16.mxu0 %v2648_v7  ;;  %v613_v50 = vld [vmem:[%s2835_s23 + $0x818] sm:$0xff]  ;;  %v631_v54 = vld [vmem:[%s2835_s23 + $0x8a8] sm:$0xff]  ;;  %v236_v56 = vld [vmem:[%s3669_s1 + $0x110] sm:$0xff] }
  0x8d   : > { %1236 = vmatmul.mubr.f32.gmra.mrb[44].mxu0 %v324_v10  ;;  %1340 = vmatprep.mubr.f32.mxu1 %v327_v13  ;;  %v651_v51 = vld [vmem:[%s3670_s2 + $0x18] sm:$0xff]  ;;  %v2694_v57 = vpack.c.bf16 %v613_v50, %v612_v49  ;;  %v652_v58 = vld [vmem:[%s3670_s2 + $0x20] sm:$0xff]  ;;  %v2696_v60 = vpack.c.bf16 %v631_v54, %v630_v53  ;;  %v615_v62 = vld [vmem:[%s2835_s23 + $0x828] sm:$0xff] }
  0x8e   : > { %2651 = vmatpush3.bf16.msra.mxu0 %v2650_v14  ;;  %2681 = vmatprep.subr.bf16.mxu1 %v2680_v18  ;;  %v233_v55 = vld [vmem:[%s3669_s1 + $0xf8] sm:$0xff]  ;;  %v614_v61 = vld [vmem:[%s2835_s23 + $0x820] sm:$0xff]  ;;  %v235_v63 = vld [vmem:[%s3669_s1 + $0x108] sm:$0xff] }
  0x8f   : > { %1341 = vmatmul.mubr.f32.gmra.mrb[44].mxu1 %v326_v17  ;;  %663 = vperm.xlu0 %2758, %v649_v21   ;;  %v253_v59 = vld [vmem:[%s3669_s1 + $0x198] sm:$0xff]  ;;  %v632_v0 = vld [vmem:[%s2835_s23 + $0x8b0] sm:$0xff]  ;;  %v255_v3 = vld [vmem:[%s3669_s1 + $0x1a8] sm:$0xff]  ;;  %v2698_v5 = vpack.c.bf16 %v615_v62, %v614_v61 }
  0x90   : > { %1240 = vmatprep.mubr.f32.mxu0 %v344_v25  ;;  %2683 = vmatpush3.bf16.msra.mxu1 %v2682_v22  ;;  %v633_v1 = vld [vmem:[%s2835_s23 + $0x8b8] sm:$0xff]  ;;  %v252_v2 = vld [vmem:[%s3669_s1 + $0x190] sm:$0xff]  ;;  %v653_v4 = vld [vmem:[%s3670_s2 + $0x28] sm:$0xff] }
  0x91   : > { %1241 = vmatmul.mubr.f32.gmra.mrb[46].mxu0 %v343_v27  ;;  %2653 = vmatprep.subr.bf16.mxu0 %v2652_v26  ;;  %v272_v6 = vld [vmem:[%s3669_s1 + $0x230] sm:$0xff]  ;;  %v617_v8 = vld [vmem:[%s2835_s23 + $0x838] sm:$0xff]  ;;  %v2700_v9 = vpack.c.bf16 %v633_v1, %v632_v0  ;;  %v642_v11 = vld [vmem:[%s2835_s23 + $0x900] sm:$0xff] }
  0x92   : > { %1345 = vmatprep.mubr.f32.mxu1 %v346_v31  ;;  %2655 = vmatpush3.bf16.msra.mxu0 %v2654_v28  ;;  %v616_v7 = vld [vmem:[%s2835_s23 + $0x830] sm:$0xff]  ;;  %v643_v12 = vld [vmem:[%s2835_s23 + $0x908] sm:$0xff]  ;;  %v254_v13 = vld [vmem:[%s3669_s1 + $0x1a0] sm:$0xff] }
  0x93   : > { %1346 = vmatmul.mubr.f32.gmra.mrb[46].mxu1 %v345_v35  ;;  %2685 = vmatprep.subr.bf16.mxu1 %v2684_v32  ;;  %v654_v10 = vld [vmem:[%s3670_s2 + $0x30] sm:$0xff]  ;;  %v634_v14 = vld [vmem:[%s2835_s23 + $0x8c0] sm:$0xff]  ;;  %v635_v15 = vld [vmem:[%s2835_s23 + $0x8c8] sm:$0xff]  ;;  %v2702_v18 = vpack.c.bf16 %v617_v8, %v616_v7  ;;  %v2720_v22 = vpack.c.bf16 %v643_v12, %v642_v11 }
  0x94   : > { %668 = vperm.xlu1 %2759, %v650_v38   ;;  %1415 = vmatprep.mubr.f32.mxu0 %v215_v39  ;;  %v271_v16 = vld [vmem:[%s3669_s1 + $0x228] sm:$0xff]  ;;  %v274_v17 = vld [vmem:[%s3669_s1 + $0x240] sm:$0xff]  ;;  %v655_v21 = vld [vmem:[%s3670_s2 + $0x38] sm:$0xff]  ;;  %v2704_v23 = vpack.c.bf16 %v635_v15, %v634_v14 }
  0x95   : > { %2687 = vmatpush3.bf16.msra.mxu1 %v2686_v40  ;;  %1416 = vmatmul.mubr.f32.vlgmr.msra.gmra.mrb[48].mxu0 %v214_v41  ;;  %v291_v19 = vld [vmem:[%s3669_s1 + $0x2c8] sm:$0xff]  ;;  %v618_v20 = vld [vmem:[%s2835_s23 + $0x840] sm:$0xff]  ;;  %v644_v25 = vld [vmem:[%s2835_s23 + $0x910] sm:$0xff] }
  0x96   : > { %2689 = vmatprep.subr.bf16.mxu0 %v2688_v42  ;;  %1520 = vmatprep.mubr.f32.mxu1 %v217_v45  ;;  %v619_v24 = vld [vmem:[%s2835_s23 + $0x848] sm:$0xff]  ;;  %v645_v26 = vld [vmem:[%s2835_s23 + $0x918] sm:$0xff]  ;;  %v636_v28 = vld [vmem:[%s2835_s23 + $0x8d0] sm:$0xff] }
  0x97   : > { %2691 = vmatpush3.bf16.msra.mxu0 %v2690_v46  ;;  %1420 = vmatprep.mubr.f32.mxu0 %v234_v48  ;;  %v273_v27 = vld [vmem:[%s3669_s1 + $0x238] sm:$0xff]  ;;  %v290_v30 = vld [vmem:[%s3669_s1 + $0x2c0] sm:$0xff]  ;;  %v2706_v32 = vpack.c.bf16 %v619_v24, %v618_v20  ;;  %v620_v34 = vld [vmem:[%s2835_s23 + $0x850] sm:$0xff]  ;;  %v2724_v35 = vpack.c.bf16 %v645_v26, %v644_v25 }
  0x98   : > { %1521 = vmatmul.mubr.f32.vlgmr.msra.gmra.mrb[48].mxu1 %v216_v47  ;;  %673 = vperm.xlu1 %2759, %v651_v51   ;;  %v637_v29 = vld [vmem:[%s2835_s23 + $0x8d8] sm:$0xff]  ;;  %v310_v33 = vld [vmem:[%s3669_s1 + $0x360] sm:$0xff]  ;;  %v647_v39 = vld [vmem:[%s2835_s23 + $0x928] sm:$0xff] }
  0x99   : > { %1421 = vmatmul.mubr.f32.gmra.mrb[50].mxu0 %v233_v55  ;;  %2693 = vmatprep.subr.bf16.mxu0 %v2692_v52  ;;  %v293_v31 = vld [vmem:[%s3669_s1 + $0x2d8] sm:$0xff]  ;;  %v2708_v36 = vpack.c.bf16 %v637_v29, %v636_v28  ;;  %v646_v38 = vld [vmem:[%s2835_s23 + $0x920] sm:$0xff]  ;;  %v292_v40 = vld [vmem:[%s3669_s1 + $0x2d0] sm:$0xff] }
  0x9a   : > { %1525 = vmatprep.mubr.f32.mxu1 %v236_v56  ;;  %678 = vperm.xlu0 %2758, %v652_v58   ;;  %v621_v37 = vld [vmem:[%s2835_s23 + $0x858] sm:$0xff]  ;;  %v638_v41 = vld [vmem:[%s2835_s23 + $0x8e0] sm:$0xff]  ;;  %v639_v42 = vld [vmem:[%s2835_s23 + $0x8e8] sm:$0xff]  ;;  %v2728_v47 = vpack.c.bf16 %v647_v39, %v646_v38 }
  0x9b   : > { %2695 = vmatpush3.bf16.msra.mxu0 %v2694_v57  ;;  %1425 = vmatprep.mubr.f32.mxu0 %v253_v59  ;;  %v309_v43 = vld [vmem:[%s3669_s1 + $0x358] sm:$0xff]  ;;  %v312_v44 = vld [vmem:[%s3669_s1 + $0x370] sm:$0xff]  ;;  %v2710_v45 = vpack.c.bf16 %v621_v37, %v620_v34  ;;  %v2712_v48 = vpack.c.bf16 %v639_v42, %v638_v41  ;;  %v622_v49 = vld [vmem:[%s2835_s23 + $0x860] sm:$0xff] }
  0x9c   : > { %1526 = vmatmul.mubr.f32.gmra.mrb[50].mxu1 %v235_v63  ;;  %2697 = vmatprep.subr.bf16.mxu0 %v2696_v60  ;;  %v329_v46 = vld [vmem:[%s3669_s1 + $0x3f8] sm:$0xff]  ;;  %v623_v50 = vld [vmem:[%s2835_s23 + $0x868] sm:$0xff]  ;;  %v640_v52 = vld [vmem:[%s2835_s23 + $0x8f0] sm:$0xff] }
  0x9d   : > { %1426 = vmatmul.mubr.f32.gmra.mrb[52].mxu0 %v252_v2  ;;  %1530 = vmatprep.mubr.f32.mxu1 %v255_v3  ;;  %v311_v51 = vld [vmem:[%s3669_s1 + $0x368] sm:$0xff]  ;;  %v641_v53 = vld [vmem:[%s2835_s23 + $0x8f8] sm:$0xff]  ;;  %v328_v54 = vld [vmem:[%s3669_s1 + $0x3f0] sm:$0xff]  ;;  %v2714_v56 = vpack.c.bf16 %v623_v50, %v622_v49 }
  0x9e   : > { %683 = vperm.xlu1 %2759, %v653_v4   ;;  %1430 = vmatprep.mubr.f32.mxu0 %v272_v6  ;;  %v331_v55 = vld [vmem:[%s3669_s1 + $0x408] sm:$0xff]  ;;  %v348_v57 = vld [vmem:[%s3669_s1 + $0x490] sm:$0xff]  ;;  %v2716_v58 = vpack.c.bf16 %v641_v53, %v640_v52  ;;  %v625_v60 = vld [vmem:[%s2835_s23 + $0x878] sm:$0xff] }
  0x9f   : > { %2699 = vmatpush3.bf16.msra.mxu0 %v2698_v5  ;;  %688 = vperm.xlu0 %2758, %v654_v10   ;;  %v624_v59 = vld [vmem:[%s2835_s23 + $0x870] sm:$0xff]  ;;  %v330_v61 = vld [vmem:[%s3669_s1 + $0x400] sm:$0xff]  ;;  %v347_v62 = vld [vmem:[%s3669_s1 + $0x488] sm:$0xff] }
  0xa0   : > { %1531 = vmatmul.mubr.f32.gmra.mrb[52].mxu1 %v254_v13  ;;  %2701 = vmatprep.subr.bf16.mxu0 %v2700_v9  ;;  %v350_v63 = vld [vmem:[%s3669_s1 + $0x4a0] sm:$0xff]  ;;  %v2718_v0 = vpack.c.bf16 %v625_v60, %v624_v59  ;;  %v219_v1 = vld [vmem:[%s3669_s1 + $0x88] sm:$0xff]  ;;  %v349_v2 = vld [vmem:[%s3669_s1 + $0x498] sm:$0xff] }
  0xa1   : > { %1431 = vmatmul.mubr.f32.gmra.mrb[54].mxu0 %v271_v16  ;;  %1535 = vmatprep.mubr.f32.mxu1 %v274_v17  ;;  %v220_v3 = vld [vmem:[%s3669_s1 + $0x90] sm:$0xff]  ;;  %v218_v4 = vld [vmem:[%s3669_s1 + $0x80] sm:$0xff]  ;;  %v239_v6 = vld [vmem:[%s3669_s1 + $0x128] sm:$0xff] }
  0xa2   : > { %1435 = vmatprep.mubr.f32.mxu0 %v291_v19  ;;  %693 = vperm.xlu1 %2759, %v655_v21   ;;  %v238_v5 = vld [vmem:[%s3669_s1 + $0x120] sm:$0xff]  ;;  %v237_v8 = vld [vmem:[%s3669_s1 + $0x118] sm:$0xff]  ;;  %v296_v11 = vld [vmem:[%s3669_s1 + $0x2f0] sm:$0xff] }
  0xa3   : > { %2703 = vmatpush3.bf16.msra.mxu0 %v2702_v18  ;;  %2721 = vmatprep.subr.bf16.mxu1 %v2720_v22  ;;  %v258_v7 = vld [vmem:[%s3669_s1 + $0x1c0] sm:$0xff]  ;;  %v257_v9 = vld [vmem:[%s3669_s1 + $0x1b8] sm:$0xff]  ;;  %v256_v12 = vld [vmem:[%s3669_s1 + $0x1b0] sm:$0xff] }
  0xa4   : > { %1536 = vmatmul.mubr.f32.gmra.mrb[54].mxu1 %v273_v27  ;;  %2705 = vmatprep.subr.bf16.mxu0 %v2704_v23  ;;  %v277_v10 = vld [vmem:[%s3669_s1 + $0x258] sm:$0xff]  ;;  %v276_v13 = vld [vmem:[%s3669_s1 + $0x250] sm:$0xff]  ;;  %v315_v14 = vld [vmem:[%s3669_s1 + $0x388] sm:$0xff] }
  0xa5   : > { %1436 = vmatmul.mubr.f32.gmra.mrb[56].mxu0 %v290_v30  ;;  %1540 = vmatprep.mubr.f32.mxu1 %v293_v31  ;;  %v334_v15 = vld [vmem:[%s3669_s1 + $0x420] sm:$0xff]  ;;  %v275_v16 = vld [vmem:[%s3669_s1 + $0x248] sm:$0xff]  ;;  %v353_v18 = vld [vmem:[%s3669_s1 + $0x4b8] sm:$0xff] }
  0xa6   : > { %1440 = vmatprep.mubr.f32.mxu0 %v310_v33  ;;  %2723 = vmatpush3.bf16.msra.mxu1 %v2720_v22  ;;  %v295_v17 = vld [vmem:[%s3669_s1 + $0x2e8] sm:$0xff]  ;;  %v294_v19 = vld [vmem:[%s3669_s1 + $0x2e0] sm:$0xff]  ;;  %v313_v21 = vld [vmem:[%s3669_s1 + $0x378] sm:$0xff] }
  0xa7   : > { %2707 = vmatpush3.bf16.msra.mxu0 %v2706_v32  ;;  %2725 = vmatprep.subr.bf16.mxu1 %v2724_v35  ;;  %v314_v20 = vld [vmem:[%s3669_s1 + $0x380] sm:$0xff]  ;;  %v333_v22 = vld [vmem:[%s3669_s1 + $0x418] sm:$0xff]  ;;  %v332_v23 = vld [vmem:[%s3669_s1 + $0x410] sm:$0xff] }
  0xa8   : > { %1541 = vmatmul.mubr.f32.gmra.mrb[56].mxu1 %v292_v40  ;;  %2709 = vmatprep.subr.bf16.mxu0 %v2708_v36  ;;  %v352_v24 = vld [vmem:[%s3669_s1 + $0x4b0] sm:$0xff]  ;;  %v351_v25 = vld [vmem:[%s3669_s1 + $0x4a8] sm:$0xff] }
  0xa9   : > { %1441 = vmatmul.mubr.f32.gmra.mrb[58].mxu0 %v309_v43  ;;  %1545 = vmatprep.mubr.f32.mxu1 %v312_v44 }
  0xaa   : > { %1445 = vmatprep.mubr.f32.mxu0 %v329_v46  ;;  %2727 = vmatpush3.bf16.msra.mxu1 %v2724_v35 }
  0xab   : > { %2711 = vmatpush3.bf16.msra.mxu0 %v2710_v45  ;;  %2729 = vmatprep.subr.bf16.mxu1 %v2728_v47 }
  0xac   : > { %1546 = vmatmul.mubr.f32.gmra.mrb[58].mxu1 %v311_v51  ;;  %2713 = vmatprep.subr.bf16.mxu0 %v2712_v48 }
  0xad   : > { %1446 = vmatmul.mubr.f32.gmra.mrb[60].mxu0 %v328_v54  ;;  %1550 = vmatprep.mubr.f32.mxu1 %v331_v55 }
  0xae   : > { %1450 = vmatprep.mubr.f32.mxu0 %v348_v57  ;;  %2731 = vmatpush3.bf16.msra.mxu1 %v2728_v47 }
  0xaf   : > { %2715 = vmatpush3.bf16.msra.mxu0 %v2714_v56 }
  0xb0   : > { %1551 = vmatmul.mubr.f32.gmra.mrb[60].mxu1 %v330_v61  ;;  %2717 = vmatprep.subr.bf16.mxu0 %v2716_v58 }
  0xb1   : > { %1451 = vmatmul.mubr.f32.gmra.mrb[62].mxu0 %v347_v62  ;;  %1555 = vmatprep.mubr.f32.mxu1 %v350_v63 }
  0xb2   : > { %1625 = vmatprep.mubr.f32.mxu0 %v219_v1 }
  0xb3   : > { %2719 = vmatpush3.bf16.msra.mxu0 %v2718_v0 }
  0xb4   : > { %1556 = vmatmul.mubr.f32.gmra.mrb[62].mxu1 %v349_v2 }
  0xb5   : > { %2420 = vmatprep.mubr.msk.f32.mxu1 %vm696_vm0, %v220_v3 }
  0xb6   : > { %1626 = vmatmul.mubr.f32.vlgmr.msra.gmra.mrb[64].mxu0 %v218_v4 }
  0xb7   : > { %1630 = vmatprep.mubr.f32.mxu0 %v238_v5 }
  0xb8   : > { %2421 = vmatmul.mubr.msk.f32.vlgmr.msra.gmra.mrb[64].mxu1 %vm696_vm0, %v239_v6 }
  0xb9   : > { %2423 = vmatprep.mubr.msk.f32.mxu1 %vm696_vm0, %v258_v7 }
  0xba   : > { %1631 = vmatmul.mubr.f32.gmra.mrb[66].mxu0 %v237_v8 }
  0xbb   : > { %1635 = vmatprep.mubr.f32.mxu0 %v257_v9 }
  0xbc   : > { %2424 = vmatmul.mubr.msk.f32.gmra.mrb[66].mxu1 %vm696_vm0, %v277_v10 }
  0xbd   : > { %2426 = vmatprep.mubr.msk.f32.mxu1 %vm696_vm0, %v296_v11 }
  0xbe   : > { %1636 = vmatmul.mubr.f32.gmra.mrb[68].mxu0 %v256_v12 }
  0xbf   : > { %1640 = vmatprep.mubr.f32.mxu0 %v276_v13 }
  0xc0   : > { %2427 = vmatmul.mubr.msk.f32.gmra.mrb[68].mxu1 %vm696_vm0, %v315_v14 }
  0xc1   : > { %2429 = vmatprep.mubr.msk.f32.mxu1 %vm696_vm0, %v334_v15 }
  0xc2   : > { %1641 = vmatmul.mubr.f32.gmra.mrb[70].mxu0 %v275_v16 }
  0xc3   : > { %1645 = vmatprep.mubr.f32.mxu0 %v295_v17 }
  0xc4   : > { %2430 = vmatmul.mubr.msk.f32.gmra.mrb[70].mxu1 %vm696_vm0, %v353_v18 }
  0xc6   : > { %1646 = vmatmul.mubr.f32.gmra.mrb[72].mxu0 %v294_v19 }
  0xc7   : > { %1650 = vmatprep.mubr.f32.mxu0 %v314_v20 }
  0xca   : > { %1651 = vmatmul.mubr.f32.gmra.mrb[74].mxu0 %v313_v21 }
  0xcb   : > { %1655 = vmatprep.mubr.f32.mxu0 %v333_v22 }
  0xce   : > { %1656 = vmatmul.mubr.f32.gmra.mrb[76].mxu0 %v332_v23 }
  0xcf   : > { %1660 = vmatprep.mubr.f32.mxu0 %v352_v24 }
  0xd2   : > { %1661 = vmatmul.mubr.f32.gmra.mrb[78].mxu0 %v351_v25 }
 0x108   : > { %v1922_v26 = vpop.f32.mrb[0].mxu0 }
 0x109   : > { %v1923_v27 = vpop.f32.mrb[1].mxu0  ;;  %v659_v30 = vpop.permute.xlu0 %658 }
 0x10a   : > { %v1978_v28 = vpop.f32.mrb[0].mxu1  ;;  %v1924_v29 = vadd.f32 %v1923_v27, %v1922_v26 }
 0x10b   : > { %v1979_v31 = vpop.f32.mrb[1].mxu1 }
 0x10c   : > { %v1980_v32 = vadd.f32 %v1979_v31, %v1978_v28  ;;  %v788_v33 = vadd.f32 %v1924_v29, %v659_v30  ;;  %v1925_v34 = vpop.f32.mrb[2].mxu0 }
 0x10d   : > { %v1926_v35 = vpop.f32.mrb[3].mxu0 }
 0x10e   : > { %v1981_v36 = vpop.f32.mrb[2].mxu1  ;;  %v3613_v37 = vadd.f32 %v1980_v32, %v788_v33  ;;  %v1927_v38 = vadd.f32 %v1926_v35, %v1925_v34  ;;  %v664_v39 = vpop.permute.xlu0 %663 }
 0x10f   : > { %v1982_v40 = vpop.f32.mrb[3].mxu1 }
 0x110   : > { %v1983_v41 = vadd.f32 %v1982_v40, %v1981_v36  ;;  %v793_v42 = vadd.f32 %v1927_v38, %v664_v39  ;;  %v1928_v43 = vpop.f32.mrb[4].mxu0 }
 0x111   : > { %v1929_v44 = vpop.f32.mrb[5].mxu0 }
 0x112   : > { %v1984_v45 = vpop.f32.mrb[4].mxu1  ;;  %v3615_v46 = vadd.f32 %v1983_v41, %v793_v42  ;;  %v1930_v47 = vadd.f32 %v1929_v44, %v1928_v43 }
 0x113   : > { %v1985_v48 = vpop.f32.mrb[5].mxu1  ;;  %v669_v49 = vpop.permute.xlu1 %668 }
 0x114   : > { %v1986_v50 = vadd.f32 %v1985_v48, %v1984_v45  ;;  %v798_v51 = vadd.f32 %v1930_v47, %v669_v49  ;;  %v1931_v52 = vpop.f32.mrb[6].mxu0 }
 0x115   : > { %v1932_v53 = vpop.f32.mrb[7].mxu0 }
 0x116   : > { %v1987_v54 = vpop.f32.mrb[6].mxu1  ;;  %v3617_v55 = vadd.f32 %v1986_v50, %v798_v51  ;;  %v1933_v56 = vadd.f32 %v1932_v53, %v1931_v52 }
 0x117   : > { %v1988_v57 = vpop.f32.mrb[7].mxu1  ;;  %v674_v58 = vpop.permute.xlu1 %673 }
 0x118   : > { %v1989_v59 = vadd.f32 %v1988_v57, %v1987_v54  ;;  %v803_v60 = vadd.f32 %v1933_v56, %v674_v58  ;;  %v1934_v61 = vpop.f32.mrb[8].mxu0 }
 0x119   : > { %v1935_v62 = vpop.f32.mrb[9].mxu0  ;;  %v679_v2 = vpop.permute.xlu0 %678 }
 0x11a   : > { %v1990_v63 = vpop.f32.mrb[8].mxu1  ;;  %v3619_v0 = vadd.f32 %v1989_v59, %v803_v60  ;;  %v1936_v1 = vadd.f32 %v1935_v62, %v1934_v61 }
 0x11b   : > { %v1991_v3 = vpop.f32.mrb[9].mxu1 }
 0x11c   : > { %v1992_v4 = vadd.f32 %v1991_v3, %v1990_v63  ;;  %v808_v5 = vadd.f32 %v1936_v1, %v679_v2  ;;  %v1937_v6 = vpop.f32.mrb[10].mxu0 }
 0x11d   : > { %v1938_v7 = vpop.f32.mrb[11].mxu0  ;;  %v684_v11 = vpop.permute.xlu1 %683 }
 0x11e   : > { %v1993_v8 = vpop.f32.mrb[10].mxu1  ;;  %v3621_v9 = vadd.f32 %v1992_v4, %v808_v5  ;;  %v1939_v10 = vadd.f32 %v1938_v7, %v1937_v6  ;;  %v689_v16 = vpop.permute.xlu0 %688 }
 0x11f   : > { %v1994_v12 = vpop.f32.mrb[11].mxu1 }
 0x120   : > { %v1995_v13 = vadd.f32 %v1994_v12, %v1993_v8  ;;  %v813_v14 = vadd.f32 %v1939_v10, %v684_v11  ;;  %v1940_v15 = vpop.f32.mrb[12].mxu0 }
 0x121   : > { %v1941_v17 = vpop.f32.mrb[13].mxu0  ;;  %v694_v25 = vpop.permute.xlu1 %693 }
 0x122   : > { %v1996_v18 = vpop.f32.mrb[12].mxu1  ;;  %v918_v19 = vadd.f32 %v1995_v13, %v813_v14  ;;  %v1942_v20 = vadd.f32 %v1941_v17, %v1940_v15 }
 0x123   : > { %v1997_v21 = vpop.f32.mrb[13].mxu1 }
 0x124   : > { %v1998_v22 = vadd.f32 %v1997_v21, %v1996_v18  ;;  %v818_v23 = vadd.f32 %v1942_v20, %v689_v16  ;;  %v1943_v24 = vpop.f32.mrb[14].mxu0 }
 0x125   : > { %v1944_v26 = vpop.f32.mrb[15].mxu0 }
 0x126   : > { %v1999_v27 = vpop.f32.mrb[14].mxu1  ;;  %v923_v28 = vadd.f32 %v1998_v22, %v818_v23  ;;  %v1945_v29 = vadd.f32 %v1944_v26, %v1943_v24 }
 0x127   : > { %v2000_v30 = vpop.f32.mrb[15].mxu1 }
 0x128   : > { %v2001_v31 = vadd.f32 %v2000_v30, %v1999_v27  ;;  %v823_v32 = vadd.f32 %v1945_v29, %v694_v25  ;;  %v2034_v33 = vpop.f32.mrb[16].mxu0 }
 0x129   : > { %v2035_v34 = vpop.f32.mrb[17].mxu0 }
 0x12a   : > { %v2090_v35 = vpop.f32.mrb[16].mxu1  ;;  %v928_v36 = vadd.f32 %v2001_v31, %v823_v32  ;;  %v2036_v38 = vadd.f32 %v2035_v34, %v2034_v33 }
 0x12b   : > { %v2091_v39 = vpop.f32.mrb[17].mxu1 }
 0x12c   : > { %v2092_v40 = vadd.f32 %v2091_v39, %v2090_v35  ;;  %v998_v41 = vadd.f32 %v2036_v38, %v3613_v37  ;;  %v2037_v42 = vpop.f32.mrb[18].mxu0 }
 0x12d   : > { %v2038_v43 = vpop.f32.mrb[19].mxu0 }
 0x12e   : > { %v2093_v44 = vpop.f32.mrb[18].mxu1  ;;  %v1103_v45 = vadd.f32 %v2092_v40, %v998_v41  ;;  %v2039_v47 = vadd.f32 %v2038_v43, %v2037_v42 }
 0x12f   : > { %v2094_v48 = vpop.f32.mrb[19].mxu1 }
 0x130   : > { %v2095_v49 = vadd.f32 %v2094_v48, %v2093_v44  ;;  %v1003_v50 = vadd.f32 %v2039_v47, %v3615_v46  ;;  %v2040_v51 = vpop.f32.mrb[20].mxu0 }
 0x131   : > { %v2041_v52 = vpop.f32.mrb[21].mxu0 }
 0x132   : > { %v2096_v53 = vpop.f32.mrb[20].mxu1  ;;  %v1108_v54 = vadd.f32 %v2095_v49, %v1003_v50  ;;  %v2042_v56 = vadd.f32 %v2041_v52, %v2040_v51 }
 0x133   : > { %v2097_v57 = vpop.f32.mrb[21].mxu1 }
 0x134   : > { %v2098_v58 = vadd.f32 %v2097_v57, %v2096_v53  ;;  %v1008_v59 = vadd.f32 %v2042_v56, %v3617_v55  ;;  %v2043_v60 = vpop.f32.mrb[22].mxu0 }
 0x135   : > { %v2044_v37 = vpop.f32.mrb[23].mxu0 }
 0x136   : > { %v2099_v61 = vpop.f32.mrb[22].mxu1  ;;  %v1113_v62 = vadd.f32 %v2098_v58, %v1008_v59  ;;  %v2045_v63 = vadd.f32 %v2044_v37, %v2043_v60 }
 0x137   : > { %v2100_v1 = vpop.f32.mrb[23].mxu1 }
 0x138   : > { %v2101_v2 = vadd.f32 %v2100_v1, %v2099_v61  ;;  %v1013_v3 = vadd.f32 %v2045_v63, %v3619_v0  ;;  %v2046_v4 = vpop.f32.mrb[24].mxu0 }
 0x139   : > { %v2047_v46 = vpop.f32.mrb[25].mxu0 }
 0x13a   : > { %v2102_v5 = vpop.f32.mrb[24].mxu1  ;;  %v1118_v6 = vadd.f32 %v2101_v2, %v1013_v3  ;;  %v2048_v7 = vadd.f32 %v2047_v46, %v2046_v4 }
 0x13b   : > { %v2103_v8 = vpop.f32.mrb[25].mxu1 }
 0x13c   : > { %v2104_v10 = vadd.f32 %v2103_v8, %v2102_v5  ;;  %v1018_v11 = vadd.f32 %v2048_v7, %v3621_v9  ;;  %v2049_v12 = vpop.f32.mrb[26].mxu0 }
 0x13d   : > { %v2050_v55 = vpop.f32.mrb[27].mxu0 }
 0x13e   : > { %v2105_v13 = vpop.f32.mrb[26].mxu1  ;;  %v1123_v14 = vadd.f32 %v2104_v10, %v1018_v11  ;;  %v2051_v15 = vadd.f32 %v2050_v55, %v2049_v12 }
 0x13f   : > { %v2106_v16 = vpop.f32.mrb[27].mxu1 }
 0x140   : > { %v2107_v17 = vadd.f32 %v2106_v16, %v2105_v13  ;;  %v1023_v18 = vadd.f32 %v2051_v15, %v918_v19  ;;  %v2052_v20 = vpop.f32.mrb[28].mxu0 }
 0x141   : > { %v2053_v21 = vpop.f32.mrb[29].mxu0 }
 0x142   : > { %v2108_v0 = vpop.f32.mrb[28].mxu1  ;;  %v1128_v22 = vadd.f32 %v2107_v17, %v1023_v18  ;;  %v2054_v23 = vadd.f32 %v2053_v21, %v2052_v20 }
 0x143   : > { %v2109_v24 = vpop.f32.mrb[29].mxu1 }
 0x144   : > { %v2110_v25 = vadd.f32 %v2109_v24, %v2108_v0  ;;  %v1028_v26 = vadd.f32 %v2054_v23, %v923_v28  ;;  %v2055_v27 = vpop.f32.mrb[30].mxu0 }
 0x145   : > { %v2056_v29 = vpop.f32.mrb[31].mxu0 }
 0x146   : > { %v2111_v30 = vpop.f32.mrb[30].mxu1  ;;  %v1133_v9 = vadd.f32 %v2110_v25, %v1028_v26  ;;  %v2057_v31 = vadd.f32 %v2056_v29, %v2055_v27 }
 0x147   : > { %v2112_v32 = vpop.f32.mrb[31].mxu1 }
 0x148   : > { %v2113_v33 = vadd.f32 %v2112_v32, %v2111_v30  ;;  %v1033_v34 = vadd.f32 %v2057_v31, %v928_v36  ;;  %v2146_v35 = vpop.f32.mrb[32].mxu0 }
 0x149   : > { %v2147_v38 = vpop.f32.mrb[33].mxu0 }
 0x14a   : > { %v2202_v39 = vpop.f32.mrb[32].mxu1  ;;  %v1138_v19 = vadd.f32 %v2113_v33, %v1033_v34  ;;  %v2148_v40 = vadd.f32 %v2147_v38, %v2146_v35 }
 0x14b   : > { %v2203_v41 = vpop.f32.mrb[33].mxu1 }
 0x14c   : > { %v2204_v42 = vadd.f32 %v2203_v41, %v2202_v39  ;;  %v1208_v43 = vadd.f32 %v2148_v40, %v1103_v45  ;;  %v2149_v44 = vpop.f32.mrb[34].mxu0 }
 0x14d   : > { %v2150_v47 = vpop.f32.mrb[35].mxu0 }
 0x14e   : > { %v2205_v48 = vpop.f32.mrb[34].mxu1  ;;  %v1313_v28 = vadd.f32 %v2204_v42, %v1208_v43  ;;  %v2151_v49 = vadd.f32 %v2150_v47, %v2149_v44 }
 0x14f   : > { %v2206_v50 = vpop.f32.mrb[35].mxu1 }
 0x150   : > { %v2207_v51 = vadd.f32 %v2206_v50, %v2205_v48  ;;  %v1213_v52 = vadd.f32 %v2151_v49, %v1108_v54  ;;  %v2152_v53 = vpop.f32.mrb[36].mxu0 }
 0x151   : > { %v2153_v56 = vpop.f32.mrb[37].mxu0 }
 0x152   : > { %v2208_v57 = vpop.f32.mrb[36].mxu1  ;;  %v1318_v36 = vadd.f32 %v2207_v51, %v1213_v52  ;;  %v2154_v58 = vadd.f32 %v2153_v56, %v2152_v53 }
 0x153   : > { %v2209_v59 = vpop.f32.mrb[37].mxu1 }
 0x154   : > { %v2210_v60 = vadd.f32 %v2209_v59, %v2208_v57  ;;  %v1218_v37 = vadd.f32 %v2154_v58, %v1113_v62  ;;  %v2155_v61 = vpop.f32.mrb[38].mxu0 }
 0x155   : > { %v2156_v63 = vpop.f32.mrb[39].mxu0 }
 0x156   : > { %v2211_v1 = vpop.f32.mrb[38].mxu1  ;;  %v1323_v45 = vadd.f32 %v2210_v60, %v1218_v37  ;;  %v2157_v2 = vadd.f32 %v2156_v63, %v2155_v61 }
 0x157   : > { %v2212_v3 = vpop.f32.mrb[39].mxu1 }
 0x158   : > { %v2213_v4 = vadd.f32 %v2212_v3, %v2211_v1  ;;  %v1223_v46 = vadd.f32 %v2157_v2, %v1118_v6  ;;  %v2158_v5 = vpop.f32.mrb[40].mxu0 }
 0x159   : > { %v2159_v7 = vpop.f32.mrb[41].mxu0 }
 0x15a   : > { %v2214_v8 = vpop.f32.mrb[40].mxu1  ;;  %v1328_v54 = vadd.f32 %v2213_v4, %v1223_v46  ;;  %v2160_v10 = vadd.f32 %v2159_v7, %v2158_v5 }
 0x15b   : > { %v2215_v11 = vpop.f32.mrb[41].mxu1 }
 0x15c   : > { %v2216_v12 = vadd.f32 %v2215_v11, %v2214_v8  ;;  %v1228_v55 = vadd.f32 %v2160_v10, %v1123_v14  ;;  %v2161_v13 = vpop.f32.mrb[42].mxu0 }
 0x15d   : > { %v2162_v15 = vpop.f32.mrb[43].mxu0 }
 0x15e   : > { %v2217_v16 = vpop.f32.mrb[42].mxu1  ;;  %v1333_v62 = vadd.f32 %v2216_v12, %v1228_v55  ;;  %v2163_v17 = vadd.f32 %v2162_v15, %v2161_v13 }
 0x15f   : > { %v2218_v18 = vpop.f32.mrb[43].mxu1 }
 0x160   : > { %v2219_v20 = vadd.f32 %v2218_v18, %v2217_v16  ;;  %v1233_v21 = vadd.f32 %v2163_v17, %v1128_v22  ;;  %v2164_v0 = vpop.f32.mrb[44].mxu0 }
 0x161   : > { %v2165_v23 = vpop.f32.mrb[45].mxu0 }
 0x162   : > { %v2220_v24 = vpop.f32.mrb[44].mxu1  ;;  %v1338_v6 = vadd.f32 %v2219_v20, %v1233_v21  ;;  %v2166_v25 = vadd.f32 %v2165_v23, %v2164_v0 }
 0x163   : > { %v2221_v26 = vpop.f32.mrb[45].mxu1 }
 0x164   : > { %v2222_v27 = vadd.f32 %v2221_v26, %v2220_v24  ;;  %v1238_v29 = vadd.f32 %v2166_v25, %v1133_v9  ;;  %v2167_v30 = vpop.f32.mrb[46].mxu0 }
 0x165   : > { %v2168_v31 = vpop.f32.mrb[47].mxu0 }
 0x166   : > { %v1343_v32 = vadd.f32 %v2222_v27, %v1238_v29  ;;  %v2169_v14 = vadd.f32 %v2168_v31, %v2167_v30  ;;  %v2223_v33 = vpop.f32.mrb[46].mxu1 }
 0x167   : > { %v2224_v34 = vpop.f32.mrb[47].mxu1 }
 0x168   : > { %v1243_v35 = vadd.f32 %v2169_v14, %v1138_v19  ;;  %v2225_v38 = vadd.f32 %v2224_v34, %v2223_v33  ;;  %v2258_v39 = vpop.f32.mrb[48].mxu0 }
 0x169   : > { %v2259_v40 = vpop.f32.mrb[49].mxu0 }
 0x16a   : > { %v1348_v41 = vadd.f32 %v2225_v38, %v1243_v35  ;;  %v2260_v22 = vadd.f32 %v2259_v40, %v2258_v39 }
 0x16b   : > { %v2314_v42 = vpop.f32.mrb[48].mxu1 }
 0x16c   : > { %v1418_v43 = vadd.f32 %v2260_v22, %v1313_v28  ;;  %v2315_v44 = vpop.f32.mrb[49].mxu1  ;;  %v2261_v47 = vpop.f32.mrb[50].mxu0 }
 0x16d   : > { %v2316_v48 = vadd.f32 %v2315_v44, %v2314_v42  ;;  %v2262_v49 = vpop.f32.mrb[51].mxu0 }
 0x16e   : > { %v2263_v50 = vadd.f32 %v2262_v49, %v2261_v47 }
 0x16f   : > { %v1523_v9 = vadd.f32 %v2316_v48, %v1418_v43  ;;  %v2317_v51 = vpop.f32.mrb[50].mxu1 }
 0x170   : > { %v1423_v52 = vadd.f32 %v2263_v50, %v1318_v36  ;;  %v2318_v53 = vpop.f32.mrb[51].mxu1  ;;  %v2264_v56 = vpop.f32.mrb[52].mxu0 }
 0x171   : > { %v2319_v57 = vadd.f32 %v2318_v53, %v2317_v51  ;;  %v2265_v58 = vpop.f32.mrb[53].mxu0 }
 0x172   : > { %v2266_v19 = vadd.f32 %v2265_v58, %v2264_v56 }
 0x173   : > { %v1528_v59 = vadd.f32 %v2319_v57, %v1423_v52  ;;  %v2320_v60 = vpop.f32.mrb[52].mxu1 }
 0x174   : > { %v1428_v37 = vadd.f32 %v2266_v19, %v1323_v45  ;;  %v2321_v61 = vpop.f32.mrb[53].mxu1  ;;  %v2267_v63 = vpop.f32.mrb[54].mxu0 }
 0x175   : > { %v2322_v1 = vadd.f32 %v2321_v61, %v2320_v60  ;;  %v2268_v28 = vpop.f32.mrb[55].mxu0 }
 0x176   : > { %v2269_v2 = vadd.f32 %v2268_v28, %v2267_v63 }
 0x177   : > { %v3628_v3 = vadd.f32 %v2322_v1, %v1428_v37  ;;  %v2323_v4 = vpop.f32.mrb[54].mxu1 }
 0x178   : > { %v1433_v46 = vadd.f32 %v2269_v2, %v1328_v54  ;;  %v2324_v5 = vpop.f32.mrb[55].mxu1  ;;  %v2270_v7 = vpop.f32.mrb[56].mxu0 }
 0x179   : > { %v2325_v36 = vadd.f32 %v2324_v5, %v2323_v4  ;;  %v2271_v8 = vpop.f32.mrb[57].mxu0 }
 0x17a   : > { %v2272_v10 = vadd.f32 %v2271_v8, %v2270_v7 }
 0x17b   : > { %v3630_v11 = vadd.f32 %v2325_v36, %v1433_v46  ;;  %v2326_v12 = vpop.f32.mrb[56].mxu1 }
 0x17c   : > { %v1438_v55 = vadd.f32 %v2272_v10, %v1333_v62  ;;  %v2327_v13 = vpop.f32.mrb[57].mxu1  ;;  %v2273_v45 = vpop.f32.mrb[58].mxu0 }
 0x17d   : > { %v2328_v15 = vadd.f32 %v2327_v13, %v2326_v12  ;;  %v2274_v16 = vpop.f32.mrb[59].mxu0 }
 0x17e   : > { %v2275_v17 = vadd.f32 %v2274_v16, %v2273_v45 }
 0x17f   : > { %v3632_v18 = vadd.f32 %v2328_v15, %v1438_v55  ;;  %v2329_v20 = vpop.f32.mrb[58].mxu1 }
 0x180   : > { %v1443_v21 = vadd.f32 %v2275_v17, %v1338_v6  ;;  %v2330_v0 = vpop.f32.mrb[59].mxu1  ;;  %v2276_v54 = vpop.f32.mrb[60].mxu0 }
 0x181   : > { %v2331_v23 = vadd.f32 %v2330_v0, %v2329_v20  ;;  %v2277_v24 = vpop.f32.mrb[61].mxu0 }
 0x182   : > { %v2278_v25 = vadd.f32 %v2277_v24, %v2276_v54 }
 0x183   : > { %v1548_v26 = vadd.f32 %v2331_v23, %v1443_v21  ;;  %v2332_v27 = vpop.f32.mrb[60].mxu1 }
 0x184   : > { %v1448_v29 = vadd.f32 %v2278_v25, %v1343_v32  ;;  %v2333_v30 = vpop.f32.mrb[61].mxu1  ;;  %v2279_v31 = vpop.f32.mrb[62].mxu0 }
 0x185   : > { %v2334_v62 = vadd.f32 %v2333_v30, %v2332_v27  ;;  %v2280_v14 = vpop.f32.mrb[63].mxu0 }
 0x186   : > { %v2281_v33 = vadd.f32 %v2280_v14, %v2279_v31 }
 0x187   : > { %v1553_v34 = vadd.f32 %v2334_v62, %v1448_v29  ;;  %v2335_v35 = vpop.f32.mrb[62].mxu1 }
 0x188   : > { %v1453_v38 = vadd.f32 %v2281_v33, %v1348_v41  ;;  %v2336_v39 = vpop.f32.mrb[63].mxu1 }
 0x189   : > { %v2337_v40 = vadd.f32 %v2336_v39, %v2335_v35  ;;  %v2370_v6 = vpop.f32.mrb[64].mxu0 }
 0x18a   : > { %v2371_v22 = vpop.f32.mrb[65].mxu0 }
 0x18b   : > { %v1558_v42 = vadd.f32 %v2337_v40, %v1453_v38  ;;  %v2372_v43 = vadd.f32 %v2371_v22, %v2370_v6  ;;  %v2422_v44 = vpop.f32.mrb[64].mxu1 }
 0x18c   : > { %v1732_v47 = vpop.f32.mrb[65].mxu1 }
 0x18d   : > { %v2373_v48 = vpop.f32.mrb[66].mxu0  ;;  %v1628_v32 = vadd.f32 %v2372_v43, %v1523_v9 }
 0x18e   : > { %v2374_v49 = vpop.f32.mrb[67].mxu0 }
 0x18f   : > { %v2375_v50 = vadd.f32 %v2374_v49, %v2373_v48  ;;  %v1733_v51 = vadd.f32 %v1732_v47, %v1628_v32  ;;  %v2425_v52 = vpop.f32.mrb[66].mxu1 }
 0x190   : > { %v1742_v41 = vpop.f32.mrb[67].mxu1 }
 0x191   : > { %v1633_v53 = vadd.f32 %v2375_v50, %v1528_v59  ;;  %v1771_v56 = vmax.f32 %v1733_v51, 0.0  ;;  %v2376_v57 = vpop.f32.mrb[68].mxu0 }
 0x192   : > { %v2377_v58 = vpop.f32.mrb[69].mxu0 }
 0x193   : > { %v1738_v19 = vadd.f32 %v2422_v44, %v1633_v53  ;;  %1780 = vst.msk [vmem:[%s3638_s5] sm:$0xff] %vm1779_vm1, %v1771_v56  ;;  %v2378_v9 = vadd.f32 %v2377_v58, %v2376_v57  ;;  %v2428_v60 = vpop.f32.mrb[68].mxu1 }
 0x194   : > { %v1752_v37 = vpop.f32.mrb[69].mxu1 }
 0x195   : > { %v1772_v61 = vmax.f32 %v1738_v19, 0.0  ;;  %v2379_v63 = vpop.f32.mrb[70].mxu0  ;;  %v1638_v1 = vadd.f32 %v2378_v9, %v3628_v3 }
 0x196   : > { %v2380_v28 = vpop.f32.mrb[71].mxu0 }
 0x197   : > { %1781 = vst.msk [vmem:[%s3638_s5 + $0x8] sm:$0xff] %vm1779_vm1, %v1772_v61  ;;  %v2381_v2 = vadd.f32 %v2380_v28, %v2379_v63  ;;  %v1743_v59 = vadd.f32 %v1742_v41, %v1638_v1  ;;  %v2431_v4 = vpop.f32.mrb[70].mxu1 }
 0x198   : > { %v1762_v46 = vpop.f32.mrb[71].mxu1 }
 0x199   : > { %v1643_v5 = vadd.f32 %v2381_v2, %v3630_v11  ;;  %v1773_v7 = vmax.f32 %v1743_v59, 0.0  ;;  %v2382_v36 = vpop.f32.mrb[72].mxu0 }
 0x19a   : > { %v2383_v8 = vpop.f32.mrb[73].mxu0 }
 0x19b   : > { %v1748_v10 = vadd.f32 %v2425_v52, %v1643_v5  ;;  %1782 = vst.msk [vmem:[%s3638_s5 + $0x10] sm:$0xff] %vm1779_vm1, %v1773_v7  ;;  %v2384_v12 = vadd.f32 %v2383_v8, %v2382_v36 }
 0x19d   : > { %v1774_v55 = vmax.f32 %v1748_v10, 0.0  ;;  %v2385_v3 = vpop.f32.mrb[74].mxu0  ;;  %v1648_v13 = vadd.f32 %v2384_v12, %v3632_v18 }
 0x19e   : > { %v2386_v45 = vpop.f32.mrb[75].mxu0 }
 0x19f   : > { %1783 = vst.msk [vmem:[%s3638_s5 + $0x18] sm:$0xff] %vm1779_vm1, %v1774_v55  ;;  %v2387_v15 = vadd.f32 %v2386_v45, %v2385_v3  ;;  %v1753_v16 = vadd.f32 %v1752_v37, %v1648_v13 }
 0x1a1   : > { %v1653_v17 = vadd.f32 %v2387_v15, %v1548_v26  ;;  %v1775_v11 = vmax.f32 %v1753_v16, 0.0  ;;  %v2388_v20 = vpop.f32.mrb[76].mxu0 }
 0x1a2   : > { %v2389_v21 = vpop.f32.mrb[77].mxu0 }
 0x1a3   : > { %v1758_v0 = vadd.f32 %v2428_v60, %v1653_v17  ;;  %1784 = vst.msk [vmem:[%s3638_s5 + $0x20] sm:$0xff] %vm1779_vm1, %v1775_v11  ;;  %v2390_v54 = vadd.f32 %v2389_v21, %v2388_v20 }
 0x1a5   : > { %v1776_v23 = vmax.f32 %v1758_v0, 0.0  ;;  %v2391_v24 = vpop.f32.mrb[78].mxu0  ;;  %v1658_v25 = vadd.f32 %v2390_v54, %v1553_v34 }
 0x1a6   : > { %v2392_v18 = vpop.f32.mrb[79].mxu0 }
 0x1a7   : > { %1785 = vst.msk [vmem:[%s3638_s5 + $0x28] sm:$0xff] %vm1779_vm1, %v1776_v23  ;;  %v2393_v27 = vadd.f32 %v2392_v18, %v2391_v24  ;;  %v1763_v29 = vadd.f32 %v1762_v46, %v1658_v25 }
 0x1a9   : > { %v1663_v30 = vadd.f32 %v2393_v27, %v1558_v42  ;;  %v1777_v31 = vmax.f32 %v1763_v29, 0.0 }
 0x1ab   : > { %v1768_v26 = vadd.f32 %v2431_v4, %v1663_v30  ;;  %1786 = vst.msk [vmem:[%s3638_s5 + $0x30] sm:$0xff] %vm1779_vm1, %v1777_v31 }
 0x1ad   : > { %v1778_v62 = vmax.f32 %v1768_v26, 0.0 }
 0x1af   : > { %1787 = vst.msk [vmem:[%s3638_s5 + $0x38] sm:$0xff] %vm1779_vm1, %v1778_v62 }
 0x1b0 PF: > { %s13_s14 = sadd.s32 1, %s2782_s14   ;;  %s3672_s12 = smov %s2778_s13 }
 0x1b1   : > { %p10_p5 = scmp.ge.s32.totalorder %s13_s14, 4   ;;  %s3673_s13 = smov %s3675_s15 }
 0x1b3   :  { %12 = sbr.rel (!%p10_p5) target bundleno = 2 (0x2), region = 62 }

// kernel: key_encoder_forward_pallas.25
= control target key start
LH: loop header
LB: loop body
LE: loop exit
PB: predicated region body
PF: predicated region fallthrough
CT: control target
= control target key end

     0   :  { %s1138_s12 = smov 0   ;;  %s1140_s13 = smov 0   ;;  %s1415_s0 = inlined_call_operand.vmem [shape: f32[2,576,16], index: 0, kind: input, shape index: {}]   ;;  %s1416_s1 = inlined_call_operand.vmem [shape: f32[64,576], index: 1, kind: input, shape index: {}]   ;;  %s1417_s2 = inlined_call_operand.vmem [shape: f32[64,1], index: 2, kind: input, shape index: {}]   ;;  %s1418_s3 = inlined_call_operand.vmem [shape: f32[2,64,16], index: 3, kind: output, shape index: {}]  }
   0x1   :  { %s1142_s14 = smov 0  }
   0x2 LB: > { %s25_s15 = sadd.s32 1, %s1111_s13  ;;  %p806_p0 = scmp.ge.s32.totalorder %s1115_s14, 1  ;;  %s1115_s14 = sphi %s1142_s14, %s13_s14   ;;  %s1111_s13 = sphi %s1140_s13, %s1420_s13   ;;  %s1107_s12 = sphi %s1138_s12, %s1419_s12  }
   0x3   : > { %p27_p1 = scmp.ge.s32.totalorder %s25_s15, 2  ;;  %p156_p2 = scmp.lt.s32.totalorder %s1115_s14, 3 }
   0x5   : > { %s1422_s15 = smov (%p27_p1, %s25_s15), 0  ;;  %p157_p3 = pnand %p806_p0, %p156_p2 }
   0x6   : > { %p186_p4 = scmp.lt.s32.totalorder (!%p157_p3), %s1107_s12, 1  ;;  %v203_v0 = vld [vmem:[%s1416_s1 + $0x8] sm:$0xff] (!%p157_p3)  ;;  %v205_v1 = vld [vmem:[%s1416_s1 + $0x18] sm:$0xff] (!%p157_p3)  ;;  %v1117_v2 = vmov (!%p157_p3), 0   ;;  %vm362_vm0 = vcmask (!%p157_p3), 523264   ;;  %vm710_vm1 = vcmask (!%p157_p3), 130048  }
   0x7   : > { %160 = sbr.rel (%p157_p3) target bundleno = 309 (0x135), region = 32  ;;  %451 = vmatprep.mubr.f32.mxu0 (!%p157_p3), %v203_v0  ;;  %556 = vmatprep.mubr.f32.mxu1 (!%p157_p3), %v205_v1 }
   0x8   : > { %1091 = vset.pattern.permute.xlu0 (!%p157_p3), %v1117_v2  ;;  %1092 = vset.pattern.permute.xlu1 (!%p157_p3), %v1117_v2 }
   0xe   : > { %s1424_s12 = smov (!%p186_p4, %s1107_s12), 1 }
   0xf   : > { %s1065_s20 = smul.u32 576, %s1424_s12  ;;  %s820_s25 = sshll.u32 %s1424_s12, 6 }
  0x10   : > { %s201_s28 = scalar_lea.vmem %s1418_s3, %s820_s25 }
  0x11   : > { %s1168_s23 = scalar_lea.vmem %s1415_s0, %s1065_s20 }
  0x12   : > { %v258_v3 = vld [vmem:[%s1168_s23 + $0x80] sm:$0xff]  ;;  %v259_v4 = vld [vmem:[%s1168_s23 + $0x88] sm:$0xff]  ;;  %v260_v14 = vld [vmem:[%s1168_s23 + $0x90] sm:$0xff] }
  0x13   : > { %v290_v5 = vld [vmem:[%s1168_s23 + $0x180] sm:$0xff]  ;;  %v977_v6 = vpack.c.bf16 %v259_v4, %v258_v3  ;;  %v291_v7 = vld [vmem:[%s1168_s23 + $0x188] sm:$0xff]  ;;  %v261_v16 = vld [vmem:[%s1168_s23 + $0x98] sm:$0xff] }
  0x14   : > { %v242_v8 = vld [vmem:[%s1168_s23] sm:$0xff]  ;;  %v243_v9 = vld [vmem:[%s1168_s23 + $0x8] sm:$0xff]  ;;  %v1009_v10 = vpack.c.bf16 %v291_v7, %v290_v5  ;;  %v292_v17 = vld [vmem:[%s1168_s23 + $0x190] sm:$0xff]  ;;  %v981_v19 = vpack.c.bf16 %v261_v16, %v260_v14 }
  0x15   : > { %v979_v11 = vpack.c.bf16 %v243_v9, %v242_v8  ;;  %v274_v12 = vld [vmem:[%s1168_s23 + $0x100] sm:$0xff]  ;;  %v275_v13 = vld [vmem:[%s1168_s23 + $0x108] sm:$0xff]  ;;  %978 = vmatprep.subr.bf16.mxu0 %v977_v6  ;;  %v293_v18 = vld [vmem:[%s1168_s23 + $0x198] sm:$0xff] }
  0x16   : > { %v1011_v15 = vpack.c.bf16 %v275_v13, %v274_v12  ;;  %1010 = vmatprep.subr.bf16.mxu1 %v1009_v10  ;;  %v1013_v20 = vpack.c.bf16 %v293_v18, %v292_v17  ;;  %v244_v21 = vld [vmem:[%s1168_s23 + $0x10] sm:$0xff]  ;;  %v245_v22 = vld [vmem:[%s1168_s23 + $0x18] sm:$0xff]  ;;  %v262_v26 = vld [vmem:[%s1168_s23 + $0xa0] sm:$0xff] }
  0x17   : > { %980 = vmatpush3.bf16.msra.mxu0 %v979_v11  ;;  %v276_v23 = vld [vmem:[%s1168_s23 + $0x110] sm:$0xff]  ;;  %v983_v24 = vpack.c.bf16 %v245_v22, %v244_v21  ;;  %v277_v25 = vld [vmem:[%s1168_s23 + $0x118] sm:$0xff]  ;;  %v263_v27 = vld [vmem:[%s1168_s23 + $0xa8] sm:$0xff] }
  0x18   : > { %1012 = vmatpush3.bf16.msra.mxu1 %v1011_v15  ;;  %982 = vmatprep.subr.bf16.mxu0 %v981_v19  ;;  %v1015_v28 = vpack.c.bf16 %v277_v25, %v276_v23  ;;  %v985_v29 = vpack.c.bf16 %v263_v27, %v262_v26  ;;  %v294_v30 = vld [vmem:[%s1168_s23 + $0x1a0] sm:$0xff]  ;;  %v295_v31 = vld [vmem:[%s1168_s23 + $0x1a8] sm:$0xff]  ;;  %v264_v38 = vld [vmem:[%s1168_s23 + $0xb0] sm:$0xff] }
  0x19   : > { %1014 = vmatprep.subr.bf16.mxu1 %v1013_v20  ;;  %v246_v32 = vld [vmem:[%s1168_s23 + $0x20] sm:$0xff]  ;;  %v1017_v33 = vpack.c.bf16 %v295_v31, %v294_v30  ;;  %v247_v34 = vld [vmem:[%s1168_s23 + $0x28] sm:$0xff]  ;;  %v265_v39 = vld [vmem:[%s1168_s23 + $0xb8] sm:$0xff] }
  0x1a   : > { %v278_v35 = vld [vmem:[%s1168_s23 + $0x120] sm:$0xff]  ;;  %v279_v36 = vld [vmem:[%s1168_s23 + $0x128] sm:$0xff]  ;;  %v987_v37 = vpack.c.bf16 %v247_v34, %v246_v32  ;;  %v296_v40 = vld [vmem:[%s1168_s23 + $0x1b0] sm:$0xff]  ;;  %v989_v42 = vpack.c.bf16 %v265_v39, %v264_v38 }
  0x1b   : > { %984 = vmatpush3.bf16.msra.mxu0 %v983_v24  ;;  %v1019_v41 = vpack.c.bf16 %v279_v36, %v278_v35  ;;  %v297_v43 = vld [vmem:[%s1168_s23 + $0x1b8] sm:$0xff]  ;;  %v248_v44 = vld [vmem:[%s1168_s23 + $0x30] sm:$0xff]  ;;  %v266_v49 = vld [vmem:[%s1168_s23 + $0xc0] sm:$0xff] }
  0x1c   : > { %1016 = vmatpush3.bf16.msra.mxu1 %v1015_v28  ;;  %986 = vmatprep.subr.bf16.mxu0 %v985_v29  ;;  %v249_v45 = vld [vmem:[%s1168_s23 + $0x38] sm:$0xff]  ;;  %v1021_v46 = vpack.c.bf16 %v297_v43, %v296_v40  ;;  %v280_v47 = vld [vmem:[%s1168_s23 + $0x130] sm:$0xff]  ;;  %v267_v50 = vld [vmem:[%s1168_s23 + $0xc8] sm:$0xff] }
  0x1d   : > { %1018 = vmatprep.subr.bf16.mxu1 %v1017_v33  ;;  %v281_v48 = vld [vmem:[%s1168_s23 + $0x138] sm:$0xff]  ;;  %v298_v51 = vld [vmem:[%s1168_s23 + $0x1c0] sm:$0xff]  ;;  %v299_v52 = vld [vmem:[%s1168_s23 + $0x1c8] sm:$0xff]  ;;  %v991_v53 = vpack.c.bf16 %v249_v45, %v248_v44  ;;  %v993_v55 = vpack.c.bf16 %v267_v50, %v266_v49 }
  0x1e   : > { %v1023_v54 = vpack.c.bf16 %v281_v48, %v280_v47  ;;  %v250_v56 = vld [vmem:[%s1168_s23 + $0x40] sm:$0xff]  ;;  %v251_v57 = vld [vmem:[%s1168_s23 + $0x48] sm:$0xff]  ;;  %v1025_v59 = vpack.c.bf16 %v299_v52, %v298_v51  ;;  %v268_v61 = vld [vmem:[%s1168_s23 + $0xd0] sm:$0xff] }
  0x1f   : > { %988 = vmatpush3.bf16.msra.mxu0 %v987_v37  ;;  %v282_v58 = vld [vmem:[%s1168_s23 + $0x140] sm:$0xff]  ;;  %v283_v60 = vld [vmem:[%s1168_s23 + $0x148] sm:$0xff]  ;;  %v269_v62 = vld [vmem:[%s1168_s23 + $0xd8] sm:$0xff]  ;;  %v995_v1 = vpack.c.bf16 %v251_v57, %v250_v56 }
  0x20   : > { %1020 = vmatpush3.bf16.msra.mxu1 %v1019_v41  ;;  %990 = vmatprep.subr.bf16.mxu0 %v989_v42  ;;  %v300_v63 = vld [vmem:[%s1168_s23 + $0x1d0] sm:$0xff]  ;;  %v301_v0 = vld [vmem:[%s1168_s23 + $0x1d8] sm:$0xff]  ;;  %v1027_v2 = vpack.c.bf16 %v283_v60, %v282_v58  ;;  %v997_v3 = vpack.c.bf16 %v269_v62, %v268_v61  ;;  %v270_v9 = vld [vmem:[%s1168_s23 + $0xe0] sm:$0xff] }
  0x21   : > { %1022 = vmatprep.subr.bf16.mxu1 %v1021_v46  ;;  %v252_v4 = vld [vmem:[%s1168_s23 + $0x50] sm:$0xff]  ;;  %v253_v5 = vld [vmem:[%s1168_s23 + $0x58] sm:$0xff]  ;;  %v1029_v7 = vpack.c.bf16 %v301_v0, %v300_v63  ;;  %v271_v10 = vld [vmem:[%s1168_s23 + $0xe8] sm:$0xff] }
  0x22   : > { %v284_v6 = vld [vmem:[%s1168_s23 + $0x150] sm:$0xff]  ;;  %v285_v8 = vld [vmem:[%s1168_s23 + $0x158] sm:$0xff]  ;;  %v302_v11 = vld [vmem:[%s1168_s23 + $0x1e0] sm:$0xff]  ;;  %v999_v13 = vpack.c.bf16 %v253_v5, %v252_v4  ;;  %v1001_v15 = vpack.c.bf16 %v271_v10, %v270_v9 }
  0x23   : > { %992 = vmatpush3.bf16.msra.mxu0 %v991_v53  ;;  %v303_v12 = vld [vmem:[%s1168_s23 + $0x1e8] sm:$0xff]  ;;  %v1031_v14 = vpack.c.bf16 %v285_v8, %v284_v6  ;;  %v254_v16 = vld [vmem:[%s1168_s23 + $0x60] sm:$0xff]  ;;  %v272_v21 = vld [vmem:[%s1168_s23 + $0xf0] sm:$0xff] }
  0x24   : > { %1024 = vmatpush3.bf16.msra.mxu1 %v1023_v54  ;;  %994 = vmatprep.subr.bf16.mxu0 %v993_v55  ;;  %v255_v17 = vld [vmem:[%s1168_s23 + $0x68] sm:$0xff]  ;;  %v286_v18 = vld [vmem:[%s1168_s23 + $0x160] sm:$0xff]  ;;  %v1033_v19 = vpack.c.bf16 %v303_v12, %v302_v11  ;;  %v273_v22 = vld [vmem:[%s1168_s23 + $0xf8] sm:$0xff] }
  0x25   : > { %1026 = vmatprep.subr.bf16.mxu1 %v1025_v59  ;;  %v287_v20 = vld [vmem:[%s1168_s23 + $0x168] sm:$0xff]  ;;  %v304_v23 = vld [vmem:[%s1168_s23 + $0x1f0] sm:$0xff]  ;;  %v305_v24 = vld [vmem:[%s1168_s23 + $0x1f8] sm:$0xff]  ;;  %v1003_v25 = vpack.c.bf16 %v255_v17, %v254_v16  ;;  %v1005_v27 = vpack.c.bf16 %v273_v22, %v272_v21 }
  0x26   : > { %v1035_v26 = vpack.c.bf16 %v287_v20, %v286_v18  ;;  %v256_v28 = vld [vmem:[%s1168_s23 + $0x70] sm:$0xff]  ;;  %v257_v29 = vld [vmem:[%s1168_s23 + $0x78] sm:$0xff]  ;;  %v1037_v31 = vpack.c.bf16 %v305_v24, %v304_v23  ;;  %v306_v33 = vld [vmem:[%s1168_s23 + $0x200] sm:$0xff] }
  0x27   : > { %996 = vmatpush3.bf16.msra.mxu0 %v995_v1  ;;  %v288_v30 = vld [vmem:[%s1168_s23 + $0x170] sm:$0xff]  ;;  %v289_v32 = vld [vmem:[%s1168_s23 + $0x178] sm:$0xff]  ;;  %v307_v34 = vld [vmem:[%s1168_s23 + $0x208] sm:$0xff]  ;;  %v1007_v35 = vpack.c.bf16 %v257_v29, %v256_v28 }
  0x28   : > { %1028 = vmatpush3.bf16.msra.mxu1 %v1027_v2  ;;  %998 = vmatprep.subr.bf16.mxu0 %v997_v3  ;;  %v1039_v36 = vpack.c.bf16 %v289_v32, %v288_v30  ;;  %v1041_v37 = vpack.c.bf16 %v307_v34, %v306_v33  ;;  %v314_v38 = vld [vmem:[%s1417_s2] sm:$0xff]  ;;  %v308_v39 = vld [vmem:[%s1168_s23 + $0x210] sm:$0xff]  ;;  %v309_v40 = vld [vmem:[%s1168_s23 + $0x218] sm:$0xff] }
  0x29   : > { %1030 = vmatprep.subr.bf16.mxu1 %v1029_v7  ;;  %324 = vperm.xlu0 %1091, %v314_v38   ;;  %v316_v41 = vld [vmem:[%s1417_s2 + $0x10] sm:$0xff]  ;;  %v202_v42 = vld [vmem:[%s1416_s1] sm:$0xff]  ;;  %v315_v43 = vld [vmem:[%s1417_s2 + $0x8] sm:$0xff]  ;;  %v1045_v46 = vpack.c.bf16 %v309_v40, %v308_v39 }
  0x2a   : > { %334 = vperm.xlu1 %1092, %v316_v41   ;;  %v204_v44 = vld [vmem:[%s1416_s1 + $0x10] sm:$0xff]  ;;  %v210_v47 = vld [vmem:[%s1416_s1 + $0x40] sm:$0xff]  ;;  %v311_v49 = vld [vmem:[%s1168_s23 + $0x228] sm:$0xff] }
  0x2b   : > { %1000 = vmatpush3.bf16.msra.mxu0 %v999_v13  ;;  %v208_v45 = vld [vmem:[%s1416_s1 + $0x30] sm:$0xff]  ;;  %v310_v48 = vld [vmem:[%s1168_s23 + $0x220] sm:$0xff]  ;;  %v207_v50 = vld [vmem:[%s1416_s1 + $0x28] sm:$0xff] }
  0x2c   : > { %1032 = vmatpush3.bf16.msra.mxu1 %v1031_v14  ;;  %1002 = vmatprep.subr.bf16.mxu0 %v1001_v15  ;;  %v209_v51 = vld [vmem:[%s1416_s1 + $0x38] sm:$0xff]  ;;  %v215_v53 = vld [vmem:[%s1416_s1 + $0x68] sm:$0xff]  ;;  %v1049_v54 = vpack.c.bf16 %v311_v49, %v310_v48  ;;  %v312_v55 = vld [vmem:[%s1168_s23 + $0x230] sm:$0xff] }
  0x2d   : > { %1034 = vmatprep.subr.bf16.mxu1 %v1033_v19  ;;  %329 = vperm.xlu0 %1091, %v315_v43   ;;  %v213_v52 = vld [vmem:[%s1416_s1 + $0x58] sm:$0xff]  ;;  %v212_v57 = vld [vmem:[%s1416_s1 + $0x50] sm:$0xff]  ;;  %v214_v58 = vld [vmem:[%s1416_s1 + $0x60] sm:$0xff] }
  0x2e   : > { %v313_v56 = vld [vmem:[%s1168_s23 + $0x238] sm:$0xff]  ;;  %v218_v59 = vld [vmem:[%s1416_s1 + $0x80] sm:$0xff]  ;;  %v220_v60 = vld [vmem:[%s1416_s1 + $0x90] sm:$0xff] }
  0x2f   : > { %1004 = vmatpush3.bf16.msra.mxu0 %v1003_v25  ;;  %v1053_v61 = vpack.c.bf16 %v313_v56, %v312_v55  ;;  %v217_v62 = vld [vmem:[%s1416_s1 + $0x78] sm:$0xff]  ;;  %v219_v63 = vld [vmem:[%s1416_s1 + $0x88] sm:$0xff]  ;;  %v222_v3 = vld [vmem:[%s1416_s1 + $0xa0] sm:$0xff] }
  0x30   : > { %1036 = vmatpush3.bf16.msra.mxu1 %v1035_v26  ;;  %1006 = vmatprep.subr.bf16.mxu0 %v1005_v27  ;;  %v223_v0 = vld [vmem:[%s1416_s1 + $0xa8] sm:$0xff]  ;;  %v225_v1 = vld [vmem:[%s1416_s1 + $0xb8] sm:$0xff]  ;;  %v318_v4 = vld [vmem:[%s1417_s2 + $0x20] sm:$0xff] }
  0x31   : > { %1038 = vmatprep.subr.bf16.mxu1 %v1037_v31  ;;  %v317_v2 = vld [vmem:[%s1417_s2 + $0x18] sm:$0xff]  ;;  %v224_v5 = vld [vmem:[%s1416_s1 + $0xb0] sm:$0xff]  ;;  %v230_v7 = vld [vmem:[%s1416_s1 + $0xe0] sm:$0xff]  ;;  %344 = vperm.xlu0 %1091, %v318_v4  }
  0x32   : > { %v228_v6 = vld [vmem:[%s1416_s1 + $0xd0] sm:$0xff]  ;;  %339 = vperm.xlu1 %1092, %v317_v2   ;;  %v319_v8 = vld [vmem:[%s1417_s2 + $0x28] sm:$0xff]  ;;  %v229_v11 = vld [vmem:[%s1416_s1 + $0xd8] sm:$0xff] }
  0x33   : > { %1008 = vmatpush3.bf16.msra.mxu0 %v1007_v35  ;;  %v227_v9 = vld [vmem:[%s1416_s1 + $0xc8] sm:$0xff]  ;;  %v320_v10 = vld [vmem:[%s1417_s2 + $0x30] sm:$0xff]  ;;  %v233_v12 = vld [vmem:[%s1416_s1 + $0xf8] sm:$0xff] }
  0x34   : > { %1040 = vmatpush3.bf16.msra.mxu1 %v1039_v36  ;;  %1042 = vmatprep.subr.bf16.mxu0 %v1041_v37  ;;  %v235_v13 = vld [vmem:[%s1416_s1 + $0x108] sm:$0xff]  ;;  %v321_v14 = vld [vmem:[%s1417_s2 + $0x38] sm:$0xff]  ;;  %v232_v15 = vld [vmem:[%s1416_s1 + $0xf0] sm:$0xff] }
  0x35   : > { %1057 = vmatprep.subr.bf16.mxu1 %v1041_v37  ;;  %354 = vperm.xlu0 %1091, %v320_v10   ;;  %v234_v16 = vld [vmem:[%s1416_s1 + $0x100] sm:$0xff]  ;;  %v240_v18 = vld [vmem:[%s1416_s1 + $0x130] sm:$0xff]  ;;  %v237_v19 = vld [vmem:[%s1416_s1 + $0x118] sm:$0xff] }
  0x36   : > { %452 = vmatmul.mubr.f32.vlgmr.msra.gmra.mrb[0].mxu0 %v202_v42  ;;  %349 = vperm.xlu1 %1092, %v319_v8   ;;  %v238_v17 = vld [vmem:[%s1416_s1 + $0x120] sm:$0xff]  ;;  %v239_v20 = vld [vmem:[%s1416_s1 + $0x128] sm:$0xff]  ;;  %v216_v25 = vld [vmem:[%s1416_s1 + $0x70] sm:$0xff] }
  0x37   : > { %557 = vmatmul.mubr.f32.vlgmr.msra.gmra.mrb[0].mxu1 %v204_v44  ;;  %1044 = vmatpush3.bf16.msra.mxu0 %v1041_v37  ;;  %v206_v21 = vld [vmem:[%s1416_s1 + $0x20] sm:$0xff]  ;;  %v211_v23 = vld [vmem:[%s1416_s1 + $0x48] sm:$0xff]  ;;  %v236_v26 = vld [vmem:[%s1416_s1 + $0x110] sm:$0xff] }
  0x38   : > { %1061 = vmatpush3.bf16.msra.mxu1 %v1041_v37  ;;  %456 = vmatprep.mubr.f32.mxu0 %v208_v45  ;;  %v226_v22 = vld [vmem:[%s1416_s1 + $0xc0] sm:$0xff]  ;;  %v231_v24 = vld [vmem:[%s1416_s1 + $0xe8] sm:$0xff]  ;;  %v221_v27 = vld [vmem:[%s1416_s1 + $0x98] sm:$0xff] }
  0x39   : > { %561 = vmatprep.mubr.f32.mxu1 %v210_v47  ;;  %1046 = vmatprep.subr.bf16.mxu0 %v1045_v46  ;;  %v241_v28 = vld [vmem:[%s1416_s1 + $0x138] sm:$0xff] }
  0x3a   : > { %457 = vmatmul.mubr.f32.gmra.mrb[2].mxu0 %v207_v50  ;;  %1058 = vmatprep.subr.bf16.mxu1 %v1045_v46 }
  0x3b   : > { %562 = vmatmul.mubr.f32.gmra.mrb[2].mxu1 %v209_v51  ;;  %461 = vmatprep.mubr.f32.mxu0 %v213_v52 }
  0x3c   : > { %566 = vmatprep.mubr.f32.mxu1 %v215_v53  ;;  %1048 = vmatpush3.bf16.msra.mxu0 %v1045_v46 }
  0x3d   : > { %1062 = vmatpush3.bf16.msra.mxu1 %v1045_v46  ;;  %1050 = vmatprep.subr.bf16.mxu0 %v1049_v54 }
  0x3e   : > { %462 = vmatmul.mubr.f32.gmra.mrb[4].mxu0 %v212_v57  ;;  %1059 = vmatprep.subr.bf16.mxu1 %v1049_v54 }
  0x3f   : > { %567 = vmatmul.mubr.f32.gmra.mrb[4].mxu1 %v214_v58  ;;  %466 = vmatprep.mubr.f32.mxu0 %v218_v59 }
  0x40   : > { %571 = vmatprep.mubr.f32.mxu1 %v220_v60  ;;  %1052 = vmatpush3.bf16.msra.mxu0 %v1049_v54 }
  0x41   : > { %1063 = vmatpush3.bf16.msra.mxu1 %v1049_v54  ;;  %1054 = vmatprep.subr.bf16.mxu0 %v1053_v61 }
  0x42   : > { %467 = vmatmul.mubr.f32.gmra.mrb[6].mxu0 %v217_v62  ;;  %1060 = vmatprep.subr.bf16.mxu1 %v1053_v61 }
  0x43   : > { %572 = vmatmul.mubr.f32.gmra.mrb[6].mxu1 %v219_v63  ;;  %471 = vmatprep.mubr.f32.mxu0 %v223_v0 }
  0x44   : > { %576 = vmatprep.mubr.f32.mxu1 %v225_v1  ;;  %1056 = vmatpush3.bf16.msra.mxu0 %v1053_v61 }
  0x45   : > { %1064 = vmatpush3.bf16.msra.mxu1 %v1053_v61  ;;  %359 = vperm.xlu1 %1092, %v321_v14  }
  0x46   : > { %472 = vmatmul.mubr.f32.gmra.mrb[8].mxu0 %v222_v3 }
  0x47   : > { %577 = vmatmul.mubr.f32.gmra.mrb[8].mxu1 %v224_v5  ;;  %476 = vmatprep.mubr.f32.mxu0 %v228_v6 }
  0x48   : > { %581 = vmatprep.mubr.f32.mxu1 %v230_v7 }
  0x4a   : > { %477 = vmatmul.mubr.f32.gmra.mrb[10].mxu0 %v227_v9 }
  0x4b   : > { %582 = vmatmul.mubr.f32.gmra.mrb[10].mxu1 %v229_v11  ;;  %481 = vmatprep.mubr.f32.mxu0 %v233_v12 }
  0x4c   : > { %586 = vmatprep.mubr.f32.mxu1 %v235_v13 }
  0x4e   : > { %482 = vmatmul.mubr.f32.gmra.mrb[12].mxu0 %v232_v15 }
  0x4f   : > { %587 = vmatmul.mubr.f32.gmra.mrb[12].mxu1 %v234_v16  ;;  %486 = vmatprep.mubr.f32.mxu0 %v238_v17 }
  0x50   : > { %591 = vmatprep.mubr.f32.mxu1 %v240_v18 }
  0x52   : > { %487 = vmatmul.mubr.f32.gmra.mrb[14].mxu0 %v237_v19 }
  0x53   : > { %592 = vmatmul.mubr.f32.gmra.mrb[14].mxu1 %v239_v20  ;;  %965 = vmatprep.mubr.msk.f32.mxu0 %vm362_vm0, %v206_v21 }
  0x54   : > { %971 = vmatprep.mubr.msk.f32.mxu1 %vm362_vm0, %v226_v22 }
  0x56   : > { %966 = vmatmul.mubr.msk.f32.vlgmr.msra.gmra.mrb[16].mxu0 %vm362_vm0, %v211_v23 }
  0x57   : > { %972 = vmatmul.mubr.msk.f32.vlgmr.msra.gmra.mrb[16].mxu1 %vm362_vm0, %v231_v24  ;;  %968 = vmatprep.mubr.msk.f32.mxu0 %vm362_vm0, %v216_v25 }
  0x58   : > { %974 = vmatprep.mubr.msk.f32.mxu1 %vm362_vm0, %v236_v26 }
  0x5a   : > { %969 = vmatmul.mubr.msk.f32.gmra.mrb[18].mxu0 %vm362_vm0, %v221_v27 }
  0x5b   : > { %975 = vmatmul.mubr.msk.f32.gmra.mrb[18].mxu1 %vm362_vm0, %v241_v28 }
  0xa8   : > { %v325_v29 = vpop.permute.xlu0 %324 }
  0xa9   : > { %v335_v47 = vpop.permute.xlu1 %334 }
  0xac   : > { %v330_v38 = vpop.permute.xlu0 %329 }
  0xb0   : > { %v345_v7 = vpop.permute.xlu0 %344 }
  0xb1   : > { %v340_v62 = vpop.permute.xlu1 %339 }
  0xb4   : > { %v355_v24 = vpop.permute.xlu0 %354 }
  0xb5   : > { %v350_v15 = vpop.permute.xlu1 %349 }
 0x109   : > { %v853_v30 = vpop.f32.mrb[0].mxu0 }
 0x10a   : > { %v909_v31 = vpop.f32.mrb[0].mxu1  ;;  %v854_v32 = vpop.f32.mrb[1].mxu0 }
 0x10b   : > { %v855_v33 = vadd.f32 %v854_v32, %v853_v30  ;;  %v910_v34 = vpop.f32.mrb[1].mxu1 }
 0x10c   : > { %v911_v35 = vadd.f32 %v910_v34, %v909_v31 }
 0x10d   : > { %v454_v36 = vadd.f32 %v855_v33, %v325_v29  ;;  %v856_v37 = vpop.f32.mrb[2].mxu0  ;;  %v360_v33 = vpop.permute.xlu1 %359 }
 0x10e   : > { %v912_v39 = vpop.f32.mrb[2].mxu1  ;;  %v857_v40 = vpop.f32.mrb[3].mxu0 }
 0x10f   : > { %v858_v41 = vadd.f32 %v857_v40, %v856_v37  ;;  %v913_v42 = vpop.f32.mrb[3].mxu1  ;;  %v1388_v43 = vadd.f32 %v911_v35, %v454_v36 }
 0x110   : > { %v914_v44 = vadd.f32 %v913_v42, %v912_v39 }
 0x111   : > { %v459_v45 = vadd.f32 %v858_v41, %v330_v38  ;;  %v859_v46 = vpop.f32.mrb[4].mxu0 }
 0x112   : > { %v915_v48 = vpop.f32.mrb[4].mxu1  ;;  %v860_v49 = vpop.f32.mrb[5].mxu0 }
 0x113   : > { %v861_v50 = vadd.f32 %v860_v49, %v859_v46  ;;  %v916_v51 = vpop.f32.mrb[5].mxu1  ;;  %v564_v52 = vadd.f32 %v914_v44, %v459_v45 }
 0x114   : > { %v917_v53 = vadd.f32 %v916_v51, %v915_v48 }
 0x115   : > { %v464_v54 = vadd.f32 %v861_v50, %v335_v47  ;;  %v862_v55 = vpop.f32.mrb[6].mxu0 }
 0x116   : > { %v918_v56 = vpop.f32.mrb[6].mxu1  ;;  %v863_v57 = vpop.f32.mrb[7].mxu0 }
 0x117   : > { %v864_v58 = vadd.f32 %v863_v57, %v862_v55  ;;  %v919_v59 = vpop.f32.mrb[7].mxu1  ;;  %v1390_v60 = vadd.f32 %v917_v53, %v464_v54 }
 0x118   : > { %v920_v61 = vadd.f32 %v919_v59, %v918_v56 }
 0x119   : > { %v469_v63 = vadd.f32 %v864_v58, %v340_v62  ;;  %v865_v0 = vpop.f32.mrb[8].mxu0 }
 0x11a   : > { %v921_v1 = vpop.f32.mrb[8].mxu1  ;;  %v866_v2 = vpop.f32.mrb[9].mxu0 }
 0x11b   : > { %v867_v3 = vadd.f32 %v866_v2, %v865_v0  ;;  %v922_v4 = vpop.f32.mrb[9].mxu1  ;;  %v574_v5 = vadd.f32 %v920_v61, %v469_v63 }
 0x11c   : > { %v923_v6 = vadd.f32 %v922_v4, %v921_v1 }
 0x11d   : > { %v474_v8 = vadd.f32 %v867_v3, %v345_v7  ;;  %v868_v9 = vpop.f32.mrb[10].mxu0 }
 0x11e   : > { %v924_v10 = vpop.f32.mrb[10].mxu1  ;;  %v869_v11 = vpop.f32.mrb[11].mxu0 }
 0x11f   : > { %v870_v12 = vadd.f32 %v869_v11, %v868_v9  ;;  %v925_v13 = vpop.f32.mrb[11].mxu1  ;;  %v579_v14 = vadd.f32 %v923_v6, %v474_v8 }
 0x120   : > { %v926_v16 = vadd.f32 %v925_v13, %v924_v10 }
 0x121   : > { %v479_v17 = vadd.f32 %v870_v12, %v350_v15  ;;  %v871_v18 = vpop.f32.mrb[12].mxu0 }
 0x122   : > { %v927_v19 = vpop.f32.mrb[12].mxu1  ;;  %v872_v20 = vpop.f32.mrb[13].mxu0 }
 0x123   : > { %v873_v21 = vadd.f32 %v872_v20, %v871_v18  ;;  %v928_v22 = vpop.f32.mrb[13].mxu1  ;;  %v584_v23 = vadd.f32 %v926_v16, %v479_v17 }
 0x124   : > { %v929_v25 = vadd.f32 %v928_v22, %v927_v19 }
 0x125   : > { %v484_v26 = vadd.f32 %v873_v21, %v355_v24  ;;  %v874_v27 = vpop.f32.mrb[14].mxu0 }
 0x126   : > { %v930_v28 = vpop.f32.mrb[14].mxu1  ;;  %v875_v29 = vpop.f32.mrb[15].mxu0 }
 0x127   : > { %v876_v30 = vadd.f32 %v875_v29, %v874_v27  ;;  %v931_v31 = vpop.f32.mrb[15].mxu1  ;;  %v589_v32 = vadd.f32 %v929_v25, %v484_v26 }
 0x128   : > { %v932_v34 = vadd.f32 %v931_v31, %v930_v28 }
 0x129   : > { %v489_v35 = vadd.f32 %v876_v30, %v360_v33  ;;  %v967_v36 = vpop.f32.mrb[16].mxu0 }
 0x12a   : > { %v669_v37 = vadd.f32 %v967_v36, %v564_v52  ;;  %v973_v38 = vpop.f32.mrb[16].mxu1  ;;  %v663_v39 = vpop.f32.mrb[17].mxu0 }
 0x12b   : > { %v689_v40 = vadd.f32 %v973_v38, %v584_v23  ;;  %v664_v41 = vadd.f32 %v663_v39, %v1388_v43  ;;  %v683_v42 = vpop.f32.mrb[17].mxu1  ;;  %v594_v44 = vadd.f32 %v932_v34, %v489_v35 }
 0x12c   : > { %v703_v45 = vmax.f32 %v669_v37, 0.0  ;;  %v684_v46 = vadd.f32 %v683_v42, %v579_v14 }
 0x12d   : > { %v707_v47 = vmax.f32 %v689_v40, 0.0  ;;  %v702_v48 = vmax.f32 %v664_v41, 0.0  ;;  %v970_v49 = vpop.f32.mrb[18].mxu0 }
 0x12e   : > { %712 = vst.msk [vmem:[%s201_s28 + $0x8] sm:$0xff] %vm710_vm1, %v703_v45  ;;  %v706_v50 = vmax.f32 %v684_v46, 0.0  ;;  %v679_v51 = vadd.f32 %v970_v49, %v574_v5  ;;  %v976_v52 = vpop.f32.mrb[18].mxu1  ;;  %v673_v53 = vpop.f32.mrb[19].mxu0 }
 0x12f   : > { %716 = vst.msk [vmem:[%s201_s28 + $0x28] sm:$0xff] %vm710_vm1, %v707_v47  ;;  %711 = vst.msk [vmem:[%s201_s28] sm:$0xff] %vm710_vm1, %v702_v48  ;;  %v699_v54 = vadd.f32 %v976_v52, %v594_v44  ;;  %v674_v43 = vadd.f32 %v673_v53, %v1390_v60  ;;  %v693_v55 = vpop.f32.mrb[19].mxu1 }
 0x130   : > { %715 = vst.msk [vmem:[%s201_s28 + $0x20] sm:$0xff] %vm710_vm1, %v706_v50  ;;  %v705_v56 = vmax.f32 %v679_v51, 0.0  ;;  %v694_v57 = vadd.f32 %v693_v55, %v589_v32 }
 0x131   : > { %v709_v58 = vmax.f32 %v699_v54, 0.0  ;;  %v704_v59 = vmax.f32 %v674_v43, 0.0 }
 0x132   : > { %714 = vst.msk [vmem:[%s201_s28 + $0x18] sm:$0xff] %vm710_vm1, %v705_v56  ;;  %v708_v61 = vmax.f32 %v694_v57, 0.0 }
 0x133   : > { %718 = vst.msk [vmem:[%s201_s28 + $0x38] sm:$0xff] %vm710_vm1, %v709_v58  ;;  %713 = vst.msk [vmem:[%s201_s28 + $0x10] sm:$0xff] %vm710_vm1, %v704_v59 }
 0x134   : > { %717 = vst.msk [vmem:[%s201_s28 + $0x30] sm:$0xff] %vm710_vm1, %v708_v61 }
 0x135 PF: > { %s13_s14 = sadd.s32 1, %s1115_s14   ;;  %s1419_s12 = smov %s1111_s13 }
 0x136   : > { %p10_p5 = scmp.ge.s32.totalorder %s13_s14, 4   ;;  %s1420_s13 = smov %s1422_s15 }
 0x138   :  { %12 = sbr.rel (!%p10_p5) target bundleno = 2 (0x2), region = 62 }

// kernel: key_encoder_forward_pallas.26
= control target key start
LH: loop header
LB: loop body
LE: loop exit
PB: predicated region body
PF: predicated region fallthrough
CT: control target
= control target key end

     0   :  { %s1117_s12 = smov 0   ;;  %s1119_s13 = smov 0   ;;  %s1474_s0 = inlined_call_operand.vmem [shape: f32[2,64,16], index: 0, kind: input, shape index: {}]   ;;  %s1475_s1 = inlined_call_operand.vmem [shape: f32[256,64], index: 1, kind: input, shape index: {}]   ;;  %s1476_s2 = inlined_call_operand.vmem [shape: f32[256,1], index: 2, kind: input, shape index: {}]   ;;  %s1477_s3 = inlined_call_operand.vmem [shape: f32[2,256,16], index: 3, kind: output, shape index: {}]  }
   0x1   :  { %s1121_s14 = smov 0  }
   0x2 LB: > { %s25_s15 = sadd.s32 1, %s1090_s13  ;;  %p876_p0 = scmp.ge.s32.totalorder %s1094_s14, 1  ;;  %s1094_s14 = sphi %s1121_s14, %s13_s14   ;;  %s1090_s13 = sphi %s1119_s13, %s1479_s13   ;;  %s1086_s12 = sphi %s1117_s12, %s1478_s12  }
   0x3   : > { %p27_p1 = scmp.ge.s32.totalorder %s25_s15, 2  ;;  %p156_p2 = scmp.lt.s32.totalorder %s1094_s14, 3 }
   0x5   : > { %s1481_s15 = smov (%p27_p1, %s25_s15), 0  ;;  %p157_p3 = pnand %p876_p0, %p156_p2 }
   0x6   : > { %p186_p4 = scmp.lt.s32.totalorder (!%p157_p3), %s1086_s12, 1  ;;  %v244_v0 = vld [vmem:[%s1476_s2 + $0x10] sm:$0xff] (!%p157_p3)  ;;  %v242_v1 = vld [vmem:[%s1476_s2] sm:$0xff] (!%p157_p3)  ;;  %vm434_vm0 = vcmask (!%p157_p3), 523264   ;;  %v1096_v2 = vmov (!%p157_p3), 0   ;;  %v245_v5 = vld [vmem:[%s1476_s2 + $0x18] sm:$0xff] (!%p157_p3) }
   0x7   : > { %160 = sbr.rel (%p157_p3) target bundleno = 280 (0x118), region = 32  ;;  %1071 = vset.pattern.permute.xlu1 (!%p157_p3), %v1096_v2  ;;  %1070 = vset.pattern.permute.xlu0 (!%p157_p3), %v1096_v2  ;;  %v202_v3 = vld [vmem:[%s1475_s1] sm:$0xff] (!%p157_p3)  ;;  %v243_v6 = vld [vmem:[%s1476_s2 + $0x8] sm:$0xff] (!%p157_p3)  ;;  %v249_v20 = vld [vmem:[%s1476_s2 + $0x38] sm:$0xff] (!%p157_p3)  ;;  %vm756_vm1 = vcmask (!%p157_p3), 130048  }
   0x8   : > { %v218_v4 = vld [vmem:[%s1475_s1 + $0x80] sm:$0xff] (!%p157_p3)  ;;  %286 = vperm.xlu1 (!%p157_p3), %1071, %v244_v0   ;;  %276 = vperm.xlu0 (!%p157_p3), %1070, %v242_v1   ;;  %v247_v15 = vld [vmem:[%s1476_s2 + $0x28] sm:$0xff] (!%p157_p3)  ;;  %v248_v21 = vld [vmem:[%s1476_s2 + $0x30] sm:$0xff] (!%p157_p3) }
   0x9   : > { %973 = vmatprep.mubr.msk.f32.mxu0 (!%p157_p3), %vm434_vm0, %v202_v3  ;;  %997 = vmatprep.mubr.msk.f32.mxu1 (!%p157_p3), %vm434_vm0, %v218_v4  ;;  %v246_v16 = vld [vmem:[%s1476_s2 + $0x20] sm:$0xff] (!%p157_p3)  ;;  %v251_v23 = vld [vmem:[%s1476_s2 + $0x48] sm:$0xff] (!%p157_p3)  ;;  %v253_v25 = vld [vmem:[%s1476_s2 + $0x58] sm:$0xff] (!%p157_p3) }
   0xa   : > { %v250_v24 = vld [vmem:[%s1476_s2 + $0x40] sm:$0xff] (!%p157_p3)  ;;  %v252_v26 = vld [vmem:[%s1476_s2 + $0x50] sm:$0xff] (!%p157_p3)  ;;  %v203_v27 = vld [vmem:[%s1475_s1 + $0x8] sm:$0xff] (!%p157_p3) }
   0xb   : > { %v219_v28 = vld [vmem:[%s1475_s1 + $0x88] sm:$0xff] (!%p157_p3)  ;;  %v204_v29 = vld [vmem:[%s1475_s1 + $0x10] sm:$0xff] (!%p157_p3)  ;;  %v254_v32 = vld [vmem:[%s1476_s2 + $0x60] sm:$0xff] (!%p157_p3) }
   0xc   : > { %291 = vperm.xlu1 (!%p157_p3), %1071, %v245_v5   ;;  %281 = vperm.xlu0 (!%p157_p3), %1070, %v243_v6   ;;  %v220_v30 = vld [vmem:[%s1475_s1 + $0x90] sm:$0xff] (!%p157_p3)  ;;  %v255_v31 = vld [vmem:[%s1476_s2 + $0x68] sm:$0xff] (!%p157_p3)  ;;  %v205_v33 = vld [vmem:[%s1475_s1 + $0x18] sm:$0xff] (!%p157_p3) }
   0xd   : > { %v221_v34 = vld [vmem:[%s1475_s1 + $0x98] sm:$0xff] (!%p157_p3)  ;;  %v206_v35 = vld [vmem:[%s1475_s1 + $0x20] sm:$0xff] (!%p157_p3)  ;;  %v256_v38 = vld [vmem:[%s1476_s2 + $0x70] sm:$0xff] (!%p157_p3) }
   0xe   : > { %s1483_s12 = smov (!%p186_p4, %s1086_s12), 1  ;;  %v222_v36 = vld [vmem:[%s1475_s1 + $0xa0] sm:$0xff]  ;;  %v257_v37 = vld [vmem:[%s1476_s2 + $0x78] sm:$0xff]  ;;  %v207_v39 = vld [vmem:[%s1475_s1 + $0x28] sm:$0xff] }
   0xf   : > { %s915_s28 = sshll.u32 %s1483_s12, 6  ;;  %v223_v40 = vld [vmem:[%s1475_s1 + $0xa8] sm:$0xff]  ;;  %v208_v41 = vld [vmem:[%s1475_s1 + $0x30] sm:$0xff]  ;;  %v258_v44 = vld [vmem:[%s1476_s2 + $0x80] sm:$0xff]  ;;  %s916_s6 = sshll.u32 %s1483_s12, 8 }
  0x10   : > { %s193_s4 = scalar_lea.vmem %s1474_s0, %s915_s28  ;;  %301 = vperm.xlu1 %1071, %v247_v15   ;;  %296 = vperm.xlu0 %1070, %v246_v16   ;;  %v224_v42 = vld [vmem:[%s1475_s1 + $0xb0] sm:$0xff]  ;;  %v259_v43 = vld [vmem:[%s1476_s2 + $0x88] sm:$0xff]  ;;  %v209_v45 = vld [vmem:[%s1475_s1 + $0x38] sm:$0xff]  ;;  %s1389_s9 = scalar_lea.vmem %s1477_s3, %s916_s6 }
  0x11   : > { %v234_v7 = vld [vmem:[%s193_s4] sm:$0xff]  ;;  %v235_v8 = vld [vmem:[%s193_s4 + $0x8] sm:$0xff]  ;;  %v236_v9 = vld [vmem:[%s193_s4 + $0x10] sm:$0xff] }
  0x12   : > { %v1021_v10 = vpack.c.bf16 %v235_v8, %v234_v7  ;;  %v237_v11 = vld [vmem:[%s193_s4 + $0x18] sm:$0xff]  ;;  %v238_v13 = vld [vmem:[%s193_s4 + $0x20] sm:$0xff]  ;;  %v239_v14 = vld [vmem:[%s193_s4 + $0x28] sm:$0xff] }
  0x13   : > { %v1025_v12 = vpack.c.bf16 %v237_v11, %v236_v9  ;;  %v1029_v17 = vpack.c.bf16 %v239_v14, %v238_v13  ;;  %v240_v18 = vld [vmem:[%s193_s4 + $0x30] sm:$0xff]  ;;  %v241_v19 = vld [vmem:[%s193_s4 + $0x38] sm:$0xff]  ;;  %v210_v47 = vld [vmem:[%s1475_s1 + $0x40] sm:$0xff] }
  0x14   : > { %1022 = vmatprep.subr.bf16.mxu0 %v1021_v10  ;;  %1037 = vmatprep.subr.bf16.mxu1 %v1021_v10  ;;  %v1033_v22 = vpack.c.bf16 %v241_v19, %v240_v18  ;;  %v225_v46 = vld [vmem:[%s1475_s1 + $0xb8] sm:$0xff]  ;;  %v226_v48 = vld [vmem:[%s1475_s1 + $0xc0] sm:$0xff]  ;;  %v260_v50 = vld [vmem:[%s1476_s2 + $0x90] sm:$0xff] }
  0x15   : > { %1024 = vmatpush3.bf16.msra.mxu0 %v1021_v10  ;;  %1041 = vmatpush3.bf16.msra.mxu1 %v1021_v10  ;;  %v261_v49 = vld [vmem:[%s1476_s2 + $0x98] sm:$0xff]  ;;  %v211_v51 = vld [vmem:[%s1475_s1 + $0x48] sm:$0xff]  ;;  %v212_v53 = vld [vmem:[%s1475_s1 + $0x50] sm:$0xff] }
  0x16   : > { %1026 = vmatprep.subr.bf16.mxu0 %v1025_v12  ;;  %1038 = vmatprep.subr.bf16.mxu1 %v1025_v12  ;;  %v227_v52 = vld [vmem:[%s1475_s1 + $0xc8] sm:$0xff]  ;;  %v228_v54 = vld [vmem:[%s1475_s1 + $0xd0] sm:$0xff]  ;;  %v262_v56 = vld [vmem:[%s1476_s2 + $0xa0] sm:$0xff] }
  0x17   : > { %311 = vperm.xlu1 %1071, %v249_v20   ;;  %306 = vperm.xlu0 %1070, %v248_v21   ;;  %v263_v55 = vld [vmem:[%s1476_s2 + $0xa8] sm:$0xff]  ;;  %v213_v57 = vld [vmem:[%s1475_s1 + $0x58] sm:$0xff]  ;;  %v214_v59 = vld [vmem:[%s1475_s1 + $0x60] sm:$0xff] }
  0x18   : > { %v229_v58 = vld [vmem:[%s1475_s1 + $0xd8] sm:$0xff]  ;;  %v230_v60 = vld [vmem:[%s1475_s1 + $0xe0] sm:$0xff]  ;;  %v264_v62 = vld [vmem:[%s1476_s2 + $0xb0] sm:$0xff] }
  0x19   : > { %1028 = vmatpush3.bf16.msra.mxu0 %v1025_v12  ;;  %1042 = vmatpush3.bf16.msra.mxu1 %v1025_v12  ;;  %v265_v61 = vld [vmem:[%s1476_s2 + $0xb8] sm:$0xff]  ;;  %v215_v63 = vld [vmem:[%s1475_s1 + $0x68] sm:$0xff]  ;;  %v216_v1 = vld [vmem:[%s1475_s1 + $0x70] sm:$0xff] }
  0x1a   : > { %1030 = vmatprep.subr.bf16.mxu0 %v1029_v17  ;;  %1039 = vmatprep.subr.bf16.mxu1 %v1029_v17  ;;  %v231_v0 = vld [vmem:[%s1475_s1 + $0xe8] sm:$0xff]  ;;  %v232_v2 = vld [vmem:[%s1475_s1 + $0xf0] sm:$0xff]  ;;  %v266_v4 = vld [vmem:[%s1476_s2 + $0xc0] sm:$0xff] }
  0x1b   : > { %321 = vperm.xlu1 %1071, %v251_v23   ;;  %316 = vperm.xlu0 %1070, %v250_v24   ;;  %v267_v3 = vld [vmem:[%s1476_s2 + $0xc8] sm:$0xff]  ;;  %v217_v5 = vld [vmem:[%s1475_s1 + $0x78] sm:$0xff]  ;;  %v268_v8 = vld [vmem:[%s1476_s2 + $0xd0] sm:$0xff] }
  0x1c   : > { %v233_v6 = vld [vmem:[%s1475_s1 + $0xf8] sm:$0xff]  ;;  %v271_v9 = vld [vmem:[%s1476_s2 + $0xe8] sm:$0xff]  ;;  %v270_v10 = vld [vmem:[%s1476_s2 + $0xe0] sm:$0xff] }
  0x1d   : > { %1032 = vmatpush3.bf16.msra.mxu0 %v1029_v17  ;;  %1043 = vmatpush3.bf16.msra.mxu1 %v1029_v17  ;;  %v269_v7 = vld [vmem:[%s1476_s2 + $0xd8] sm:$0xff]  ;;  %v272_v12 = vld [vmem:[%s1476_s2 + $0xf0] sm:$0xff] }
  0x1e   : > { %1034 = vmatprep.subr.bf16.mxu0 %v1033_v22  ;;  %1040 = vmatprep.subr.bf16.mxu1 %v1033_v22  ;;  %v273_v11 = vld [vmem:[%s1476_s2 + $0xf8] sm:$0xff] }
  0x1f   : > { %331 = vperm.xlu1 %1071, %v253_v25   ;;  %326 = vperm.xlu0 %1070, %v252_v26  }
  0x21   : > { %1036 = vmatpush3.bf16.msra.mxu0 %v1033_v22  ;;  %1044 = vmatpush3.bf16.msra.mxu1 %v1033_v22 }
  0x23   : > { %341 = vperm.xlu1 %1071, %v255_v31   ;;  %336 = vperm.xlu0 %1070, %v254_v32  }
  0x24   : > { %974 = vmatmul.mubr.msk.f32.vlgmr.msra.gmra.mrb[0].mxu0 %vm434_vm0, %v203_v27  ;;  %998 = vmatmul.mubr.msk.f32.vlgmr.msra.gmra.mrb[0].mxu1 %vm434_vm0, %v219_v28 }
  0x25   : > { %976 = vmatprep.mubr.msk.f32.mxu0 %vm434_vm0, %v204_v29  ;;  %1000 = vmatprep.mubr.msk.f32.mxu1 %vm434_vm0, %v220_v30 }
  0x27   : > { %351 = vperm.xlu1 %1071, %v257_v37   ;;  %346 = vperm.xlu0 %1070, %v256_v38  }
  0x28   : > { %977 = vmatmul.mubr.msk.f32.gmra.mrb[2].mxu0 %vm434_vm0, %v205_v33  ;;  %1001 = vmatmul.mubr.msk.f32.gmra.mrb[2].mxu1 %vm434_vm0, %v221_v34 }
  0x29   : > { %979 = vmatprep.mubr.msk.f32.mxu0 %vm434_vm0, %v206_v35  ;;  %1003 = vmatprep.mubr.msk.f32.mxu1 %vm434_vm0, %v222_v36 }
  0x2b   : > { %361 = vperm.xlu1 %1071, %v259_v43   ;;  %356 = vperm.xlu0 %1070, %v258_v44  }
  0x2c   : > { %980 = vmatmul.mubr.msk.f32.gmra.mrb[4].mxu0 %vm434_vm0, %v207_v39  ;;  %1004 = vmatmul.mubr.msk.f32.gmra.mrb[4].mxu1 %vm434_vm0, %v223_v40 }
  0x2d   : > { %982 = vmatprep.mubr.msk.f32.mxu0 %vm434_vm0, %v208_v41  ;;  %1006 = vmatprep.mubr.msk.f32.mxu1 %vm434_vm0, %v224_v42 }
  0x2f   : > { %371 = vperm.xlu1 %1071, %v261_v49   ;;  %366 = vperm.xlu0 %1070, %v260_v50  }
  0x30   : > { %983 = vmatmul.mubr.msk.f32.gmra.mrb[6].mxu0 %vm434_vm0, %v209_v45  ;;  %1007 = vmatmul.mubr.msk.f32.gmra.mrb[6].mxu1 %vm434_vm0, %v225_v46 }
  0x31   : > { %985 = vmatprep.mubr.msk.f32.mxu0 %vm434_vm0, %v210_v47  ;;  %1009 = vmatprep.mubr.msk.f32.mxu1 %vm434_vm0, %v226_v48 }
  0x33   : > { %381 = vperm.xlu1 %1071, %v263_v55   ;;  %376 = vperm.xlu0 %1070, %v262_v56  }
  0x34   : > { %986 = vmatmul.mubr.msk.f32.gmra.mrb[8].mxu0 %vm434_vm0, %v211_v51  ;;  %1010 = vmatmul.mubr.msk.f32.gmra.mrb[8].mxu1 %vm434_vm0, %v227_v52 }
  0x35   : > { %988 = vmatprep.mubr.msk.f32.mxu0 %vm434_vm0, %v212_v53  ;;  %1012 = vmatprep.mubr.msk.f32.mxu1 %vm434_vm0, %v228_v54 }
  0x37   : > { %391 = vperm.xlu1 %1071, %v265_v61   ;;  %386 = vperm.xlu0 %1070, %v264_v62  }
  0x38   : > { %989 = vmatmul.mubr.msk.f32.gmra.mrb[10].mxu0 %vm434_vm0, %v213_v57  ;;  %1013 = vmatmul.mubr.msk.f32.gmra.mrb[10].mxu1 %vm434_vm0, %v229_v58 }
  0x39   : > { %991 = vmatprep.mubr.msk.f32.mxu0 %vm434_vm0, %v214_v59  ;;  %1015 = vmatprep.mubr.msk.f32.mxu1 %vm434_vm0, %v230_v60 }
  0x3b   : > { %401 = vperm.xlu1 %1071, %v267_v3   ;;  %396 = vperm.xlu0 %1070, %v266_v4  }
  0x3c   : > { %992 = vmatmul.mubr.msk.f32.gmra.mrb[12].mxu0 %vm434_vm0, %v215_v63  ;;  %1016 = vmatmul.mubr.msk.f32.gmra.mrb[12].mxu1 %vm434_vm0, %v231_v0 }
  0x3d   : > { %994 = vmatprep.mubr.msk.f32.mxu0 %vm434_vm0, %v216_v1  ;;  %1018 = vmatprep.mubr.msk.f32.mxu1 %vm434_vm0, %v232_v2 }
  0x3f   : > { %411 = vperm.xlu1 %1071, %v269_v7   ;;  %406 = vperm.xlu0 %1070, %v268_v8  }
  0x40   : > { %995 = vmatmul.mubr.msk.f32.gmra.mrb[14].mxu0 %vm434_vm0, %v217_v5  ;;  %1019 = vmatmul.mubr.msk.f32.gmra.mrb[14].mxu1 %vm434_vm0, %v233_v6 }
  0x43   : > { %421 = vperm.xlu1 %1071, %v271_v9   ;;  %416 = vperm.xlu0 %1070, %v270_v10  }
  0x47   : > { %431 = vperm.xlu1 %1071, %v273_v11   ;;  %426 = vperm.xlu0 %1070, %v272_v12  }
  0x87   : > { %v287_v13 = vpop.permute.xlu1 %286  ;;  %v277_v14 = vpop.permute.xlu0 %276 }
  0x8b   : > { %v292_v15 = vpop.permute.xlu1 %291  ;;  %v282_v16 = vpop.permute.xlu0 %281 }
  0x8f   : > { %v302_v17 = vpop.permute.xlu1 %301  ;;  %v297_v18 = vpop.permute.xlu0 %296 }
  0x96   : > { %v1365_v19 = vpop.permute.xlu1 %311  ;;  %v1367_v20 = vpop.permute.xlu0 %306 }
  0x9a   : > { %v1369_v21 = vpop.permute.xlu1 %321  ;;  %v1371_v22 = vpop.permute.xlu0 %316 }
  0x9e   : > { %v1373_v23 = vpop.permute.xlu1 %331  ;;  %v1375_v24 = vpop.permute.xlu0 %326 }
  0xa2   : > { %v1377_v25 = vpop.permute.xlu1 %341  ;;  %v1379_v26 = vpop.permute.xlu0 %336 }
  0xa6   : > { %v1381_v27 = vpop.permute.xlu1 %351  ;;  %v1383_v28 = vpop.permute.xlu0 %346 }
  0xaa   : > { %v362_v29 = vpop.permute.xlu1 %361  ;;  %v357_v30 = vpop.permute.xlu0 %356 }
  0xae   : > { %v372_v31 = vpop.permute.xlu1 %371  ;;  %v367_v32 = vpop.permute.xlu0 %366 }
  0xb2   : > { %v382_v33 = vpop.permute.xlu1 %381  ;;  %v377_v34 = vpop.permute.xlu0 %376 }
  0xb6   : > { %v392_v35 = vpop.permute.xlu1 %391  ;;  %v387_v36 = vpop.permute.xlu0 %386 }
  0xba   : > { %v402_v45 = vpop.permute.xlu1 %401  ;;  %v397_v46 = vpop.permute.xlu0 %396 }
  0xbe   : > { %v412_v63 = vpop.permute.xlu1 %411  ;;  %v407_v0 = vpop.permute.xlu0 %406 }
  0xf7   : > { %v975_v37 = vpop.f32.mrb[0].mxu0  ;;  %v999_v38 = vpop.f32.mrb[0].mxu1 }
  0xf8   : > { %v603_v39 = vadd.f32 %v975_v37, %v282_v16  ;;  %v683_v40 = vadd.f32 %v999_v38, %v362_v29  ;;  %v597_v41 = vpop.f32.mrb[1].mxu0  ;;  %v677_v42 = vpop.f32.mrb[1].mxu1 }
  0xf9   : > { %v598_v43 = vadd.f32 %v597_v41, %v277_v14  ;;  %v678_v44 = vadd.f32 %v677_v42, %v357_v30 }
  0xfa   : > { %758 = vst.msk [vmem:[%s1389_s9 + $0x8] sm:$0xff] %vm756_vm1, %v603_v39  ;;  %774 = vst.msk [vmem:[%s1389_s9 + $0x88] sm:$0xff] %vm756_vm1, %v683_v40 }
  0xfb   : > { %757 = vst.msk [vmem:[%s1389_s9] sm:$0xff] %vm756_vm1, %v598_v43  ;;  %773 = vst.msk [vmem:[%s1389_s9 + $0x80] sm:$0xff] %vm756_vm1, %v678_v44  ;;  %v978_v47 = vpop.f32.mrb[2].mxu0  ;;  %v1002_v48 = vpop.f32.mrb[2].mxu1 }
  0xfc   : > { %v613_v49 = vadd.f32 %v978_v47, %v292_v15  ;;  %v693_v50 = vadd.f32 %v1002_v48, %v372_v31  ;;  %v607_v51 = vpop.f32.mrb[3].mxu0  ;;  %v687_v52 = vpop.f32.mrb[3].mxu1 }
  0xfd   : > { %v608_v53 = vadd.f32 %v607_v51, %v287_v13  ;;  %v688_v54 = vadd.f32 %v687_v52, %v367_v32 }
  0xfe   : > { %760 = vst.msk [vmem:[%s1389_s9 + $0x18] sm:$0xff] %vm756_vm1, %v613_v49  ;;  %776 = vst.msk [vmem:[%s1389_s9 + $0x98] sm:$0xff] %vm756_vm1, %v693_v50 }
  0xff   : > { %759 = vst.msk [vmem:[%s1389_s9 + $0x10] sm:$0xff] %vm756_vm1, %v608_v53  ;;  %775 = vst.msk [vmem:[%s1389_s9 + $0x90] sm:$0xff] %vm756_vm1, %v688_v54  ;;  %v981_v55 = vpop.f32.mrb[4].mxu0  ;;  %v1005_v56 = vpop.f32.mrb[4].mxu1 }
 0x100   : > { %v623_v57 = vadd.f32 %v981_v55, %v302_v17  ;;  %v703_v58 = vadd.f32 %v1005_v56, %v382_v33  ;;  %v617_v59 = vpop.f32.mrb[5].mxu0  ;;  %v697_v60 = vpop.f32.mrb[5].mxu1 }
 0x101   : > { %v618_v61 = vadd.f32 %v617_v59, %v297_v18  ;;  %v698_v62 = vadd.f32 %v697_v60, %v377_v34  ;;  %v422_v17 = vpop.permute.xlu1 %421  ;;  %v417_v18 = vpop.permute.xlu0 %416 }
 0x102   : > { %762 = vst.msk [vmem:[%s1389_s9 + $0x28] sm:$0xff] %vm756_vm1, %v623_v57  ;;  %778 = vst.msk [vmem:[%s1389_s9 + $0xa8] sm:$0xff] %vm756_vm1, %v703_v58 }
 0x103   : > { %761 = vst.msk [vmem:[%s1389_s9 + $0x20] sm:$0xff] %vm756_vm1, %v618_v61  ;;  %777 = vst.msk [vmem:[%s1389_s9 + $0xa0] sm:$0xff] %vm756_vm1, %v698_v62  ;;  %v984_v1 = vpop.f32.mrb[6].mxu0  ;;  %v1008_v2 = vpop.f32.mrb[6].mxu1 }
 0x104   : > { %v633_v3 = vadd.f32 %v984_v1, %v1365_v19  ;;  %v713_v4 = vadd.f32 %v1008_v2, %v392_v35  ;;  %v627_v5 = vpop.f32.mrb[7].mxu0  ;;  %v707_v6 = vpop.f32.mrb[7].mxu1 }
 0x105   : > { %v628_v7 = vadd.f32 %v627_v5, %v1367_v20  ;;  %v708_v8 = vadd.f32 %v707_v6, %v387_v36  ;;  %v432_v39 = vpop.permute.xlu1 %431  ;;  %v427_v40 = vpop.permute.xlu0 %426 }
 0x106   : > { %764 = vst.msk [vmem:[%s1389_s9 + $0x38] sm:$0xff] %vm756_vm1, %v633_v3  ;;  %780 = vst.msk [vmem:[%s1389_s9 + $0xb8] sm:$0xff] %vm756_vm1, %v713_v4 }
 0x107   : > { %763 = vst.msk [vmem:[%s1389_s9 + $0x30] sm:$0xff] %vm756_vm1, %v628_v7  ;;  %779 = vst.msk [vmem:[%s1389_s9 + $0xb0] sm:$0xff] %vm756_vm1, %v708_v8  ;;  %v987_v9 = vpop.f32.mrb[8].mxu0  ;;  %v1011_v10 = vpop.f32.mrb[8].mxu1 }
 0x108   : > { %v643_v11 = vadd.f32 %v987_v9, %v1369_v21  ;;  %v723_v12 = vadd.f32 %v1011_v10, %v402_v45  ;;  %v637_v13 = vpop.f32.mrb[9].mxu0  ;;  %v717_v14 = vpop.f32.mrb[9].mxu1 }
 0x109   : > { %v638_v15 = vadd.f32 %v637_v13, %v1371_v22  ;;  %v718_v16 = vadd.f32 %v717_v14, %v397_v46 }
 0x10a   : > { %766 = vst.msk [vmem:[%s1389_s9 + $0x48] sm:$0xff] %vm756_vm1, %v643_v11  ;;  %782 = vst.msk [vmem:[%s1389_s9 + $0xc8] sm:$0xff] %vm756_vm1, %v723_v12 }
 0x10b   : > { %765 = vst.msk [vmem:[%s1389_s9 + $0x40] sm:$0xff] %vm756_vm1, %v638_v15  ;;  %781 = vst.msk [vmem:[%s1389_s9 + $0xc0] sm:$0xff] %vm756_vm1, %v718_v16  ;;  %v990_v19 = vpop.f32.mrb[10].mxu0  ;;  %v1014_v20 = vpop.f32.mrb[10].mxu1 }
 0x10c   : > { %v653_v21 = vadd.f32 %v990_v19, %v1373_v23  ;;  %v733_v22 = vadd.f32 %v1014_v20, %v412_v63  ;;  %v647_v29 = vpop.f32.mrb[11].mxu0  ;;  %v727_v30 = vpop.f32.mrb[11].mxu1 }
 0x10d   : > { %v648_v31 = vadd.f32 %v647_v29, %v1375_v24  ;;  %v728_v32 = vadd.f32 %v727_v30, %v407_v0 }
 0x10e   : > { %768 = vst.msk [vmem:[%s1389_s9 + $0x58] sm:$0xff] %vm756_vm1, %v653_v21  ;;  %784 = vst.msk [vmem:[%s1389_s9 + $0xd8] sm:$0xff] %vm756_vm1, %v733_v22 }
 0x10f   : > { %767 = vst.msk [vmem:[%s1389_s9 + $0x50] sm:$0xff] %vm756_vm1, %v648_v31  ;;  %783 = vst.msk [vmem:[%s1389_s9 + $0xd0] sm:$0xff] %vm756_vm1, %v728_v32  ;;  %v993_v33 = vpop.f32.mrb[12].mxu0  ;;  %v1017_v23 = vpop.f32.mrb[12].mxu1 }
 0x110   : > { %v663_v34 = vadd.f32 %v993_v33, %v1377_v25  ;;  %v743_v35 = vadd.f32 %v1017_v23, %v422_v17  ;;  %v657_v36 = vpop.f32.mrb[13].mxu0  ;;  %v737_v24 = vpop.f32.mrb[13].mxu1 }
 0x111   : > { %v658_v37 = vadd.f32 %v657_v36, %v1379_v26  ;;  %v738_v38 = vadd.f32 %v737_v24, %v417_v18 }
 0x112   : > { %770 = vst.msk [vmem:[%s1389_s9 + $0x68] sm:$0xff] %vm756_vm1, %v663_v34  ;;  %786 = vst.msk [vmem:[%s1389_s9 + $0xe8] sm:$0xff] %vm756_vm1, %v743_v35 }
 0x113   : > { %769 = vst.msk [vmem:[%s1389_s9 + $0x60] sm:$0xff] %vm756_vm1, %v658_v37  ;;  %785 = vst.msk [vmem:[%s1389_s9 + $0xe0] sm:$0xff] %vm756_vm1, %v738_v38  ;;  %v996_v25 = vpop.f32.mrb[14].mxu0  ;;  %v1020_v41 = vpop.f32.mrb[14].mxu1 }
 0x114   : > { %v673_v42 = vadd.f32 %v996_v25, %v1381_v27  ;;  %v753_v26 = vadd.f32 %v1020_v41, %v432_v39  ;;  %v667_v43 = vpop.f32.mrb[15].mxu0  ;;  %v747_v44 = vpop.f32.mrb[15].mxu1 }
 0x115   : > { %v668_v45 = vadd.f32 %v667_v43, %v1383_v28  ;;  %v748_v46 = vadd.f32 %v747_v44, %v427_v40 }
 0x116   : > { %772 = vst.msk [vmem:[%s1389_s9 + $0x78] sm:$0xff] %vm756_vm1, %v673_v42  ;;  %788 = vst.msk [vmem:[%s1389_s9 + $0xf8] sm:$0xff] %vm756_vm1, %v753_v26 }
 0x117   : > { %771 = vst.msk [vmem:[%s1389_s9 + $0x70] sm:$0xff] %vm756_vm1, %v668_v45  ;;  %787 = vst.msk [vmem:[%s1389_s9 + $0xf0] sm:$0xff] %vm756_vm1, %v748_v46 }
 0x118 PF: > { %s13_s14 = sadd.s32 1, %s1094_s14   ;;  %s1478_s12 = smov %s1090_s13 }
 0x119   : > { %p10_p5 = scmp.ge.s32.totalorder %s13_s14, 4   ;;  %s1479_s13 = smov %s1481_s15 }
 0x11b   :  { %12 = sbr.rel (!%p10_p5) target bundleno = 2 (0x2), region = 62 }

// kernel: key_encoder_forward_pallas.28
= control target key start
LH: loop header
LB: loop body
LE: loop exit
PB: predicated region body
PF: predicated region fallthrough
CT: control target
= control target key end

     0   :  { %s692_s12 = smov 0   ;;  %s694_s13 = smov 0   ;;  %s853_s0 = inlined_call_operand.vmem [shape: f32[2,256,16], index: 0, kind: input, shape index: {}]   ;;  %s854_s1 = inlined_call_operand.vmem [shape: f32[64,256], index: 1, kind: input, shape index: {}]   ;;  %s855_s2 = inlined_call_operand.vmem [shape: f32[64,1], index: 2, kind: input, shape index: {}]   ;;  %s856_s3 = inlined_call_operand.vmem [shape: f32[2,64,16], index: 3, kind: output, shape index: {}]  }
   0x1   :  { %s696_s14 = smov 0  }
   0x2 LB: > { %s25_s15 = sadd.s32 1, %s665_s13  ;;  %p507_p0 = scmp.ge.s32.totalorder %s669_s14, 1  ;;  %s669_s14 = sphi %s696_s14, %s13_s14   ;;  %s665_s13 = sphi %s694_s13, %s858_s13   ;;  %s661_s12 = sphi %s692_s12, %s857_s12  }
   0x3   : > { %p27_p1 = scmp.ge.s32.totalorder %s25_s15, 2  ;;  %p156_p2 = scmp.lt.s32.totalorder %s669_s14, 3 }
   0x5   : > { %s860_s15 = smov (%p27_p1, %s25_s15), 0  ;;  %p157_p3 = pnand %p507_p0, %p156_p2 }
   0x6   : > { %p186_p4 = scmp.lt.s32.totalorder (!%p157_p3), %s661_s12, 1  ;;  %v203_v0 = vld [vmem:[%s854_s1 + $0x8] sm:$0xff] (!%p157_p3)  ;;  %v671_v2 = vmov (!%p157_p3), 0   ;;  %v252_v3 = vld [vmem:[%s855_s2 + $0x10] sm:$0xff] (!%p157_p3)  ;;  %v250_v4 = vld [vmem:[%s855_s2] sm:$0xff] (!%p157_p3)  ;;  %vm411_vm0 = vcmask (!%p157_p3), 130048  }
   0x7   : > { %160 = sbr.rel (%p157_p3) target bundleno = 284 (0x11c), region = 32  ;;  %v211_v1 = vld [vmem:[%s854_s1 + $0x48] sm:$0xff] (!%p157_p3)  ;;  %362 = vmatprep.mubr.f32.mxu0 (!%p157_p3), %v203_v0  ;;  %646 = vset.pattern.permute.xlu1 (!%p157_p3), %v671_v2  ;;  %v253_v30 = vld [vmem:[%s855_s2 + $0x18] sm:$0xff] (!%p157_p3)  ;;  %v254_v39 = vld [vmem:[%s855_s2 + $0x20] sm:$0xff] (!%p157_p3) }
   0x8   : > { %382 = vmatprep.mubr.f32.mxu1 (!%p157_p3), %v211_v1  ;;  %645 = vset.pattern.permute.xlu0 (!%p157_p3), %v671_v2  ;;  %v251_v31 = vld [vmem:[%s855_s2 + $0x8] sm:$0xff] (!%p157_p3)  ;;  %v257_v41 = vld [vmem:[%s855_s2 + $0x38] sm:$0xff] (!%p157_p3)  ;;  %v256_v47 = vld [vmem:[%s855_s2 + $0x30] sm:$0xff] (!%p157_p3) }
   0x9   : > { %270 = vperm.xlu1 (!%p157_p3), %646, %v252_v3   ;;  %260 = vperm.xlu0 (!%p157_p3), %645, %v250_v4   ;;  %v255_v33 = vld [vmem:[%s855_s2 + $0x28] sm:$0xff] (!%p157_p3)  ;;  %v202_v59 = vld [vmem:[%s854_s1] sm:$0xff] (!%p157_p3)  ;;  %v205_v61 = vld [vmem:[%s854_s1 + $0x18] sm:$0xff] (!%p157_p3) }
   0xa   : > { %v210_v60 = vld [vmem:[%s854_s1 + $0x40] sm:$0xff] (!%p157_p3)  ;;  %v213_v62 = vld [vmem:[%s854_s1 + $0x58] sm:$0xff] (!%p157_p3)  ;;  %v204_v63 = vld [vmem:[%s854_s1 + $0x10] sm:$0xff] (!%p157_p3) }
   0xb   : > { %v212_v0 = vld [vmem:[%s854_s1 + $0x50] sm:$0xff] (!%p157_p3)  ;;  %v207_v1 = vld [vmem:[%s854_s1 + $0x28] sm:$0xff] (!%p157_p3)  ;;  %v206_v3 = vld [vmem:[%s854_s1 + $0x20] sm:$0xff] (!%p157_p3) }
   0xc   : > { %v215_v2 = vld [vmem:[%s854_s1 + $0x68] sm:$0xff] (!%p157_p3)  ;;  %v214_v4 = vld [vmem:[%s854_s1 + $0x60] sm:$0xff] (!%p157_p3) }
   0xd   : > { %275 = vperm.xlu1 (!%p157_p3), %646, %v253_v30   ;;  %265 = vperm.xlu0 (!%p157_p3), %645, %v251_v31  }
   0xe   : > { %s862_s12 = smov (!%p186_p4, %s661_s12), 1 }
   0xf   : > { %s514_s20 = sshll.u32 %s862_s12, 8  ;;  %s515_s22 = sshll.u32 %s862_s12, 6 }
  0x10   : > { %s722_s23 = scalar_lea.vmem %s853_s0, %s514_s20  ;;  %s826_s25 = scalar_lea.vmem %s856_s3, %s515_s22 }
  0x11   : > { %v234_v5 = vld [vmem:[%s722_s23 + $0x80] sm:$0xff]  ;;  %v235_v6 = vld [vmem:[%s722_s23 + $0x88] sm:$0xff]  ;;  %v236_v10 = vld [vmem:[%s722_s23 + $0x90] sm:$0xff]  ;;  %285 = vperm.xlu1 %646, %v255_v33   ;;  %280 = vperm.xlu0 %645, %v254_v39  }
  0x12   : > { %v218_v7 = vld [vmem:[%s722_s23] sm:$0xff]  ;;  %v572_v8 = vpack.c.bf16 %v235_v6, %v234_v5  ;;  %v219_v9 = vld [vmem:[%s722_s23 + $0x8] sm:$0xff]  ;;  %v237_v11 = vld [vmem:[%s722_s23 + $0x98] sm:$0xff] }
  0x13   : > { %v574_v12 = vpack.c.bf16 %v219_v9, %v218_v7  ;;  %v576_v13 = vpack.c.bf16 %v237_v11, %v236_v10  ;;  %v220_v14 = vld [vmem:[%s722_s23 + $0x10] sm:$0xff]  ;;  %v221_v15 = vld [vmem:[%s722_s23 + $0x18] sm:$0xff]  ;;  %v238_v16 = vld [vmem:[%s722_s23 + $0xa0] sm:$0xff] }
  0x14   : > { %573 = vmatprep.subr.bf16.mxu0 %v572_v8  ;;  %604 = vmatprep.subr.bf16.mxu1 %v572_v8  ;;  %v239_v17 = vld [vmem:[%s722_s23 + $0xa8] sm:$0xff]  ;;  %v578_v18 = vpack.c.bf16 %v221_v15, %v220_v14  ;;  %v222_v20 = vld [vmem:[%s722_s23 + $0x20] sm:$0xff]  ;;  %v240_v22 = vld [vmem:[%s722_s23 + $0xb0] sm:$0xff] }
  0x15   : > { %575 = vmatpush3.bf16.msra.mxu0 %v574_v12  ;;  %612 = vmatpush3.bf16.msra.mxu1 %v574_v12  ;;  %v580_v19 = vpack.c.bf16 %v239_v17, %v238_v16  ;;  %v223_v21 = vld [vmem:[%s722_s23 + $0x28] sm:$0xff]  ;;  %v241_v23 = vld [vmem:[%s722_s23 + $0xb8] sm:$0xff]  ;;  %v224_v26 = vld [vmem:[%s722_s23 + $0x30] sm:$0xff] }
  0x16   : > { %577 = vmatprep.subr.bf16.mxu0 %v576_v13  ;;  %605 = vmatprep.subr.bf16.mxu1 %v576_v13  ;;  %v582_v24 = vpack.c.bf16 %v223_v21, %v222_v20  ;;  %v584_v25 = vpack.c.bf16 %v241_v23, %v240_v22  ;;  %v225_v27 = vld [vmem:[%s722_s23 + $0x38] sm:$0xff]  ;;  %v242_v28 = vld [vmem:[%s722_s23 + $0xc0] sm:$0xff]  ;;  %v243_v29 = vld [vmem:[%s722_s23 + $0xc8] sm:$0xff] }
  0x17   : > { %v586_v32 = vpack.c.bf16 %v225_v27, %v224_v26  ;;  %v588_v34 = vpack.c.bf16 %v243_v29, %v242_v28  ;;  %v226_v35 = vld [vmem:[%s722_s23 + $0x40] sm:$0xff]  ;;  %v227_v36 = vld [vmem:[%s722_s23 + $0x48] sm:$0xff]  ;;  %v244_v37 = vld [vmem:[%s722_s23 + $0xd0] sm:$0xff]  ;;  %295 = vperm.xlu1 %646, %v257_v41   ;;  %290 = vperm.xlu0 %645, %v256_v47  }
  0x18   : > { %v245_v38 = vld [vmem:[%s722_s23 + $0xd8] sm:$0xff]  ;;  %v590_v40 = vpack.c.bf16 %v227_v36, %v226_v35  ;;  %v228_v43 = vld [vmem:[%s722_s23 + $0x50] sm:$0xff]  ;;  %v246_v45 = vld [vmem:[%s722_s23 + $0xe0] sm:$0xff] }
  0x19   : > { %579 = vmatpush3.bf16.msra.mxu0 %v578_v18  ;;  %613 = vmatpush3.bf16.msra.mxu1 %v578_v18  ;;  %v592_v42 = vpack.c.bf16 %v245_v38, %v244_v37  ;;  %v229_v44 = vld [vmem:[%s722_s23 + $0x58] sm:$0xff]  ;;  %v247_v46 = vld [vmem:[%s722_s23 + $0xe8] sm:$0xff]  ;;  %v230_v50 = vld [vmem:[%s722_s23 + $0x60] sm:$0xff] }
  0x1a   : > { %581 = vmatprep.subr.bf16.mxu0 %v580_v19  ;;  %606 = vmatprep.subr.bf16.mxu1 %v580_v19  ;;  %v594_v48 = vpack.c.bf16 %v229_v44, %v228_v43  ;;  %v596_v49 = vpack.c.bf16 %v247_v46, %v246_v45  ;;  %v231_v51 = vld [vmem:[%s722_s23 + $0x68] sm:$0xff]  ;;  %v248_v52 = vld [vmem:[%s722_s23 + $0xf0] sm:$0xff]  ;;  %v249_v53 = vld [vmem:[%s722_s23 + $0xf8] sm:$0xff] }
  0x1b   : > { %v598_v54 = vpack.c.bf16 %v231_v51, %v230_v50  ;;  %v600_v55 = vpack.c.bf16 %v249_v53, %v248_v52  ;;  %v232_v56 = vld [vmem:[%s722_s23 + $0x70] sm:$0xff]  ;;  %v233_v57 = vld [vmem:[%s722_s23 + $0x78] sm:$0xff] }
  0x1c   : > { %v602_v58 = vpack.c.bf16 %v233_v57, %v232_v56  ;;  %v209_v5 = vld [vmem:[%s854_s1 + $0x38] sm:$0xff]  ;;  %v208_v7 = vld [vmem:[%s854_s1 + $0x30] sm:$0xff] }
  0x1d   : > { %583 = vmatpush3.bf16.msra.mxu0 %v582_v24  ;;  %614 = vmatpush3.bf16.msra.mxu1 %v582_v24  ;;  %v217_v6 = vld [vmem:[%s854_s1 + $0x78] sm:$0xff]  ;;  %v216_v8 = vld [vmem:[%s854_s1 + $0x70] sm:$0xff] }
  0x1e   : > { %585 = vmatprep.subr.bf16.mxu0 %v584_v25  ;;  %607 = vmatprep.subr.bf16.mxu1 %v584_v25 }
  0x21   : > { %587 = vmatpush3.bf16.msra.mxu0 %v586_v32  ;;  %615 = vmatpush3.bf16.msra.mxu1 %v586_v32 }
  0x22   : > { %589 = vmatprep.subr.bf16.mxu0 %v588_v34  ;;  %608 = vmatprep.subr.bf16.mxu1 %v588_v34 }
  0x25   : > { %591 = vmatpush3.bf16.msra.mxu0 %v590_v40  ;;  %616 = vmatpush3.bf16.msra.mxu1 %v590_v40 }
  0x26   : > { %593 = vmatprep.subr.bf16.mxu0 %v592_v42  ;;  %609 = vmatprep.subr.bf16.mxu1 %v592_v42 }
  0x29   : > { %595 = vmatpush3.bf16.msra.mxu0 %v594_v48  ;;  %617 = vmatpush3.bf16.msra.mxu1 %v594_v48 }
  0x2a   : > { %597 = vmatprep.subr.bf16.mxu0 %v596_v49  ;;  %610 = vmatprep.subr.bf16.mxu1 %v596_v49 }
  0x2d   : > { %599 = vmatpush3.bf16.msra.mxu0 %v598_v54  ;;  %618 = vmatpush3.bf16.msra.mxu1 %v598_v54 }
  0x2e   : > { %601 = vmatprep.subr.bf16.mxu0 %v600_v55  ;;  %611 = vmatprep.subr.bf16.mxu1 %v600_v55 }
  0x31   : > { %603 = vmatpush3.bf16.msra.mxu0 %v602_v58  ;;  %619 = vmatpush3.bf16.msra.mxu1 %v602_v58 }
  0x34   : > { %363 = vmatmul.mubr.f32.vlgmr.msra.gmra.mrb[0].mxu0 %v202_v59  ;;  %383 = vmatmul.mubr.f32.vlgmr.msra.gmra.mrb[0].mxu1 %v210_v60 }
  0x35   : > { %367 = vmatprep.mubr.f32.mxu0 %v205_v61  ;;  %387 = vmatprep.mubr.f32.mxu1 %v213_v62 }
  0x38   : > { %368 = vmatmul.mubr.f32.gmra.mrb[2].mxu0 %v204_v63  ;;  %388 = vmatmul.mubr.f32.gmra.mrb[2].mxu1 %v212_v0 }
  0x39   : > { %372 = vmatprep.mubr.f32.mxu0 %v207_v1  ;;  %392 = vmatprep.mubr.f32.mxu1 %v215_v2 }
  0x3c   : > { %373 = vmatmul.mubr.f32.gmra.mrb[4].mxu0 %v206_v3  ;;  %393 = vmatmul.mubr.f32.gmra.mrb[4].mxu1 %v214_v4 }
  0x3d   : > { %377 = vmatprep.mubr.f32.mxu0 %v209_v5  ;;  %397 = vmatprep.mubr.f32.mxu1 %v217_v6 }
  0x40   : > { %378 = vmatmul.mubr.f32.gmra.mrb[6].mxu0 %v208_v7  ;;  %398 = vmatmul.mubr.f32.gmra.mrb[6].mxu1 %v216_v8 }
  0x88   : > { %v261_v9 = vpop.permute.xlu0 %260  ;;  %v271_v10 = vpop.permute.xlu1 %270 }
  0x8c   : > { %v266_v11 = vpop.permute.xlu0 %265  ;;  %v276_v12 = vpop.permute.xlu1 %275 }
  0x90   : > { %v281_v19 = vpop.permute.xlu0 %280  ;;  %v286_v30 = vpop.permute.xlu1 %285 }
  0x96   : > { %v291_v41 = vpop.permute.xlu0 %290  ;;  %v296_v52 = vpop.permute.xlu1 %295 }
 0x107   : > { %v548_v13 = vpop.f32.mrb[0].mxu0  ;;  %v560_v14 = vpop.f32.mrb[0].mxu1 }
 0x108   : > { %v549_v15 = vpop.f32.mrb[1].mxu0  ;;  %v561_v16 = vpop.f32.mrb[1].mxu1 }
 0x109   : > { %v550_v17 = vadd.f32 %v549_v15, %v548_v13  ;;  %v562_v18 = vadd.f32 %v561_v16, %v560_v14 }
 0x10b   : > { %v365_v20 = vadd.f32 %v550_v17, %v261_v9  ;;  %v385_v21 = vadd.f32 %v562_v18, %v281_v19  ;;  %v551_v22 = vpop.f32.mrb[2].mxu0  ;;  %v563_v23 = vpop.f32.mrb[2].mxu1 }
 0x10c   : > { %v552_v24 = vpop.f32.mrb[3].mxu0  ;;  %v564_v25 = vpop.f32.mrb[3].mxu1 }
 0x10d   : > { %v403_v26 = vmax.f32 %v365_v20, 0.0  ;;  %v407_v27 = vmax.f32 %v385_v21, 0.0  ;;  %v553_v28 = vadd.f32 %v552_v24, %v551_v22  ;;  %v565_v29 = vadd.f32 %v564_v25, %v563_v23 }
 0x10f   : > { %412 = vst.msk [vmem:[%s826_s25] sm:$0xff] %vm411_vm0, %v403_v26  ;;  %416 = vst.msk [vmem:[%s826_s25 + $0x20] sm:$0xff] %vm411_vm0, %v407_v27  ;;  %v370_v31 = vadd.f32 %v553_v28, %v266_v11  ;;  %v390_v32 = vadd.f32 %v565_v29, %v286_v30  ;;  %v554_v33 = vpop.f32.mrb[4].mxu0  ;;  %v566_v34 = vpop.f32.mrb[4].mxu1 }
 0x110   : > { %v555_v35 = vpop.f32.mrb[5].mxu0  ;;  %v567_v36 = vpop.f32.mrb[5].mxu1 }
 0x111   : > { %v404_v37 = vmax.f32 %v370_v31, 0.0  ;;  %v408_v38 = vmax.f32 %v390_v32, 0.0  ;;  %v556_v39 = vadd.f32 %v555_v35, %v554_v33  ;;  %v568_v40 = vadd.f32 %v567_v36, %v566_v34 }
 0x113   : > { %413 = vst.msk [vmem:[%s826_s25 + $0x8] sm:$0xff] %vm411_vm0, %v404_v37  ;;  %417 = vst.msk [vmem:[%s826_s25 + $0x28] sm:$0xff] %vm411_vm0, %v408_v38  ;;  %v375_v42 = vadd.f32 %v556_v39, %v271_v10  ;;  %v395_v43 = vadd.f32 %v568_v40, %v291_v41  ;;  %v557_v44 = vpop.f32.mrb[6].mxu0  ;;  %v569_v45 = vpop.f32.mrb[6].mxu1 }
 0x114   : > { %v558_v46 = vpop.f32.mrb[7].mxu0  ;;  %v570_v47 = vpop.f32.mrb[7].mxu1 }
 0x115   : > { %v405_v48 = vmax.f32 %v375_v42, 0.0  ;;  %v409_v49 = vmax.f32 %v395_v43, 0.0  ;;  %v559_v50 = vadd.f32 %v558_v46, %v557_v44  ;;  %v571_v51 = vadd.f32 %v570_v47, %v569_v45 }
 0x117   : > { %414 = vst.msk [vmem:[%s826_s25 + $0x10] sm:$0xff] %vm411_vm0, %v405_v48  ;;  %418 = vst.msk [vmem:[%s826_s25 + $0x30] sm:$0xff] %vm411_vm0, %v409_v49  ;;  %v380_v53 = vadd.f32 %v559_v50, %v276_v12  ;;  %v400_v54 = vadd.f32 %v571_v51, %v296_v52 }
 0x119   : > { %v406_v55 = vmax.f32 %v380_v53, 0.0  ;;  %v410_v56 = vmax.f32 %v400_v54, 0.0 }
 0x11b   : > { %415 = vst.msk [vmem:[%s826_s25 + $0x18] sm:$0xff] %vm411_vm0, %v406_v55  ;;  %419 = vst.msk [vmem:[%s826_s25 + $0x38] sm:$0xff] %vm411_vm0, %v410_v56 }
 0x11c PF: > { %s13_s14 = sadd.s32 1, %s669_s14   ;;  %s857_s12 = smov %s665_s13 }
 0x11d   : > { %p10_p5 = scmp.ge.s32.totalorder %s13_s14, 4   ;;  %s858_s13 = smov %s860_s15 }
 0x11f   :  { %12 = sbr.rel (!%p10_p5) target bundleno = 2 (0x2), region = 62 }

// kernel: key_encoder_forward_pallas.27
= control target key start
LH: loop header
LB: loop body
LE: loop exit
PB: predicated region body
PF: predicated region fallthrough
CT: control target
= control target key end

     0   :  { %s1297_s15 = smov 0   ;;  %s1299_s16 = smov 0   ;;  %s1718_s0 = inlined_call_operand.vmem [shape: f32[2,64,16], index: 0, kind: input, shape index: {}]   ;;  %s1719_s1 = inlined_call_operand.vmem [shape: f32[256,64], index: 1, kind: input, shape index: {}]   ;;  %s1720_s2 = inlined_call_operand.vmem [shape: f32[256,1], index: 2, kind: input, shape index: {}]   ;;  %s1721_s3 = inlined_call_operand.vmem [shape: f32[2,256,16], index: 3, kind: input, shape index: {}]   ;;  %s1722_s4 = inlined_call_operand.vmem [shape: f32[2,256,16], index: 4, kind: output, shape index: {}]  }
   0x1   :  { %s1301_s17 = smov 0  }
   0x2 LB: > { %s26_s18 = sadd.s32 1, %s1265_s16  ;;  %p1048_p0 = scmp.ge.s32.totalorder %s1269_s17, 1  ;;  %s1269_s17 = sphi %s1301_s17, %s14_s17   ;;  %s1265_s16 = sphi %s1299_s16, %s1724_s16   ;;  %s1261_s15 = sphi %s1297_s15, %s1723_s15  }
   0x3   : > { %p28_p1 = scmp.ge.s32.totalorder %s26_s18, 2  ;;  %p196_p2 = scmp.lt.s32.totalorder %s1269_s17, 3 }
   0x5   : > { %s1726_s18 = smov (%p28_p1, %s26_s18), 0  ;;  %p197_p3 = pnand %p1048_p0, %p196_p2 }
   0x6   : > { %p236_p4 = scmp.lt.s32.totalorder (!%p197_p3), %s1261_s15, 1  ;;  %v302_v0 = vld [vmem:[%s1720_s2 + $0x10] sm:$0xff] (!%p197_p3)  ;;  %v300_v1 = vld [vmem:[%s1720_s2] sm:$0xff] (!%p197_p3)  ;;  %vm492_vm0 = vcmask (!%p197_p3), 523264   ;;  %v1271_v2 = vmov (!%p197_p3), 0   ;;  %v303_v5 = vld [vmem:[%s1720_s2 + $0x18] sm:$0xff] (!%p197_p3) }
   0x7   : > { %200 = sbr.rel (%p197_p3) target bundleno = 284 (0x11c), region = 36  ;;  %1246 = vset.pattern.permute.xlu1 (!%p197_p3), %v1271_v2  ;;  %1245 = vset.pattern.permute.xlu0 (!%p197_p3), %v1271_v2  ;;  %v260_v3 = vld [vmem:[%s1719_s1] sm:$0xff] (!%p197_p3)  ;;  %v301_v6 = vld [vmem:[%s1720_s2 + $0x8] sm:$0xff] (!%p197_p3)  ;;  %v307_v20 = vld [vmem:[%s1720_s2 + $0x38] sm:$0xff] (!%p197_p3)  ;;  %vm910_vm1 = vcmask (!%p197_p3), 130048  }
   0x8   : > { %v276_v4 = vld [vmem:[%s1719_s1 + $0x80] sm:$0xff] (!%p197_p3)  ;;  %344 = vperm.xlu1 (!%p197_p3), %1246, %v302_v0   ;;  %334 = vperm.xlu0 (!%p197_p3), %1245, %v300_v1   ;;  %v305_v15 = vld [vmem:[%s1720_s2 + $0x28] sm:$0xff] (!%p197_p3)  ;;  %v306_v21 = vld [vmem:[%s1720_s2 + $0x30] sm:$0xff] (!%p197_p3) }
   0x9   : > { %1148 = vmatprep.mubr.msk.f32.mxu0 (!%p197_p3), %vm492_vm0, %v260_v3  ;;  %1172 = vmatprep.mubr.msk.f32.mxu1 (!%p197_p3), %vm492_vm0, %v276_v4  ;;  %v304_v16 = vld [vmem:[%s1720_s2 + $0x20] sm:$0xff] (!%p197_p3)  ;;  %v309_v23 = vld [vmem:[%s1720_s2 + $0x48] sm:$0xff] (!%p197_p3)  ;;  %v311_v25 = vld [vmem:[%s1720_s2 + $0x58] sm:$0xff] (!%p197_p3) }
   0xa   : > { %v308_v24 = vld [vmem:[%s1720_s2 + $0x40] sm:$0xff] (!%p197_p3)  ;;  %v310_v26 = vld [vmem:[%s1720_s2 + $0x50] sm:$0xff] (!%p197_p3)  ;;  %v261_v27 = vld [vmem:[%s1719_s1 + $0x8] sm:$0xff] (!%p197_p3) }
   0xb   : > { %v277_v28 = vld [vmem:[%s1719_s1 + $0x88] sm:$0xff] (!%p197_p3)  ;;  %v262_v29 = vld [vmem:[%s1719_s1 + $0x10] sm:$0xff] (!%p197_p3)  ;;  %v312_v32 = vld [vmem:[%s1720_s2 + $0x60] sm:$0xff] (!%p197_p3) }
   0xc   : > { %349 = vperm.xlu1 (!%p197_p3), %1246, %v303_v5   ;;  %339 = vperm.xlu0 (!%p197_p3), %1245, %v301_v6   ;;  %v278_v30 = vld [vmem:[%s1719_s1 + $0x90] sm:$0xff] (!%p197_p3)  ;;  %v313_v31 = vld [vmem:[%s1720_s2 + $0x68] sm:$0xff] (!%p197_p3)  ;;  %v263_v33 = vld [vmem:[%s1719_s1 + $0x18] sm:$0xff] (!%p197_p3) }
   0xd   : > { %v279_v34 = vld [vmem:[%s1719_s1 + $0x98] sm:$0xff] (!%p197_p3)  ;;  %v264_v35 = vld [vmem:[%s1719_s1 + $0x20] sm:$0xff] (!%p197_p3)  ;;  %v314_v38 = vld [vmem:[%s1720_s2 + $0x70] sm:$0xff] (!%p197_p3) }
   0xe   : > { %s1728_s15 = smov (!%p236_p4, %s1261_s15), 1  ;;  %v280_v36 = vld [vmem:[%s1719_s1 + $0xa0] sm:$0xff]  ;;  %v315_v37 = vld [vmem:[%s1720_s2 + $0x78] sm:$0xff]  ;;  %v265_v39 = vld [vmem:[%s1719_s1 + $0x28] sm:$0xff] }
   0xf   : > { %s1089_s5 = sshll.u32 %s1728_s15, 6  ;;  %v281_v40 = vld [vmem:[%s1719_s1 + $0xa8] sm:$0xff]  ;;  %v266_v41 = vld [vmem:[%s1719_s1 + $0x30] sm:$0xff]  ;;  %v316_v44 = vld [vmem:[%s1720_s2 + $0x80] sm:$0xff]  ;;  %s1090_s19 = sshll.u32 %s1728_s15, 8 }
  0x10   : > { %s243_s8 = scalar_lea.vmem %s1718_s0, %s1089_s5  ;;  %359 = vperm.xlu1 %1246, %v305_v15   ;;  %354 = vperm.xlu0 %1245, %v304_v16   ;;  %v282_v42 = vld [vmem:[%s1719_s1 + $0xb0] sm:$0xff]  ;;  %v317_v43 = vld [vmem:[%s1720_s2 + $0x88] sm:$0xff]  ;;  %v267_v45 = vld [vmem:[%s1719_s1 + $0x38] sm:$0xff]  ;;  %s1575_s22 = scalar_lea.vmem %s1721_s3, %s1090_s19 }
  0x11   : > { %v292_v7 = vld [vmem:[%s243_s8] sm:$0xff]  ;;  %v293_v8 = vld [vmem:[%s243_s8 + $0x8] sm:$0xff]  ;;  %v294_v9 = vld [vmem:[%s243_s8 + $0x10] sm:$0xff]  ;;  %s1592_s24 = scalar_lea.vmem %s1722_s4, %s1090_s19 }
  0x12   : > { %v1196_v10 = vpack.c.bf16 %v293_v8, %v292_v7  ;;  %v295_v11 = vld [vmem:[%s243_s8 + $0x18] sm:$0xff]  ;;  %v296_v13 = vld [vmem:[%s243_s8 + $0x20] sm:$0xff]  ;;  %v297_v14 = vld [vmem:[%s243_s8 + $0x28] sm:$0xff] }
  0x13   : > { %v1200_v12 = vpack.c.bf16 %v295_v11, %v294_v9  ;;  %v1204_v17 = vpack.c.bf16 %v297_v14, %v296_v13  ;;  %v298_v18 = vld [vmem:[%s243_s8 + $0x30] sm:$0xff]  ;;  %v299_v19 = vld [vmem:[%s243_s8 + $0x38] sm:$0xff]  ;;  %v268_v47 = vld [vmem:[%s1719_s1 + $0x40] sm:$0xff] }
  0x14   : > { %1197 = vmatprep.subr.bf16.mxu0 %v1196_v10  ;;  %1212 = vmatprep.subr.bf16.mxu1 %v1196_v10  ;;  %v1208_v22 = vpack.c.bf16 %v299_v19, %v298_v18  ;;  %v283_v46 = vld [vmem:[%s1719_s1 + $0xb8] sm:$0xff]  ;;  %v284_v48 = vld [vmem:[%s1719_s1 + $0xc0] sm:$0xff]  ;;  %v318_v50 = vld [vmem:[%s1720_s2 + $0x90] sm:$0xff] }
  0x15   : > { %1199 = vmatpush3.bf16.msra.mxu0 %v1196_v10  ;;  %1216 = vmatpush3.bf16.msra.mxu1 %v1196_v10  ;;  %v319_v49 = vld [vmem:[%s1720_s2 + $0x98] sm:$0xff]  ;;  %v269_v51 = vld [vmem:[%s1719_s1 + $0x48] sm:$0xff]  ;;  %v270_v53 = vld [vmem:[%s1719_s1 + $0x50] sm:$0xff] }
  0x16   : > { %1201 = vmatprep.subr.bf16.mxu0 %v1200_v12  ;;  %1213 = vmatprep.subr.bf16.mxu1 %v1200_v12  ;;  %v285_v52 = vld [vmem:[%s1719_s1 + $0xc8] sm:$0xff]  ;;  %v286_v54 = vld [vmem:[%s1719_s1 + $0xd0] sm:$0xff]  ;;  %v320_v56 = vld [vmem:[%s1720_s2 + $0xa0] sm:$0xff] }
  0x17   : > { %369 = vperm.xlu1 %1246, %v307_v20   ;;  %364 = vperm.xlu0 %1245, %v306_v21   ;;  %v321_v55 = vld [vmem:[%s1720_s2 + $0xa8] sm:$0xff]  ;;  %v271_v57 = vld [vmem:[%s1719_s1 + $0x58] sm:$0xff]  ;;  %v272_v59 = vld [vmem:[%s1719_s1 + $0x60] sm:$0xff] }
  0x18   : > { %v287_v58 = vld [vmem:[%s1719_s1 + $0xd8] sm:$0xff]  ;;  %v288_v60 = vld [vmem:[%s1719_s1 + $0xe0] sm:$0xff]  ;;  %v322_v62 = vld [vmem:[%s1720_s2 + $0xb0] sm:$0xff] }
  0x19   : > { %1203 = vmatpush3.bf16.msra.mxu0 %v1200_v12  ;;  %1217 = vmatpush3.bf16.msra.mxu1 %v1200_v12  ;;  %v323_v61 = vld [vmem:[%s1720_s2 + $0xb8] sm:$0xff]  ;;  %v273_v63 = vld [vmem:[%s1719_s1 + $0x68] sm:$0xff]  ;;  %v274_v1 = vld [vmem:[%s1719_s1 + $0x70] sm:$0xff] }
  0x1a   : > { %1205 = vmatprep.subr.bf16.mxu0 %v1204_v17  ;;  %1214 = vmatprep.subr.bf16.mxu1 %v1204_v17  ;;  %v289_v0 = vld [vmem:[%s1719_s1 + $0xe8] sm:$0xff]  ;;  %v290_v2 = vld [vmem:[%s1719_s1 + $0xf0] sm:$0xff]  ;;  %v324_v4 = vld [vmem:[%s1720_s2 + $0xc0] sm:$0xff] }
  0x1b   : > { %379 = vperm.xlu1 %1246, %v309_v23   ;;  %374 = vperm.xlu0 %1245, %v308_v24   ;;  %v325_v3 = vld [vmem:[%s1720_s2 + $0xc8] sm:$0xff]  ;;  %v275_v5 = vld [vmem:[%s1719_s1 + $0x78] sm:$0xff]  ;;  %v326_v8 = vld [vmem:[%s1720_s2 + $0xd0] sm:$0xff] }
  0x1c   : > { %v291_v6 = vld [vmem:[%s1719_s1 + $0xf8] sm:$0xff]  ;;  %v329_v9 = vld [vmem:[%s1720_s2 + $0xe8] sm:$0xff]  ;;  %v328_v10 = vld [vmem:[%s1720_s2 + $0xe0] sm:$0xff] }
  0x1d   : > { %1207 = vmatpush3.bf16.msra.mxu0 %v1204_v17  ;;  %1218 = vmatpush3.bf16.msra.mxu1 %v1204_v17  ;;  %v327_v7 = vld [vmem:[%s1720_s2 + $0xd8] sm:$0xff]  ;;  %v330_v12 = vld [vmem:[%s1720_s2 + $0xf0] sm:$0xff] }
  0x1e   : > { %1209 = vmatprep.subr.bf16.mxu0 %v1208_v22  ;;  %1215 = vmatprep.subr.bf16.mxu1 %v1208_v22  ;;  %v331_v11 = vld [vmem:[%s1720_s2 + $0xf8] sm:$0xff] }
  0x1f   : > { %389 = vperm.xlu1 %1246, %v311_v25   ;;  %384 = vperm.xlu0 %1245, %v310_v26  }
  0x21   : > { %1211 = vmatpush3.bf16.msra.mxu0 %v1208_v22  ;;  %1219 = vmatpush3.bf16.msra.mxu1 %v1208_v22 }
  0x23   : > { %399 = vperm.xlu1 %1246, %v313_v31   ;;  %394 = vperm.xlu0 %1245, %v312_v32  }
  0x24   : > { %1149 = vmatmul.mubr.msk.f32.vlgmr.msra.gmra.mrb[0].mxu0 %vm492_vm0, %v261_v27  ;;  %1173 = vmatmul.mubr.msk.f32.vlgmr.msra.gmra.mrb[0].mxu1 %vm492_vm0, %v277_v28 }
  0x25   : > { %1151 = vmatprep.mubr.msk.f32.mxu0 %vm492_vm0, %v262_v29  ;;  %1175 = vmatprep.mubr.msk.f32.mxu1 %vm492_vm0, %v278_v30 }
  0x27   : > { %409 = vperm.xlu1 %1246, %v315_v37   ;;  %404 = vperm.xlu0 %1245, %v314_v38   ;;  %v815_v38 = vld [vmem:[%s1575_s22 + $0x8] sm:$0xff] }
  0x28   : > { %1152 = vmatmul.mubr.msk.f32.gmra.mrb[2].mxu0 %vm492_vm0, %v263_v33  ;;  %1176 = vmatmul.mubr.msk.f32.gmra.mrb[2].mxu1 %vm492_vm0, %v279_v34 }
  0x29   : > { %1154 = vmatprep.mubr.msk.f32.mxu0 %vm492_vm0, %v264_v35  ;;  %1178 = vmatprep.mubr.msk.f32.mxu1 %vm492_vm0, %v280_v36 }
  0x2b   : > { %419 = vperm.xlu1 %1246, %v317_v43   ;;  %414 = vperm.xlu0 %1245, %v316_v44   ;;  %v814_v44 = vld [vmem:[%s1575_s22] sm:$0xff] }
  0x2c   : > { %1155 = vmatmul.mubr.msk.f32.gmra.mrb[4].mxu0 %vm492_vm0, %v265_v39  ;;  %1179 = vmatmul.mubr.msk.f32.gmra.mrb[4].mxu1 %vm492_vm0, %v281_v40  ;;  %v831_v40 = vld [vmem:[%s1575_s22 + $0x88] sm:$0xff] }
  0x2d   : > { %1157 = vmatprep.mubr.msk.f32.mxu0 %vm492_vm0, %v266_v41  ;;  %1181 = vmatprep.mubr.msk.f32.mxu1 %vm492_vm0, %v282_v42 }
  0x2f   : > { %429 = vperm.xlu1 %1246, %v319_v49   ;;  %424 = vperm.xlu0 %1245, %v318_v50  }
  0x30   : > { %1158 = vmatmul.mubr.msk.f32.gmra.mrb[6].mxu0 %vm492_vm0, %v267_v45  ;;  %1182 = vmatmul.mubr.msk.f32.gmra.mrb[6].mxu1 %vm492_vm0, %v283_v46  ;;  %v830_v46 = vld [vmem:[%s1575_s22 + $0x80] sm:$0xff] }
  0x31   : > { %1160 = vmatprep.mubr.msk.f32.mxu0 %vm492_vm0, %v268_v47  ;;  %1184 = vmatprep.mubr.msk.f32.mxu1 %vm492_vm0, %v284_v48 }
  0x33   : > { %439 = vperm.xlu1 %1246, %v321_v55   ;;  %434 = vperm.xlu0 %1245, %v320_v56   ;;  %v817_v56 = vld [vmem:[%s1575_s22 + $0x18] sm:$0xff] }
  0x34   : > { %1161 = vmatmul.mubr.msk.f32.gmra.mrb[8].mxu0 %vm492_vm0, %v269_v51  ;;  %1185 = vmatmul.mubr.msk.f32.gmra.mrb[8].mxu1 %vm492_vm0, %v285_v52 }
  0x35   : > { %1163 = vmatprep.mubr.msk.f32.mxu0 %vm492_vm0, %v270_v53  ;;  %1187 = vmatprep.mubr.msk.f32.mxu1 %vm492_vm0, %v286_v54 }
  0x37   : > { %449 = vperm.xlu1 %1246, %v323_v61   ;;  %444 = vperm.xlu0 %1245, %v322_v62  }
  0x38   : > { %1164 = vmatmul.mubr.msk.f32.gmra.mrb[10].mxu0 %vm492_vm0, %v271_v57  ;;  %1188 = vmatmul.mubr.msk.f32.gmra.mrb[10].mxu1 %vm492_vm0, %v287_v58  ;;  %v833_v58 = vld [vmem:[%s1575_s22 + $0x98] sm:$0xff] }
  0x39   : > { %1166 = vmatprep.mubr.msk.f32.mxu0 %vm492_vm0, %v272_v59  ;;  %1190 = vmatprep.mubr.msk.f32.mxu1 %vm492_vm0, %v288_v60 }
  0x3b   : > { %459 = vperm.xlu1 %1246, %v325_v3   ;;  %454 = vperm.xlu0 %1245, %v324_v4  }
  0x3c   : > { %1167 = vmatmul.mubr.msk.f32.gmra.mrb[12].mxu0 %vm492_vm0, %v273_v63  ;;  %1191 = vmatmul.mubr.msk.f32.gmra.mrb[12].mxu1 %vm492_vm0, %v289_v0  ;;  %v816_v0 = vld [vmem:[%s1575_s22 + $0x10] sm:$0xff] }
  0x3d   : > { %1169 = vmatprep.mubr.msk.f32.mxu0 %vm492_vm0, %v274_v1  ;;  %1193 = vmatprep.mubr.msk.f32.mxu1 %vm492_vm0, %v290_v2  ;;  %v832_v2 = vld [vmem:[%s1575_s22 + $0x90] sm:$0xff] }
  0x3f   : > { %469 = vperm.xlu1 %1246, %v327_v7   ;;  %464 = vperm.xlu0 %1245, %v326_v8  }
  0x40   : > { %1170 = vmatmul.mubr.msk.f32.gmra.mrb[14].mxu0 %vm492_vm0, %v275_v5  ;;  %1194 = vmatmul.mubr.msk.f32.gmra.mrb[14].mxu1 %vm492_vm0, %v291_v6 }
  0x43   : > { %479 = vperm.xlu1 %1246, %v329_v9   ;;  %474 = vperm.xlu0 %1245, %v328_v10  }
  0x47   : > { %489 = vperm.xlu1 %1246, %v331_v11   ;;  %484 = vperm.xlu0 %1245, %v330_v12   ;;  %v819_v12 = vld [vmem:[%s1575_s22 + $0x28] sm:$0xff] }
  0x87   : > { %v345_v13 = vpop.permute.xlu1 %344  ;;  %v335_v14 = vpop.permute.xlu0 %334 }
  0x8b   : > { %v350_v15 = vpop.permute.xlu1 %349  ;;  %v340_v16 = vpop.permute.xlu0 %339 }
  0x8f   : > { %v1545_v17 = vpop.permute.xlu1 %359  ;;  %v1547_v18 = vpop.permute.xlu0 %354 }
  0x96   : > { %v1549_v19 = vpop.permute.xlu1 %369  ;;  %v1551_v20 = vpop.permute.xlu0 %364 }
  0x9a   : > { %v1553_v21 = vpop.permute.xlu1 %379  ;;  %v1555_v22 = vpop.permute.xlu0 %374 }
  0x9e   : > { %v1557_v23 = vpop.permute.xlu1 %389  ;;  %v1559_v24 = vpop.permute.xlu0 %384 }
  0xa2   : > { %v1561_v25 = vpop.permute.xlu1 %399  ;;  %v1563_v26 = vpop.permute.xlu0 %394 }
  0xa6   : > { %v1565_v27 = vpop.permute.xlu1 %409  ;;  %v1567_v28 = vpop.permute.xlu0 %404 }
  0xaa   : > { %v420_v29 = vpop.permute.xlu1 %419  ;;  %v415_v30 = vpop.permute.xlu0 %414 }
  0xae   : > { %v430_v31 = vpop.permute.xlu1 %429  ;;  %v425_v32 = vpop.permute.xlu0 %424 }
  0xb2   : > { %v440_v33 = vpop.permute.xlu1 %439  ;;  %v1569_v34 = vpop.permute.xlu0 %434 }
  0xb6   : > { %v1577_v35 = vpop.permute.xlu1 %449  ;;  %v1579_v36 = vpop.permute.xlu0 %444 }
  0xba   : > { %v1585_v49 = vpop.permute.xlu1 %459  ;;  %v1587_v50 = vpop.permute.xlu0 %454 }
  0xf7   : > { %v1150_v37 = vpop.f32.mrb[0].mxu0  ;;  %v1174_v39 = vpop.f32.mrb[0].mxu1 }
  0xf8   : > { %v661_v41 = vadd.f32 %v1150_v37, %v340_v16  ;;  %v741_v42 = vadd.f32 %v1174_v39, %v420_v29  ;;  %v655_v43 = vpop.f32.mrb[1].mxu0  ;;  %v735_v45 = vpop.f32.mrb[1].mxu1 }
  0xf9   : > { %v656_v47 = vadd.f32 %v655_v43, %v335_v14  ;;  %v736_v48 = vadd.f32 %v735_v45, %v415_v30  ;;  %v1613_v43 = vpop.permute.xlu1 %469 }
  0xfa   : > { %v847_v51 = vadd.f32 %v815_v38, %v661_v41  ;;  %v863_v52 = vadd.f32 %v831_v40, %v741_v42  ;;  %v834_v38 = vld [vmem:[%s1575_s22 + $0xa0] sm:$0xff] }
  0xfb   : > { %v846_v53 = vadd.f32 %v814_v44, %v656_v47  ;;  %v862_v54 = vadd.f32 %v830_v46, %v736_v48  ;;  %v1153_v55 = vpop.f32.mrb[2].mxu0  ;;  %v1177_v57 = vpop.f32.mrb[2].mxu1  ;;  %v837_v48 = vld [vmem:[%s1575_s22 + $0xb8] sm:$0xff] }
  0xfc   : > { %v879_v59 = vmax.f32 %v847_v51, 0.0  ;;  %v895_v60 = vmax.f32 %v863_v52, 0.0  ;;  %v671_v61 = vadd.f32 %v1153_v55, %v350_v15  ;;  %v751_v62 = vadd.f32 %v1177_v57, %v430_v31  ;;  %v665_v63 = vpop.f32.mrb[3].mxu0  ;;  %v745_v1 = vpop.f32.mrb[3].mxu1 }
  0xfd   : > { %v878_v3 = vmax.f32 %v846_v53, 0.0  ;;  %v894_v4 = vmax.f32 %v862_v54, 0.0  ;;  %v666_v5 = vadd.f32 %v665_v63, %v345_v13  ;;  %v746_v6 = vadd.f32 %v745_v1, %v425_v32  ;;  %v835_v13 = vld [vmem:[%s1575_s22 + $0xa8] sm:$0xff]  ;;  %v818_v32 = vld [vmem:[%s1575_s22 + $0x20] sm:$0xff]  ;;  %v1615_v44 = vpop.permute.xlu0 %464 }
  0xfe   : > { %912 = vst.msk [vmem:[%s1592_s24 + $0x8] sm:$0xff] %vm910_vm1, %v879_v59  ;;  %928 = vst.msk [vmem:[%s1592_s24 + $0x88] sm:$0xff] %vm910_vm1, %v895_v60  ;;  %v849_v7 = vadd.f32 %v817_v56, %v671_v61  ;;  %v865_v8 = vadd.f32 %v833_v58, %v751_v62  ;;  %v820_v56 = vld [vmem:[%s1575_s22 + $0x30] sm:$0xff] }
  0xff   : > { %911 = vst.msk [vmem:[%s1592_s24] sm:$0xff] %vm910_vm1, %v878_v3  ;;  %927 = vst.msk [vmem:[%s1592_s24 + $0x80] sm:$0xff] %vm910_vm1, %v894_v4  ;;  %v848_v9 = vadd.f32 %v816_v0, %v666_v5  ;;  %v864_v10 = vadd.f32 %v832_v2, %v746_v6  ;;  %v1156_v11 = vpop.f32.mrb[4].mxu0  ;;  %v1180_v14 = vpop.f32.mrb[4].mxu1  ;;  %v836_v58 = vld [vmem:[%s1575_s22 + $0xb0] sm:$0xff]  ;;  %v823_v2 = vld [vmem:[%s1575_s22 + $0x48] sm:$0xff] }
 0x100   : > { %v881_v15 = vmax.f32 %v849_v7, 0.0  ;;  %v897_v16 = vmax.f32 %v865_v8, 0.0  ;;  %v681_v29 = vadd.f32 %v1156_v11, %v1545_v17  ;;  %v761_v30 = vadd.f32 %v1180_v14, %v440_v33  ;;  %v675_v31 = vpop.f32.mrb[5].mxu0  ;;  %v755_v37 = vpop.f32.mrb[5].mxu1  ;;  %v822_v8 = vld [vmem:[%s1575_s22 + $0x40] sm:$0xff] }
 0x101   : > { %v880_v39 = vmax.f32 %v848_v9, 0.0  ;;  %v896_v40 = vmax.f32 %v864_v10, 0.0  ;;  %v676_v41 = vadd.f32 %v675_v31, %v1547_v18  ;;  %v756_v42 = vadd.f32 %v755_v37, %v1569_v34  ;;  %v821_v34 = vld [vmem:[%s1575_s22 + $0x38] sm:$0xff]  ;;  %v838_v10 = vld [vmem:[%s1575_s22 + $0xc0] sm:$0xff] }
 0x102   : > { %914 = vst.msk [vmem:[%s1592_s24 + $0x18] sm:$0xff] %vm910_vm1, %v881_v15  ;;  %930 = vst.msk [vmem:[%s1592_s24 + $0x98] sm:$0xff] %vm910_vm1, %v897_v16  ;;  %v851_v17 = vadd.f32 %v819_v12, %v681_v29  ;;  %v867_v33 = vadd.f32 %v835_v13, %v761_v30  ;;  %v480_v15 = vpop.permute.xlu1 %479  ;;  %v475_v16 = vpop.permute.xlu0 %474 }
 0x103   : > { %913 = vst.msk [vmem:[%s1592_s24 + $0x10] sm:$0xff] %vm910_vm1, %v880_v39  ;;  %929 = vst.msk [vmem:[%s1592_s24 + $0x90] sm:$0xff] %vm910_vm1, %v896_v40  ;;  %v850_v45 = vadd.f32 %v818_v32, %v676_v41  ;;  %v866_v18 = vadd.f32 %v834_v38, %v756_v42  ;;  %v1159_v46 = vpop.f32.mrb[6].mxu0  ;;  %v1183_v47 = vpop.f32.mrb[6].mxu1  ;;  %v841_v32 = vld [vmem:[%s1575_s22 + $0xd8] sm:$0xff]  ;;  %v824_v42 = vld [vmem:[%s1575_s22 + $0x50] sm:$0xff] }
 0x104   : > { %v883_v51 = vmax.f32 %v851_v17, 0.0  ;;  %v899_v52 = vmax.f32 %v867_v33, 0.0  ;;  %v691_v53 = vadd.f32 %v1159_v46, %v1549_v19  ;;  %v771_v54 = vadd.f32 %v1183_v47, %v1577_v35  ;;  %v685_v55 = vpop.f32.mrb[7].mxu0  ;;  %v765_v57 = vpop.f32.mrb[7].mxu1  ;;  %v840_v33 = vld [vmem:[%s1575_s22 + $0xd0] sm:$0xff] }
 0x105   : > { %v882_v59 = vmax.f32 %v850_v45, 0.0  ;;  %v898_v60 = vmax.f32 %v866_v18, 0.0  ;;  %v686_v61 = vadd.f32 %v685_v55, %v1551_v20  ;;  %v766_v62 = vadd.f32 %v765_v57, %v1579_v36  ;;  %v839_v20 = vld [vmem:[%s1575_s22 + $0xc8] sm:$0xff] }
 0x106   : > { %916 = vst.msk [vmem:[%s1592_s24 + $0x28] sm:$0xff] %vm910_vm1, %v883_v51  ;;  %932 = vst.msk [vmem:[%s1592_s24 + $0xa8] sm:$0xff] %vm910_vm1, %v899_v52  ;;  %v853_v19 = vadd.f32 %v821_v34, %v691_v53  ;;  %v869_v63 = vadd.f32 %v837_v48, %v771_v54  ;;  %v827_v52 = vld [vmem:[%s1575_s22 + $0x68] sm:$0xff] }
 0x107   : > { %915 = vst.msk [vmem:[%s1592_s24 + $0x20] sm:$0xff] %vm910_vm1, %v882_v59  ;;  %931 = vst.msk [vmem:[%s1592_s24 + $0xa0] sm:$0xff] %vm910_vm1, %v898_v60  ;;  %v852_v35 = vadd.f32 %v820_v56, %v686_v61  ;;  %v868_v0 = vadd.f32 %v836_v58, %v766_v62  ;;  %v1162_v1 = vpop.f32.mrb[8].mxu0  ;;  %v1186_v3 = vpop.f32.mrb[8].mxu1  ;;  %v826_v58 = vld [vmem:[%s1575_s22 + $0x60] sm:$0xff] }
 0x108   : > { %v885_v36 = vmax.f32 %v853_v19, 0.0  ;;  %v901_v4 = vmax.f32 %v869_v63, 0.0  ;;  %v701_v5 = vadd.f32 %v1162_v1, %v1553_v21  ;;  %v781_v6 = vadd.f32 %v1186_v3, %v1585_v49  ;;  %v695_v7 = vpop.f32.mrb[9].mxu0  ;;  %v775_v9 = vpop.f32.mrb[9].mxu1  ;;  %v842_v60 = vld [vmem:[%s1575_s22 + $0xe0] sm:$0xff] }
 0x109   : > { %v884_v11 = vmax.f32 %v852_v35, 0.0  ;;  %v900_v12 = vmax.f32 %v868_v0, 0.0  ;;  %v696_v14 = vadd.f32 %v695_v7, %v1555_v22  ;;  %v776_v13 = vadd.f32 %v775_v9, %v1587_v50  ;;  %v825_v22 = vld [vmem:[%s1575_s22 + $0x58] sm:$0xff]  ;;  %v490_v35 = vpop.permute.xlu1 %489  ;;  %v485_v0 = vpop.permute.xlu0 %484 }
 0x10a   : > { %918 = vst.msk [vmem:[%s1592_s24 + $0x38] sm:$0xff] %vm910_vm1, %v885_v36  ;;  %934 = vst.msk [vmem:[%s1592_s24 + $0xb8] sm:$0xff] %vm910_vm1, %v901_v4  ;;  %v855_v21 = vadd.f32 %v823_v2, %v701_v5  ;;  %v871_v49 = vadd.f32 %v839_v20, %v781_v6  ;;  %v845_v4 = vld [vmem:[%s1575_s22 + $0xf8] sm:$0xff] }
 0x10b   : > { %917 = vst.msk [vmem:[%s1592_s24 + $0x30] sm:$0xff] %vm910_vm1, %v884_v11  ;;  %933 = vst.msk [vmem:[%s1592_s24 + $0xb0] sm:$0xff] %vm910_vm1, %v900_v12  ;;  %v854_v29 = vadd.f32 %v822_v8, %v696_v14  ;;  %v870_v30 = vadd.f32 %v838_v10, %v776_v13  ;;  %v1165_v31 = vpop.f32.mrb[10].mxu0  ;;  %v1189_v50 = vpop.f32.mrb[10].mxu1  ;;  %v828_v10 = vld [vmem:[%s1575_s22 + $0x70] sm:$0xff] }
 0x10c   : > { %v887_v37 = vmax.f32 %v855_v21, 0.0  ;;  %v903_v38 = vmax.f32 %v871_v49, 0.0  ;;  %v711_v39 = vadd.f32 %v1165_v31, %v1557_v23  ;;  %v791_v40 = vadd.f32 %v1189_v50, %v1613_v43  ;;  %v705_v41 = vpop.f32.mrb[11].mxu0  ;;  %v785_v17 = vpop.f32.mrb[11].mxu1  ;;  %v844_v12 = vld [vmem:[%s1575_s22 + $0xf0] sm:$0xff] }
 0x10d   : > { %v886_v45 = vmax.f32 %v854_v29, 0.0  ;;  %v902_v18 = vmax.f32 %v870_v30, 0.0  ;;  %v706_v46 = vadd.f32 %v705_v41, %v1559_v24  ;;  %v786_v34 = vadd.f32 %v785_v17, %v1615_v44  ;;  %v843_v24 = vld [vmem:[%s1575_s22 + $0xe8] sm:$0xff] }
 0x10e   : > { %920 = vst.msk [vmem:[%s1592_s24 + $0x48] sm:$0xff] %vm910_vm1, %v887_v37  ;;  %936 = vst.msk [vmem:[%s1592_s24 + $0xc8] sm:$0xff] %vm910_vm1, %v903_v38  ;;  %v857_v23 = vadd.f32 %v825_v22, %v711_v39  ;;  %v873_v47 = vadd.f32 %v841_v32, %v791_v40 }
 0x10f   : > { %919 = vst.msk [vmem:[%s1592_s24 + $0x40] sm:$0xff] %vm910_vm1, %v886_v45  ;;  %935 = vst.msk [vmem:[%s1592_s24 + $0xc0] sm:$0xff] %vm910_vm1, %v902_v18  ;;  %v856_v43 = vadd.f32 %v824_v42, %v706_v46  ;;  %v872_v48 = vadd.f32 %v840_v33, %v786_v34  ;;  %v1168_v51 = vpop.f32.mrb[12].mxu0  ;;  %v1192_v53 = vpop.f32.mrb[12].mxu1 }
 0x110   : > { %v889_v44 = vmax.f32 %v857_v23, 0.0  ;;  %v905_v54 = vmax.f32 %v873_v47, 0.0  ;;  %v721_v55 = vadd.f32 %v1168_v51, %v1561_v25  ;;  %v801_v56 = vadd.f32 %v1192_v53, %v480_v15  ;;  %v715_v57 = vpop.f32.mrb[13].mxu0  ;;  %v795_v59 = vpop.f32.mrb[13].mxu1 }
 0x111   : > { %v888_v61 = vmax.f32 %v856_v43, 0.0  ;;  %v904_v62 = vmax.f32 %v872_v48, 0.0  ;;  %v716_v19 = vadd.f32 %v715_v57, %v1563_v26  ;;  %v796_v63 = vadd.f32 %v795_v59, %v475_v16  ;;  %v829_v26 = vld [vmem:[%s1575_s22 + $0x78] sm:$0xff] }
 0x112   : > { %922 = vst.msk [vmem:[%s1592_s24 + $0x58] sm:$0xff] %vm910_vm1, %v889_v44  ;;  %938 = vst.msk [vmem:[%s1592_s24 + $0xd8] sm:$0xff] %vm910_vm1, %v905_v54  ;;  %v859_v25 = vadd.f32 %v827_v52, %v721_v55  ;;  %v875_v1 = vadd.f32 %v843_v24, %v801_v56 }
 0x113   : > { %921 = vst.msk [vmem:[%s1592_s24 + $0x50] sm:$0xff] %vm910_vm1, %v888_v61  ;;  %937 = vst.msk [vmem:[%s1592_s24 + $0xd0] sm:$0xff] %vm910_vm1, %v904_v62  ;;  %v858_v2 = vadd.f32 %v826_v58, %v716_v19  ;;  %v874_v3 = vadd.f32 %v842_v60, %v796_v63  ;;  %v1171_v20 = vpop.f32.mrb[14].mxu0  ;;  %v1195_v36 = vpop.f32.mrb[14].mxu1 }
 0x114   : > { %v891_v5 = vmax.f32 %v859_v25, 0.0  ;;  %v907_v6 = vmax.f32 %v875_v1, 0.0  ;;  %v731_v7 = vadd.f32 %v1171_v20, %v1565_v27  ;;  %v811_v8 = vadd.f32 %v1195_v36, %v490_v35  ;;  %v725_v9 = vpop.f32.mrb[15].mxu0  ;;  %v805_v11 = vpop.f32.mrb[15].mxu1 }
 0x115   : > { %v890_v14 = vmax.f32 %v858_v2, 0.0  ;;  %v906_v13 = vmax.f32 %v874_v3, 0.0  ;;  %v726_v15 = vadd.f32 %v725_v9, %v1567_v28  ;;  %v806_v16 = vadd.f32 %v805_v11, %v485_v0 }
 0x116   : > { %924 = vst.msk [vmem:[%s1592_s24 + $0x68] sm:$0xff] %vm910_vm1, %v891_v5  ;;  %940 = vst.msk [vmem:[%s1592_s24 + $0xe8] sm:$0xff] %vm910_vm1, %v907_v6  ;;  %v861_v21 = vadd.f32 %v829_v26, %v731_v7  ;;  %v877_v27 = vadd.f32 %v845_v4, %v811_v8 }
 0x117   : > { %923 = vst.msk [vmem:[%s1592_s24 + $0x60] sm:$0xff] %vm910_vm1, %v890_v14  ;;  %939 = vst.msk [vmem:[%s1592_s24 + $0xe0] sm:$0xff] %vm910_vm1, %v906_v13  ;;  %v860_v49 = vadd.f32 %v828_v10, %v726_v15  ;;  %v876_v29 = vadd.f32 %v844_v12, %v806_v16 }
 0x118   : > { %v893_v30 = vmax.f32 %v861_v21, 0.0  ;;  %v909_v31 = vmax.f32 %v877_v27, 0.0 }
 0x119   : > { %v892_v22 = vmax.f32 %v860_v49, 0.0  ;;  %v908_v50 = vmax.f32 %v876_v29, 0.0 }
 0x11a   : > { %926 = vst.msk [vmem:[%s1592_s24 + $0x78] sm:$0xff] %vm910_vm1, %v893_v30  ;;  %942 = vst.msk [vmem:[%s1592_s24 + $0xf8] sm:$0xff] %vm910_vm1, %v909_v31 }
 0x11b   : > { %925 = vst.msk [vmem:[%s1592_s24 + $0x70] sm:$0xff] %vm910_vm1, %v892_v22  ;;  %941 = vst.msk [vmem:[%s1592_s24 + $0xf0] sm:$0xff] %vm910_vm1, %v908_v50 }
 0x11c PF: > { %s14_s17 = sadd.s32 1, %s1269_s17   ;;  %s1723_s15 = smov %s1265_s16 }
 0x11d   : > { %p11_p5 = scmp.ge.s32.totalorder %s14_s17, 4   ;;  %s1724_s16 = smov %s1726_s18 }
 0x11f   :  { %13 = sbr.rel (!%p11_p5) target bundleno = 2 (0x2), region = 69 }

</bundles_post_ra>
